<compile_context>
chip_gen: v7x
topology: tpu7x:2x2x1
jax: 0.10.0
libtpu: 0.0.40
codegen_flags: <defaults>
</compile_context>

<pallas_src>
import jax
import jax.numpy as jnp
from jax.experimental import pallas as pl
from jax.experimental.pallas import tpu as pltpu


# ----------------------------- Pallas kernels ------------------------------ #

def _make_bilstm_kernel(fuse_linear):
    """Bidirectional LSTM kernel; optionally fuses a final Linear epilogue."""

    def kernel(*refs):
        if fuse_linear:
            (x_ref, wih_ref, whh_f_ref, whh_b_ref, b_ref,
             lin_w_ref, lin_b_ref, out_ref, xg_ref, hid_ref) = refs
        else:
            (x_ref, wih_ref, whh_f_ref, whh_b_ref, b_ref,
             out_ref, xg_ref) = refs
            hid_ref = out_ref  # write hidden states straight to the output

        T, B, Din = x_ref.shape
        H = whh_f_ref.shape[0]

        # Hot path #1: ONE fused MXU matmul for both directions' input
        # projection (bf16 inputs, f32 accumulation), biases already fused.
        x2d = x_ref[...].reshape(T * B, Din)
        xg_ref[...] = (
            jnp.dot(x2d, wih_ref[...], preferred_element_type=jnp.float32)
            + b_ref[...]
        ).reshape(T, B, 8 * H)

        # Hoist the recurrent weights out of the sequential loop.
        whh_f = whh_f_ref[...]
        whh_b = whh_b_ref[...]

        def cell(gates, c_prev):
            i = jax.nn.sigmoid(gates[:, 0 * H:1 * H])
            f = jax.nn.sigmoid(gates[:, 1 * H:2 * H])
            g = jnp.tanh(gates[:, 2 * H:3 * H])
            o = jax.nn.sigmoid(gates[:, 3 * H:4 * H])
            c = f * c_prev + i * g
            return o * jnp.tanh(c), c

        h0 = jnp.zeros((B, H), jnp.float32)
        c0 = jnp.zeros((B, H), jnp.float32)

        # Hot path #2: interleaved fwd/bwd recurrence.  Two independent small
        # matmuls per step are issued back-to-back to hide MXU result latency.
        def step(t, carry):
            hf, cf, hb, cb = carry
            tr = T - 1 - t
            # Load only the gate half each direction needs (lane slices are
            # static multiples of 128).
            gf = xg_ref[t, :, :4 * H] + jnp.dot(
                hf.astype(whh_f.dtype), whh_f,
                preferred_element_type=jnp.float32)
            gb = xg_ref[tr, :, 4 * H:] + jnp.dot(
                hb.astype(whh_b.dtype), whh_b,
                preferred_element_type=jnp.float32)
            hf, cf = cell(gf, cf)
            hb, cb = cell(gb, cb)
            # Lane-dense half-row stores into the fused (T, B, 2H) block.
            hid_ref[t, :, :H] = hf.astype(hid_ref.dtype)
            hid_ref[tr, :, H:] = hb.astype(hid_ref.dtype)
            return hf, cf, hb, cb

        unroll = T if T <= 16 else 2
        jax.lax.fori_loop(0, T, step, (h0, c0, h0, c0), unroll=unroll)

        if fuse_linear:
            # Epilogue fusion: linear2 on the whole (T*B, 2H) hidden block.
            Dout = out_ref.shape[-1]
            hid2d = hid_ref[...].reshape(T * B, 2 * H).astype(lin_w_ref.dtype)
            out_ref[...] = (
                jnp.dot(hid2d, lin_w_ref[...],
                        preferred_element_type=jnp.float32)
                + lin_b_ref[...]
            ).reshape(T, B, Dout)

    return kernel


# ------------------------------ JAX wrappers ------------------------------- #

def _pick_batch_tile(B, row_bytes, budget=12 << 20):
    """Largest multiple-of-8 tile (<=128 rows) fitting the VMEM budget.

    row_bytes: approximate per-batch-row VMEM footprint of one grid program
    (input block, projection scratch, hidden scratch, output block, with
    double-buffering).  Prefers >=2 grid programs (v7x megacore); falls back
    to a single full-batch block (legal: full-dim blocks need no alignment).
    """
    cands = [t for t in (128, 64, 32, 16, 8)
             if B % t == 0 and t * row_bytes <= budget]
    for t in cands:
        if B // t >= 2:
            return t
    if cands:
        return cands[0]
    return 8 if B % 8 == 0 else B


def bilstm_tm(xt, p, lin=None):
    """Time-major bidirectional LSTM (PyTorch bi-LSTM semantics).

    xt:  (T, B, Din) time-major input
    p:   dict(wih=(Din,8H) bf16, whh_f=(H,4H) bf16, whh_b=(H,4H) bf16,
              b=(1,8H) f32)  -- fused fwd|bwd weights, gate order i,f,g,o
    lin: optional (w=(2H,Dout) bf16, b=(1,Dout) f32) fused into the epilogue
    returns (T, B, 2H) f32 (or (T, B, Dout) f32 when lin is given)
    """
    T, B, Din = xt.shape
    H = p["whh_f"].shape[0]
    fuse = lin is not None
    Dout = lin[0].shape[1] if fuse else 2 * H

    # Per-batch-row VMEM bytes for one grid program (x block + out block are
    # double-buffered by the pipeline; xg / hid are single-buffered scratch).
    row_bytes = T * (8 * H * 4                       # xg scratch (f32)
                     + 2 * Din * 2                   # bf16 input block x2
                     + 2 * Dout * 4                  # f32 output block x2
                     + (2 * H * 4 if fuse else 0))   # f32 hid scratch
    tb = _pick_batch_tile(B, row_bytes)
    xt = xt.astype(jnp.bfloat16)

    def rep(shape):
        return pl.BlockSpec(shape, lambda i, _n=len(shape): (0,) * _n)

    in_specs = [
        pl.BlockSpec((T, tb, Din), lambda i: (0, i, 0)),
        rep((Din, 8 * H)), rep((H, 4 * H)), rep((H, 4 * H)), rep((1, 8 * H)),
    ]
    args = [xt, p["wih"], p["whh_f"], p["whh_b"], p["b"]]
    scratch = [pltpu.VMEM((T, tb, 8 * H), jnp.float32)]
    if fuse:
        in_specs += [rep((2 * H, Dout)), rep((1, Dout))]
        args += [lin[0], lin[1]]
        scratch.append(pltpu.VMEM((T, tb, 2 * H), jnp.float32))

    return pl.pallas_call(
        _make_bilstm_kernel(fuse),
        out_shape=jax.ShapeDtypeStruct((T, B, Dout), jnp.float32),
        grid=(B // tb,),
        in_specs=in_specs,
        out_specs=pl.BlockSpec((T, tb, Dout), lambda i: (0, i, 0)),
        scratch_shapes=scratch,
        compiler_params=pltpu.CompilerParams(
            dimension_semantics=("parallel",)),
    )(*args)


def rnn_layer_forward(x, kp):
    """Matches RNNLayer.forward. x: (bs, C, T, F) -> (bs, C, T, F)."""
    bs, C, T, Freq = x.shape
    H = kp["sb"]["whh_f"].shape[0]

    # (bs, C, T, F) -> time-major sub-band layout (T, bs*F, C): one transpose.
    out = jnp.transpose(x, (2, 0, 3, 1)).reshape(T, bs * Freq, C)
    out = bilstm_tm(out, kp["sb"])                                # (T, bs*F, 2H)

    # (T, bs, F, 2H) -> freq-major full-band layout (F, bs*T, 2H): one transpose.
    out = out.reshape(T, bs, Freq, 2 * H)
    out = jnp.transpose(out, (2, 1, 0, 3)).reshape(Freq, bs * T, 2 * H)

    # Full-band BiLSTM with linear2 fused into the kernel epilogue.
    out = bilstm_tm(out, kp["fb"], lin=(kp["lin_w"], kp["lin_b"]))  # (F, bs*T, C)

    # (F, bs, T, C) -> (bs, C, T, F): one transpose.
    out = out.reshape(Freq, bs, T, C)
    return jnp.transpose(out, (1, 3, 2, 0))


# ------------------------- deterministic parameters ------------------------ #

def init_raw_params(key, channels, hidden_dim):
    """PyTorch-style f32 parameters (uniform +-1/sqrt(fan))."""
    def lstm_dir(k, din, H):
        k1, k2, k3, k4 = jax.random.split(k, 4)
        s = 1.0 / (H ** 0.5)
        u = lambda kk, shape: jax.random.uniform(kk, shape, jnp.float32, -s, s)
        return dict(wih=u(k1, (4 * H, din)), whh=u(k2, (4 * H, H)),
                    bih=u(k3, (4 * H,)), bhh=u(k4, (4 * H,)))

    ks = jax.random.split(key, 6)
    C, H = channels, hidden_dim
    s = 1.0 / ((2 * C) ** 0.5)
    return dict(
        sb_f=lstm_dir(ks[0], C, H), sb_b=lstm_dir(ks[1], C, H),
        fb_f=lstm_dir(ks[2], 2 * H, H), fb_b=lstm_dir(ks[3], 2 * H, H),
        lin_w=jax.random.uniform(ks[4], (C, 2 * C), jnp.float32, -s, s),
        lin_b=jax.random.uniform(ks[5], (C,), jnp.float32, -s, s))


def pack_params(raw):
    """Kernel layout: fused fwd|bwd input weights (bf16), f32 fused biases."""
    def pack_bi(f, b):
        return dict(
            wih=jnp.concatenate([f["wih"].T, b["wih"].T], axis=1)
                  .astype(jnp.bfloat16),                        # (Din, 8H)
            whh_f=f["whh"].T.astype(jnp.bfloat16),              # (H, 4H)
            whh_b=b["whh"].T.astype(jnp.bfloat16),              # (H, 4H)
            b=jnp.concatenate([f["bih"] + f["bhh"],
                               b["bih"] + b["bhh"]])[None, :]
                  .astype(jnp.float32))                         # (1, 8H)

    return dict(
        sb=pack_bi(raw["sb_f"], raw["sb_b"]),
        fb=pack_bi(raw["fb_f"], raw["fb_b"]),
        lin_w=raw["lin_w"].T.astype(jnp.bfloat16),              # (2H, C)
        lin_b=raw["lin_b"][None, :].astype(jnp.float32))        # (1, C)


# ----------------------------- pure-JAX reference -------------------------- #

def _lstm_dir_ref(x, prm, reverse):
    B, T, _ = x.shape
    H = prm["whh"].shape[1]
    wih, whh = prm["wih"].T, prm["whh"].T
    b = (prm["bih"] + prm["bhh"])[None, :]
    xs = jnp.transpose(x, (1, 0, 2))
    if reverse:
        xs = xs[::-1]

    def step(carry, xt):
        h, c = carry
        g = xt @ wih + b + h @ whh
        i = jax.nn.sigmoid(g[:, :H]); f = jax.nn.sigmoid(g[:, H:2 * H])
        gg = jnp.tanh(g[:, 2 * H:3 * H]); o = jax.nn.sigmoid(g[:, 3 * H:])
        c = f * c + i * gg
        h = o * jnp.tanh(c)
        return (h, c), h

    init = (jnp.zeros((B, H), jnp.float32), jnp.zeros((B, H), jnp.float32))
    _, hs = jax.lax.scan(step, init, xs)
    if reverse:
        hs = hs[::-1]
    return jnp.transpose(hs, (1, 0, 2))


def _bilstm_ref(x, pf, pb):
    return jnp.concatenate([_lstm_dir_ref(x, pf, False),
                            _lstm_dir_ref(x, pb, True)], axis=-1)


def rnn_layer_ref(x, raw):
    bs, C, T, Freq = x.shape
    H = raw["sb_f"]["whh"].shape[1]
    out = jnp.transpose(x, (0, 3, 2, 1)).reshape(bs * Freq, T, C)
    out = _bilstm_ref(out, raw["sb_f"], raw["sb_b"])
    out = out.reshape(bs, Freq, T, 2 * H).transpose(0, 2, 1, 3).reshape(bs * T, Freq, 2 * H)
    out = _bilstm_ref(out, raw["fb_f"], raw["fb_b"])
    out = out.reshape(-1, 2 * H) @ raw["lin_w"].T + raw["lin_b"]
    out = out.reshape(bs, T, Freq, C).transpose(0, 3, 1, 2)
    return out


# ----------------------------------- main ---------------------------------- #

if __name__ == "__main__":
    bs, T, Freq = 2, 8, 8
    # linear2 has in_features = 2*channels while fb_lstm emits 2*hidden_dim,
    # so the PyTorch forward only works when hidden_dim == channels.  128 keeps
    # H, 2H, 4H and C lane-dense (multiples of 128).
    C = H = 128

    key = jax.random.PRNGKey(0)
    kx, kp = jax.random.split(key)
    x = jax.random.normal(kx, (bs, C, T, Freq), jnp.float32)
    raw = init_raw_params(kp, C, H)
    packed = pack_params(raw)

    out = jax.jit(rnn_layer_forward)(x, packed)
    out = jax.block_until_ready(out)

    ref = rnn_layer_ref(x, raw)
    assert out.shape == (bs, C, T, Freq), out.shape
    err = float(jnp.max(jnp.abs(out - ref)))
    # bf16 MXU inputs (f32 accumulation, f32 cell math) vs. pure-f32 reference.
    assert jnp.allclose(out, ref, atol=2e-2, rtol=2e-2), err
    print("KERNEL_OK")
</pallas_src>

<mosaic_0001>
module attributes {stable_mosaic.version = 11 : i64} {
  func.func @kernel(%arg0: i32, %arg1: memref<8x8x128xbf16, #tpu.memory_space<vmem>>, %arg2: memref<128x1024xbf16, #tpu.memory_space<vmem>>, %arg3: memref<128x512xbf16, #tpu.memory_space<vmem>>, %arg4: memref<128x512xbf16, #tpu.memory_space<vmem>>, %arg5: memref<1x1024xf32, #tpu.memory_space<vmem>>, %arg6: memref<8x8x256xf32, #tpu.memory_space<vmem>>, %arg7: memref<8x8x1024xf32, #tpu.memory_space<vmem>>) attributes {dimension_semantics = [#tpu.dimension_semantics<parallel>], iteration_bounds = array<i64: 2>, scalar_prefetch = 0 : i64, scratch_operands = 1 : i64, tpu.core_type = #tpu.core_type<tc>, window_params = [{transform_indices = @transform_0, window_bounds = array<i64: 8, 8, 128>}, {pipeline_mode = #tpu.pipeline_mode<synchronous>, transform_indices = @transform_1, window_bounds = array<i64: 128, 1024>}, {pipeline_mode = #tpu.pipeline_mode<synchronous>, transform_indices = @transform_2, window_bounds = array<i64: 128, 512>}, {pipeline_mode = #tpu.pipeline_mode<synchronous>, transform_indices = @transform_3, window_bounds = array<i64: 128, 512>}, {pipeline_mode = #tpu.pipeline_mode<synchronous>, transform_indices = @transform_4, window_bounds = array<i64: 1, 1024>}, {transform_indices = @transform_5, window_bounds = array<i64: 8, 8, 256>}]} {
    %c0 = arith.constant 0 : index
    %c0_0 = arith.constant 0 : index
    %c0_1 = arith.constant 0 : index
    %0 = vector.load %arg1[%c0, %c0_0, %c0_1] : memref<8x8x128xbf16, #tpu.memory_space<vmem>>, vector<8x8x128xbf16>
    %1 = vector.shape_cast %0 : vector<8x8x128xbf16> to vector<64x128xbf16>
    %c0_2 = arith.constant 0 : index
    %c0_3 = arith.constant 0 : index
    %2 = vector.load %arg2[%c0_2, %c0_3] : memref<128x1024xbf16, #tpu.memory_space<vmem>>, vector<128x1024xbf16>
    %cst = arith.constant dense<0.000000e+00> : vector<64x1024xf32>
    %3 = tpu.matmul %1, %2, %cst {dimension_numbers = #tpu.dot_dimension_numbers<[1], [0], [0], [1], [0, 0, 1, 1], [], []>} : vector<64x128xbf16>, vector<128x1024xbf16>, vector<64x1024xf32> -> vector<64x1024xf32>
    %c0_4 = arith.constant 0 : index
    %c0_5 = arith.constant 0 : index
    %4 = vector.load %arg5[%c0_4, %c0_5] : memref<1x1024xf32, #tpu.memory_space<vmem>>, vector<1x1024xf32>
    %5 = vector.broadcast %4 : vector<1x1024xf32> to vector<64x1024xf32>
    %6 = arith.addf %3, %5 : vector<64x1024xf32>
    %7 = vector.shape_cast %6 : vector<64x1024xf32> to vector<8x8x1024xf32>
    %c0_6 = arith.constant 0 : index
    %c0_7 = arith.constant 0 : index
    %c0_8 = arith.constant 0 : index
    %8 = vector.load %arg7[%c0_6, %c0_7, %c0_8] : memref<8x8x1024xf32, #tpu.memory_space<vmem>>, vector<8x8x1024xf32>
    tpu.vector_store %arg7[%c0_6, %c0_7, %c0_8], %7 {strides = array<i32>} : memref<8x8x1024xf32, #tpu.memory_space<vmem>>, vector<8x8x1024xf32>,
    %c0_9 = arith.constant 0 : index
    %c0_10 = arith.constant 0 : index
    %9 = vector.load %arg3[%c0_9, %c0_10] : memref<128x512xbf16, #tpu.memory_space<vmem>>, vector<128x512xbf16>
    %c0_11 = arith.constant 0 : index
    %c0_12 = arith.constant 0 : index
    %10 = vector.load %arg4[%c0_11, %c0_12] : memref<128x512xbf16, #tpu.memory_space<vmem>>, vector<128x512xbf16>
    %cst_13 = arith.constant 0.000000e+00 : f32
    %11 = vector.broadcast %cst_13 : f32 to vector<8x128xf32>
    %cst_14 = arith.constant 0.000000e+00 : f32
    %12 = vector.broadcast %cst_14 : f32 to vector<8x128xf32>
    %c0_i32 = arith.constant 0 : i32
    %c7_i32 = arith.constant 7 : i32
    %13 = arith.subi %c7_i32, %c0_i32 : i32
    %14 = arith.index_cast %c0_i32 : i32 to index
    %c0_15 = arith.constant 0 : index
    %c0_16 = arith.constant 0 : index
    %15 = vector.load %arg7[%14, %c0_15, %c0_16] : memref<8x8x1024xf32, #tpu.memory_space<vmem>>, vector<1x8x512xf32>
    %16 = vector.shape_cast %15 : vector<1x8x512xf32> to vector<8x512xf32>
    %17 = arith.truncf %11 : vector<8x128xf32> to vector<8x128xbf16>
    %cst_17 = arith.constant dense<0.000000e+00> : vector<8x512xf32>
    %18 = tpu.matmul %17, %9, %cst_17 {dimension_numbers = #tpu.dot_dimension_numbers<[1], [0], [0], [1], [0, 0, 1, 1], [], []>} : vector<8x128xbf16>, vector<128x512xbf16>, vector<8x512xf32> -> vector<8x512xf32>
    %19 = arith.addf %16, %18 : vector<8x512xf32>
    %20 = arith.index_cast %13 : i32 to index
    %c0_18 = arith.constant 0 : index
    %c512 = arith.constant 512 : index
    %21 = vector.load %arg7[%20, %c0_18, %c512] : memref<8x8x1024xf32, #tpu.memory_space<vmem>>, vector<1x8x512xf32>
    %22 = vector.shape_cast %21 : vector<1x8x512xf32> to vector<8x512xf32>
    %23 = arith.truncf %11 : vector<8x128xf32> to vector<8x128xbf16>
    %cst_19 = arith.constant dense<0.000000e+00> : vector<8x512xf32>
    %24 = tpu.matmul %23, %10, %cst_19 {dimension_numbers = #tpu.dot_dimension_numbers<[1], [0], [0], [1], [0, 0, 1, 1], [], []>} : vector<8x128xbf16>, vector<128x512xbf16>, vector<8x512xf32> -> vector<8x512xf32>
    %25 = arith.addf %22, %24 : vector<8x512xf32>
    %26 = vector.extract_strided_slice %19 {offsets = [0, 0], sizes = [8, 128], strides = [1, 1]} : vector<8x512xf32> to vector<8x128xf32>
    %27 = arith.negf %26 : vector<8x128xf32>
    %28 = math.exp %27 : vector<8x128xf32>
    %cst_20 = arith.constant 1.000000e+00 : f32
    %29 = vector.broadcast %cst_20 : f32 to vector<8x128xf32>
    %30 = arith.addf %29, %28 : vector<8x128xf32>
    %31 = arith.divf %29, %30 : vector<8x128xf32>
    %32 = vector.extract_strided_slice %19 {offsets = [0, 128], sizes = [8, 128], strides = [1, 1]} : vector<8x512xf32> to vector<8x128xf32>
    %33 = arith.negf %32 : vector<8x128xf32>
    %34 = math.exp %33 : vector<8x128xf32>
    %cst_21 = arith.constant 1.000000e+00 : f32
    %35 = vector.broadcast %cst_21 : f32 to vector<8x128xf32>
    %36 = arith.addf %35, %34 : vector<8x128xf32>
    %37 = arith.divf %35, %36 : vector<8x128xf32>
    %38 = vector.extract_strided_slice %19 {offsets = [0, 256], sizes = [8, 128], strides = [1, 1]} : vector<8x512xf32> to vector<8x128xf32>
    %39 = math.tanh %38 : vector<8x128xf32>
    %40 = vector.extract_strided_slice %19 {offsets = [0, 384], sizes = [8, 128], strides = [1, 1]} : vector<8x512xf32> to vector<8x128xf32>
    %41 = arith.negf %40 : vector<8x128xf32>
    %42 = math.exp %41 : vector<8x128xf32>
    %cst_22 = arith.constant 1.000000e+00 : f32
    %43 = vector.broadcast %cst_22 : f32 to vector<8x128xf32>
    %44 = arith.addf %43, %42 : vector<8x128xf32>
    %45 = arith.divf %43, %44 : vector<8x128xf32>
    %46 = arith.mulf %37, %12 : vector<8x128xf32>
    %47 = arith.mulf %31, %39 : vector<8x128xf32>
    %48 = arith.addf %46, %47 : vector<8x128xf32>
    %49 = math.tanh %48 : vector<8x128xf32>
    %50 = arith.mulf %45, %49 : vector<8x128xf32>
    %51 = vector.extract_strided_slice %25 {offsets = [0, 0], sizes = [8, 128], strides = [1, 1]} : vector<8x512xf32> to vector<8x128xf32>
    %52 = arith.negf %51 : vector<8x128xf32>
    %53 = math.exp %52 : vector<8x128xf32>
    %cst_23 = arith.constant 1.000000e+00 : f32
    %54 = vector.broadcast %cst_23 : f32 to vector<8x128xf32>
    %55 = arith.addf %54, %53 : vector<8x128xf32>
    %56 = arith.divf %54, %55 : vector<8x128xf32>
    %57 = vector.extract_strided_slice %25 {offsets = [0, 128], sizes = [8, 128], strides = [1, 1]} : vector<8x512xf32> to vector<8x128xf32>
    %58 = arith.negf %57 : vector<8x128xf32>
    %59 = math.exp %58 : vector<8x128xf32>
    %cst_24 = arith.constant 1.000000e+00 : f32
    %60 = vector.broadcast %cst_24 : f32 to vector<8x128xf32>
    %61 = arith.addf %60, %59 : vector<8x128xf32>
    %62 = arith.divf %60, %61 : vector<8x128xf32>
    %63 = vector.extract_strided_slice %25 {offsets = [0, 256], sizes = [8, 128], strides = [1, 1]} : vector<8x512xf32> to vector<8x128xf32>
    %64 = math.tanh %63 : vector<8x128xf32>
    %65 = vector.extract_strided_slice %25 {offsets = [0, 384], sizes = [8, 128], strides = [1, 1]} : vector<8x512xf32> to vector<8x128xf32>
    %66 = arith.negf %65 : vector<8x128xf32>
    %67 = math.exp %66 : vector<8x128xf32>
    %cst_25 = arith.constant 1.000000e+00 : f32
    %68 = vector.broadcast %cst_25 : f32 to vector<8x128xf32>
    %69 = arith.addf %68, %67 : vector<8x128xf32>
    %70 = arith.divf %68, %69 : vector<8x128xf32>
    %71 = arith.mulf %62, %12 : vector<8x128xf32>
    %72 = arith.mulf %56, %64 : vector<8x128xf32>
    %73 = arith.addf %71, %72 : vector<8x128xf32>
    %74 = math.tanh %73 : vector<8x128xf32>
    %75 = arith.mulf %70, %74 : vector<8x128xf32>
    %76 = arith.index_cast %c0_i32 : i32 to index
    %c0_26 = arith.constant 0 : index
    %c0_27 = arith.constant 0 : index
    %77 = vector.load %arg6[%76, %c0_26, %c0_27] : memref<8x8x256xf32, #tpu.memory_space<vmem>>, vector<1x8x128xf32>
    %78 = vector.shape_cast %77 : vector<1x8x128xf32> to vector<8x128xf32>
    %79 = vector.shape_cast %50 : vector<8x128xf32> to vector<1x8x128xf32>
    tpu.vector_store %arg6[%76, %c0_26, %c0_27], %79 {strides = array<i32>} : memref<8x8x256xf32, #tpu.memory_space<vmem>>, vector<1x8x128xf32>,
    %80 = arith.index_cast %13 : i32 to index
    %c0_28 = arith.constant 0 : index
    %c128 = arith.constant 128 : index
    %81 = vector.load %arg6[%80, %c0_28, %c128] : memref<8x8x256xf32, #tpu.memory_space<vmem>>, vector<1x8x128xf32>
    %82 = vector.shape_cast %81 : vector<1x8x128xf32> to vector<8x128xf32>
    %83 = vector.shape_cast %75 : vector<8x128xf32> to vector<1x8x128xf32>
    tpu.vector_store %arg6[%80, %c0_28, %c128], %83 {strides = array<i32>} : memref<8x8x256xf32, #tpu.memory_space<vmem>>, vector<1x8x128xf32>,
    %c1_i32 = arith.constant 1 : i32
    %c7_i32_29 = arith.constant 7 : i32
    %84 = arith.subi %c7_i32_29, %c1_i32 : i32
    %85 = arith.index_cast %c1_i32 : i32 to index
    %c0_30 = arith.constant 0 : index
    %c0_31 = arith.constant 0 : index
    %86 = vector.load %arg7[%85, %c0_30, %c0_31] : memref<8x8x1024xf32, #tpu.memory_space<vmem>>, vector<1x8x512xf32>
    %87 = vector.shape_cast %86 : vector<1x8x512xf32> to vector<8x512xf32>
    %88 = arith.truncf %50 : vector<8x128xf32> to vector<8x128xbf16>
    %cst_32 = arith.constant dense<0.000000e+00> : vector<8x512xf32>
    %89 = tpu.matmul %88, %9, %cst_32 {dimension_numbers = #tpu.dot_dimension_numbers<[1], [0], [0], [1], [0, 0, 1, 1], [], []>} : vector<8x128xbf16>, vector<128x512xbf16>, vector<8x512xf32> -> vector<8x512xf32>
    %90 = arith.addf %87, %89 : vector<8x512xf32>
    %91 = arith.index_cast %84 : i32 to index
    %c0_33 = arith.constant 0 : index
    %c512_34 = arith.constant 512 : index
    %92 = vector.load %arg7[%91, %c0_33, %c512_34] : memref<8x8x1024xf32, #tpu.memory_space<vmem>>, vector<1x8x512xf32>
    %93 = vector.shape_cast %92 : vector<1x8x512xf32> to vector<8x512xf32>
    %94 = arith.truncf %75 : vector<8x128xf32> to vector<8x128xbf16>
    %cst_35 = arith.constant dense<0.000000e+00> : vector<8x512xf32>
    %95 = tpu.matmul %94, %10, %cst_35 {dimension_numbers = #tpu.dot_dimension_numbers<[1], [0], [0], [1], [0, 0, 1, 1], [], []>} : vector<8x128xbf16>, vector<128x512xbf16>, vector<8x512xf32> -> vector<8x512xf32>
    %96 = arith.addf %93, %95 : vector<8x512xf32>
    %97 = vector.extract_strided_slice %90 {offsets = [0, 0], sizes = [8, 128], strides = [1, 1]} : vector<8x512xf32> to vector<8x128xf32>
    %98 = arith.negf %97 : vector<8x128xf32>
    %99 = math.exp %98 : vector<8x128xf32>
    %cst_36 = arith.constant 1.000000e+00 : f32
    %100 = vector.broadcast %cst_36 : f32 to vector<8x128xf32>
    %101 = arith.addf %100, %99 : vector<8x128xf32>
    %102 = arith.divf %100, %101 : vector<8x128xf32>
    %103 = vector.extract_strided_slice %90 {offsets = [0, 128], sizes = [8, 128], strides = [1, 1]} : vector<8x512xf32> to vector<8x128xf32>
    %104 = arith.negf %103 : vector<8x128xf32>
    %105 = math.exp %104 : vector<8x128xf32>
    %cst_37 = arith.constant 1.000000e+00 : f32
    %106 = vector.broadcast %cst_37 : f32 to vector<8x128xf32>
    %107 = arith.addf %106, %105 : vector<8x128xf32>
    %108 = arith.divf %106, %107 : vector<8x128xf32>
    %109 = vector.extract_strided_slice %90 {offsets = [0, 256], sizes = [8, 128], strides = [1, 1]} : vector<8x512xf32> to vector<8x128xf32>
    %110 = math.tanh %109 : vector<8x128xf32>
    %111 = vector.extract_strided_slice %90 {offsets = [0, 384], sizes = [8, 128], strides = [1, 1]} : vector<8x512xf32> to vector<8x128xf32>
    %112 = arith.negf %111 : vector<8x128xf32>
    %113 = math.exp %112 : vector<8x128xf32>
    %cst_38 = arith.constant 1.000000e+00 : f32
    %114 = vector.broadcast %cst_38 : f32 to vector<8x128xf32>
    %115 = arith.addf %114, %113 : vector<8x128xf32>
    %116 = arith.divf %114, %115 : vector<8x128xf32>
    %117 = arith.mulf %108, %48 : vector<8x128xf32>
    %118 = arith.mulf %102, %110 : vector<8x128xf32>
    %119 = arith.addf %117, %118 : vector<8x128xf32>
    %120 = math.tanh %119 : vector<8x128xf32>
    %121 = arith.mulf %116, %120 : vector<8x128xf32>
    %122 = vector.extract_strided_slice %96 {offsets = [0, 0], sizes = [8, 128], strides = [1, 1]} : vector<8x512xf32> to vector<8x128xf32>
    %123 = arith.negf %122 : vector<8x128xf32>
    %124 = math.exp %123 : vector<8x128xf32>
    %cst_39 = arith.constant 1.000000e+00 : f32
    %125 = vector.broadcast %cst_39 : f32 to vector<8x128xf32>
    %126 = arith.addf %125, %124 : vector<8x128xf32>
    %127 = arith.divf %125, %126 : vector<8x128xf32>
    %128 = vector.extract_strided_slice %96 {offsets = [0, 128], sizes = [8, 128], strides = [1, 1]} : vector<8x512xf32> to vector<8x128xf32>
    %129 = arith.negf %128 : vector<8x128xf32>
    %130 = math.exp %129 : vector<8x128xf32>
    %cst_40 = arith.constant 1.000000e+00 : f32
    %131 = vector.broadcast %cst_40 : f32 to vector<8x128xf32>
    %132 = arith.addf %131, %130 : vector<8x128xf32>
    %133 = arith.divf %131, %132 : vector<8x128xf32>
    %134 = vector.extract_strided_slice %96 {offsets = [0, 256], sizes = [8, 128], strides = [1, 1]} : vector<8x512xf32> to vector<8x128xf32>
    %135 = math.tanh %134 : vector<8x128xf32>
    %136 = vector.extract_strided_slice %96 {offsets = [0, 384], sizes = [8, 128], strides = [1, 1]} : vector<8x512xf32> to vector<8x128xf32>
    %137 = arith.negf %136 : vector<8x128xf32>
    %138 = math.exp %137 : vector<8x128xf32>
    %cst_41 = arith.constant 1.000000e+00 : f32
    %139 = vector.broadcast %cst_41 : f32 to vector<8x128xf32>
    %140 = arith.addf %139, %138 : vector<8x128xf32>
    %141 = arith.divf %139, %140 : vector<8x128xf32>
    %142 = arith.mulf %133, %73 : vector<8x128xf32>
    %143 = arith.mulf %127, %135 : vector<8x128xf32>
    %144 = arith.addf %142, %143 : vector<8x128xf32>
    %145 = math.tanh %144 : vector<8x128xf32>
    %146 = arith.mulf %141, %145 : vector<8x128xf32>
    %147 = arith.index_cast %c1_i32 : i32 to index
    %c0_42 = arith.constant 0 : index
    %c0_43 = arith.constant 0 : index
    %148 = vector.load %arg6[%147, %c0_42, %c0_43] : memref<8x8x256xf32, #tpu.memory_space<vmem>>, vector<1x8x128xf32>
    %149 = vector.shape_cast %148 : vector<1x8x128xf32> to vector<8x128xf32>
    %150 = vector.shape_cast %121 : vector<8x128xf32> to vector<1x8x128xf32>
    tpu.vector_store %arg6[%147, %c0_42, %c0_43], %150 {strides = array<i32>} : memref<8x8x256xf32, #tpu.memory_space<vmem>>, vector<1x8x128xf32>,
    %151 = arith.index_cast %84 : i32 to index
    %c0_44 = arith.constant 0 : index
    %c128_45 = arith.constant 128 : index
    %152 = vector.load %arg6[%151, %c0_44, %c128_45] : memref<8x8x256xf32, #tpu.memory_space<vmem>>, vector<1x8x128xf32>
    %153 = vector.shape_cast %152 : vector<1x8x128xf32> to vector<8x128xf32>
    %154 = vector.shape_cast %146 : vector<8x128xf32> to vector<1x8x128xf32>
    tpu.vector_store %arg6[%151, %c0_44, %c128_45], %154 {strides = array<i32>} : memref<8x8x256xf32, #tpu.memory_space<vmem>>, vector<1x8x128xf32>,
    %c2_i32 = arith.constant 2 : i32
    %c7_i32_46 = arith.constant 7 : i32
    %155 = arith.subi %c7_i32_46, %c2_i32 : i32
    %156 = arith.index_cast %c2_i32 : i32 to index
    %c0_47 = arith.constant 0 : index
    %c0_48 = arith.constant 0 : index
    %157 = vector.load %arg7[%156, %c0_47, %c0_48] : memref<8x8x1024xf32, #tpu.memory_space<vmem>>, vector<1x8x512xf32>
    %158 = vector.shape_cast %157 : vector<1x8x512xf32> to vector<8x512xf32>
    %159 = arith.truncf %121 : vector<8x128xf32> to vector<8x128xbf16>
    %cst_49 = arith.constant dense<0.000000e+00> : vector<8x512xf32>
    %160 = tpu.matmul %159, %9, %cst_49 {dimension_numbers = #tpu.dot_dimension_numbers<[1], [0], [0], [1], [0, 0, 1, 1], [], []>} : vector<8x128xbf16>, vector<128x512xbf16>, vector<8x512xf32> -> vector<8x512xf32>
    %161 = arith.addf %158, %160 : vector<8x512xf32>
    %162 = arith.index_cast %155 : i32 to index
    %c0_50 = arith.constant 0 : index
    %c512_51 = arith.constant 512 : index
    %163 = vector.load %arg7[%162, %c0_50, %c512_51] : memref<8x8x1024xf32, #tpu.memory_space<vmem>>, vector<1x8x512xf32>
    %164 = vector.shape_cast %163 : vector<1x8x512xf32> to vector<8x512xf32>
    %165 = arith.truncf %146 : vector<8x128xf32> to vector<8x128xbf16>
    %cst_52 = arith.constant dense<0.000000e+00> : vector<8x512xf32>
    %166 = tpu.matmul %165, %10, %cst_52 {dimension_numbers = #tpu.dot_dimension_numbers<[1], [0], [0], [1], [0, 0, 1, 1], [], []>} : vector<8x128xbf16>, vector<128x512xbf16>, vector<8x512xf32> -> vector<8x512xf32>
    %167 = arith.addf %164, %166 : vector<8x512xf32>
    %168 = vector.extract_strided_slice %161 {offsets = [0, 0], sizes = [8, 128], strides = [1, 1]} : vector<8x512xf32> to vector<8x128xf32>
    %169 = arith.negf %168 : vector<8x128xf32>
    %170 = math.exp %169 : vector<8x128xf32>
    %cst_53 = arith.constant 1.000000e+00 : f32
    %171 = vector.broadcast %cst_53 : f32 to vector<8x128xf32>
    %172 = arith.addf %171, %170 : vector<8x128xf32>
    %173 = arith.divf %171, %172 : vector<8x128xf32>
    %174 = vector.extract_strided_slice %161 {offsets = [0, 128], sizes = [8, 128], strides = [1, 1]} : vector<8x512xf32> to vector<8x128xf32>
    %175 = arith.negf %174 : vector<8x128xf32>
    %176 = math.exp %175 : vector<8x128xf32>
    %cst_54 = arith.constant 1.000000e+00 : f32
    %177 = vector.broadcast %cst_54 : f32 to vector<8x128xf32>
    %178 = arith.addf %177, %176 : vector<8x128xf32>
    %179 = arith.divf %177, %178 : vector<8x128xf32>
    %180 = vector.extract_strided_slice %161 {offsets = [0, 256], sizes = [8, 128], strides = [1, 1]} : vector<8x512xf32> to vector<8x128xf32>
    %181 = math.tanh %180 : vector<8x128xf32>
    %182 = vector.extract_strided_slice %161 {offsets = [0, 384], sizes = [8, 128], strides = [1, 1]} : vector<8x512xf32> to vector<8x128xf32>
    %183 = arith.negf %182 : vector<8x128xf32>
    %184 = math.exp %183 : vector<8x128xf32>
    %cst_55 = arith.constant 1.000000e+00 : f32
    %185 = vector.broadcast %cst_55 : f32 to vector<8x128xf32>
    %186 = arith.addf %185, %184 : vector<8x128xf32>
    %187 = arith.divf %185, %186 : vector<8x128xf32>
    %188 = arith.mulf %179, %119 : vector<8x128xf32>
    %189 = arith.mulf %173, %181 : vector<8x128xf32>
    %190 = arith.addf %188, %189 : vector<8x128xf32>
    %191 = math.tanh %190 : vector<8x128xf32>
    %192 = arith.mulf %187, %191 : vector<8x128xf32>
    %193 = vector.extract_strided_slice %167 {offsets = [0, 0], sizes = [8, 128], strides = [1, 1]} : vector<8x512xf32> to vector<8x128xf32>
    %194 = arith.negf %193 : vector<8x128xf32>
    %195 = math.exp %194 : vector<8x128xf32>
    %cst_56 = arith.constant 1.000000e+00 : f32
    %196 = vector.broadcast %cst_56 : f32 to vector<8x128xf32>
    %197 = arith.addf %196, %195 : vector<8x128xf32>
    %198 = arith.divf %196, %197 : vector<8x128xf32>
    %199 = vector.extract_strided_slice %167 {offsets = [0, 128], sizes = [8, 128], strides = [1, 1]} : vector<8x512xf32> to vector<8x128xf32>
    %200 = arith.negf %199 : vector<8x128xf32>
    %201 = math.exp %200 : vector<8x128xf32>
    %cst_57 = arith.constant 1.000000e+00 : f32
    %202 = vector.broadcast %cst_57 : f32 to vector<8x128xf32>
    %203 = arith.addf %202, %201 : vector<8x128xf32>
    %204 = arith.divf %202, %203 : vector<8x128xf32>
    %205 = vector.extract_strided_slice %167 {offsets = [0, 256], sizes = [8, 128], strides = [1, 1]} : vector<8x512xf32> to vector<8x128xf32>
    %206 = math.tanh %205 : vector<8x128xf32>
    %207 = vector.extract_strided_slice %167 {offsets = [0, 384], sizes = [8, 128], strides = [1, 1]} : vector<8x512xf32> to vector<8x128xf32>
    %208 = arith.negf %207 : vector<8x128xf32>
    %209 = math.exp %208 : vector<8x128xf32>
    %cst_58 = arith.constant 1.000000e+00 : f32
    %210 = vector.broadcast %cst_58 : f32 to vector<8x128xf32>
    %211 = arith.addf %210, %209 : vector<8x128xf32>
    %212 = arith.divf %210, %211 : vector<8x128xf32>
    %213 = arith.mulf %204, %144 : vector<8x128xf32>
    %214 = arith.mulf %198, %206 : vector<8x128xf32>
    %215 = arith.addf %213, %214 : vector<8x128xf32>
    %216 = math.tanh %215 : vector<8x128xf32>
    %217 = arith.mulf %212, %216 : vector<8x128xf32>
    %218 = arith.index_cast %c2_i32 : i32 to index
    %c0_59 = arith.constant 0 : index
    %c0_60 = arith.constant 0 : index
    %219 = vector.load %arg6[%218, %c0_59, %c0_60] : memref<8x8x256xf32, #tpu.memory_space<vmem>>, vector<1x8x128xf32>
    %220 = vector.shape_cast %219 : vector<1x8x128xf32> to vector<8x128xf32>
    %221 = vector.shape_cast %192 : vector<8x128xf32> to vector<1x8x128xf32>
    tpu.vector_store %arg6[%218, %c0_59, %c0_60], %221 {strides = array<i32>} : memref<8x8x256xf32, #tpu.memory_space<vmem>>, vector<1x8x128xf32>,
    %222 = arith.index_cast %155 : i32 to index
    %c0_61 = arith.constant 0 : index
    %c128_62 = arith.constant 128 : index
    %223 = vector.load %arg6[%222, %c0_61, %c128_62] : memref<8x8x256xf32, #tpu.memory_space<vmem>>, vector<1x8x128xf32>
    %224 = vector.shape_cast %223 : vector<1x8x128xf32> to vector<8x128xf32>
    %225 = vector.shape_cast %217 : vector<8x128xf32> to vector<1x8x128xf32>
    tpu.vector_store %arg6[%222, %c0_61, %c128_62], %225 {strides = array<i32>} : memref<8x8x256xf32, #tpu.memory_space<vmem>>, vector<1x8x128xf32>,
    %c3_i32 = arith.constant 3 : i32
    %c7_i32_63 = arith.constant 7 : i32
    %226 = arith.subi %c7_i32_63, %c3_i32 : i32
    %227 = arith.index_cast %c3_i32 : i32 to index
    %c0_64 = arith.constant 0 : index
    %c0_65 = arith.constant 0 : index
    %228 = vector.load %arg7[%227, %c0_64, %c0_65] : memref<8x8x1024xf32, #tpu.memory_space<vmem>>, vector<1x8x512xf32>
    %229 = vector.shape_cast %228 : vector<1x8x512xf32> to vector<8x512xf32>
    %230 = arith.truncf %192 : vector<8x128xf32> to vector<8x128xbf16>
    %cst_66 = arith.constant dense<0.000000e+00> : vector<8x512xf32>
    %231 = tpu.matmul %230, %9, %cst_66 {dimension_numbers = #tpu.dot_dimension_numbers<[1], [0], [0], [1], [0, 0, 1, 1], [], []>} : vector<8x128xbf16>, vector<128x512xbf16>, vector<8x512xf32> -> vector<8x512xf32>
    %232 = arith.addf %229, %231 : vector<8x512xf32>
    %233 = arith.index_cast %226 : i32 to index
    %c0_67 = arith.constant 0 : index
    %c512_68 = arith.constant 512 : index
    %234 = vector.load %arg7[%233, %c0_67, %c512_68] : memref<8x8x1024xf32, #tpu.memory_space<vmem>>, vector<1x8x512xf32>
    %235 = vector.shape_cast %234 : vector<1x8x512xf32> to vector<8x512xf32>
    %236 = arith.truncf %217 : vector<8x128xf32> to vector<8x128xbf16>
    %cst_69 = arith.constant dense<0.000000e+00> : vector<8x512xf32>
    %237 = tpu.matmul %236, %10, %cst_69 {dimension_numbers = #tpu.dot_dimension_numbers<[1], [0], [0], [1], [0, 0, 1, 1], [], []>} : vector<8x128xbf16>, vector<128x512xbf16>, vector<8x512xf32> -> vector<8x512xf32>
    %238 = arith.addf %235, %237 : vector<8x512xf32>
    %239 = vector.extract_strided_slice %232 {offsets = [0, 0], sizes = [8, 128], strides = [1, 1]} : vector<8x512xf32> to vector<8x128xf32>
    %240 = arith.negf %239 : vector<8x128xf32>
    %241 = math.exp %240 : vector<8x128xf32>
    %cst_70 = arith.constant 1.000000e+00 : f32
    %242 = vector.broadcast %cst_70 : f32 to vector<8x128xf32>
    %243 = arith.addf %242, %241 : vector<8x128xf32>
    %244 = arith.divf %242, %243 : vector<8x128xf32>
    %245 = vector.extract_strided_slice %232 {offsets = [0, 128], sizes = [8, 128], strides = [1, 1]} : vector<8x512xf32> to vector<8x128xf32>
    %246 = arith.negf %245 : vector<8x128xf32>
    %247 = math.exp %246 : vector<8x128xf32>
    %cst_71 = arith.constant 1.000000e+00 : f32
    %248 = vector.broadcast %cst_71 : f32 to vector<8x128xf32>
    %249 = arith.addf %248, %247 : vector<8x128xf32>
    %250 = arith.divf %248, %249 : vector<8x128xf32>
    %251 = vector.extract_strided_slice %232 {offsets = [0, 256], sizes = [8, 128], strides = [1, 1]} : vector<8x512xf32> to vector<8x128xf32>
    %252 = math.tanh %251 : vector<8x128xf32>
    %253 = vector.extract_strided_slice %232 {offsets = [0, 384], sizes = [8, 128], strides = [1, 1]} : vector<8x512xf32> to vector<8x128xf32>
    %254 = arith.negf %253 : vector<8x128xf32>
    %255 = math.exp %254 : vector<8x128xf32>
    %cst_72 = arith.constant 1.000000e+00 : f32
    %256 = vector.broadcast %cst_72 : f32 to vector<8x128xf32>
    %257 = arith.addf %256, %255 : vector<8x128xf32>
    %258 = arith.divf %256, %257 : vector<8x128xf32>
    %259 = arith.mulf %250, %190 : vector<8x128xf32>
    %260 = arith.mulf %244, %252 : vector<8x128xf32>
    %261 = arith.addf %259, %260 : vector<8x128xf32>
    %262 = math.tanh %261 : vector<8x128xf32>
    %263 = arith.mulf %258, %262 : vector<8x128xf32>
    %264 = vector.extract_strided_slice %238 {offsets = [0, 0], sizes = [8, 128], strides = [1, 1]} : vector<8x512xf32> to vector<8x128xf32>
    %265 = arith.negf %264 : vector<8x128xf32>
    %266 = math.exp %265 : vector<8x128xf32>
    %cst_73 = arith.constant 1.000000e+00 : f32
    %267 = vector.broadcast %cst_73 : f32 to vector<8x128xf32>
    %268 = arith.addf %267, %266 : vector<8x128xf32>
    %269 = arith.divf %267, %268 : vector<8x128xf32>
    %270 = vector.extract_strided_slice %238 {offsets = [0, 128], sizes = [8, 128], strides = [1, 1]} : vector<8x512xf32> to vector<8x128xf32>
    %271 = arith.negf %270 : vector<8x128xf32>
    %272 = math.exp %271 : vector<8x128xf32>
    %cst_74 = arith.constant 1.000000e+00 : f32
    %273 = vector.broadcast %cst_74 : f32 to vector<8x128xf32>
    %274 = arith.addf %273, %272 : vector<8x128xf32>
    %275 = arith.divf %273, %274 : vector<8x128xf32>
    %276 = vector.extract_strided_slice %238 {offsets = [0, 256], sizes = [8, 128], strides = [1, 1]} : vector<8x512xf32> to vector<8x128xf32>
    %277 = math.tanh %276 : vector<8x128xf32>
    %278 = vector.extract_strided_slice %238 {offsets = [0, 384], sizes = [8, 128], strides = [1, 1]} : vector<8x512xf32> to vector<8x128xf32>
    %279 = arith.negf %278 : vector<8x128xf32>
    %280 = math.exp %279 : vector<8x128xf32>
    %cst_75 = arith.constant 1.000000e+00 : f32
    %281 = vector.broadcast %cst_75 : f32 to vector<8x128xf32>
    %282 = arith.addf %281, %280 : vector<8x128xf32>
    %283 = arith.divf %281, %282 : vector<8x128xf32>
    %284 = arith.mulf %275, %215 : vector<8x128xf32>
    %285 = arith.mulf %269, %277 : vector<8x128xf32>
    %286 = arith.addf %284, %285 : vector<8x128xf32>
    %287 = math.tanh %286 : vector<8x128xf32>
    %288 = arith.mulf %283, %287 : vector<8x128xf32>
    %289 = arith.index_cast %c3_i32 : i32 to index
    %c0_76 = arith.constant 0 : index
    %c0_77 = arith.constant 0 : index
    %290 = vector.load %arg6[%289, %c0_76, %c0_77] : memref<8x8x256xf32, #tpu.memory_space<vmem>>, vector<1x8x128xf32>
    %291 = vector.shape_cast %290 : vector<1x8x128xf32> to vector<8x128xf32>
    %292 = vector.shape_cast %263 : vector<8x128xf32> to vector<1x8x128xf32>
    tpu.vector_store %arg6[%289, %c0_76, %c0_77], %292 {strides = array<i32>} : memref<8x8x256xf32, #tpu.memory_space<vmem>>, vector<1x8x128xf32>,
    %293 = arith.index_cast %226 : i32 to index
    %c0_78 = arith.constant 0 : index
    %c128_79 = arith.constant 128 : index
    %294 = vector.load %arg6[%293, %c0_78, %c128_79] : memref<8x8x256xf32, #tpu.memory_space<vmem>>, vector<1x8x128xf32>
    %295 = vector.shape_cast %294 : vector<1x8x128xf32> to vector<8x128xf32>
    %296 = vector.shape_cast %288 : vector<8x128xf32> to vector<1x8x128xf32>
    tpu.vector_store %arg6[%293, %c0_78, %c128_79], %296 {strides = array<i32>} : memref<8x8x256xf32, #tpu.memory_space<vmem>>, vector<1x8x128xf32>,
    %c4_i32 = arith.constant 4 : i32
    %c7_i32_80 = arith.constant 7 : i32
    %297 = arith.subi %c7_i32_80, %c4_i32 : i32
    %298 = arith.index_cast %c4_i32 : i32 to index
    %c0_81 = arith.constant 0 : index
    %c0_82 = arith.constant 0 : index
    %299 = vector.load %arg7[%298, %c0_81, %c0_82] : memref<8x8x1024xf32, #tpu.memory_space<vmem>>, vector<1x8x512xf32>
    %300 = vector.shape_cast %299 : vector<1x8x512xf32> to vector<8x512xf32>
    %301 = arith.truncf %263 : vector<8x128xf32> to vector<8x128xbf16>
    %cst_83 = arith.constant dense<0.000000e+00> : vector<8x512xf32>
    %302 = tpu.matmul %301, %9, %cst_83 {dimension_numbers = #tpu.dot_dimension_numbers<[1], [0], [0], [1], [0, 0, 1, 1], [], []>} : vector<8x128xbf16>, vector<128x512xbf16>, vector<8x512xf32> -> vector<8x512xf32>
    %303 = arith.addf %300, %302 : vector<8x512xf32>
    %304 = arith.index_cast %297 : i32 to index
    %c0_84 = arith.constant 0 : index
    %c512_85 = arith.constant 512 : index
    %305 = vector.load %arg7[%304, %c0_84, %c512_85] : memref<8x8x1024xf32, #tpu.memory_space<vmem>>, vector<1x8x512xf32>
    %306 = vector.shape_cast %305 : vector<1x8x512xf32> to vector<8x512xf32>
    %307 = arith.truncf %288 : vector<8x128xf32> to vector<8x128xbf16>
    %cst_86 = arith.constant dense<0.000000e+00> : vector<8x512xf32>
    %308 = tpu.matmul %307, %10, %cst_86 {dimension_numbers = #tpu.dot_dimension_numbers<[1], [0], [0], [1], [0, 0, 1, 1], [], []>} : vector<8x128xbf16>, vector<128x512xbf16>, vector<8x512xf32> -> vector<8x512xf32>
    %309 = arith.addf %306, %308 : vector<8x512xf32>
    %310 = vector.extract_strided_slice %303 {offsets = [0, 0], sizes = [8, 128], strides = [1, 1]} : vector<8x512xf32> to vector<8x128xf32>
    %311 = arith.negf %310 : vector<8x128xf32>
    %312 = math.exp %311 : vector<8x128xf32>
    %cst_87 = arith.constant 1.000000e+00 : f32
    %313 = vector.broadcast %cst_87 : f32 to vector<8x128xf32>
    %314 = arith.addf %313, %312 : vector<8x128xf32>
    %315 = arith.divf %313, %314 : vector<8x128xf32>
    %316 = vector.extract_strided_slice %303 {offsets = [0, 128], sizes = [8, 128], strides = [1, 1]} : vector<8x512xf32> to vector<8x128xf32>
    %317 = arith.negf %316 : vector<8x128xf32>
    %318 = math.exp %317 : vector<8x128xf32>
    %cst_88 = arith.constant 1.000000e+00 : f32
    %319 = vector.broadcast %cst_88 : f32 to vector<8x128xf32>
    %320 = arith.addf %319, %318 : vector<8x128xf32>
    %321 = arith.divf %319, %320 : vector<8x128xf32>
    %322 = vector.extract_strided_slice %303 {offsets = [0, 256], sizes = [8, 128], strides = [1, 1]} : vector<8x512xf32> to vector<8x128xf32>
    %323 = math.tanh %322 : vector<8x128xf32>
    %324 = vector.extract_strided_slice %303 {offsets = [0, 384], sizes = [8, 128], strides = [1, 1]} : vector<8x512xf32> to vector<8x128xf32>
    %325 = arith.negf %324 : vector<8x128xf32>
    %326 = math.exp %325 : vector<8x128xf32>
    %cst_89 = arith.constant 1.000000e+00 : f32
    %327 = vector.broadcast %cst_89 : f32 to vector<8x128xf32>
    %328 = arith.addf %327, %326 : vector<8x128xf32>
    %329 = arith.divf %327, %328 : vector<8x128xf32>
    %330 = arith.mulf %321, %261 : vector<8x128xf32>
    %331 = arith.mulf %315, %323 : vector<8x128xf32>
    %332 = arith.addf %330, %331 : vector<8x128xf32>
    %333 = math.tanh %332 : vector<8x128xf32>
    %334 = arith.mulf %329, %333 : vector<8x128xf32>
    %335 = vector.extract_strided_slice %309 {offsets = [0, 0], sizes = [8, 128], strides = [1, 1]} : vector<8x512xf32> to vector<8x128xf32>
    %336 = arith.negf %335 : vector<8x128xf32>
    %337 = math.exp %336 : vector<8x128xf32>
    %cst_90 = arith.constant 1.000000e+00 : f32
    %338 = vector.broadcast %cst_90 : f32 to vector<8x128xf32>
    %339 = arith.addf %338, %337 : vector<8x128xf32>
    %340 = arith.divf %338, %339 : vector<8x128xf32>
    %341 = vector.extract_strided_slice %309 {offsets = [0, 128], sizes = [8, 128], strides = [1, 1]} : vector<8x512xf32> to vector<8x128xf32>
    %342 = arith.negf %341 : vector<8x128xf32>
    %343 = math.exp %342 : vector<8x128xf32>
    %cst_91 = arith.constant 1.000000e+00 : f32
    %344 = vector.broadcast %cst_91 : f32 to vector<8x128xf32>
    %345 = arith.addf %344, %343 : vector<8x128xf32>
    %346 = arith.divf %344, %345 : vector<8x128xf32>
    %347 = vector.extract_strided_slice %309 {offsets = [0, 256], sizes = [8, 128], strides = [1, 1]} : vector<8x512xf32> to vector<8x128xf32>
    %348 = math.tanh %347 : vector<8x128xf32>
    %349 = vector.extract_strided_slice %309 {offsets = [0, 384], sizes = [8, 128], strides = [1, 1]} : vector<8x512xf32> to vector<8x128xf32>
    %350 = arith.negf %349 : vector<8x128xf32>
    %351 = math.exp %350 : vector<8x128xf32>
    %cst_92 = arith.constant 1.000000e+00 : f32
    %352 = vector.broadcast %cst_92 : f32 to vector<8x128xf32>
    %353 = arith.addf %352, %351 : vector<8x128xf32>
    %354 = arith.divf %352, %353 : vector<8x128xf32>
    %355 = arith.mulf %346, %286 : vector<8x128xf32>
    %356 = arith.mulf %340, %348 : vector<8x128xf32>
    %357 = arith.addf %355, %356 : vector<8x128xf32>
    %358 = math.tanh %357 : vector<8x128xf32>
    %359 = arith.mulf %354, %358 : vector<8x128xf32>
    %360 = arith.index_cast %c4_i32 : i32 to index
    %c0_93 = arith.constant 0 : index
    %c0_94 = arith.constant 0 : index
    %361 = vector.load %arg6[%360, %c0_93, %c0_94] : memref<8x8x256xf32, #tpu.memory_space<vmem>>, vector<1x8x128xf32>
    %362 = vector.shape_cast %361 : vector<1x8x128xf32> to vector<8x128xf32>
    %363 = vector.shape_cast %334 : vector<8x128xf32> to vector<1x8x128xf32>
    tpu.vector_store %arg6[%360, %c0_93, %c0_94], %363 {strides = array<i32>} : memref<8x8x256xf32, #tpu.memory_space<vmem>>, vector<1x8x128xf32>,
    %364 = arith.index_cast %297 : i32 to index
    %c0_95 = arith.constant 0 : index
    %c128_96 = arith.constant 128 : index
    %365 = vector.load %arg6[%364, %c0_95, %c128_96] : memref<8x8x256xf32, #tpu.memory_space<vmem>>, vector<1x8x128xf32>
    %366 = vector.shape_cast %365 : vector<1x8x128xf32> to vector<8x128xf32>
    %367 = vector.shape_cast %359 : vector<8x128xf32> to vector<1x8x128xf32>
    tpu.vector_store %arg6[%364, %c0_95, %c128_96], %367 {strides = array<i32>} : memref<8x8x256xf32, #tpu.memory_space<vmem>>, vector<1x8x128xf32>,
    %c5_i32 = arith.constant 5 : i32
    %c7_i32_97 = arith.constant 7 : i32
    %368 = arith.subi %c7_i32_97, %c5_i32 : i32
    %369 = arith.index_cast %c5_i32 : i32 to index
    %c0_98 = arith.constant 0 : index
    %c0_99 = arith.constant 0 : index
    %370 = vector.load %arg7[%369, %c0_98, %c0_99] : memref<8x8x1024xf32, #tpu.memory_space<vmem>>, vector<1x8x512xf32>
    %371 = vector.shape_cast %370 : vector<1x8x512xf32> to vector<8x512xf32>
    %372 = arith.truncf %334 : vector<8x128xf32> to vector<8x128xbf16>
    %cst_100 = arith.constant dense<0.000000e+00> : vector<8x512xf32>
    %373 = tpu.matmul %372, %9, %cst_100 {dimension_numbers = #tpu.dot_dimension_numbers<[1], [0], [0], [1], [0, 0, 1, 1], [], []>} : vector<8x128xbf16>, vector<128x512xbf16>, vector<8x512xf32> -> vector<8x512xf32>
    %374 = arith.addf %371, %373 : vector<8x512xf32>
    %375 = arith.index_cast %368 : i32 to index
    %c0_101 = arith.constant 0 : index
    %c512_102 = arith.constant 512 : index
    %376 = vector.load %arg7[%375, %c0_101, %c512_102] : memref<8x8x1024xf32, #tpu.memory_space<vmem>>, vector<1x8x512xf32>
    %377 = vector.shape_cast %376 : vector<1x8x512xf32> to vector<8x512xf32>
    %378 = arith.truncf %359 : vector<8x128xf32> to vector<8x128xbf16>
    %cst_103 = arith.constant dense<0.000000e+00> : vector<8x512xf32>
    %379 = tpu.matmul %378, %10, %cst_103 {dimension_numbers = #tpu.dot_dimension_numbers<[1], [0], [0], [1], [0, 0, 1, 1], [], []>} : vector<8x128xbf16>, vector<128x512xbf16>, vector<8x512xf32> -> vector<8x512xf32>
    %380 = arith.addf %377, %379 : vector<8x512xf32>
    %381 = vector.extract_strided_slice %374 {offsets = [0, 0], sizes = [8, 128], strides = [1, 1]} : vector<8x512xf32> to vector<8x128xf32>
    %382 = arith.negf %381 : vector<8x128xf32>
    %383 = math.exp %382 : vector<8x128xf32>
    %cst_104 = arith.constant 1.000000e+00 : f32
    %384 = vector.broadcast %cst_104 : f32 to vector<8x128xf32>
    %385 = arith.addf %384, %383 : vector<8x128xf32>
    %386 = arith.divf %384, %385 : vector<8x128xf32>
    %387 = vector.extract_strided_slice %374 {offsets = [0, 128], sizes = [8, 128], strides = [1, 1]} : vector<8x512xf32> to vector<8x128xf32>
    %388 = arith.negf %387 : vector<8x128xf32>
    %389 = math.exp %388 : vector<8x128xf32>
    %cst_105 = arith.constant 1.000000e+00 : f32
    %390 = vector.broadcast %cst_105 : f32 to vector<8x128xf32>
    %391 = arith.addf %390, %389 : vector<8x128xf32>
    %392 = arith.divf %390, %391 : vector<8x128xf32>
    %393 = vector.extract_strided_slice %374 {offsets = [0, 256], sizes = [8, 128], strides = [1, 1]} : vector<8x512xf32> to vector<8x128xf32>
    %394 = math.tanh %393 : vector<8x128xf32>
    %395 = vector.extract_strided_slice %374 {offsets = [0, 384], sizes = [8, 128], strides = [1, 1]} : vector<8x512xf32> to vector<8x128xf32>
    %396 = arith.negf %395 : vector<8x128xf32>
    %397 = math.exp %396 : vector<8x128xf32>
    %cst_106 = arith.constant 1.000000e+00 : f32
    %398 = vector.broadcast %cst_106 : f32 to vector<8x128xf32>
    %399 = arith.addf %398, %397 : vector<8x128xf32>
    %400 = arith.divf %398, %399 : vector<8x128xf32>
    %401 = arith.mulf %392, %332 : vector<8x128xf32>
    %402 = arith.mulf %386, %394 : vector<8x128xf32>
    %403 = arith.addf %401, %402 : vector<8x128xf32>
    %404 = math.tanh %403 : vector<8x128xf32>
    %405 = arith.mulf %400, %404 : vector<8x128xf32>
    %406 = vector.extract_strided_slice %380 {offsets = [0, 0], sizes = [8, 128], strides = [1, 1]} : vector<8x512xf32> to vector<8x128xf32>
    %407 = arith.negf %406 : vector<8x128xf32>
    %408 = math.exp %407 : vector<8x128xf32>
    %cst_107 = arith.constant 1.000000e+00 : f32
    %409 = vector.broadcast %cst_107 : f32 to vector<8x128xf32>
    %410 = arith.addf %409, %408 : vector<8x128xf32>
    %411 = arith.divf %409, %410 : vector<8x128xf32>
    %412 = vector.extract_strided_slice %380 {offsets = [0, 128], sizes = [8, 128], strides = [1, 1]} : vector<8x512xf32> to vector<8x128xf32>
    %413 = arith.negf %412 : vector<8x128xf32>
    %414 = math.exp %413 : vector<8x128xf32>
    %cst_108 = arith.constant 1.000000e+00 : f32
    %415 = vector.broadcast %cst_108 : f32 to vector<8x128xf32>
    %416 = arith.addf %415, %414 : vector<8x128xf32>
    %417 = arith.divf %415, %416 : vector<8x128xf32>
    %418 = vector.extract_strided_slice %380 {offsets = [0, 256], sizes = [8, 128], strides = [1, 1]} : vector<8x512xf32> to vector<8x128xf32>
    %419 = math.tanh %418 : vector<8x128xf32>
    %420 = vector.extract_strided_slice %380 {offsets = [0, 384], sizes = [8, 128], strides = [1, 1]} : vector<8x512xf32> to vector<8x128xf32>
    %421 = arith.negf %420 : vector<8x128xf32>
    %422 = math.exp %421 : vector<8x128xf32>
    %cst_109 = arith.constant 1.000000e+00 : f32
    %423 = vector.broadcast %cst_109 : f32 to vector<8x128xf32>
    %424 = arith.addf %423, %422 : vector<8x128xf32>
    %425 = arith.divf %423, %424 : vector<8x128xf32>
    %426 = arith.mulf %417, %357 : vector<8x128xf32>
    %427 = arith.mulf %411, %419 : vector<8x128xf32>
    %428 = arith.addf %426, %427 : vector<8x128xf32>
    %429 = math.tanh %428 : vector<8x128xf32>
    %430 = arith.mulf %425, %429 : vector<8x128xf32>
    %431 = arith.index_cast %c5_i32 : i32 to index
    %c0_110 = arith.constant 0 : index
    %c0_111 = arith.constant 0 : index
    %432 = vector.load %arg6[%431, %c0_110, %c0_111] : memref<8x8x256xf32, #tpu.memory_space<vmem>>, vector<1x8x128xf32>
    %433 = vector.shape_cast %432 : vector<1x8x128xf32> to vector<8x128xf32>
    %434 = vector.shape_cast %405 : vector<8x128xf32> to vector<1x8x128xf32>
    tpu.vector_store %arg6[%431, %c0_110, %c0_111], %434 {strides = array<i32>} : memref<8x8x256xf32, #tpu.memory_space<vmem>>, vector<1x8x128xf32>,
    %435 = arith.index_cast %368 : i32 to index
    %c0_112 = arith.constant 0 : index
    %c128_113 = arith.constant 128 : index
    %436 = vector.load %arg6[%435, %c0_112, %c128_113] : memref<8x8x256xf32, #tpu.memory_space<vmem>>, vector<1x8x128xf32>
    %437 = vector.shape_cast %436 : vector<1x8x128xf32> to vector<8x128xf32>
    %438 = vector.shape_cast %430 : vector<8x128xf32> to vector<1x8x128xf32>
    tpu.vector_store %arg6[%435, %c0_112, %c128_113], %438 {strides = array<i32>} : memref<8x8x256xf32, #tpu.memory_space<vmem>>, vector<1x8x128xf32>,
    %c6_i32 = arith.constant 6 : i32
    %c7_i32_114 = arith.constant 7 : i32
    %439 = arith.subi %c7_i32_114, %c6_i32 : i32
    %440 = arith.index_cast %c6_i32 : i32 to index
    %c0_115 = arith.constant 0 : index
    %c0_116 = arith.constant 0 : index
    %441 = vector.load %arg7[%440, %c0_115, %c0_116] : memref<8x8x1024xf32, #tpu.memory_space<vmem>>, vector<1x8x512xf32>
    %442 = vector.shape_cast %441 : vector<1x8x512xf32> to vector<8x512xf32>
    %443 = arith.truncf %405 : vector<8x128xf32> to vector<8x128xbf16>
    %cst_117 = arith.constant dense<0.000000e+00> : vector<8x512xf32>
    %444 = tpu.matmul %443, %9, %cst_117 {dimension_numbers = #tpu.dot_dimension_numbers<[1], [0], [0], [1], [0, 0, 1, 1], [], []>} : vector<8x128xbf16>, vector<128x512xbf16>, vector<8x512xf32> -> vector<8x512xf32>
    %445 = arith.addf %442, %444 : vector<8x512xf32>
    %446 = arith.index_cast %439 : i32 to index
    %c0_118 = arith.constant 0 : index
    %c512_119 = arith.constant 512 : index
    %447 = vector.load %arg7[%446, %c0_118, %c512_119] : memref<8x8x1024xf32, #tpu.memory_space<vmem>>, vector<1x8x512xf32>
    %448 = vector.shape_cast %447 : vector<1x8x512xf32> to vector<8x512xf32>
    %449 = arith.truncf %430 : vector<8x128xf32> to vector<8x128xbf16>
    %cst_120 = arith.constant dense<0.000000e+00> : vector<8x512xf32>
    %450 = tpu.matmul %449, %10, %cst_120 {dimension_numbers = #tpu.dot_dimension_numbers<[1], [0], [0], [1], [0, 0, 1, 1], [], []>} : vector<8x128xbf16>, vector<128x512xbf16>, vector<8x512xf32> -> vector<8x512xf32>
    %451 = arith.addf %448, %450 : vector<8x512xf32>
    %452 = vector.extract_strided_slice %445 {offsets = [0, 0], sizes = [8, 128], strides = [1, 1]} : vector<8x512xf32> to vector<8x128xf32>
    %453 = arith.negf %452 : vector<8x128xf32>
    %454 = math.exp %453 : vector<8x128xf32>
    %cst_121 = arith.constant 1.000000e+00 : f32
    %455 = vector.broadcast %cst_121 : f32 to vector<8x128xf32>
    %456 = arith.addf %455, %454 : vector<8x128xf32>
    %457 = arith.divf %455, %456 : vector<8x128xf32>
    %458 = vector.extract_strided_slice %445 {offsets = [0, 128], sizes = [8, 128], strides = [1, 1]} : vector<8x512xf32> to vector<8x128xf32>
    %459 = arith.negf %458 : vector<8x128xf32>
    %460 = math.exp %459 : vector<8x128xf32>
    %cst_122 = arith.constant 1.000000e+00 : f32
    %461 = vector.broadcast %cst_122 : f32 to vector<8x128xf32>
    %462 = arith.addf %461, %460 : vector<8x128xf32>
    %463 = arith.divf %461, %462 : vector<8x128xf32>
    %464 = vector.extract_strided_slice %445 {offsets = [0, 256], sizes = [8, 128], strides = [1, 1]} : vector<8x512xf32> to vector<8x128xf32>
    %465 = math.tanh %464 : vector<8x128xf32>
    %466 = vector.extract_strided_slice %445 {offsets = [0, 384], sizes = [8, 128], strides = [1, 1]} : vector<8x512xf32> to vector<8x128xf32>
    %467 = arith.negf %466 : vector<8x128xf32>
    %468 = math.exp %467 : vector<8x128xf32>
    %cst_123 = arith.constant 1.000000e+00 : f32
    %469 = vector.broadcast %cst_123 : f32 to vector<8x128xf32>
    %470 = arith.addf %469, %468 : vector<8x128xf32>
    %471 = arith.divf %469, %470 : vector<8x128xf32>
    %472 = arith.mulf %463, %403 : vector<8x128xf32>
    %473 = arith.mulf %457, %465 : vector<8x128xf32>
    %474 = arith.addf %472, %473 : vector<8x128xf32>
    %475 = math.tanh %474 : vector<8x128xf32>
    %476 = arith.mulf %471, %475 : vector<8x128xf32>
    %477 = vector.extract_strided_slice %451 {offsets = [0, 0], sizes = [8, 128], strides = [1, 1]} : vector<8x512xf32> to vector<8x128xf32>
    %478 = arith.negf %477 : vector<8x128xf32>
    %479 = math.exp %478 : vector<8x128xf32>
    %cst_124 = arith.constant 1.000000e+00 : f32
    %480 = vector.broadcast %cst_124 : f32 to vector<8x128xf32>
    %481 = arith.addf %480, %479 : vector<8x128xf32>
    %482 = arith.divf %480, %481 : vector<8x128xf32>
    %483 = vector.extract_strided_slice %451 {offsets = [0, 128], sizes = [8, 128], strides = [1, 1]} : vector<8x512xf32> to vector<8x128xf32>
    %484 = arith.negf %483 : vector<8x128xf32>
    %485 = math.exp %484 : vector<8x128xf32>
    %cst_125 = arith.constant 1.000000e+00 : f32
    %486 = vector.broadcast %cst_125 : f32 to vector<8x128xf32>
    %487 = arith.addf %486, %485 : vector<8x128xf32>
    %488 = arith.divf %486, %487 : vector<8x128xf32>
    %489 = vector.extract_strided_slice %451 {offsets = [0, 256], sizes = [8, 128], strides = [1, 1]} : vector<8x512xf32> to vector<8x128xf32>
    %490 = math.tanh %489 : vector<8x128xf32>
    %491 = vector.extract_strided_slice %451 {offsets = [0, 384], sizes = [8, 128], strides = [1, 1]} : vector<8x512xf32> to vector<8x128xf32>
    %492 = arith.negf %491 : vector<8x128xf32>
    %493 = math.exp %492 : vector<8x128xf32>
    %cst_126 = arith.constant 1.000000e+00 : f32
    %494 = vector.broadcast %cst_126 : f32 to vector<8x128xf32>
    %495 = arith.addf %494, %493 : vector<8x128xf32>
    %496 = arith.divf %494, %495 : vector<8x128xf32>
    %497 = arith.mulf %488, %428 : vector<8x128xf32>
    %498 = arith.mulf %482, %490 : vector<8x128xf32>
    %499 = arith.addf %497, %498 : vector<8x128xf32>
    %500 = math.tanh %499 : vector<8x128xf32>
    %501 = arith.mulf %496, %500 : vector<8x128xf32>
    %502 = arith.index_cast %c6_i32 : i32 to index
    %c0_127 = arith.constant 0 : index
    %c0_128 = arith.constant 0 : index
    %503 = vector.load %arg6[%502, %c0_127, %c0_128] : memref<8x8x256xf32, #tpu.memory_space<vmem>>, vector<1x8x128xf32>
    %504 = vector.shape_cast %503 : vector<1x8x128xf32> to vector<8x128xf32>
    %505 = vector.shape_cast %476 : vector<8x128xf32> to vector<1x8x128xf32>
    tpu.vector_store %arg6[%502, %c0_127, %c0_128], %505 {strides = array<i32>} : memref<8x8x256xf32, #tpu.memory_space<vmem>>, vector<1x8x128xf32>,
    %506 = arith.index_cast %439 : i32 to index
    %c0_129 = arith.constant 0 : index
    %c128_130 = arith.constant 128 : index
    %507 = vector.load %arg6[%506, %c0_129, %c128_130] : memref<8x8x256xf32, #tpu.memory_space<vmem>>, vector<1x8x128xf32>
    %508 = vector.shape_cast %507 : vector<1x8x128xf32> to vector<8x128xf32>
    %509 = vector.shape_cast %501 : vector<8x128xf32> to vector<1x8x128xf32>
    tpu.vector_store %arg6[%506, %c0_129, %c128_130], %509 {strides = array<i32>} : memref<8x8x256xf32, #tpu.memory_space<vmem>>, vector<1x8x128xf32>,
    %c7_i32_131 = arith.constant 7 : i32
    %c7_i32_132 = arith.constant 7 : i32
    %510 = arith.subi %c7_i32_132, %c7_i32_131 : i32
    %511 = arith.index_cast %c7_i32_131 : i32 to index
    %c0_133 = arith.constant 0 : index
    %c0_134 = arith.constant 0 : index
    %512 = vector.load %arg7[%511, %c0_133, %c0_134] : memref<8x8x1024xf32, #tpu.memory_space<vmem>>, vector<1x8x512xf32>
    %513 = vector.shape_cast %512 : vector<1x8x512xf32> to vector<8x512xf32>
    %514 = arith.truncf %476 : vector<8x128xf32> to vector<8x128xbf16>
    %cst_135 = arith.constant dense<0.000000e+00> : vector<8x512xf32>
    %515 = tpu.matmul %514, %9, %cst_135 {dimension_numbers = #tpu.dot_dimension_numbers<[1], [0], [0], [1], [0, 0, 1, 1], [], []>} : vector<8x128xbf16>, vector<128x512xbf16>, vector<8x512xf32> -> vector<8x512xf32>
    %516 = arith.addf %513, %515 : vector<8x512xf32>
    %517 = arith.index_cast %510 : i32 to index
    %c0_136 = arith.constant 0 : index
    %c512_137 = arith.constant 512 : index
    %518 = vector.load %arg7[%517, %c0_136, %c512_137] : memref<8x8x1024xf32, #tpu.memory_space<vmem>>, vector<1x8x512xf32>
    %519 = vector.shape_cast %518 : vector<1x8x512xf32> to vector<8x512xf32>
    %520 = arith.truncf %501 : vector<8x128xf32> to vector<8x128xbf16>
    %cst_138 = arith.constant dense<0.000000e+00> : vector<8x512xf32>
    %521 = tpu.matmul %520, %10, %cst_138 {dimension_numbers = #tpu.dot_dimension_numbers<[1], [0], [0], [1], [0, 0, 1, 1], [], []>} : vector<8x128xbf16>, vector<128x512xbf16>, vector<8x512xf32> -> vector<8x512xf32>
    %522 = arith.addf %519, %521 : vector<8x512xf32>
    %523 = vector.extract_strided_slice %516 {offsets = [0, 0], sizes = [8, 128], strides = [1, 1]} : vector<8x512xf32> to vector<8x128xf32>
    %524 = arith.negf %523 : vector<8x128xf32>
    %525 = math.exp %524 : vector<8x128xf32>
    %cst_139 = arith.constant 1.000000e+00 : f32
    %526 = vector.broadcast %cst_139 : f32 to vector<8x128xf32>
    %527 = arith.addf %526, %525 : vector<8x128xf32>
    %528 = arith.divf %526, %527 : vector<8x128xf32>
    %529 = vector.extract_strided_slice %516 {offsets = [0, 128], sizes = [8, 128], strides = [1, 1]} : vector<8x512xf32> to vector<8x128xf32>
    %530 = arith.negf %529 : vector<8x128xf32>
    %531 = math.exp %530 : vector<8x128xf32>
    %cst_140 = arith.constant 1.000000e+00 : f32
    %532 = vector.broadcast %cst_140 : f32 to vector<8x128xf32>
    %533 = arith.addf %532, %531 : vector<8x128xf32>
    %534 = arith.divf %532, %533 : vector<8x128xf32>
    %535 = vector.extract_strided_slice %516 {offsets = [0, 256], sizes = [8, 128], strides = [1, 1]} : vector<8x512xf32> to vector<8x128xf32>
    %536 = math.tanh %535 : vector<8x128xf32>
    %537 = vector.extract_strided_slice %516 {offsets = [0, 384], sizes = [8, 128], strides = [1, 1]} : vector<8x512xf32> to vector<8x128xf32>
    %538 = arith.negf %537 : vector<8x128xf32>
    %539 = math.exp %538 : vector<8x128xf32>
    %cst_141 = arith.constant 1.000000e+00 : f32
    %540 = vector.broadcast %cst_141 : f32 to vector<8x128xf32>
    %541 = arith.addf %540, %539 : vector<8x128xf32>
    %542 = arith.divf %540, %541 : vector<8x128xf32>
    %543 = arith.mulf %534, %474 : vector<8x128xf32>
    %544 = arith.mulf %528, %536 : vector<8x128xf32>
    %545 = arith.addf %543, %544 : vector<8x128xf32>
    %546 = math.tanh %545 : vector<8x128xf32>
    %547 = arith.mulf %542, %546 : vector<8x128xf32>
    %548 = vector.extract_strided_slice %522 {offsets = [0, 0], sizes = [8, 128], strides = [1, 1]} : vector<8x512xf32> to vector<8x128xf32>
    %549 = arith.negf %548 : vector<8x128xf32>
    %550 = math.exp %549 : vector<8x128xf32>
    %cst_142 = arith.constant 1.000000e+00 : f32
    %551 = vector.broadcast %cst_142 : f32 to vector<8x128xf32>
    %552 = arith.addf %551, %550 : vector<8x128xf32>
    %553 = arith.divf %551, %552 : vector<8x128xf32>
    %554 = vector.extract_strided_slice %522 {offsets = [0, 128], sizes = [8, 128], strides = [1, 1]} : vector<8x512xf32> to vector<8x128xf32>
    %555 = arith.negf %554 : vector<8x128xf32>
    %556 = math.exp %555 : vector<8x128xf32>
    %cst_143 = arith.constant 1.000000e+00 : f32
    %557 = vector.broadcast %cst_143 : f32 to vector<8x128xf32>
    %558 = arith.addf %557, %556 : vector<8x128xf32>
    %559 = arith.divf %557, %558 : vector<8x128xf32>
    %560 = vector.extract_strided_slice %522 {offsets = [0, 256], sizes = [8, 128], strides = [1, 1]} : vector<8x512xf32> to vector<8x128xf32>
    %561 = math.tanh %560 : vector<8x128xf32>
    %562 = vector.extract_strided_slice %522 {offsets = [0, 384], sizes = [8, 128], strides = [1, 1]} : vector<8x512xf32> to vector<8x128xf32>
    %563 = arith.negf %562 : vector<8x128xf32>
    %564 = math.exp %563 : vector<8x128xf32>
    %cst_144 = arith.constant 1.000000e+00 : f32
    %565 = vector.broadcast %cst_144 : f32 to vector<8x128xf32>
    %566 = arith.addf %565, %564 : vector<8x128xf32>
    %567 = arith.divf %565, %566 : vector<8x128xf32>
    %568 = arith.mulf %559, %499 : vector<8x128xf32>
    %569 = arith.mulf %553, %561 : vector<8x128xf32>
    %570 = arith.addf %568, %569 : vector<8x128xf32>
    %571 = math.tanh %570 : vector<8x128xf32>
    %572 = arith.mulf %567, %571 : vector<8x128xf32>
    %573 = arith.index_cast %c7_i32_131 : i32 to index
    %c0_145 = arith.constant 0 : index
    %c0_146 = arith.constant 0 : index
    %574 = vector.load %arg6[%573, %c0_145, %c0_146] : memref<8x8x256xf32, #tpu.memory_space<vmem>>, vector<1x8x128xf32>
    %575 = vector.shape_cast %574 : vector<1x8x128xf32> to vector<8x128xf32>
    %576 = vector.shape_cast %547 : vector<8x128xf32> to vector<1x8x128xf32>
    tpu.vector_store %arg6[%573, %c0_145, %c0_146], %576 {strides = array<i32>} : memref<8x8x256xf32, #tpu.memory_space<vmem>>, vector<1x8x128xf32>,
    %577 = arith.index_cast %510 : i32 to index
    %c0_147 = arith.constant 0 : index
    %c128_148 = arith.constant 128 : index
    %578 = vector.load %arg6[%577, %c0_147, %c128_148] : memref<8x8x256xf32, #tpu.memory_space<vmem>>, vector<1x8x128xf32>
    %579 = vector.shape_cast %578 : vector<1x8x128xf32> to vector<8x128xf32>
    %580 = vector.shape_cast %572 : vector<8x128xf32> to vector<1x8x128xf32>
    tpu.vector_store %arg6[%577, %c0_147, %c128_148], %580 {strides = array<i32>} : memref<8x8x256xf32, #tpu.memory_space<vmem>>, vector<1x8x128xf32>,
    %c8_i32 = arith.constant 8 : i32
    return
  }
  func.func @transform_0(%arg0: i32) -> (i32, i32, i32) {
    %c0_i32 = arith.constant 0 : i32
    %c0_i32_0 = arith.constant 0 : i32
    %c0_i32_1 = arith.constant 0 : i32
    return %c0_i32, %arg0, %c0_i32_0 : i32, i32, i32
  }
  func.func @transform_1(%arg0: i32) -> (i32, i32) {
    %c0_i32 = arith.constant 0 : i32
    %c0_i32_0 = arith.constant 0 : i32
    %c0_i32_1 = arith.constant 0 : i32
    return %c0_i32, %c0_i32_0 : i32, i32
  }
  func.func @transform_2(%arg0: i32) -> (i32, i32) {
    %c0_i32 = arith.constant 0 : i32
    %c0_i32_0 = arith.constant 0 : i32
    %c0_i32_1 = arith.constant 0 : i32
    return %c0_i32, %c0_i32_0 : i32, i32
  }
  func.func @transform_3(%arg0: i32) -> (i32, i32) {
    %c0_i32 = arith.constant 0 : i32
    %c0_i32_0 = arith.constant 0 : i32
    %c0_i32_1 = arith.constant 0 : i32
    return %c0_i32, %c0_i32_0 : i32, i32
  }
  func.func @transform_4(%arg0: i32) -> (i32, i32) {
    %c0_i32 = arith.constant 0 : i32
    %c0_i32_0 = arith.constant 0 : i32
    %c0_i32_1 = arith.constant 0 : i32
    return %c0_i32, %c0_i32_0 : i32, i32
  }
  func.func @transform_5(%arg0: i32) -> (i32, i32, i32) {
    %c0_i32 = arith.constant 0 : i32
    %c0_i32_0 = arith.constant 0 : i32
    %c0_i32_1 = arith.constant 0 : i32
    return %c0_i32, %arg0, %c0_i32_0 : i32, i32, i32
  }
}

module attributes {stable_mosaic.version = 11 : i64} {
  func.func @kernel(%arg0: i32, %arg1: memref<8x8x256xbf16, #tpu.memory_space<vmem>>, %arg2: memref<256x1024xbf16, #tpu.memory_space<vmem>>, %arg3: memref<128x512xbf16, #tpu.memory_space<vmem>>, %arg4: memref<128x512xbf16, #tpu.memory_space<vmem>>, %arg5: memref<1x1024xf32, #tpu.memory_space<vmem>>, %arg6: memref<256x128xbf16, #tpu.memory_space<vmem>>, %arg7: memref<1x128xf32, #tpu.memory_space<vmem>>, %arg8: memref<8x8x128xf32, #tpu.memory_space<vmem>>, %arg9: memref<8x8x1024xf32, #tpu.memory_space<vmem>>, %arg10: memref<8x8x256xf32, #tpu.memory_space<vmem>>) attributes {dimension_semantics = [#tpu.dimension_semantics<parallel>], iteration_bounds = array<i64: 2>, scalar_prefetch = 0 : i64, scratch_operands = 2 : i64, tpu.core_type = #tpu.core_type<tc>, window_params = [{transform_indices = @transform_0, window_bounds = array<i64: 8, 8, 256>}, {pipeline_mode = #tpu.pipeline_mode<synchronous>, transform_indices = @transform_1, window_bounds = array<i64: 256, 1024>}, {pipeline_mode = #tpu.pipeline_mode<synchronous>, transform_indices = @transform_2, window_bounds = array<i64: 128, 512>}, {pipeline_mode = #tpu.pipeline_mode<synchronous>, transform_indices = @transform_3, window_bounds = array<i64: 128, 512>}, {pipeline_mode = #tpu.pipeline_mode<synchronous>, transform_indices = @transform_4, window_bounds = array<i64: 1, 1024>}, {pipeline_mode = #tpu.pipeline_mode<synchronous>, transform_indices = @transform_5, window_bounds = array<i64: 256, 128>}, {pipeline_mode = #tpu.pipeline_mode<synchronous>, transform_indices = @transform_6, window_bounds = array<i64: 1, 128>}, {transform_indices = @transform_7, window_bounds = array<i64: 8, 8, 128>}]} {
    %c0 = arith.constant 0 : index
    %c0_0 = arith.constant 0 : index
    %c0_1 = arith.constant 0 : index
    %0 = vector.load %arg1[%c0, %c0_0, %c0_1] : memref<8x8x256xbf16, #tpu.memory_space<vmem>>, vector<8x8x256xbf16>
    %1 = vector.shape_cast %0 : vector<8x8x256xbf16> to vector<64x256xbf16>
    %c0_2 = arith.constant 0 : index
    %c0_3 = arith.constant 0 : index
    %2 = vector.load %arg2[%c0_2, %c0_3] : memref<256x1024xbf16, #tpu.memory_space<vmem>>, vector<256x1024xbf16>
    %cst = arith.constant dense<0.000000e+00> : vector<64x1024xf32>
    %3 = tpu.matmul %1, %2, %cst {dimension_numbers = #tpu.dot_dimension_numbers<[1], [0], [0], [1], [0, 0, 1, 1], [], []>} : vector<64x256xbf16>, vector<256x1024xbf16>, vector<64x1024xf32> -> vector<64x1024xf32>
    %c0_4 = arith.constant 0 : index
    %c0_5 = arith.constant 0 : index
    %4 = vector.load %arg5[%c0_4, %c0_5] : memref<1x1024xf32, #tpu.memory_space<vmem>>, vector<1x1024xf32>
    %5 = vector.broadcast %4 : vector<1x1024xf32> to vector<64x1024xf32>
    %6 = arith.addf %3, %5 : vector<64x1024xf32>
    %7 = vector.shape_cast %6 : vector<64x1024xf32> to vector<8x8x1024xf32>
    %c0_6 = arith.constant 0 : index
    %c0_7 = arith.constant 0 : index
    %c0_8 = arith.constant 0 : index
    %8 = vector.load %arg9[%c0_6, %c0_7, %c0_8] : memref<8x8x1024xf32, #tpu.memory_space<vmem>>, vector<8x8x1024xf32>
    tpu.vector_store %arg9[%c0_6, %c0_7, %c0_8], %7 {strides = array<i32>} : memref<8x8x1024xf32, #tpu.memory_space<vmem>>, vector<8x8x1024xf32>,
    %c0_9 = arith.constant 0 : index
    %c0_10 = arith.constant 0 : index
    %9 = vector.load %arg3[%c0_9, %c0_10] : memref<128x512xbf16, #tpu.memory_space<vmem>>, vector<128x512xbf16>
    %c0_11 = arith.constant 0 : index
    %c0_12 = arith.constant 0 : index
    %10 = vector.load %arg4[%c0_11, %c0_12] : memref<128x512xbf16, #tpu.memory_space<vmem>>, vector<128x512xbf16>
    %cst_13 = arith.constant 0.000000e+00 : f32
    %11 = vector.broadcast %cst_13 : f32 to vector<8x128xf32>
    %cst_14 = arith.constant 0.000000e+00 : f32
    %12 = vector.broadcast %cst_14 : f32 to vector<8x128xf32>
    %c0_i32 = arith.constant 0 : i32
    %c7_i32 = arith.constant 7 : i32
    %13 = arith.subi %c7_i32, %c0_i32 : i32
    %14 = arith.index_cast %c0_i32 : i32 to index
    %c0_15 = arith.constant 0 : index
    %c0_16 = arith.constant 0 : index
    %15 = vector.load %arg9[%14, %c0_15, %c0_16] : memref<8x8x1024xf32, #tpu.memory_space<vmem>>, vector<1x8x512xf32>
    %16 = vector.shape_cast %15 : vector<1x8x512xf32> to vector<8x512xf32>
    %17 = arith.truncf %11 : vector<8x128xf32> to vector<8x128xbf16>
    %cst_17 = arith.constant dense<0.000000e+00> : vector<8x512xf32>
    %18 = tpu.matmul %17, %9, %cst_17 {dimension_numbers = #tpu.dot_dimension_numbers<[1], [0], [0], [1], [0, 0, 1, 1], [], []>} : vector<8x128xbf16>, vector<128x512xbf16>, vector<8x512xf32> -> vector<8x512xf32>
    %19 = arith.addf %16, %18 : vector<8x512xf32>
    %20 = arith.index_cast %13 : i32 to index
    %c0_18 = arith.constant 0 : index
    %c512 = arith.constant 512 : index
    %21 = vector.load %arg9[%20, %c0_18, %c512] : memref<8x8x1024xf32, #tpu.memory_space<vmem>>, vector<1x8x512xf32>
    %22 = vector.shape_cast %21 : vector<1x8x512xf32> to vector<8x512xf32>
    %23 = arith.truncf %11 : vector<8x128xf32> to vector<8x128xbf16>
    %cst_19 = arith.constant dense<0.000000e+00> : vector<8x512xf32>
    %24 = tpu.matmul %23, %10, %cst_19 {dimension_numbers = #tpu.dot_dimension_numbers<[1], [0], [0], [1], [0, 0, 1, 1], [], []>} : vector<8x128xbf16>, vector<128x512xbf16>, vector<8x512xf32> -> vector<8x512xf32>
    %25 = arith.addf %22, %24 : vector<8x512xf32>
    %26 = vector.extract_strided_slice %19 {offsets = [0, 0], sizes = [8, 128], strides = [1, 1]} : vector<8x512xf32> to vector<8x128xf32>
    %27 = arith.negf %26 : vector<8x128xf32>
    %28 = math.exp %27 : vector<8x128xf32>
    %cst_20 = arith.constant 1.000000e+00 : f32
    %29 = vector.broadcast %cst_20 : f32 to vector<8x128xf32>
    %30 = arith.addf %29, %28 : vector<8x128xf32>
    %31 = arith.divf %29, %30 : vector<8x128xf32>
    %32 = vector.extract_strided_slice %19 {offsets = [0, 128], sizes = [8, 128], strides = [1, 1]} : vector<8x512xf32> to vector<8x128xf32>
    %33 = arith.negf %32 : vector<8x128xf32>
    %34 = math.exp %33 : vector<8x128xf32>
    %cst_21 = arith.constant 1.000000e+00 : f32
    %35 = vector.broadcast %cst_21 : f32 to vector<8x128xf32>
    %36 = arith.addf %35, %34 : vector<8x128xf32>
    %37 = arith.divf %35, %36 : vector<8x128xf32>
    %38 = vector.extract_strided_slice %19 {offsets = [0, 256], sizes = [8, 128], strides = [1, 1]} : vector<8x512xf32> to vector<8x128xf32>
    %39 = math.tanh %38 : vector<8x128xf32>
    %40 = vector.extract_strided_slice %19 {offsets = [0, 384], sizes = [8, 128], strides = [1, 1]} : vector<8x512xf32> to vector<8x128xf32>
    %41 = arith.negf %40 : vector<8x128xf32>
    %42 = math.exp %41 : vector<8x128xf32>
    %cst_22 = arith.constant 1.000000e+00 : f32
    %43 = vector.broadcast %cst_22 : f32 to vector<8x128xf32>
    %44 = arith.addf %43, %42 : vector<8x128xf32>
    %45 = arith.divf %43, %44 : vector<8x128xf32>
    %46 = arith.mulf %37, %12 : vector<8x128xf32>
    %47 = arith.mulf %31, %39 : vector<8x128xf32>
    %48 = arith.addf %46, %47 : vector<8x128xf32>
    %49 = math.tanh %48 : vector<8x128xf32>
    %50 = arith.mulf %45, %49 : vector<8x128xf32>
    %51 = vector.extract_strided_slice %25 {offsets = [0, 0], sizes = [8, 128], strides = [1, 1]} : vector<8x512xf32> to vector<8x128xf32>
    %52 = arith.negf %51 : vector<8x128xf32>
    %53 = math.exp %52 : vector<8x128xf32>
    %cst_23 = arith.constant 1.000000e+00 : f32
    %54 = vector.broadcast %cst_23 : f32 to vector<8x128xf32>
    %55 = arith.addf %54, %53 : vector<8x128xf32>
    %56 = arith.divf %54, %55 : vector<8x128xf32>
    %57 = vector.extract_strided_slice %25 {offsets = [0, 128], sizes = [8, 128], strides = [1, 1]} : vector<8x512xf32> to vector<8x128xf32>
    %58 = arith.negf %57 : vector<8x128xf32>
    %59 = math.exp %58 : vector<8x128xf32>
    %cst_24 = arith.constant 1.000000e+00 : f32
    %60 = vector.broadcast %cst_24 : f32 to vector<8x128xf32>
    %61 = arith.addf %60, %59 : vector<8x128xf32>
    %62 = arith.divf %60, %61 : vector<8x128xf32>
    %63 = vector.extract_strided_slice %25 {offsets = [0, 256], sizes = [8, 128], strides = [1, 1]} : vector<8x512xf32> to vector<8x128xf32>
    %64 = math.tanh %63 : vector<8x128xf32>
    %65 = vector.extract_strided_slice %25 {offsets = [0, 384], sizes = [8, 128], strides = [1, 1]} : vector<8x512xf32> to vector<8x128xf32>
    %66 = arith.negf %65 : vector<8x128xf32>
    %67 = math.exp %66 : vector<8x128xf32>
    %cst_25 = arith.constant 1.000000e+00 : f32
    %68 = vector.broadcast %cst_25 : f32 to vector<8x128xf32>
    %69 = arith.addf %68, %67 : vector<8x128xf32>
    %70 = arith.divf %68, %69 : vector<8x128xf32>
    %71 = arith.mulf %62, %12 : vector<8x128xf32>
    %72 = arith.mulf %56, %64 : vector<8x128xf32>
    %73 = arith.addf %71, %72 : vector<8x128xf32>
    %74 = math.tanh %73 : vector<8x128xf32>
    %75 = arith.mulf %70, %74 : vector<8x128xf32>
    %76 = arith.index_cast %c0_i32 : i32 to index
    %c0_26 = arith.constant 0 : index
    %c0_27 = arith.constant 0 : index
    %77 = vector.load %arg10[%76, %c0_26, %c0_27] : memref<8x8x256xf32, #tpu.memory_space<vmem>>, vector<1x8x128xf32>
    %78 = vector.shape_cast %77 : vector<1x8x128xf32> to vector<8x128xf32>
    %79 = vector.shape_cast %50 : vector<8x128xf32> to vector<1x8x128xf32>
    tpu.vector_store %arg10[%76, %c0_26, %c0_27], %79 {strides = array<i32>} : memref<8x8x256xf32, #tpu.memory_space<vmem>>, vector<1x8x128xf32>,
    %80 = arith.index_cast %13 : i32 to index
    %c0_28 = arith.constant 0 : index
    %c128 = arith.constant 128 : index
    %81 = vector.load %arg10[%80, %c0_28, %c128] : memref<8x8x256xf32, #tpu.memory_space<vmem>>, vector<1x8x128xf32>
    %82 = vector.shape_cast %81 : vector<1x8x128xf32> to vector<8x128xf32>
    %83 = vector.shape_cast %75 : vector<8x128xf32> to vector<1x8x128xf32>
    tpu.vector_store %arg10[%80, %c0_28, %c128], %83 {strides = array<i32>} : memref<8x8x256xf32, #tpu.memory_space<vmem>>, vector<1x8x128xf32>,
    %c1_i32 = arith.constant 1 : i32
    %c7_i32_29 = arith.constant 7 : i32
    %84 = arith.subi %c7_i32_29, %c1_i32 : i32
    %85 = arith.index_cast %c1_i32 : i32 to index
    %c0_30 = arith.constant 0 : index
    %c0_31 = arith.constant 0 : index
    %86 = vector.load %arg9[%85, %c0_30, %c0_31] : memref<8x8x1024xf32, #tpu.memory_space<vmem>>, vector<1x8x512xf32>
    %87 = vector.shape_cast %86 : vector<1x8x512xf32> to vector<8x512xf32>
    %88 = arith.truncf %50 : vector<8x128xf32> to vector<8x128xbf16>
    %cst_32 = arith.constant dense<0.000000e+00> : vector<8x512xf32>
    %89 = tpu.matmul %88, %9, %cst_32 {dimension_numbers = #tpu.dot_dimension_numbers<[1], [0], [0], [1], [0, 0, 1, 1], [], []>} : vector<8x128xbf16>, vector<128x512xbf16>, vector<8x512xf32> -> vector<8x512xf32>
    %90 = arith.addf %87, %89 : vector<8x512xf32>
    %91 = arith.index_cast %84 : i32 to index
    %c0_33 = arith.constant 0 : index
    %c512_34 = arith.constant 512 : index
    %92 = vector.load %arg9[%91, %c0_33, %c512_34] : memref<8x8x1024xf32, #tpu.memory_space<vmem>>, vector<1x8x512xf32>
    %93 = vector.shape_cast %92 : vector<1x8x512xf32> to vector<8x512xf32>
    %94 = arith.truncf %75 : vector<8x128xf32> to vector<8x128xbf16>
    %cst_35 = arith.constant dense<0.000000e+00> : vector<8x512xf32>
    %95 = tpu.matmul %94, %10, %cst_35 {dimension_numbers = #tpu.dot_dimension_numbers<[1], [0], [0], [1], [0, 0, 1, 1], [], []>} : vector<8x128xbf16>, vector<128x512xbf16>, vector<8x512xf32> -> vector<8x512xf32>
    %96 = arith.addf %93, %95 : vector<8x512xf32>
    %97 = vector.extract_strided_slice %90 {offsets = [0, 0], sizes = [8, 128], strides = [1, 1]} : vector<8x512xf32> to vector<8x128xf32>
    %98 = arith.negf %97 : vector<8x128xf32>
    %99 = math.exp %98 : vector<8x128xf32>
    %cst_36 = arith.constant 1.000000e+00 : f32
    %100 = vector.broadcast %cst_36 : f32 to vector<8x128xf32>
    %101 = arith.addf %100, %99 : vector<8x128xf32>
    %102 = arith.divf %100, %101 : vector<8x128xf32>
    %103 = vector.extract_strided_slice %90 {offsets = [0, 128], sizes = [8, 128], strides = [1, 1]} : vector<8x512xf32> to vector<8x128xf32>
    %104 = arith.negf %103 : vector<8x128xf32>
    %105 = math.exp %104 : vector<8x128xf32>
    %cst_37 = arith.constant 1.000000e+00 : f32
    %106 = vector.broadcast %cst_37 : f32 to vector<8x128xf32>
    %107 = arith.addf %106, %105 : vector<8x128xf32>
    %108 = arith.divf %106, %107 : vector<8x128xf32>
    %109 = vector.extract_strided_slice %90 {offsets = [0, 256], sizes = [8, 128], strides = [1, 1]} : vector<8x512xf32> to vector<8x128xf32>
    %110 = math.tanh %109 : vector<8x128xf32>
    %111 = vector.extract_strided_slice %90 {offsets = [0, 384], sizes = [8, 128], strides = [1, 1]} : vector<8x512xf32> to vector<8x128xf32>
    %112 = arith.negf %111 : vector<8x128xf32>
    %113 = math.exp %112 : vector<8x128xf32>
    %cst_38 = arith.constant 1.000000e+00 : f32
    %114 = vector.broadcast %cst_38 : f32 to vector<8x128xf32>
    %115 = arith.addf %114, %113 : vector<8x128xf32>
    %116 = arith.divf %114, %115 : vector<8x128xf32>
    %117 = arith.mulf %108, %48 : vector<8x128xf32>
    %118 = arith.mulf %102, %110 : vector<8x128xf32>
    %119 = arith.addf %117, %118 : vector<8x128xf32>
    %120 = math.tanh %119 : vector<8x128xf32>
    %121 = arith.mulf %116, %120 : vector<8x128xf32>
    %122 = vector.extract_strided_slice %96 {offsets = [0, 0], sizes = [8, 128], strides = [1, 1]} : vector<8x512xf32> to vector<8x128xf32>
    %123 = arith.negf %122 : vector<8x128xf32>
    %124 = math.exp %123 : vector<8x128xf32>
    %cst_39 = arith.constant 1.000000e+00 : f32
    %125 = vector.broadcast %cst_39 : f32 to vector<8x128xf32>
    %126 = arith.addf %125, %124 : vector<8x128xf32>
    %127 = arith.divf %125, %126 : vector<8x128xf32>
    %128 = vector.extract_strided_slice %96 {offsets = [0, 128], sizes = [8, 128], strides = [1, 1]} : vector<8x512xf32> to vector<8x128xf32>
    %129 = arith.negf %128 : vector<8x128xf32>
    %130 = math.exp %129 : vector<8x128xf32>
    %cst_40 = arith.constant 1.000000e+00 : f32
    %131 = vector.broadcast %cst_40 : f32 to vector<8x128xf32>
    %132 = arith.addf %131, %130 : vector<8x128xf32>
    %133 = arith.divf %131, %132 : vector<8x128xf32>
    %134 = vector.extract_strided_slice %96 {offsets = [0, 256], sizes = [8, 128], strides = [1, 1]} : vector<8x512xf32> to vector<8x128xf32>
    %135 = math.tanh %134 : vector<8x128xf32>
    %136 = vector.extract_strided_slice %96 {offsets = [0, 384], sizes = [8, 128], strides = [1, 1]} : vector<8x512xf32> to vector<8x128xf32>
    %137 = arith.negf %136 : vector<8x128xf32>
    %138 = math.exp %137 : vector<8x128xf32>
    %cst_41 = arith.constant 1.000000e+00 : f32
    %139 = vector.broadcast %cst_41 : f32 to vector<8x128xf32>
    %140 = arith.addf %139, %138 : vector<8x128xf32>
    %141 = arith.divf %139, %140 : vector<8x128xf32>
    %142 = arith.mulf %133, %73 : vector<8x128xf32>
    %143 = arith.mulf %127, %135 : vector<8x128xf32>
    %144 = arith.addf %142, %143 : vector<8x128xf32>
    %145 = math.tanh %144 : vector<8x128xf32>
    %146 = arith.mulf %141, %145 : vector<8x128xf32>
    %147 = arith.index_cast %c1_i32 : i32 to index
    %c0_42 = arith.constant 0 : index
    %c0_43 = arith.constant 0 : index
    %148 = vector.load %arg10[%147, %c0_42, %c0_43] : memref<8x8x256xf32, #tpu.memory_space<vmem>>, vector<1x8x128xf32>
    %149 = vector.shape_cast %148 : vector<1x8x128xf32> to vector<8x128xf32>
    %150 = vector.shape_cast %121 : vector<8x128xf32> to vector<1x8x128xf32>
    tpu.vector_store %arg10[%147, %c0_42, %c0_43], %150 {strides = array<i32>} : memref<8x8x256xf32, #tpu.memory_space<vmem>>, vector<1x8x128xf32>,
    %151 = arith.index_cast %84 : i32 to index
    %c0_44 = arith.constant 0 : index
    %c128_45 = arith.constant 128 : index
    %152 = vector.load %arg10[%151, %c0_44, %c128_45] : memref<8x8x256xf32, #tpu.memory_space<vmem>>, vector<1x8x128xf32>
    %153 = vector.shape_cast %152 : vector<1x8x128xf32> to vector<8x128xf32>
    %154 = vector.shape_cast %146 : vector<8x128xf32> to vector<1x8x128xf32>
    tpu.vector_store %arg10[%151, %c0_44, %c128_45], %154 {strides = array<i32>} : memref<8x8x256xf32, #tpu.memory_space<vmem>>, vector<1x8x128xf32>,
    %c2_i32 = arith.constant 2 : i32
    %c7_i32_46 = arith.constant 7 : i32
    %155 = arith.subi %c7_i32_46, %c2_i32 : i32
    %156 = arith.index_cast %c2_i32 : i32 to index
    %c0_47 = arith.constant 0 : index
    %c0_48 = arith.constant 0 : index
    %157 = vector.load %arg9[%156, %c0_47, %c0_48] : memref<8x8x1024xf32, #tpu.memory_space<vmem>>, vector<1x8x512xf32>
    %158 = vector.shape_cast %157 : vector<1x8x512xf32> to vector<8x512xf32>
    %159 = arith.truncf %121 : vector<8x128xf32> to vector<8x128xbf16>
    %cst_49 = arith.constant dense<0.000000e+00> : vector<8x512xf32>
    %160 = tpu.matmul %159, %9, %cst_49 {dimension_numbers = #tpu.dot_dimension_numbers<[1], [0], [0], [1], [0, 0, 1, 1], [], []>} : vector<8x128xbf16>, vector<128x512xbf16>, vector<8x512xf32> -> vector<8x512xf32>
    %161 = arith.addf %158, %160 : vector<8x512xf32>
    %162 = arith.index_cast %155 : i32 to index
    %c0_50 = arith.constant 0 : index
    %c512_51 = arith.constant 512 : index
    %163 = vector.load %arg9[%162, %c0_50, %c512_51] : memref<8x8x1024xf32, #tpu.memory_space<vmem>>, vector<1x8x512xf32>
    %164 = vector.shape_cast %163 : vector<1x8x512xf32> to vector<8x512xf32>
    %165 = arith.truncf %146 : vector<8x128xf32> to vector<8x128xbf16>
    %cst_52 = arith.constant dense<0.000000e+00> : vector<8x512xf32>
    %166 = tpu.matmul %165, %10, %cst_52 {dimension_numbers = #tpu.dot_dimension_numbers<[1], [0], [0], [1], [0, 0, 1, 1], [], []>} : vector<8x128xbf16>, vector<128x512xbf16>, vector<8x512xf32> -> vector<8x512xf32>
    %167 = arith.addf %164, %166 : vector<8x512xf32>
    %168 = vector.extract_strided_slice %161 {offsets = [0, 0], sizes = [8, 128], strides = [1, 1]} : vector<8x512xf32> to vector<8x128xf32>
    %169 = arith.negf %168 : vector<8x128xf32>
    %170 = math.exp %169 : vector<8x128xf32>
    %cst_53 = arith.constant 1.000000e+00 : f32
    %171 = vector.broadcast %cst_53 : f32 to vector<8x128xf32>
    %172 = arith.addf %171, %170 : vector<8x128xf32>
    %173 = arith.divf %171, %172 : vector<8x128xf32>
    %174 = vector.extract_strided_slice %161 {offsets = [0, 128], sizes = [8, 128], strides = [1, 1]} : vector<8x512xf32> to vector<8x128xf32>
    %175 = arith.negf %174 : vector<8x128xf32>
    %176 = math.exp %175 : vector<8x128xf32>
    %cst_54 = arith.constant 1.000000e+00 : f32
    %177 = vector.broadcast %cst_54 : f32 to vector<8x128xf32>
    %178 = arith.addf %177, %176 : vector<8x128xf32>
    %179 = arith.divf %177, %178 : vector<8x128xf32>
    %180 = vector.extract_strided_slice %161 {offsets = [0, 256], sizes = [8, 128], strides = [1, 1]} : vector<8x512xf32> to vector<8x128xf32>
    %181 = math.tanh %180 : vector<8x128xf32>
    %182 = vector.extract_strided_slice %161 {offsets = [0, 384], sizes = [8, 128], strides = [1, 1]} : vector<8x512xf32> to vector<8x128xf32>
    %183 = arith.negf %182 : vector<8x128xf32>
    %184 = math.exp %183 : vector<8x128xf32>
    %cst_55 = arith.constant 1.000000e+00 : f32
    %185 = vector.broadcast %cst_55 : f32 to vector<8x128xf32>
    %186 = arith.addf %185, %184 : vector<8x128xf32>
    %187 = arith.divf %185, %186 : vector<8x128xf32>
    %188 = arith.mulf %179, %119 : vector<8x128xf32>
    %189 = arith.mulf %173, %181 : vector<8x128xf32>
    %190 = arith.addf %188, %189 : vector<8x128xf32>
    %191 = math.tanh %190 : vector<8x128xf32>
    %192 = arith.mulf %187, %191 : vector<8x128xf32>
    %193 = vector.extract_strided_slice %167 {offsets = [0, 0], sizes = [8, 128], strides = [1, 1]} : vector<8x512xf32> to vector<8x128xf32>
    %194 = arith.negf %193 : vector<8x128xf32>
    %195 = math.exp %194 : vector<8x128xf32>
    %cst_56 = arith.constant 1.000000e+00 : f32
    %196 = vector.broadcast %cst_56 : f32 to vector<8x128xf32>
    %197 = arith.addf %196, %195 : vector<8x128xf32>
    %198 = arith.divf %196, %197 : vector<8x128xf32>
    %199 = vector.extract_strided_slice %167 {offsets = [0, 128], sizes = [8, 128], strides = [1, 1]} : vector<8x512xf32> to vector<8x128xf32>
    %200 = arith.negf %199 : vector<8x128xf32>
    %201 = math.exp %200 : vector<8x128xf32>
    %cst_57 = arith.constant 1.000000e+00 : f32
    %202 = vector.broadcast %cst_57 : f32 to vector<8x128xf32>
    %203 = arith.addf %202, %201 : vector<8x128xf32>
    %204 = arith.divf %202, %203 : vector<8x128xf32>
    %205 = vector.extract_strided_slice %167 {offsets = [0, 256], sizes = [8, 128], strides = [1, 1]} : vector<8x512xf32> to vector<8x128xf32>
    %206 = math.tanh %205 : vector<8x128xf32>
    %207 = vector.extract_strided_slice %167 {offsets = [0, 384], sizes = [8, 128], strides = [1, 1]} : vector<8x512xf32> to vector<8x128xf32>
    %208 = arith.negf %207 : vector<8x128xf32>
    %209 = math.exp %208 : vector<8x128xf32>
    %cst_58 = arith.constant 1.000000e+00 : f32
    %210 = vector.broadcast %cst_58 : f32 to vector<8x128xf32>
    %211 = arith.addf %210, %209 : vector<8x128xf32>
    %212 = arith.divf %210, %211 : vector<8x128xf32>
    %213 = arith.mulf %204, %144 : vector<8x128xf32>
    %214 = arith.mulf %198, %206 : vector<8x128xf32>
    %215 = arith.addf %213, %214 : vector<8x128xf32>
    %216 = math.tanh %215 : vector<8x128xf32>
    %217 = arith.mulf %212, %216 : vector<8x128xf32>
    %218 = arith.index_cast %c2_i32 : i32 to index
    %c0_59 = arith.constant 0 : index
    %c0_60 = arith.constant 0 : index
    %219 = vector.load %arg10[%218, %c0_59, %c0_60] : memref<8x8x256xf32, #tpu.memory_space<vmem>>, vector<1x8x128xf32>
    %220 = vector.shape_cast %219 : vector<1x8x128xf32> to vector<8x128xf32>
    %221 = vector.shape_cast %192 : vector<8x128xf32> to vector<1x8x128xf32>
    tpu.vector_store %arg10[%218, %c0_59, %c0_60], %221 {strides = array<i32>} : memref<8x8x256xf32, #tpu.memory_space<vmem>>, vector<1x8x128xf32>,
    %222 = arith.index_cast %155 : i32 to index
    %c0_61 = arith.constant 0 : index
    %c128_62 = arith.constant 128 : index
    %223 = vector.load %arg10[%222, %c0_61, %c128_62] : memref<8x8x256xf32, #tpu.memory_space<vmem>>, vector<1x8x128xf32>
    %224 = vector.shape_cast %223 : vector<1x8x128xf32> to vector<8x128xf32>
    %225 = vector.shape_cast %217 : vector<8x128xf32> to vector<1x8x128xf32>
    tpu.vector_store %arg10[%222, %c0_61, %c128_62], %225 {strides = array<i32>} : memref<8x8x256xf32, #tpu.memory_space<vmem>>, vector<1x8x128xf32>,
    %c3_i32 = arith.constant 3 : i32
    %c7_i32_63 = arith.constant 7 : i32
    %226 = arith.subi %c7_i32_63, %c3_i32 : i32
    %227 = arith.index_cast %c3_i32 : i32 to index
    %c0_64 = arith.constant 0 : index
    %c0_65 = arith.constant 0 : index
    %228 = vector.load %arg9[%227, %c0_64, %c0_65] : memref<8x8x1024xf32, #tpu.memory_space<vmem>>, vector<1x8x512xf32>
    %229 = vector.shape_cast %228 : vector<1x8x512xf32> to vector<8x512xf32>
    %230 = arith.truncf %192 : vector<8x128xf32> to vector<8x128xbf16>
    %cst_66 = arith.constant dense<0.000000e+00> : vector<8x512xf32>
    %231 = tpu.matmul %230, %9, %cst_66 {dimension_numbers = #tpu.dot_dimension_numbers<[1], [0], [0], [1], [0, 0, 1, 1], [], []>} : vector<8x128xbf16>, vector<128x512xbf16>, vector<8x512xf32> -> vector<8x512xf32>
    %232 = arith.addf %229, %231 : vector<8x512xf32>
    %233 = arith.index_cast %226 : i32 to index
    %c0_67 = arith.constant 0 : index
    %c512_68 = arith.constant 512 : index
    %234 = vector.load %arg9[%233, %c0_67, %c512_68] : memref<8x8x1024xf32, #tpu.memory_space<vmem>>, vector<1x8x512xf32>
    %235 = vector.shape_cast %234 : vector<1x8x512xf32> to vector<8x512xf32>
    %236 = arith.truncf %217 : vector<8x128xf32> to vector<8x128xbf16>
    %cst_69 = arith.constant dense<0.000000e+00> : vector<8x512xf32>
    %237 = tpu.matmul %236, %10, %cst_69 {dimension_numbers = #tpu.dot_dimension_numbers<[1], [0], [0], [1], [0, 0, 1, 1], [], []>} : vector<8x128xbf16>, vector<128x512xbf16>, vector<8x512xf32> -> vector<8x512xf32>
    %238 = arith.addf %235, %237 : vector<8x512xf32>
    %239 = vector.extract_strided_slice %232 {offsets = [0, 0], sizes = [8, 128], strides = [1, 1]} : vector<8x512xf32> to vector<8x128xf32>
    %240 = arith.negf %239 : vector<8x128xf32>
    %241 = math.exp %240 : vector<8x128xf32>
    %cst_70 = arith.constant 1.000000e+00 : f32
    %242 = vector.broadcast %cst_70 : f32 to vector<8x128xf32>
    %243 = arith.addf %242, %241 : vector<8x128xf32>
    %244 = arith.divf %242, %243 : vector<8x128xf32>
    %245 = vector.extract_strided_slice %232 {offsets = [0, 128], sizes = [8, 128], strides = [1, 1]} : vector<8x512xf32> to vector<8x128xf32>
    %246 = arith.negf %245 : vector<8x128xf32>
    %247 = math.exp %246 : vector<8x128xf32>
    %cst_71 = arith.constant 1.000000e+00 : f32
    %248 = vector.broadcast %cst_71 : f32 to vector<8x128xf32>
    %249 = arith.addf %248, %247 : vector<8x128xf32>
    %250 = arith.divf %248, %249 : vector<8x128xf32>
    %251 = vector.extract_strided_slice %232 {offsets = [0, 256], sizes = [8, 128], strides = [1, 1]} : vector<8x512xf32> to vector<8x128xf32>
    %252 = math.tanh %251 : vector<8x128xf32>
    %253 = vector.extract_strided_slice %232 {offsets = [0, 384], sizes = [8, 128], strides = [1, 1]} : vector<8x512xf32> to vector<8x128xf32>
    %254 = arith.negf %253 : vector<8x128xf32>
    %255 = math.exp %254 : vector<8x128xf32>
    %cst_72 = arith.constant 1.000000e+00 : f32
    %256 = vector.broadcast %cst_72 : f32 to vector<8x128xf32>
    %257 = arith.addf %256, %255 : vector<8x128xf32>
    %258 = arith.divf %256, %257 : vector<8x128xf32>
    %259 = arith.mulf %250, %190 : vector<8x128xf32>
    %260 = arith.mulf %244, %252 : vector<8x128xf32>
    %261 = arith.addf %259, %260 : vector<8x128xf32>
    %262 = math.tanh %261 : vector<8x128xf32>
    %263 = arith.mulf %258, %262 : vector<8x128xf32>
    %264 = vector.extract_strided_slice %238 {offsets = [0, 0], sizes = [8, 128], strides = [1, 1]} : vector<8x512xf32> to vector<8x128xf32>
    %265 = arith.negf %264 : vector<8x128xf32>
    %266 = math.exp %265 : vector<8x128xf32>
    %cst_73 = arith.constant 1.000000e+00 : f32
    %267 = vector.broadcast %cst_73 : f32 to vector<8x128xf32>
    %268 = arith.addf %267, %266 : vector<8x128xf32>
    %269 = arith.divf %267, %268 : vector<8x128xf32>
    %270 = vector.extract_strided_slice %238 {offsets = [0, 128], sizes = [8, 128], strides = [1, 1]} : vector<8x512xf32> to vector<8x128xf32>
    %271 = arith.negf %270 : vector<8x128xf32>
    %272 = math.exp %271 : vector<8x128xf32>
    %cst_74 = arith.constant 1.000000e+00 : f32
    %273 = vector.broadcast %cst_74 : f32 to vector<8x128xf32>
    %274 = arith.addf %273, %272 : vector<8x128xf32>
    %275 = arith.divf %273, %274 : vector<8x128xf32>
    %276 = vector.extract_strided_slice %238 {offsets = [0, 256], sizes = [8, 128], strides = [1, 1]} : vector<8x512xf32> to vector<8x128xf32>
    %277 = math.tanh %276 : vector<8x128xf32>
    %278 = vector.extract_strided_slice %238 {offsets = [0, 384], sizes = [8, 128], strides = [1, 1]} : vector<8x512xf32> to vector<8x128xf32>
    %279 = arith.negf %278 : vector<8x128xf32>
    %280 = math.exp %279 : vector<8x128xf32>
    %cst_75 = arith.constant 1.000000e+00 : f32
    %281 = vector.broadcast %cst_75 : f32 to vector<8x128xf32>
    %282 = arith.addf %281, %280 : vector<8x128xf32>
    %283 = arith.divf %281, %282 : vector<8x128xf32>
    %284 = arith.mulf %275, %215 : vector<8x128xf32>
    %285 = arith.mulf %269, %277 : vector<8x128xf32>
    %286 = arith.addf %284, %285 : vector<8x128xf32>
    %287 = math.tanh %286 : vector<8x128xf32>
    %288 = arith.mulf %283, %287 : vector<8x128xf32>
    %289 = arith.index_cast %c3_i32 : i32 to index
    %c0_76 = arith.constant 0 : index
    %c0_77 = arith.constant 0 : index
    %290 = vector.load %arg10[%289, %c0_76, %c0_77] : memref<8x8x256xf32, #tpu.memory_space<vmem>>, vector<1x8x128xf32>
    %291 = vector.shape_cast %290 : vector<1x8x128xf32> to vector<8x128xf32>
    %292 = vector.shape_cast %263 : vector<8x128xf32> to vector<1x8x128xf32>
    tpu.vector_store %arg10[%289, %c0_76, %c0_77], %292 {strides = array<i32>} : memref<8x8x256xf32, #tpu.memory_space<vmem>>, vector<1x8x128xf32>,
    %293 = arith.index_cast %226 : i32 to index
    %c0_78 = arith.constant 0 : index
    %c128_79 = arith.constant 128 : index
    %294 = vector.load %arg10[%293, %c0_78, %c128_79] : memref<8x8x256xf32, #tpu.memory_space<vmem>>, vector<1x8x128xf32>
    %295 = vector.shape_cast %294 : vector<1x8x128xf32> to vector<8x128xf32>
    %296 = vector.shape_cast %288 : vector<8x128xf32> to vector<1x8x128xf32>
    tpu.vector_store %arg10[%293, %c0_78, %c128_79], %296 {strides = array<i32>} : memref<8x8x256xf32, #tpu.memory_space<vmem>>, vector<1x8x128xf32>,
    %c4_i32 = arith.constant 4 : i32
    %c7_i32_80 = arith.constant 7 : i32
    %297 = arith.subi %c7_i32_80, %c4_i32 : i32
    %298 = arith.index_cast %c4_i32 : i32 to index
    %c0_81 = arith.constant 0 : index
    %c0_82 = arith.constant 0 : index
    %299 = vector.load %arg9[%298, %c0_81, %c0_82] : memref<8x8x1024xf32, #tpu.memory_space<vmem>>, vector<1x8x512xf32>
    %300 = vector.shape_cast %299 : vector<1x8x512xf32> to vector<8x512xf32>
    %301 = arith.truncf %263 : vector<8x128xf32> to vector<8x128xbf16>
    %cst_83 = arith.constant dense<0.000000e+00> : vector<8x512xf32>
    %302 = tpu.matmul %301, %9, %cst_83 {dimension_numbers = #tpu.dot_dimension_numbers<[1], [0], [0], [1], [0, 0, 1, 1], [], []>} : vector<8x128xbf16>, vector<128x512xbf16>, vector<8x512xf32> -> vector<8x512xf32>
    %303 = arith.addf %300, %302 : vector<8x512xf32>
    %304 = arith.index_cast %297 : i32 to index
    %c0_84 = arith.constant 0 : index
    %c512_85 = arith.constant 512 : index
    %305 = vector.load %arg9[%304, %c0_84, %c512_85] : memref<8x8x1024xf32, #tpu.memory_space<vmem>>, vector<1x8x512xf32>
    %306 = vector.shape_cast %305 : vector<1x8x512xf32> to vector<8x512xf32>
    %307 = arith.truncf %288 : vector<8x128xf32> to vector<8x128xbf16>
    %cst_86 = arith.constant dense<0.000000e+00> : vector<8x512xf32>
    %308 = tpu.matmul %307, %10, %cst_86 {dimension_numbers = #tpu.dot_dimension_numbers<[1], [0], [0], [1], [0, 0, 1, 1], [], []>} : vector<8x128xbf16>, vector<128x512xbf16>, vector<8x512xf32> -> vector<8x512xf32>
    %309 = arith.addf %306, %308 : vector<8x512xf32>
    %310 = vector.extract_strided_slice %303 {offsets = [0, 0], sizes = [8, 128], strides = [1, 1]} : vector<8x512xf32> to vector<8x128xf32>
    %311 = arith.negf %310 : vector<8x128xf32>
    %312 = math.exp %311 : vector<8x128xf32>
    %cst_87 = arith.constant 1.000000e+00 : f32
    %313 = vector.broadcast %cst_87 : f32 to vector<8x128xf32>
    %314 = arith.addf %313, %312 : vector<8x128xf32>
    %315 = arith.divf %313, %314 : vector<8x128xf32>
    %316 = vector.extract_strided_slice %303 {offsets = [0, 128], sizes = [8, 128], strides = [1, 1]} : vector<8x512xf32> to vector<8x128xf32>
    %317 = arith.negf %316 : vector<8x128xf32>
    %318 = math.exp %317 : vector<8x128xf32>
    %cst_88 = arith.constant 1.000000e+00 : f32
    %319 = vector.broadcast %cst_88 : f32 to vector<8x128xf32>
    %320 = arith.addf %319, %318 : vector<8x128xf32>
    %321 = arith.divf %319, %320 : vector<8x128xf32>
    %322 = vector.extract_strided_slice %303 {offsets = [0, 256], sizes = [8, 128], strides = [1, 1]} : vector<8x512xf32> to vector<8x128xf32>
    %323 = math.tanh %322 : vector<8x128xf32>
    %324 = vector.extract_strided_slice %303 {offsets = [0, 384], sizes = [8, 128], strides = [1, 1]} : vector<8x512xf32> to vector<8x128xf32>
    %325 = arith.negf %324 : vector<8x128xf32>
    %326 = math.exp %325 : vector<8x128xf32>
    %cst_89 = arith.constant 1.000000e+00 : f32
    %327 = vector.broadcast %cst_89 : f32 to vector<8x128xf32>
    %328 = arith.addf %327, %326 : vector<8x128xf32>
    %329 = arith.divf %327, %328 : vector<8x128xf32>
    %330 = arith.mulf %321, %261 : vector<8x128xf32>
    %331 = arith.mulf %315, %323 : vector<8x128xf32>
    %332 = arith.addf %330, %331 : vector<8x128xf32>
    %333 = math.tanh %332 : vector<8x128xf32>
    %334 = arith.mulf %329, %333 : vector<8x128xf32>
    %335 = vector.extract_strided_slice %309 {offsets = [0, 0], sizes = [8, 128], strides = [1, 1]} : vector<8x512xf32> to vector<8x128xf32>
    %336 = arith.negf %335 : vector<8x128xf32>
    %337 = math.exp %336 : vector<8x128xf32>
    %cst_90 = arith.constant 1.000000e+00 : f32
    %338 = vector.broadcast %cst_90 : f32 to vector<8x128xf32>
    %339 = arith.addf %338, %337 : vector<8x128xf32>
    %340 = arith.divf %338, %339 : vector<8x128xf32>
    %341 = vector.extract_strided_slice %309 {offsets = [0, 128], sizes = [8, 128], strides = [1, 1]} : vector<8x512xf32> to vector<8x128xf32>
    %342 = arith.negf %341 : vector<8x128xf32>
    %343 = math.exp %342 : vector<8x128xf32>
    %cst_91 = arith.constant 1.000000e+00 : f32
    %344 = vector.broadcast %cst_91 : f32 to vector<8x128xf32>
    %345 = arith.addf %344, %343 : vector<8x128xf32>
    %346 = arith.divf %344, %345 : vector<8x128xf32>
    %347 = vector.extract_strided_slice %309 {offsets = [0, 256], sizes = [8, 128], strides = [1, 1]} : vector<8x512xf32> to vector<8x128xf32>
    %348 = math.tanh %347 : vector<8x128xf32>
    %349 = vector.extract_strided_slice %309 {offsets = [0, 384], sizes = [8, 128], strides = [1, 1]} : vector<8x512xf32> to vector<8x128xf32>
    %350 = arith.negf %349 : vector<8x128xf32>
    %351 = math.exp %350 : vector<8x128xf32>
    %cst_92 = arith.constant 1.000000e+00 : f32
    %352 = vector.broadcast %cst_92 : f32 to vector<8x128xf32>
    %353 = arith.addf %352, %351 : vector<8x128xf32>
    %354 = arith.divf %352, %353 : vector<8x128xf32>
    %355 = arith.mulf %346, %286 : vector<8x128xf32>
    %356 = arith.mulf %340, %348 : vector<8x128xf32>
    %357 = arith.addf %355, %356 : vector<8x128xf32>
    %358 = math.tanh %357 : vector<8x128xf32>
    %359 = arith.mulf %354, %358 : vector<8x128xf32>
    %360 = arith.index_cast %c4_i32 : i32 to index
    %c0_93 = arith.constant 0 : index
    %c0_94 = arith.constant 0 : index
    %361 = vector.load %arg10[%360, %c0_93, %c0_94] : memref<8x8x256xf32, #tpu.memory_space<vmem>>, vector<1x8x128xf32>
    %362 = vector.shape_cast %361 : vector<1x8x128xf32> to vector<8x128xf32>
    %363 = vector.shape_cast %334 : vector<8x128xf32> to vector<1x8x128xf32>
    tpu.vector_store %arg10[%360, %c0_93, %c0_94], %363 {strides = array<i32>} : memref<8x8x256xf32, #tpu.memory_space<vmem>>, vector<1x8x128xf32>,
    %364 = arith.index_cast %297 : i32 to index
    %c0_95 = arith.constant 0 : index
    %c128_96 = arith.constant 128 : index
    %365 = vector.load %arg10[%364, %c0_95, %c128_96] : memref<8x8x256xf32, #tpu.memory_space<vmem>>, vector<1x8x128xf32>
    %366 = vector.shape_cast %365 : vector<1x8x128xf32> to vector<8x128xf32>
    %367 = vector.shape_cast %359 : vector<8x128xf32> to vector<1x8x128xf32>
    tpu.vector_store %arg10[%364, %c0_95, %c128_96], %367 {strides = array<i32>} : memref<8x8x256xf32, #tpu.memory_space<vmem>>, vector<1x8x128xf32>,
    %c5_i32 = arith.constant 5 : i32
    %c7_i32_97 = arith.constant 7 : i32
    %368 = arith.subi %c7_i32_97, %c5_i32 : i32
    %369 = arith.index_cast %c5_i32 : i32 to index
    %c0_98 = arith.constant 0 : index
    %c0_99 = arith.constant 0 : index
    %370 = vector.load %arg9[%369, %c0_98, %c0_99] : memref<8x8x1024xf32, #tpu.memory_space<vmem>>, vector<1x8x512xf32>
    %371 = vector.shape_cast %370 : vector<1x8x512xf32> to vector<8x512xf32>
    %372 = arith.truncf %334 : vector<8x128xf32> to vector<8x128xbf16>
    %cst_100 = arith.constant dense<0.000000e+00> : vector<8x512xf32>
    %373 = tpu.matmul %372, %9, %cst_100 {dimension_numbers = #tpu.dot_dimension_numbers<[1], [0], [0], [1], [0, 0, 1, 1], [], []>} : vector<8x128xbf16>, vector<128x512xbf16>, vector<8x512xf32> -> vector<8x512xf32>
    %374 = arith.addf %371, %373 : vector<8x512xf32>
    %375 = arith.index_cast %368 : i32 to index
    %c0_101 = arith.constant 0 : index
    %c512_102 = arith.constant 512 : index
    %376 = vector.load %arg9[%375, %c0_101, %c512_102] : memref<8x8x1024xf32, #tpu.memory_space<vmem>>, vector<1x8x512xf32>
    %377 = vector.shape_cast %376 : vector<1x8x512xf32> to vector<8x512xf32>
    %378 = arith.truncf %359 : vector<8x128xf32> to vector<8x128xbf16>
    %cst_103 = arith.constant dense<0.000000e+00> : vector<8x512xf32>
    %379 = tpu.matmul %378, %10, %cst_103 {dimension_numbers = #tpu.dot_dimension_numbers<[1], [0], [0], [1], [0, 0, 1, 1], [], []>} : vector<8x128xbf16>, vector<128x512xbf16>, vector<8x512xf32> -> vector<8x512xf32>
    %380 = arith.addf %377, %379 : vector<8x512xf32>
    %381 = vector.extract_strided_slice %374 {offsets = [0, 0], sizes = [8, 128], strides = [1, 1]} : vector<8x512xf32> to vector<8x128xf32>
    %382 = arith.negf %381 : vector<8x128xf32>
    %383 = math.exp %382 : vector<8x128xf32>
    %cst_104 = arith.constant 1.000000e+00 : f32
    %384 = vector.broadcast %cst_104 : f32 to vector<8x128xf32>
    %385 = arith.addf %384, %383 : vector<8x128xf32>
    %386 = arith.divf %384, %385 : vector<8x128xf32>
    %387 = vector.extract_strided_slice %374 {offsets = [0, 128], sizes = [8, 128], strides = [1, 1]} : vector<8x512xf32> to vector<8x128xf32>
    %388 = arith.negf %387 : vector<8x128xf32>
    %389 = math.exp %388 : vector<8x128xf32>
    %cst_105 = arith.constant 1.000000e+00 : f32
    %390 = vector.broadcast %cst_105 : f32 to vector<8x128xf32>
    %391 = arith.addf %390, %389 : vector<8x128xf32>
    %392 = arith.divf %390, %391 : vector<8x128xf32>
    %393 = vector.extract_strided_slice %374 {offsets = [0, 256], sizes = [8, 128], strides = [1, 1]} : vector<8x512xf32> to vector<8x128xf32>
    %394 = math.tanh %393 : vector<8x128xf32>
    %395 = vector.extract_strided_slice %374 {offsets = [0, 384], sizes = [8, 128], strides = [1, 1]} : vector<8x512xf32> to vector<8x128xf32>
    %396 = arith.negf %395 : vector<8x128xf32>
    %397 = math.exp %396 : vector<8x128xf32>
    %cst_106 = arith.constant 1.000000e+00 : f32
    %398 = vector.broadcast %cst_106 : f32 to vector<8x128xf32>
    %399 = arith.addf %398, %397 : vector<8x128xf32>
    %400 = arith.divf %398, %399 : vector<8x128xf32>
    %401 = arith.mulf %392, %332 : vector<8x128xf32>
    %402 = arith.mulf %386, %394 : vector<8x128xf32>
    %403 = arith.addf %401, %402 : vector<8x128xf32>
    %404 = math.tanh %403 : vector<8x128xf32>
    %405 = arith.mulf %400, %404 : vector<8x128xf32>
    %406 = vector.extract_strided_slice %380 {offsets = [0, 0], sizes = [8, 128], strides = [1, 1]} : vector<8x512xf32> to vector<8x128xf32>
    %407 = arith.negf %406 : vector<8x128xf32>
    %408 = math.exp %407 : vector<8x128xf32>
    %cst_107 = arith.constant 1.000000e+00 : f32
    %409 = vector.broadcast %cst_107 : f32 to vector<8x128xf32>
    %410 = arith.addf %409, %408 : vector<8x128xf32>
    %411 = arith.divf %409, %410 : vector<8x128xf32>
    %412 = vector.extract_strided_slice %380 {offsets = [0, 128], sizes = [8, 128], strides = [1, 1]} : vector<8x512xf32> to vector<8x128xf32>
    %413 = arith.negf %412 : vector<8x128xf32>
    %414 = math.exp %413 : vector<8x128xf32>
    %cst_108 = arith.constant 1.000000e+00 : f32
    %415 = vector.broadcast %cst_108 : f32 to vector<8x128xf32>
    %416 = arith.addf %415, %414 : vector<8x128xf32>
    %417 = arith.divf %415, %416 : vector<8x128xf32>
    %418 = vector.extract_strided_slice %380 {offsets = [0, 256], sizes = [8, 128], strides = [1, 1]} : vector<8x512xf32> to vector<8x128xf32>
    %419 = math.tanh %418 : vector<8x128xf32>
    %420 = vector.extract_strided_slice %380 {offsets = [0, 384], sizes = [8, 128], strides = [1, 1]} : vector<8x512xf32> to vector<8x128xf32>
    %421 = arith.negf %420 : vector<8x128xf32>
    %422 = math.exp %421 : vector<8x128xf32>
    %cst_109 = arith.constant 1.000000e+00 : f32
    %423 = vector.broadcast %cst_109 : f32 to vector<8x128xf32>
    %424 = arith.addf %423, %422 : vector<8x128xf32>
    %425 = arith.divf %423, %424 : vector<8x128xf32>
    %426 = arith.mulf %417, %357 : vector<8x128xf32>
    %427 = arith.mulf %411, %419 : vector<8x128xf32>
    %428 = arith.addf %426, %427 : vector<8x128xf32>
    %429 = math.tanh %428 : vector<8x128xf32>
    %430 = arith.mulf %425, %429 : vector<8x128xf32>
    %431 = arith.index_cast %c5_i32 : i32 to index
    %c0_110 = arith.constant 0 : index
    %c0_111 = arith.constant 0 : index
    %432 = vector.load %arg10[%431, %c0_110, %c0_111] : memref<8x8x256xf32, #tpu.memory_space<vmem>>, vector<1x8x128xf32>
    %433 = vector.shape_cast %432 : vector<1x8x128xf32> to vector<8x128xf32>
    %434 = vector.shape_cast %405 : vector<8x128xf32> to vector<1x8x128xf32>
    tpu.vector_store %arg10[%431, %c0_110, %c0_111], %434 {strides = array<i32>} : memref<8x8x256xf32, #tpu.memory_space<vmem>>, vector<1x8x128xf32>,
    %435 = arith.index_cast %368 : i32 to index
    %c0_112 = arith.constant 0 : index
    %c128_113 = arith.constant 128 : index
    %436 = vector.load %arg10[%435, %c0_112, %c128_113] : memref<8x8x256xf32, #tpu.memory_space<vmem>>, vector<1x8x128xf32>
    %437 = vector.shape_cast %436 : vector<1x8x128xf32> to vector<8x128xf32>
    %438 = vector.shape_cast %430 : vector<8x128xf32> to vector<1x8x128xf32>
    tpu.vector_store %arg10[%435, %c0_112, %c128_113], %438 {strides = array<i32>} : memref<8x8x256xf32, #tpu.memory_space<vmem>>, vector<1x8x128xf32>,
    %c6_i32 = arith.constant 6 : i32
    %c7_i32_114 = arith.constant 7 : i32
    %439 = arith.subi %c7_i32_114, %c6_i32 : i32
    %440 = arith.index_cast %c6_i32 : i32 to index
    %c0_115 = arith.constant 0 : index
    %c0_116 = arith.constant 0 : index
    %441 = vector.load %arg9[%440, %c0_115, %c0_116] : memref<8x8x1024xf32, #tpu.memory_space<vmem>>, vector<1x8x512xf32>
    %442 = vector.shape_cast %441 : vector<1x8x512xf32> to vector<8x512xf32>
    %443 = arith.truncf %405 : vector<8x128xf32> to vector<8x128xbf16>
    %cst_117 = arith.constant dense<0.000000e+00> : vector<8x512xf32>
    %444 = tpu.matmul %443, %9, %cst_117 {dimension_numbers = #tpu.dot_dimension_numbers<[1], [0], [0], [1], [0, 0, 1, 1], [], []>} : vector<8x128xbf16>, vector<128x512xbf16>, vector<8x512xf32> -> vector<8x512xf32>
    %445 = arith.addf %442, %444 : vector<8x512xf32>
    %446 = arith.index_cast %439 : i32 to index
    %c0_118 = arith.constant 0 : index
    %c512_119 = arith.constant 512 : index
    %447 = vector.load %arg9[%446, %c0_118, %c512_119] : memref<8x8x1024xf32, #tpu.memory_space<vmem>>, vector<1x8x512xf32>
    %448 = vector.shape_cast %447 : vector<1x8x512xf32> to vector<8x512xf32>
    %449 = arith.truncf %430 : vector<8x128xf32> to vector<8x128xbf16>
    %cst_120 = arith.constant dense<0.000000e+00> : vector<8x512xf32>
    %450 = tpu.matmul %449, %10, %cst_120 {dimension_numbers = #tpu.dot_dimension_numbers<[1], [0], [0], [1], [0, 0, 1, 1], [], []>} : vector<8x128xbf16>, vector<128x512xbf16>, vector<8x512xf32> -> vector<8x512xf32>
    %451 = arith.addf %448, %450 : vector<8x512xf32>
    %452 = vector.extract_strided_slice %445 {offsets = [0, 0], sizes = [8, 128], strides = [1, 1]} : vector<8x512xf32> to vector<8x128xf32>
    %453 = arith.negf %452 : vector<8x128xf32>
    %454 = math.exp %453 : vector<8x128xf32>
    %cst_121 = arith.constant 1.000000e+00 : f32
    %455 = vector.broadcast %cst_121 : f32 to vector<8x128xf32>
    %456 = arith.addf %455, %454 : vector<8x128xf32>
    %457 = arith.divf %455, %456 : vector<8x128xf32>
    %458 = vector.extract_strided_slice %445 {offsets = [0, 128], sizes = [8, 128], strides = [1, 1]} : vector<8x512xf32> to vector<8x128xf32>
    %459 = arith.negf %458 : vector<8x128xf32>
    %460 = math.exp %459 : vector<8x128xf32>
    %cst_122 = arith.constant 1.000000e+00 : f32
    %461 = vector.broadcast %cst_122 : f32 to vector<8x128xf32>
    %462 = arith.addf %461, %460 : vector<8x128xf32>
    %463 = arith.divf %461, %462 : vector<8x128xf32>
    %464 = vector.extract_strided_slice %445 {offsets = [0, 256], sizes = [8, 128], strides = [1, 1]} : vector<8x512xf32> to vector<8x128xf32>
    %465 = math.tanh %464 : vector<8x128xf32>
    %466 = vector.extract_strided_slice %445 {offsets = [0, 384], sizes = [8, 128], strides = [1, 1]} : vector<8x512xf32> to vector<8x128xf32>
    %467 = arith.negf %466 : vector<8x128xf32>
    %468 = math.exp %467 : vector<8x128xf32>
    %cst_123 = arith.constant 1.000000e+00 : f32
    %469 = vector.broadcast %cst_123 : f32 to vector<8x128xf32>
    %470 = arith.addf %469, %468 : vector<8x128xf32>
    %471 = arith.divf %469, %470 : vector<8x128xf32>
    %472 = arith.mulf %463, %403 : vector<8x128xf32>
    %473 = arith.mulf %457, %465 : vector<8x128xf32>
    %474 = arith.addf %472, %473 : vector<8x128xf32>
    %475 = math.tanh %474 : vector<8x128xf32>
    %476 = arith.mulf %471, %475 : vector<8x128xf32>
    %477 = vector.extract_strided_slice %451 {offsets = [0, 0], sizes = [8, 128], strides = [1, 1]} : vector<8x512xf32> to vector<8x128xf32>
    %478 = arith.negf %477 : vector<8x128xf32>
    %479 = math.exp %478 : vector<8x128xf32>
    %cst_124 = arith.constant 1.000000e+00 : f32
    %480 = vector.broadcast %cst_124 : f32 to vector<8x128xf32>
    %481 = arith.addf %480, %479 : vector<8x128xf32>
    %482 = arith.divf %480, %481 : vector<8x128xf32>
    %483 = vector.extract_strided_slice %451 {offsets = [0, 128], sizes = [8, 128], strides = [1, 1]} : vector<8x512xf32> to vector<8x128xf32>
    %484 = arith.negf %483 : vector<8x128xf32>
    %485 = math.exp %484 : vector<8x128xf32>
    %cst_125 = arith.constant 1.000000e+00 : f32
    %486 = vector.broadcast %cst_125 : f32 to vector<8x128xf32>
    %487 = arith.addf %486, %485 : vector<8x128xf32>
    %488 = arith.divf %486, %487 : vector<8x128xf32>
    %489 = vector.extract_strided_slice %451 {offsets = [0, 256], sizes = [8, 128], strides = [1, 1]} : vector<8x512xf32> to vector<8x128xf32>
    %490 = math.tanh %489 : vector<8x128xf32>
    %491 = vector.extract_strided_slice %451 {offsets = [0, 384], sizes = [8, 128], strides = [1, 1]} : vector<8x512xf32> to vector<8x128xf32>
    %492 = arith.negf %491 : vector<8x128xf32>
    %493 = math.exp %492 : vector<8x128xf32>
    %cst_126 = arith.constant 1.000000e+00 : f32
    %494 = vector.broadcast %cst_126 : f32 to vector<8x128xf32>
    %495 = arith.addf %494, %493 : vector<8x128xf32>
    %496 = arith.divf %494, %495 : vector<8x128xf32>
    %497 = arith.mulf %488, %428 : vector<8x128xf32>
    %498 = arith.mulf %482, %490 : vector<8x128xf32>
    %499 = arith.addf %497, %498 : vector<8x128xf32>
    %500 = math.tanh %499 : vector<8x128xf32>
    %501 = arith.mulf %496, %500 : vector<8x128xf32>
    %502 = arith.index_cast %c6_i32 : i32 to index
    %c0_127 = arith.constant 0 : index
    %c0_128 = arith.constant 0 : index
    %503 = vector.load %arg10[%502, %c0_127, %c0_128] : memref<8x8x256xf32, #tpu.memory_space<vmem>>, vector<1x8x128xf32>
    %504 = vector.shape_cast %503 : vector<1x8x128xf32> to vector<8x128xf32>
    %505 = vector.shape_cast %476 : vector<8x128xf32> to vector<1x8x128xf32>
    tpu.vector_store %arg10[%502, %c0_127, %c0_128], %505 {strides = array<i32>} : memref<8x8x256xf32, #tpu.memory_space<vmem>>, vector<1x8x128xf32>,
    %506 = arith.index_cast %439 : i32 to index
    %c0_129 = arith.constant 0 : index
    %c128_130 = arith.constant 128 : index
    %507 = vector.load %arg10[%506, %c0_129, %c128_130] : memref<8x8x256xf32, #tpu.memory_space<vmem>>, vector<1x8x128xf32>
    %508 = vector.shape_cast %507 : vector<1x8x128xf32> to vector<8x128xf32>
    %509 = vector.shape_cast %501 : vector<8x128xf32> to vector<1x8x128xf32>
    tpu.vector_store %arg10[%506, %c0_129, %c128_130], %509 {strides = array<i32>} : memref<8x8x256xf32, #tpu.memory_space<vmem>>, vector<1x8x128xf32>,
    %c7_i32_131 = arith.constant 7 : i32
    %c7_i32_132 = arith.constant 7 : i32
    %510 = arith.subi %c7_i32_132, %c7_i32_131 : i32
    %511 = arith.index_cast %c7_i32_131 : i32 to index
    %c0_133 = arith.constant 0 : index
    %c0_134 = arith.constant 0 : index
    %512 = vector.load %arg9[%511, %c0_133, %c0_134] : memref<8x8x1024xf32, #tpu.memory_space<vmem>>, vector<1x8x512xf32>
    %513 = vector.shape_cast %512 : vector<1x8x512xf32> to vector<8x512xf32>
    %514 = arith.truncf %476 : vector<8x128xf32> to vector<8x128xbf16>
    %cst_135 = arith.constant dense<0.000000e+00> : vector<8x512xf32>
    %515 = tpu.matmul %514, %9, %cst_135 {dimension_numbers = #tpu.dot_dimension_numbers<[1], [0], [0], [1], [0, 0, 1, 1], [], []>} : vector<8x128xbf16>, vector<128x512xbf16>, vector<8x512xf32> -> vector<8x512xf32>
    %516 = arith.addf %513, %515 : vector<8x512xf32>
    %517 = arith.index_cast %510 : i32 to index
    %c0_136 = arith.constant 0 : index
    %c512_137 = arith.constant 512 : index
    %518 = vector.load %arg9[%517, %c0_136, %c512_137] : memref<8x8x1024xf32, #tpu.memory_space<vmem>>, vector<1x8x512xf32>
    %519 = vector.shape_cast %518 : vector<1x8x512xf32> to vector<8x512xf32>
    %520 = arith.truncf %501 : vector<8x128xf32> to vector<8x128xbf16>
    %cst_138 = arith.constant dense<0.000000e+00> : vector<8x512xf32>
    %521 = tpu.matmul %520, %10, %cst_138 {dimension_numbers = #tpu.dot_dimension_numbers<[1], [0], [0], [1], [0, 0, 1, 1], [], []>} : vector<8x128xbf16>, vector<128x512xbf16>, vector<8x512xf32> -> vector<8x512xf32>
    %522 = arith.addf %519, %521 : vector<8x512xf32>
    %523 = vector.extract_strided_slice %516 {offsets = [0, 0], sizes = [8, 128], strides = [1, 1]} : vector<8x512xf32> to vector<8x128xf32>
    %524 = arith.negf %523 : vector<8x128xf32>
    %525 = math.exp %524 : vector<8x128xf32>
    %cst_139 = arith.constant 1.000000e+00 : f32
    %526 = vector.broadcast %cst_139 : f32 to vector<8x128xf32>
    %527 = arith.addf %526, %525 : vector<8x128xf32>
    %528 = arith.divf %526, %527 : vector<8x128xf32>
    %529 = vector.extract_strided_slice %516 {offsets = [0, 128], sizes = [8, 128], strides = [1, 1]} : vector<8x512xf32> to vector<8x128xf32>
    %530 = arith.negf %529 : vector<8x128xf32>
    %531 = math.exp %530 : vector<8x128xf32>
    %cst_140 = arith.constant 1.000000e+00 : f32
    %532 = vector.broadcast %cst_140 : f32 to vector<8x128xf32>
    %533 = arith.addf %532, %531 : vector<8x128xf32>
    %534 = arith.divf %532, %533 : vector<8x128xf32>
    %535 = vector.extract_strided_slice %516 {offsets = [0, 256], sizes = [8, 128], strides = [1, 1]} : vector<8x512xf32> to vector<8x128xf32>
    %536 = math.tanh %535 : vector<8x128xf32>
    %537 = vector.extract_strided_slice %516 {offsets = [0, 384], sizes = [8, 128], strides = [1, 1]} : vector<8x512xf32> to vector<8x128xf32>
    %538 = arith.negf %537 : vector<8x128xf32>
    %539 = math.exp %538 : vector<8x128xf32>
    %cst_141 = arith.constant 1.000000e+00 : f32
    %540 = vector.broadcast %cst_141 : f32 to vector<8x128xf32>
    %541 = arith.addf %540, %539 : vector<8x128xf32>
    %542 = arith.divf %540, %541 : vector<8x128xf32>
    %543 = arith.mulf %534, %474 : vector<8x128xf32>
    %544 = arith.mulf %528, %536 : vector<8x128xf32>
    %545 = arith.addf %543, %544 : vector<8x128xf32>
    %546 = math.tanh %545 : vector<8x128xf32>
    %547 = arith.mulf %542, %546 : vector<8x128xf32>
    %548 = vector.extract_strided_slice %522 {offsets = [0, 0], sizes = [8, 128], strides = [1, 1]} : vector<8x512xf32> to vector<8x128xf32>
    %549 = arith.negf %548 : vector<8x128xf32>
    %550 = math.exp %549 : vector<8x128xf32>
    %cst_142 = arith.constant 1.000000e+00 : f32
    %551 = vector.broadcast %cst_142 : f32 to vector<8x128xf32>
    %552 = arith.addf %551, %550 : vector<8x128xf32>
    %553 = arith.divf %551, %552 : vector<8x128xf32>
    %554 = vector.extract_strided_slice %522 {offsets = [0, 128], sizes = [8, 128], strides = [1, 1]} : vector<8x512xf32> to vector<8x128xf32>
    %555 = arith.negf %554 : vector<8x128xf32>
    %556 = math.exp %555 : vector<8x128xf32>
    %cst_143 = arith.constant 1.000000e+00 : f32
    %557 = vector.broadcast %cst_143 : f32 to vector<8x128xf32>
    %558 = arith.addf %557, %556 : vector<8x128xf32>
    %559 = arith.divf %557, %558 : vector<8x128xf32>
    %560 = vector.extract_strided_slice %522 {offsets = [0, 256], sizes = [8, 128], strides = [1, 1]} : vector<8x512xf32> to vector<8x128xf32>
    %561 = math.tanh %560 : vector<8x128xf32>
    %562 = vector.extract_strided_slice %522 {offsets = [0, 384], sizes = [8, 128], strides = [1, 1]} : vector<8x512xf32> to vector<8x128xf32>
    %563 = arith.negf %562 : vector<8x128xf32>
    %564 = math.exp %563 : vector<8x128xf32>
    %cst_144 = arith.constant 1.000000e+00 : f32
    %565 = vector.broadcast %cst_144 : f32 to vector<8x128xf32>
    %566 = arith.addf %565, %564 : vector<8x128xf32>
    %567 = arith.divf %565, %566 : vector<8x128xf32>
    %568 = arith.mulf %559, %499 : vector<8x128xf32>
    %569 = arith.mulf %553, %561 : vector<8x128xf32>
    %570 = arith.addf %568, %569 : vector<8x128xf32>
    %571 = math.tanh %570 : vector<8x128xf32>
    %572 = arith.mulf %567, %571 : vector<8x128xf32>
    %573 = arith.index_cast %c7_i32_131 : i32 to index
    %c0_145 = arith.constant 0 : index
    %c0_146 = arith.constant 0 : index
    %574 = vector.load %arg10[%573, %c0_145, %c0_146] : memref<8x8x256xf32, #tpu.memory_space<vmem>>, vector<1x8x128xf32>
    %575 = vector.shape_cast %574 : vector<1x8x128xf32> to vector<8x128xf32>
    %576 = vector.shape_cast %547 : vector<8x128xf32> to vector<1x8x128xf32>
    tpu.vector_store %arg10[%573, %c0_145, %c0_146], %576 {strides = array<i32>} : memref<8x8x256xf32, #tpu.memory_space<vmem>>, vector<1x8x128xf32>,
    %577 = arith.index_cast %510 : i32 to index
    %c0_147 = arith.constant 0 : index
    %c128_148 = arith.constant 128 : index
    %578 = vector.load %arg10[%577, %c0_147, %c128_148] : memref<8x8x256xf32, #tpu.memory_space<vmem>>, vector<1x8x128xf32>
    %579 = vector.shape_cast %578 : vector<1x8x128xf32> to vector<8x128xf32>
    %580 = vector.shape_cast %572 : vector<8x128xf32> to vector<1x8x128xf32>
    tpu.vector_store %arg10[%577, %c0_147, %c128_148], %580 {strides = array<i32>} : memref<8x8x256xf32, #tpu.memory_space<vmem>>, vector<1x8x128xf32>,
    %c8_i32 = arith.constant 8 : i32
    %c0_149 = arith.constant 0 : index
    %c0_150 = arith.constant 0 : index
    %c0_151 = arith.constant 0 : index
    %581 = vector.load %arg10[%c0_149, %c0_150, %c0_151] : memref<8x8x256xf32, #tpu.memory_space<vmem>>, vector<8x8x256xf32>
    %582 = vector.shape_cast %581 : vector<8x8x256xf32> to vector<64x256xf32>
    %583 = arith.truncf %582 : vector<64x256xf32> to vector<64x256xbf16>
    %c0_152 = arith.constant 0 : index
    %c0_153 = arith.constant 0 : index
    %584 = vector.load %arg6[%c0_152, %c0_153] : memref<256x128xbf16, #tpu.memory_space<vmem>>, vector<256x128xbf16>
    %cst_154 = arith.constant dense<0.000000e+00> : vector<64x128xf32>
    %585 = tpu.matmul %583, %584, %cst_154 {dimension_numbers = #tpu.dot_dimension_numbers<[1], [0], [0], [1], [0, 0, 1, 1], [], []>} : vector<64x256xbf16>, vector<256x128xbf16>, vector<64x128xf32> -> vector<64x128xf32>
    %c0_155 = arith.constant 0 : index
    %c0_156 = arith.constant 0 : index
    %586 = vector.load %arg7[%c0_155, %c0_156] : memref<1x128xf32, #tpu.memory_space<vmem>>, vector<1x128xf32>
    %587 = vector.broadcast %586 : vector<1x128xf32> to vector<64x128xf32>
    %588 = arith.addf %585, %587 : vector<64x128xf32>
    %589 = vector.shape_cast %588 : vector<64x128xf32> to vector<8x8x128xf32>
    %c0_157 = arith.constant 0 : index
    %c0_158 = arith.constant 0 : index
    %c0_159 = arith.constant 0 : index
    %590 = vector.load %arg8[%c0_157, %c0_158, %c0_159] : memref<8x8x128xf32, #tpu.memory_space<vmem>>, vector<8x8x128xf32>
    tpu.vector_store %arg8[%c0_157, %c0_158, %c0_159], %589 {strides = array<i32>} : memref<8x8x128xf32, #tpu.memory_space<vmem>>, vector<8x8x128xf32>,
    return
  }
  func.func @transform_0(%arg0: i32) -> (i32, i32, i32) {
    %c0_i32 = arith.constant 0 : i32
    %c0_i32_0 = arith.constant 0 : i32
    %c0_i32_1 = arith.constant 0 : i32
    return %c0_i32, %arg0, %c0_i32_0 : i32, i32, i32
  }
  func.func @transform_1(%arg0: i32) -> (i32, i32) {
    %c0_i32 = arith.constant 0 : i32
    %c0_i32_0 = arith.constant 0 : i32
    %c0_i32_1 = arith.constant 0 : i32
    return %c0_i32, %c0_i32_0 : i32, i32
  }
  func.func @transform_2(%arg0: i32) -> (i32, i32) {
    %c0_i32 = arith.constant 0 : i32
    %c0_i32_0 = arith.constant 0 : i32
    %c0_i32_1 = arith.constant 0 : i32
    return %c0_i32, %c0_i32_0 : i32, i32
  }
  func.func @transform_3(%arg0: i32) -> (i32, i32) {
    %c0_i32 = arith.constant 0 : i32
    %c0_i32_0 = arith.constant 0 : i32
    %c0_i32_1 = arith.constant 0 : i32
    return %c0_i32, %c0_i32_0 : i32, i32
  }
  func.func @transform_4(%arg0: i32) -> (i32, i32) {
    %c0_i32 = arith.constant 0 : i32
    %c0_i32_0 = arith.constant 0 : i32
    %c0_i32_1 = arith.constant 0 : i32
    return %c0_i32, %c0_i32_0 : i32, i32
  }
  func.func @transform_5(%arg0: i32) -> (i32, i32) {
    %c0_i32 = arith.constant 0 : i32
    %c0_i32_0 = arith.constant 0 : i32
    %c0_i32_1 = arith.constant 0 : i32
    return %c0_i32, %c0_i32_0 : i32, i32
  }
  func.func @transform_6(%arg0: i32) -> (i32, i32) {
    %c0_i32 = arith.constant 0 : i32
    %c0_i32_0 = arith.constant 0 : i32
    %c0_i32_1 = arith.constant 0 : i32
    return %c0_i32, %c0_i32_0 : i32, i32
  }
  func.func @transform_7(%arg0: i32) -> (i32, i32, i32) {
    %c0_i32 = arith.constant 0 : i32
    %c0_i32_0 = arith.constant 0 : i32
    %c0_i32_1 = arith.constant 0 : i32
    return %c0_i32, %arg0, %c0_i32_0 : i32, i32, i32
  }
}

</mosaic_0001>

<bundles_post_ra>
// kernel: rnn_layer_forward.2
= control target key start
LH: loop header
LB: loop body
LE: loop exit
PB: predicated region body
PF: predicated region fallthrough
CT: control target
= control target key end

     0   :  { %10 = vsyncpa [#allocation5], 0  ;;  %s5781_s0 = inlined_call_operand.vmem [shape: bf16[8,16,128], index: 0, kind: input, shape index: {}]   ;;  %s5782_s1 = inlined_call_operand.hbm [shape: bf16[128,1024], index: 1, kind: input, shape index: {}]   ;;  %s5783_s2 = inlined_call_operand.hbm [shape: bf16[128,512], index: 2, kind: input, shape index: {}]   ;;  %s5784_s3 = inlined_call_operand.hbm [shape: bf16[128,512], index: 3, kind: input, shape index: {}]   ;;  %s5785_s4 = inlined_call_operand.vmem [shape: f32[1,1024], index: 4, kind: input, shape index: {}]   ;;  %s5786_s5 = inlined_call_operand.vmem [shape: f32[8,16,256], index: 5, kind: output, shape index: {}]  }
   0x1   :  { %11 = vsyncpa [#allocation7], 0  ;;  %s4456_s18 = smov 0   ;;  %s4458_s19 = smov 0  }
   0x2   :  { %s4460_s20 = smov 0  }
   0x3 LB: > { %s4472_s21 = sadd.s32 4294967295, %s4416_s20   ;;  %s4475_s22 = sadd.s32 1, %s4416_s20   ;;  %s4416_s20 = sphi %s4460_s20, %s6162_s20   ;;  %s4412_s19 = sphi %s4458_s19, %s6161_s19   ;;  %s4408_s18 = sphi %s4456_s18, %s6160_s18  }
   0x4   : > { %s21_s23 = ssub.s32 %s4416_s20, %s4475_s22  ;;  %s24_s24 = sadd.s32 1, %s4412_s19 }
   0x5   : > { %p22_p0 = scmp.eq.s32.totalorder %s21_s23, 0  ;;  %p31_p1 = scmp.ne.s32.totalorder %s4412_s19, %s4408_s18 }
   0x6   : > { %p32_p2 = scmp.eq.s32.totalorder %s4416_s20, 0  ;;  %p145_p3 = scmp.eq.s32.totalorder %s4472_s21, 1 }
   0x7   : > { %s4485_s25 = scalar_select %p22_p0, %s4412_s19, %s24_s24  }
   0x8   : > { %p4487_p4 = por %p32_p2, %p31_p1  ;;  %p4491_p5 = por %p145_p3, %p31_p1 }
   0x9   : > { %p3545_p6 = scmp.ge.s32.totalorder %s4416_s20, 1  ;;  %p158_p7 = scmp.lt.s32.totalorder %s4416_s20, 3 }
   0xa   : > { %s5884_s26 = scalar_select %p4487_p4, 1, 0 }
   0xb   : > { %s5885_s27 = scalar_select %p4491_p5, 1, 0 }
   0xc   : > { %p5787_p8 = scmp.eq.s32.totalorder %s4472_s21, 0  ;;  %p4498_p9 = pnand %p3545_p6, %p158_p7 }
   0xd   : > { %s4418_s29 = smov [#allocation6]   ;;  %s4419_s7 = smov [#allocation4]  }
   0xe   : > { %s5886_s28 = scalar_select %p4498_p9, 1, 0 }
   0xf   : > { %s183_s30 = sshll.u32 %s4418_s29, 4  ;;  %p3770_p10 = pneg %p4498_p9  ;;  %s184_s30 = int_to_ptr.vmem [resolvable:$true] %s183_s30 }
  0x10   : > { %s170_s8 = sshll.u32 %s4419_s7, 4  ;;  %s4302_s11 = scalar_lea.hbm %s5783_s2, 4096  ;;  %s4510_s8 = int_to_ptr.vmem [resolvable:$true] %s170_s8 }
  0x11   : > { %p4506_p11 = pnand %p5787_p8, %p3770_p10  ;;  %p4303_p12 = scmp.ne.s32.totalorder %s5783_s2, %s4302_s11 }
  0x12   : > { %p4309_p2 = scmp.lt.u32.totalorder %s4302_s11, %s5783_s2 }
  0x13   : > { %p4520_p13 = pneg %p4506_p11 }
  0x15   : > { %p4305_p0 = pnand %p4520_p13, %p4303_p12 }
  0x17   : > { %p4306_p1 = pneg %p4305_p0 }
  0x19   : > { %p4311_p3 = pnand %p4309_p2, %p4306_p1 }
  0x1b   : > { %4314 = shalt.err (!%p4311_p3)
}
  0x1c   : > { %s4315_s17 = scalar_lea.vmem %s184_s30, 4096  ;;  %p4323_p8 = scmp.lt.s32.totalorder %s184_s30, %s184_s30 }
  0x1d   : > { %p4316_p6 = scmp.ne.s32.totalorder %s184_s30, %s4315_s17  ;;  %p4324_p5 = scmp.lt.s32.totalorder %s4315_s17, %s4315_s17 }
  0x1f   : > { %p4318_p7 = pnand %p4316_p6, %p4520_p13  ;;  %p4325_p9 = por %p4324_p5, %p4323_p8 }
  0x21   : > { %p4319_p10 = pneg %p4318_p7 }
  0x23   : > { %p4326_p4 = pnand %p4325_p9, %p4319_p10 }
  0x25   : > { %4329 = shalt.err (!%p4326_p4)
}
  0x26   : > { %s5789_s23 = smov 256   ;;  %s5790_s24 = smov 16  }
  0x27   : > { %3776 = dma.hbm_to_vmem [thread:$0]  (!%p4506_p11), %s5783_s2, 4096, %s184_s30, [#allocation7], %s5789_s23, %s5789_s23, %s5790_s24  }
  0x28   : > { %s4330_s11 = scalar_lea.hbm %s5782_s1, 8192 }
  0x29   : > { %p4331_p4 = scmp.ne.s32.totalorder %s5782_s1, %s4330_s11  ;;  %p4337_p9 = scmp.lt.u32.totalorder %s4330_s11, %s5782_s1 }
  0x2b   : > { %p4333_p5 = pnand %p4331_p4, %p4520_p13 }
  0x2d   : > { %p4334_p8 = pneg %p4333_p5 }
  0x2f   : > { %p4339_p12 = pnand %p4337_p9, %p4334_p8 }
  0x31   : > { %4342 = shalt.err (!%p4339_p12)
}
  0x32   : > { %s4343_s30 = scalar_lea.vmem %s4510_s8, 8192  ;;  %p4351_p3 = scmp.lt.s32.totalorder %s4510_s8, %s4510_s8 }
  0x33   : > { %p4344_p0 = scmp.ne.s32.totalorder %s4510_s8, %s4343_s30  ;;  %p4352_p6 = scmp.lt.s32.totalorder %s4343_s30, %s4343_s30 }
  0x35   : > { %p4346_p1 = pnand %p4344_p0, %p4520_p13  ;;  %p4353_p7 = por %p4352_p6, %p4351_p3 }
  0x37   : > { %p4347_p2 = pneg %p4346_p1 }
  0x39   : > { %p4354_p10 = pnand %p4353_p7, %p4347_p2 }
  0x3b   : > { %4357 = shalt.err (!%p4354_p10)
}
  0x3c   : > { %s4422_s17 = smov 512   ;;  %s4423_s29 = smov 32  }
  0x3d   : > { %3773 = dma.hbm_to_vmem [thread:$0]  (!%p4506_p11), %s5782_s1, 8192, %s4510_s8, [#allocation5], %s4422_s17, %s4422_s17, %s4423_s29  }
  0x3e   : > { %s4424_s10 = smov [#allocation8]   ;;  %s4358_s15 = scalar_lea.hbm %s5784_s3, 4096 }
  0x3f   : > { %s196_s11 = sshll.u32 %s4424_s10, 4  ;;  %p4359_p4 = scmp.ne.s32.totalorder %s5784_s3, %s4358_s15  ;;  %s197_s11 = int_to_ptr.vmem [resolvable:$true] %s196_s11 }
  0x40   : > { %p4365_p9 = scmp.lt.u32.totalorder %s4358_s15, %s5784_s3 }
  0x41   : > { %p4361_p5 = pnand %p4359_p4, %p4520_p13 }
  0x43   : > { %p4362_p8 = pneg %p4361_p5 }
  0x45   : > { %p4367_p12 = pnand %p4365_p9, %p4362_p8 }
  0x47   : > { %4370 = shalt.err (!%p4367_p12)
}
  0x48   : > { %s4371_s8 = scalar_lea.vmem %s197_s11, 4096  ;;  %p4379_p3 = scmp.lt.s32.totalorder %s197_s11, %s197_s11 }
  0x49   : > { %p4372_p0 = scmp.ne.s32.totalorder %s197_s11, %s4371_s8  ;;  %p4380_p6 = scmp.lt.s32.totalorder %s4371_s8, %s4371_s8 }
  0x4b   : > { %p4374_p1 = pnand %p4372_p0, %p4520_p13  ;;  %p4381_p7 = por %p4380_p6, %p4379_p3 }
  0x4d   : > { %p4375_p2 = pneg %p4374_p1 }
  0x4f   : > { %p4382_p10 = pnand %p4381_p7, %p4375_p2 }
  0x51   : > { %4385 = shalt.err (!%p4382_p10)
}
  0x52   : > { %s5889_s17 = smov 16   ;;  %s5890_s29 = smov 256  }
  0x53   : > { %3779 = dma.hbm_to_vmem [thread:$0]  (!%p4506_p11), %s5784_s3, 4096, %s197_s11, [#allocation7], %s5890_s29, %s5890_s29, %s5889_s17  }
  0x54   : > { %p3549_p4 = scmp.ge.s32.totalorder %s4416_s20, 2 }
  0x55   : > { %p5891_p13 = scmp.ne.s32.totalorder (!%p3549_p4), %s5884_s26, 0 }
  0x56   : > { %209 = sbr.rel (%p3549_p4) target bundleno = 102 (0x66), region = 32 }
  0x5d   : > { %212 = sbr.rel (!%p5891_p13) target bundleno = 102 (0x66), region = 36  ;;  %s214_s14 = sand.u32 (%p5891_p13), 1, %s4412_s19  }
  0x5e   : > { %s3551_s7 = sshll.u32 (%p5891_p13), %s4416_s20, 2  ;;  %s3550_s9 = sshll.u32 (%p5891_p13), %s214_s14, 5 }
  0x5f   : > { %s218_s12 = scalar_lea.vmem (%p5891_p13), %s5781_s0, %s3551_s7  ;;  %s216_s13 = scalar_lea.vmem (%p5891_p13), [#allocation3], %s3550_s9 }
  0x60   : > { %v234_v0 = vld [vmem:[%s218_s12] sm:$0xf] (%p5891_p13)  ;;  %v236_v1 = vld [vmem:[%s218_s12 + $0x8] sm:$0xf] (%p5891_p13)  ;;  %v238_v2 = vld [vmem:[%s218_s12 + $0x10] sm:$0xf] (%p5891_p13) }
  0x61   : > { %235 = vst [vmem:[%s216_s13] sm:$0xf] (%p5891_p13), %v234_v0  ;;  %237 = vst [vmem:[%s216_s13 + $0x4] sm:$0xf] (%p5891_p13), %v236_v1  ;;  %v240_v3 = vld [vmem:[%s218_s12 + $0x18] sm:$0xf] (%p5891_p13) }
  0x62   : > { %v242_v4 = vld [vmem:[%s218_s12 + $0x20] sm:$0xf] (%p5891_p13)  ;;  %239 = vst [vmem:[%s216_s13 + $0x8] sm:$0xf] (%p5891_p13), %v238_v2  ;;  %241 = vst [vmem:[%s216_s13 + $0xc] sm:$0xf] (%p5891_p13), %v240_v3 }
  0x63   : > { %243 = vst [vmem:[%s216_s13 + $0x10] sm:$0xf] (%p5891_p13), %v242_v4  ;;  %v244_v5 = vld [vmem:[%s218_s12 + $0x28] sm:$0xf] (%p5891_p13)  ;;  %v246_v6 = vld [vmem:[%s218_s12 + $0x30] sm:$0xf] (%p5891_p13) }
  0x64   : > { %v248_v7 = vld [vmem:[%s218_s12 + $0x38] sm:$0xf]  ;;  %245 = vst [vmem:[%s216_s13 + $0x14] sm:$0xf] %v244_v5  ;;  %247 = vst [vmem:[%s216_s13 + $0x18] sm:$0xf] %v246_v6 }
  0x65   : > { %249 = vst [vmem:[%s216_s13 + $0x1c] sm:$0xf] %v248_v7 }
  0x66 PF: > { %p5892_p11 = scmp.ne.s32.totalorder %s5886_s28, 0 }
  0x68   : > { %291 = sbr.rel (%p5892_p11) target bundleno = 2337 (0x921), region = 77 }
  0x6f   : > { %s294_s20 = sand.u32 1, %s4408_s18   ;;  %p5893_p5 = scmp.eq.s32.totalorder %s4472_s21, 0 }
  0x70   : > { %s3553_s26 = sshll.u32 %s294_s20, 5 }
  0x71   : > { %s4596_s11 = scalar_lea.vmem [#allocation3], %s3553_s26 }
  0x72   : > { %4399 = dma.done.wait (%p5893_p5), [#allocation5], 8192   ;;  %p5894_p8 = pmov %p5893_p5 }
  0x73   : > { %p5895_p9 = pmov %p5893_p5 }
  0x74   : > { %4401 = vsyncadd (%p5894_p8), [#allocation5], 4294959104 }
  0x75   : > { %4403 = dma.done.wait (%p5895_p9), [#allocation7], 8192   ;;  %p5896_p12 = pmov %p5893_p5 }
  0x76   : > { %v5791_v8 = vmov 0   ;;  %v341_v9 = vld [vmem:[#allocation4] sm:$0xff]  ;;  %v342_v11 = vld [vmem:[#allocation4 + $0x8] sm:$0xff]  ;;  %v343_v6 = vld [vmem:[#allocation4 + $0x10] sm:$0xff]  ;;  %s3557_s16 = sshll.u32 %s294_s20, 7  ;;  %p6159_p0 = scmp.ne.s32.totalorder %s5885_s27, 0 }
  0x77   : > { %4405 = vsyncadd (%p5896_p12), [#allocation7], 4294959104  ;;  %823 = vmatprep.mubr.bf16.mxu0 %v5791_v8  ;;  %896 = vmatprep.mubr.bf16.mxu1 %v5791_v8  ;;  %v345_v10 = vld [vmem:[#allocation4 + $0x20] sm:$0xff]  ;;  %v346_v13 = vld [vmem:[#allocation4 + $0x28] sm:$0xff]  ;;  %s5118_s30 = scalar_lea.vmem [#allocation9], %s3557_s16  ;;  %s3757_s18 = sshll.u32 (%p6159_p0), %s4472_s21, 4 }
  0x78   : > { %v3563_v12 = vcombine.high %v341_v9, %v345_v10  ;;  %v3562_v14 = vcombine.low %v341_v9, %v345_v10  ;;  %v349_v15 = vld [vmem:[#allocation4 + $0x40] sm:$0xff]  ;;  %v3565_v17 = vcombine.high %v342_v11, %v346_v13  ;;  %v3564_v18 = vcombine.low %v342_v11, %v346_v13  ;;  %v350_v20 = vld [vmem:[#allocation4 + $0x48] sm:$0xff]  ;;  %v347_v9 = vld [vmem:[#allocation4 + $0x30] sm:$0xff]  ;;  %s3408_s29 = scalar_lea.vmem (%p6159_p0), %s5786_s5, %s3757_s18 }
  0x79   : > { %v353_v16 = vld [vmem:[#allocation4 + $0x60] sm:$0xff]  ;;  %v354_v21 = vld [vmem:[#allocation4 + $0x68] sm:$0xff]  ;;  %v344_v10 = vld [vmem:[#allocation4 + $0x18] sm:$0xff] }
  0x7a   : > { %v3571_v19 = vcombine.high %v349_v15, %v353_v16  ;;  %v357_v22 = vld [vmem:[#allocation4 + $0x80] sm:$0xff]  ;;  %791 = vmatprep.subr.bf16.mxu0 %v3563_v12  ;;  %v3573_v23 = vcombine.high %v350_v20, %v354_v21  ;;  %v358_v25 = vld [vmem:[#allocation4 + $0x88] sm:$0xff]  ;;  %864 = vmatprep.subr.bf16.mxu1 %v3565_v17  ;;  %v3570_v27 = vcombine.low %v349_v15, %v353_v16  ;;  %v348_v11 = vld [vmem:[#allocation4 + $0x38] sm:$0xff] }
  0x7b   : > { %v361_v24 = vld [vmem:[#allocation4 + $0xa0] sm:$0xff]  ;;  %v362_v26 = vld [vmem:[#allocation4 + $0xa8] sm:$0xff]  ;;  %792 = vmatpush1.bf16.msra.mxu0 %v3562_v14  ;;  %865 = vmatpush1.bf16.msra.mxu1 %v3564_v18  ;;  %v3572_v28 = vcombine.low %v350_v20, %v354_v21  ;;  %v3567_v15 = vcombine.high %v343_v6, %v347_v9  ;;  %v351_v16 = vld [vmem:[#allocation4 + $0x50] sm:$0xff]  ;;  %v3569_v17 = vcombine.high %v344_v10, %v348_v11 }
  0x7c   : > { %793 = vmatprep.subr.bf16.mxu0 %v3571_v19  ;;  %v3579_v29 = vcombine.high %v357_v22, %v361_v24  ;;  %866 = vmatprep.subr.bf16.mxu1 %v3573_v23  ;;  %v3581_v30 = vcombine.high %v358_v25, %v362_v26  ;;  %v365_v31 = vld [vmem:[#allocation4 + $0xc0] sm:$0xff]  ;;  %v366_v33 = vld [vmem:[#allocation4 + $0xc8] sm:$0xff]  ;;  %v3578_v35 = vcombine.low %v357_v22, %v361_v24  ;;  %v355_v18 = vld [vmem:[#allocation4 + $0x70] sm:$0xff] }
  0x7d   : > { %v369_v32 = vld [vmem:[#allocation4 + $0xe0] sm:$0xff]  ;;  %v370_v34 = vld [vmem:[#allocation4 + $0xe8] sm:$0xff]  ;;  %v3580_v36 = vcombine.low %v358_v25, %v362_v26  ;;  %v352_v19 = vld [vmem:[#allocation4 + $0x58] sm:$0xff]  ;;  %v3566_v21 = vcombine.low %v343_v6, %v347_v9  ;;  %v3568_v22 = vcombine.low %v344_v10, %v348_v11  ;;  %v3575_v23 = vcombine.high %v351_v16, %v355_v18 }
  0x7e   : > { %v3587_v37 = vcombine.high %v365_v31, %v369_v32  ;;  %v3589_v38 = vcombine.high %v366_v33, %v370_v34  ;;  %v373_v39 = vld [vmem:[#allocation4 + $0x100] sm:$0xff]  ;;  %v374_v41 = vld [vmem:[#allocation4 + $0x108] sm:$0xff]  ;;  %v3586_v43 = vcombine.low %v365_v31, %v369_v32  ;;  %v3588_v44 = vcombine.low %v366_v33, %v370_v34  ;;  %v356_v20 = vld [vmem:[#allocation4 + $0x78] sm:$0xff] }
  0x7f   : > { %794 = vmatpush1.bf16.msra.mxu0 %v3570_v27  ;;  %867 = vmatpush1.bf16.msra.mxu1 %v3572_v28  ;;  %v377_v40 = vld [vmem:[#allocation4 + $0x120] sm:$0xff]  ;;  %v378_v42 = vld [vmem:[#allocation4 + $0x128] sm:$0xff]  ;;  %v359_v24 = vld [vmem:[#allocation4 + $0x90] sm:$0xff]  ;;  %v3577_v25 = vcombine.high %v352_v19, %v356_v20 }
  0x80   : > { %795 = vmatprep.subr.bf16.mxu0 %v3579_v29  ;;  %868 = vmatprep.subr.bf16.mxu1 %v3581_v30  ;;  %v3595_v45 = vcombine.high %v373_v39, %v377_v40  ;;  %v381_v46 = vld [vmem:[#allocation4 + $0x140] sm:$0xff]  ;;  %v3597_v47 = vcombine.high %v374_v41, %v378_v42  ;;  %v382_v49 = vld [vmem:[#allocation4 + $0x148] sm:$0xff]  ;;  %v3594_v51 = vcombine.low %v373_v39, %v377_v40  ;;  %v363_v26 = vld [vmem:[#allocation4 + $0xb0] sm:$0xff] }
  0x81   : > { %v385_v48 = vld [vmem:[#allocation4 + $0x160] sm:$0xff]  ;;  %v386_v50 = vld [vmem:[#allocation4 + $0x168] sm:$0xff]  ;;  %v3596_v52 = vcombine.low %v374_v41, %v378_v42  ;;  %v360_v27 = vld [vmem:[#allocation4 + $0x98] sm:$0xff]  ;;  %v3574_v29 = vcombine.low %v351_v16, %v355_v18  ;;  %v3576_v30 = vcombine.low %v352_v19, %v356_v20  ;;  %v3583_v32 = vcombine.high %v359_v24, %v363_v26 }
  0x82   : > { %v3603_v53 = vcombine.high %v381_v46, %v385_v48  ;;  %v389_v54 = vld [vmem:[#allocation4 + $0x180] sm:$0xff]  ;;  %v3605_v55 = vcombine.high %v382_v49, %v386_v50  ;;  %v390_v57 = vld [vmem:[#allocation4 + $0x188] sm:$0xff]  ;;  %v3602_v59 = vcombine.low %v381_v46, %v385_v48  ;;  %v3604_v60 = vcombine.low %v382_v49, %v386_v50  ;;  %v364_v28 = vld [vmem:[#allocation4 + $0xb8] sm:$0xff] }
  0x83   : > { %796 = vmatpush1.bf16.msra.mxu0 %v3578_v35  ;;  %869 = vmatpush1.bf16.msra.mxu1 %v3580_v36  ;;  %v393_v56 = vld [vmem:[#allocation4 + $0x1a0] sm:$0xff]  ;;  %v394_v58 = vld [vmem:[#allocation4 + $0x1a8] sm:$0xff]  ;;  %v367_v33 = vld [vmem:[#allocation4 + $0xd0] sm:$0xff]  ;;  %v3585_v34 = vcombine.high %v360_v27, %v364_v28  ;;  %v3584_v39 = vcombine.low %v360_v27, %v364_v28 }
  0x84   : > { %797 = vmatprep.subr.bf16.mxu0 %v3587_v37  ;;  %870 = vmatprep.subr.bf16.mxu1 %v3589_v38  ;;  %v3611_v61 = vcombine.high %v389_v54, %v393_v56  ;;  %v3613_v62 = vcombine.high %v390_v57, %v394_v58  ;;  %v397_v63 = vld [vmem:[#allocation4 + $0x1c0] sm:$0xff]  ;;  %v398_v1 = vld [vmem:[#allocation4 + $0x1c8] sm:$0xff]  ;;  %v3610_v3 = vcombine.low %v389_v54, %v393_v56  ;;  %v371_v35 = vld [vmem:[#allocation4 + $0xf0] sm:$0xff] }
  0x85   : > { %v401_v0 = vld [vmem:[#allocation4 + $0x1e0] sm:$0xff]  ;;  %v402_v2 = vld [vmem:[#allocation4 + $0x1e8] sm:$0xff]  ;;  %v3612_v4 = vcombine.low %v390_v57, %v394_v58  ;;  %v368_v36 = vld [vmem:[#allocation4 + $0xd8] sm:$0xff]  ;;  %v3582_v38 = vcombine.low %v359_v24, %v363_v26  ;;  %v3591_v40 = vcombine.high %v367_v33, %v371_v35  ;;  %v3590_v46 = vcombine.low %v367_v33, %v371_v35 }
  0x86   : > { %v3619_v5 = vcombine.high %v397_v63, %v401_v0  ;;  %v3621_v7 = vcombine.high %v398_v1, %v402_v2  ;;  %v3618_v12 = vcombine.low %v397_v63, %v401_v0  ;;  %v3620_v13 = vcombine.low %v398_v1, %v402_v2  ;;  %v4609_v14 = vld [vmem:[%s4596_s11] sm:$0xff]   ;;  %v4614_v31 = vld [vmem:[%s4596_s11 + $0x8] sm:$0xff]   ;;  %v372_v37 = vld [vmem:[#allocation4 + $0xf8] sm:$0xff] }
  0x87   : > { %798 = vmatpush1.bf16.msra.mxu0 %v3586_v43  ;;  %871 = vmatpush1.bf16.msra.mxu1 %v3588_v44  ;;  %v375_v41 = vld [vmem:[#allocation4 + $0x110] sm:$0xff]  ;;  %v3593_v42 = vcombine.high %v368_v36, %v372_v37  ;;  %v376_v44 = vld [vmem:[#allocation4 + $0x118] sm:$0xff] }
  0x88   : > { %799 = vmatprep.subr.bf16.mxu0 %v3595_v45  ;;  %872 = vmatprep.subr.bf16.mxu1 %v3597_v47  ;;  %v379_v43 = vld [vmem:[#allocation4 + $0x130] sm:$0xff]  ;;  %v380_v45 = vld [vmem:[#allocation4 + $0x138] sm:$0xff]  ;;  %v3592_v47 = vcombine.low %v368_v36, %v372_v37 }
  0x89   : > { %v4621_v48 = vld [vmem:[%s4596_s11 + $0x10] sm:$0xff]   ;;  %v3599_v49 = vcombine.high %v375_v41, %v379_v43  ;;  %v388_v54 = vld [vmem:[#allocation4 + $0x178] sm:$0xff]  ;;  %v3600_v56 = vcombine.low %v376_v44, %v380_v45 }
  0x8a   : > { %v383_v50 = vld [vmem:[#allocation4 + $0x150] sm:$0xff]  ;;  %v4628_v1 = vld [vmem:[%s4596_s11 + $0x18] sm:$0xff]  }
  0x8b   : > { %800 = vmatpush1.bf16.msra.mxu0 %v3594_v51  ;;  %873 = vmatpush1.bf16.msra.mxu1 %v3596_v52  ;;  %v3601_v51 = vcombine.high %v376_v44, %v380_v45  ;;  %v387_v52 = vld [vmem:[#allocation4 + $0x170] sm:$0xff]  ;;  %v400_v6 = vld [vmem:[#allocation4 + $0x1d8] sm:$0xff] }
  0x8c   : > { %801 = vmatprep.subr.bf16.mxu0 %v3603_v53  ;;  %874 = vmatprep.subr.bf16.mxu1 %v3605_v55  ;;  %v384_v53 = vld [vmem:[#allocation4 + $0x158] sm:$0xff]  ;;  %v3598_v55 = vcombine.low %v375_v41, %v379_v43  ;;  %v3607_v57 = vcombine.high %v383_v50, %v387_v52  ;;  %v391_v58 = vld [vmem:[#allocation4 + $0x190] sm:$0xff]  ;;  %v3606_v63 = vcombine.low %v383_v50, %v387_v52 }
  0x8d   : > { %v3608_v0 = vcombine.low %v384_v53, %v388_v54  ;;  %v4634_v16 = vld [vmem:[#allocation6 + $0x4] ss:$16 sps:$4 sm:$0xff]   ;;  %v4640_v18 = vld [vmem:[#allocation6] ss:$16 sps:$4 sm:$0xff]   ;;  %v4642_v19 = vld [vmem:[#allocation6 + $0x8] ss:$16 sps:$4 sm:$0xff]  }
  0x8e   : > { %5897 = vst [vmem:[#allocation12_spill] sm:$0xff] %v4640_v18  ;;  %5898 = vst [vmem:[#allocation13_spill] sm:$0xff] %v4642_v19  ;;  %v4645_v20 = vld [vmem:[#allocation6 + $0x24] ss:$16 sps:$4 sm:$0xff]   ;;  %v4671_v26 = vld [vmem:[#allocation6 + $0x48] ss:$16 sps:$4 sm:$0xff]  }
  0x8f   : > { %802 = vmatpush1.bf16.msra.mxu0 %v3602_v59  ;;  %875 = vmatpush1.bf16.msra.mxu1 %v3604_v60  ;;  %v3609_v59 = vcombine.high %v384_v53, %v388_v54  ;;  %v395_v60 = vld [vmem:[#allocation4 + $0x1b0] sm:$0xff]  ;;  %5899 = vst [vmem:[#allocation14_spill] sm:$0xff] %v4645_v20  ;;  %5906 = vst [vmem:[#allocation21_spill] sm:$0xff] %v4671_v26  ;;  %v4676_v28 = vld [vmem:[#allocation6 + $0x6c] ss:$16 sps:$4 sm:$0xff]  }
  0x90   : > { %803 = vmatprep.subr.bf16.mxu0 %v3611_v61  ;;  %876 = vmatprep.subr.bf16.mxu1 %v3613_v62  ;;  %v392_v61 = vld [vmem:[#allocation4 + $0x198] sm:$0xff]  ;;  %v3615_v2 = vcombine.high %v391_v58, %v395_v60  ;;  %v3614_v9 = vcombine.low %v391_v58, %v395_v60  ;;  %v4659_v24 = vld [vmem:[#allocation6 + $0x44] ss:$16 sps:$4 sm:$0xff]   ;;  %5908 = vst [vmem:[#allocation23_spill] sm:$0xff] %v4676_v28  ;;  %v4709_v37 = vld [vmem:[#allocation6 + $0xa0] ss:$16 sps:$4 sm:$0xff]  }
  0x91   : > { %v396_v62 = vld [vmem:[#allocation4 + $0x1b8] sm:$0xff]  ;;  %5903 = vst [vmem:[#allocation18_spill] sm:$0xff] %v4659_v24  ;;  %v4673_v27 = vld [vmem:[#allocation6 + $0x64] ss:$16 sps:$4 sm:$0xff]   ;;  %5917 = vst [vmem:[#allocation32_spill] sm:$0xff] %v4709_v37 }
  0x92   : > { %v3616_v10 = vcombine.low %v392_v61, %v396_v62  ;;  %5907 = vst [vmem:[#allocation22_spill] sm:$0xff] %v4673_v27  ;;  %v4691_v33 = vld [vmem:[#allocation6 + $0x8c] ss:$16 sps:$4 sm:$0xff]   ;;  %v4701_v35 = vld [vmem:[#allocation6 + $0xa4] ss:$16 sps:$4 sm:$0xff]  }
  0x93   : > { %804 = vmatpush1.bf16.msra.mxu0 %v3610_v3  ;;  %877 = vmatpush1.bf16.msra.mxu1 %v3612_v4  ;;  %v399_v3 = vld [vmem:[#allocation4 + $0x1d0] sm:$0xff]  ;;  %v3617_v4 = vcombine.high %v392_v61, %v396_v62  ;;  %5912 = vst [vmem:[#allocation27_spill] sm:$0xff] %v4691_v33  ;;  %5915 = vst [vmem:[#allocation30_spill] sm:$0xff] %v4701_v35  ;;  %v4704_v36 = vld [vmem:[#allocation6 + $0xac] ss:$16 sps:$4 sm:$0xff]  }
  0x94   : > { %805 = vmatprep.subr.bf16.mxu0 %v3619_v5  ;;  %878 = vmatprep.subr.bf16.mxu1 %v3621_v7  ;;  %v403_v5 = vld [vmem:[#allocation4 + $0x1f0] sm:$0xff]  ;;  %v404_v7 = vld [vmem:[#allocation4 + $0x1f8] sm:$0xff]  ;;  %5916 = vst [vmem:[#allocation31_spill] sm:$0xff] %v4704_v36 }
  0x95   : > { %v3623_v11 = vcombine.high %v399_v3, %v403_v5  ;;  %v4723_v41 = vld [vmem:[#allocation6 + $0xc0] ss:$16 sps:$4 sm:$0xff]   ;;  %v4729_v43 = vld [vmem:[#allocation6 + $0xe4] ss:$16 sps:$4 sm:$0xff]   ;;  %v4732_v44 = vld [vmem:[#allocation6 + $0xec] ss:$16 sps:$4 sm:$0xff]  }
  0x96   : > { %5921 = vst [vmem:[#allocation36_spill] sm:$0xff] %v4723_v41  ;;  %5923 = vst [vmem:[#allocation38_spill] sm:$0xff] %v4729_v43  ;;  %v4737_v45 = vld [vmem:[#allocation6 + $0xe0] ss:$16 sps:$4 sm:$0xff]   ;;  %v4755_v50 = vld [vmem:[#allocation8 + $0x8] ss:$16 sps:$4 sm:$0xff]  }
  0x97   : > { %806 = vmatpush1.bf16.msra.mxu0 %v3618_v12  ;;  %879 = vmatpush1.bf16.msra.mxu1 %v3620_v13  ;;  %v3625_v12 = vcombine.high %v400_v6, %v404_v7  ;;  %v3622_v13 = vcombine.low %v399_v3, %v403_v5  ;;  %5924 = vst [vmem:[#allocation39_spill] sm:$0xff] %v4732_v44  ;;  %5925 = vst [vmem:[#allocation40_spill] sm:$0xff] %v4737_v45  ;;  %v4760_v52 = vld [vmem:[#allocation8 + $0x2c] ss:$16 sps:$4 sm:$0xff]   ;;  %v4765_v53 = vld [vmem:[#allocation8 + $0x20] ss:$16 sps:$4 sm:$0xff]  }
  0x98   : > { %937 = vmatprep.subr.bf16.mxu0 %v3567_v15  ;;  %1010 = vmatprep.subr.bf16.mxu1 %v3569_v17  ;;  %v3624_v15 = vcombine.low %v400_v6, %v404_v7  ;;  %v4637_v17 = vld [vmem:[#allocation6 + $0xc] ss:$16 sps:$4 sm:$0xff]   ;;  %v4769_v54 = vld [vmem:[#allocation8 + $0x28] ss:$16 sps:$4 sm:$0xff]   ;;  %v4791_v61 = vld [vmem:[#allocation8 + $0x60] ss:$16 sps:$4 sm:$0xff]  }
  0x99   : > { %v4783_v58 = vld [vmem:[#allocation8 + $0x48] ss:$16 sps:$4 sm:$0xff]   ;;  %v4788_v60 = vld [vmem:[#allocation8 + $0x6c] ss:$16 sps:$4 sm:$0xff]   ;;  %v4809_v3 = vld [vmem:[#allocation8 + $0xa4] ss:$16 sps:$4 sm:$0xff]  }
  0x9a   : > { %824 = vmatmul.mubr.bf16.vlgmr.msra.gmra.mrb[0].mxu0 %v4609_v14  ;;  %897 = vmatmul.mubr.bf16.vlgmr.msra.gmra.mrb[0].mxu1 %v4609_v14  ;;  %v4795_v62 = vld [vmem:[#allocation8 + $0x68] ss:$16 sps:$4 sm:$0xff]   ;;  %v4815_v5 = vld [vmem:[#allocation8 + $0xa0] ss:$16 sps:$4 sm:$0xff]   ;;  %v4821_v7 = vld [vmem:[#allocation8 + $0xc4] ss:$16 sps:$4 sm:$0xff]  }
  0x9b   : > { %938 = vmatpush1.bf16.msra.mxu0 %v3566_v21  ;;  %1011 = vmatpush1.bf16.msra.mxu1 %v3568_v22  ;;  %v4648_v21 = vld [vmem:[#allocation6 + $0x2c] ss:$16 sps:$4 sm:$0xff]   ;;  %v4653_v22 = vld [vmem:[#allocation6 + $0x20] ss:$16 sps:$4 sm:$0xff]   ;;  %v4819_v6 = vld [vmem:[#allocation8 + $0xa8] ss:$16 sps:$4 sm:$0xff]  }
  0x9c   : > { %939 = vmatprep.subr.bf16.mxu0 %v3575_v23  ;;  %1012 = vmatprep.subr.bf16.mxu1 %v3577_v25  ;;  %5900 = vst [vmem:[#allocation15_spill] sm:$0xff] %v4648_v21  ;;  %5901 = vst [vmem:[#allocation16_spill] sm:$0xff] %v4653_v22  ;;  %v4657_v23 = vld [vmem:[#allocation6 + $0x28] ss:$16 sps:$4 sm:$0xff]   ;;  %v4663_v25 = vld [vmem:[#allocation6 + $0x4c] ss:$16 sps:$4 sm:$0xff]  }
  0x9d   : > { %833 = vmatprep.mubr.bf16.mxu0 %v5791_v8  ;;  %906 = vmatprep.mubr.bf16.mxu1 %v5791_v8  ;;  %5902 = vst [vmem:[#allocation17_spill] sm:$0xff] %v4657_v23  ;;  %5904 = vst [vmem:[#allocation19_spill] sm:$0xff] %v4663_v25 }
  0x9f   : > { %940 = vmatpush1.bf16.msra.mxu0 %v3574_v29  ;;  %1013 = vmatpush1.bf16.msra.mxu1 %v3576_v30  ;;  %v4681_v29 = vld [vmem:[#allocation6 + $0x60] ss:$16 sps:$4 sm:$0xff]   ;;  %v4685_v30 = vld [vmem:[#allocation6 + $0x68] ss:$16 sps:$4 sm:$0xff]  }
  0xa0   : > { %941 = vmatprep.subr.bf16.mxu0 %v3583_v32  ;;  %1014 = vmatprep.subr.bf16.mxu1 %v3585_v34  ;;  %5909 = vst [vmem:[#allocation24_spill] sm:$0xff] %v4681_v29  ;;  %5910 = vst [vmem:[#allocation25_spill] sm:$0xff] %v4685_v30  ;;  %v4687_v32 = vld [vmem:[#allocation6 + $0x84] ss:$16 sps:$4 sm:$0xff]   ;;  %v4699_v34 = vld [vmem:[#allocation6 + $0x88] ss:$16 sps:$4 sm:$0xff]  }
  0xa1   : > { %5911 = vst [vmem:[#allocation26_spill] sm:$0xff] %v4687_v32  ;;  %5914 = vst [vmem:[#allocation29_spill] sm:$0xff] %v4699_v34 }
  0xa2   : > { %834 = vmatmul.mubr.bf16.gmra.mrb[4].mxu0 %v4614_v31  ;;  %907 = vmatmul.mubr.bf16.gmra.mrb[4].mxu1 %v4614_v31 }
  0xa3   : > { %942 = vmatpush1.bf16.msra.mxu0 %v3582_v38  ;;  %1015 = vmatpush1.bf16.msra.mxu1 %v3584_v39  ;;  %v4713_v38 = vld [vmem:[#allocation6 + $0xa8] ss:$16 sps:$4 sm:$0xff]   ;;  %v4715_v39 = vld [vmem:[#allocation6 + $0xc4] ss:$16 sps:$4 sm:$0xff]  }
  0xa4   : > { %943 = vmatprep.subr.bf16.mxu0 %v3591_v40  ;;  %1016 = vmatprep.subr.bf16.mxu1 %v3593_v42  ;;  %5918 = vst [vmem:[#allocation33_spill] sm:$0xff] %v4713_v38  ;;  %5919 = vst [vmem:[#allocation34_spill] sm:$0xff] %v4715_v39  ;;  %v4719_v40 = vld [vmem:[#allocation6 + $0xcc] ss:$16 sps:$4 sm:$0xff]   ;;  %v4727_v42 = vld [vmem:[#allocation6 + $0xc8] ss:$16 sps:$4 sm:$0xff]  }
  0xa5   : > { %843 = vmatprep.mubr.bf16.mxu0 %v5791_v8  ;;  %916 = vmatprep.mubr.bf16.mxu1 %v5791_v8  ;;  %5920 = vst [vmem:[#allocation35_spill] sm:$0xff] %v4719_v40  ;;  %5922 = vst [vmem:[#allocation37_spill] sm:$0xff] %v4727_v42 }
  0xa7   : > { %944 = vmatpush1.bf16.msra.mxu0 %v3590_v46  ;;  %1017 = vmatpush1.bf16.msra.mxu1 %v3592_v47  ;;  %v4741_v46 = vld [vmem:[#allocation6 + $0xe8] ss:$16 sps:$4 sm:$0xff]   ;;  %v4743_v47 = vld [vmem:[#allocation8 + $0x4] ss:$16 sps:$4 sm:$0xff]  }
  0xa8   : > { %945 = vmatprep.subr.bf16.mxu0 %v3599_v49  ;;  %1018 = vmatprep.subr.bf16.mxu1 %v3601_v51  ;;  %5926 = vst [vmem:[#allocation41_spill] sm:$0xff] %v4741_v46  ;;  %5927 = vst [vmem:[#allocation42_spill] sm:$0xff] %v4743_v47  ;;  %v4751_v49 = vld [vmem:[#allocation8] ss:$16 sps:$4 sm:$0xff]   ;;  %v4757_v51 = vld [vmem:[#allocation8 + $0x24] ss:$16 sps:$4 sm:$0xff]  }
  0xaa   : > { %844 = vmatmul.mubr.bf16.gmra.mrb[8].mxu0 %v4621_v48  ;;  %917 = vmatmul.mubr.bf16.gmra.mrb[8].mxu1 %v4621_v48 }
  0xab   : > { %946 = vmatpush1.bf16.msra.mxu0 %v3598_v55  ;;  %1019 = vmatpush1.bf16.msra.mxu1 %v3600_v56  ;;  %v4771_v55 = vld [vmem:[#allocation8 + $0x44] ss:$16 sps:$4 sm:$0xff]   ;;  %v4774_v56 = vld [vmem:[#allocation8 + $0x4c] ss:$16 sps:$4 sm:$0xff]  }
  0xac   : > { %947 = vmatprep.subr.bf16.mxu0 %v3607_v57  ;;  %1020 = vmatprep.subr.bf16.mxu1 %v3609_v59  ;;  %v4779_v57 = vld [vmem:[#allocation8 + $0x40] ss:$16 sps:$4 sm:$0xff]   ;;  %v4785_v59 = vld [vmem:[#allocation8 + $0x64] ss:$16 sps:$4 sm:$0xff]  }
  0xad   : > { %853 = vmatprep.mubr.bf16.mxu0 %v5791_v8  ;;  %926 = vmatprep.mubr.bf16.mxu1 %v5791_v8 }
  0xaf   : > { %948 = vmatpush1.bf16.msra.mxu0 %v3606_v63  ;;  %1021 = vmatpush1.bf16.msra.mxu1 %v3608_v0  ;;  %v4797_v63 = vld [vmem:[#allocation8 + $0x84] ss:$16 sps:$4 sm:$0xff]   ;;  %v4800_v0 = vld [vmem:[#allocation8 + $0x8c] ss:$16 sps:$4 sm:$0xff]  }
  0xb0   : > { %949 = vmatprep.subr.bf16.mxu0 %v3615_v2  ;;  %1022 = vmatprep.subr.bf16.mxu1 %v3617_v4  ;;  %v4807_v2 = vld [vmem:[#allocation8 + $0x88] ss:$16 sps:$4 sm:$0xff]   ;;  %v4812_v4 = vld [vmem:[#allocation8 + $0xac] ss:$16 sps:$4 sm:$0xff]  }
  0xb2   : > { %854 = vmatmul.mubr.bf16.gmra.mrb[12].mxu0 %v4628_v1  ;;  %927 = vmatmul.mubr.bf16.gmra.mrb[12].mxu1 %v4628_v1 }
  0xb3   : > { %950 = vmatpush1.bf16.msra.mxu0 %v3614_v9  ;;  %1023 = vmatpush1.bf16.msra.mxu1 %v3616_v10  ;;  %v4824_v9 = vld [vmem:[#allocation8 + $0xcc] ss:$16 sps:$4 sm:$0xff]   ;;  %v4827_v10 = vld [vmem:[#allocation8 + $0xc0] ss:$16 sps:$4 sm:$0xff]  }
  0xb4   : > { %951 = vmatprep.subr.bf16.mxu0 %v3623_v11  ;;  %1024 = vmatprep.subr.bf16.mxu1 %v3625_v12  ;;  %5929 = vst [vmem:[#allocation44_spill] sm:$0xff] %v4824_v9  ;;  %v4831_v11 = vld [vmem:[#allocation8 + $0xc8] ss:$16 sps:$4 sm:$0xff]   ;;  %v4833_v12 = vld [vmem:[#allocation8 + $0xe4] ss:$16 sps:$4 sm:$0xff]  }
  0xb5   : > { %969 = vmatprep.mubr.bf16.mxu0 %v5791_v8  ;;  %1042 = vmatprep.mubr.bf16.mxu1 %v5791_v8 }
  0xb7   : > { %952 = vmatpush1.bf16.msra.mxu0 %v3622_v13  ;;  %1025 = vmatpush1.bf16.msra.mxu1 %v3624_v15  ;;  %v4836_v13 = vld [vmem:[#allocation8 + $0xec] ss:$16 sps:$4 sm:$0xff]   ;;  %v4839_v15 = vld [vmem:[#allocation8 + $0xe0] ss:$16 sps:$4 sm:$0xff]  }
  0xb8   : > { %1375 = vmatprep.subr.bf16.mxu0 %v4634_v16  ;;  %1416 = vmatprep.subr.bf16.mxu1 %v4637_v17 }
  0xba   : > { %970 = vmatmul.mubr.bf16.vlgmr.msra.gmra.mrb[16].mxu0 %v4609_v14  ;;  %1043 = vmatmul.mubr.bf16.vlgmr.msra.gmra.mrb[16].mxu1 %v4609_v14  ;;  %v4667_v14 = vld [vmem:[#allocation6 + $0x40] ss:$16 sps:$4 sm:$0xff]  }
  0xbb   : > { %1376 = vmatpush1.bf16.msra.mxu0 %v4640_v18  ;;  %1417 = vmatpush1.bf16.msra.mxu1 %v4642_v19  ;;  %5905 = vst [vmem:[#allocation20_spill] sm:$0xff] %v4667_v14 }
  0xbc   : > { %1377 = vmatprep.subr.bf16.mxu0 %v4645_v20  ;;  %1418 = vmatprep.subr.bf16.mxu1 %v4648_v21 }
  0xbd   : > { %979 = vmatprep.mubr.bf16.mxu0 %v5791_v8  ;;  %1052 = vmatprep.mubr.bf16.mxu1 %v5791_v8 }
  0xbf   : > { %1378 = vmatpush1.bf16.msra.mxu0 %v4653_v22  ;;  %1419 = vmatpush1.bf16.msra.mxu1 %v4657_v23 }
  0xc0   : > { %1379 = vmatprep.subr.bf16.mxu0 %v4659_v24  ;;  %1420 = vmatprep.subr.bf16.mxu1 %v4663_v25 }
  0xc2   : > { %980 = vmatmul.mubr.bf16.gmra.mrb[20].mxu0 %v4614_v31  ;;  %1053 = vmatmul.mubr.bf16.gmra.mrb[20].mxu1 %v4614_v31  ;;  %v4695_v31 = vld [vmem:[#allocation6 + $0x80] ss:$16 sps:$4 sm:$0xff]  }
  0xc3   : > { %1380 = vmatpush1.bf16.msra.mxu0 %v4667_v14  ;;  %1421 = vmatpush1.bf16.msra.mxu1 %v4671_v26  ;;  %5913 = vst [vmem:[#allocation28_spill] sm:$0xff] %v4695_v31 }
  0xc4   : > { %1381 = vmatprep.subr.bf16.mxu0 %v4673_v27  ;;  %1422 = vmatprep.subr.bf16.mxu1 %v4676_v28 }
  0xc5   : > { %989 = vmatprep.mubr.bf16.mxu0 %v5791_v8  ;;  %1062 = vmatprep.mubr.bf16.mxu1 %v5791_v8 }
  0xc7   : > { %1382 = vmatpush1.bf16.msra.mxu0 %v4681_v29  ;;  %1423 = vmatpush1.bf16.msra.mxu1 %v4685_v30 }
  0xc8   : > { %1383 = vmatprep.subr.bf16.mxu0 %v4687_v32  ;;  %1424 = vmatprep.subr.bf16.mxu1 %v4691_v33 }
  0xca   : > { %990 = vmatmul.mubr.bf16.gmra.mrb[24].mxu0 %v4621_v48  ;;  %1063 = vmatmul.mubr.bf16.gmra.mrb[24].mxu1 %v4621_v48  ;;  %v4747_v48 = vld [vmem:[#allocation8 + $0xc] ss:$16 sps:$4 sm:$0xff]  }
  0xcb   : > { %1384 = vmatpush1.bf16.msra.mxu0 %v4695_v31  ;;  %1425 = vmatpush1.bf16.msra.mxu1 %v4699_v34  ;;  %5928 = vst [vmem:[#allocation43_spill] sm:$0xff] %v4747_v48 }
  0xcc   : > { %1385 = vmatprep.subr.bf16.mxu0 %v4701_v35  ;;  %1426 = vmatprep.subr.bf16.mxu1 %v4704_v36 }
  0xcd   : > { %999 = vmatprep.mubr.bf16.mxu0 %v5791_v8  ;;  %1072 = vmatprep.mubr.bf16.mxu1 %v5791_v8 }
  0xcf   : > { %1386 = vmatpush1.bf16.msra.mxu0 %v4709_v37  ;;  %1427 = vmatpush1.bf16.msra.mxu1 %v4713_v38 }
  0xd0   : > { %1387 = vmatprep.subr.bf16.mxu0 %v4715_v39  ;;  %1428 = vmatprep.subr.bf16.mxu1 %v4719_v40 }
  0xd2   : > { %1000 = vmatmul.mubr.bf16.gmra.mrb[28].mxu0 %v4628_v1  ;;  %1073 = vmatmul.mubr.bf16.gmra.mrb[28].mxu1 %v4628_v1  ;;  %v4803_v1 = vld [vmem:[#allocation8 + $0x80] ss:$16 sps:$4 sm:$0xff]  }
  0xd3   : > { %1388 = vmatpush1.bf16.msra.mxu0 %v4723_v41  ;;  %1429 = vmatpush1.bf16.msra.mxu1 %v4727_v42 }
  0xd4   : > { %1389 = vmatprep.subr.bf16.mxu0 %v4729_v43  ;;  %1430 = vmatprep.subr.bf16.mxu1 %v4732_v44 }
  0xd5   : > { %1407 = vmatprep.mubr.bf16.mxu0 %v5791_v8  ;;  %1448 = vmatprep.mubr.bf16.mxu1 %v5791_v8 }
  0xd7   : > { %1390 = vmatpush1.bf16.msra.mxu0 %v4737_v45  ;;  %1431 = vmatpush1.bf16.msra.mxu1 %v4741_v46 }
  0xd8   : > { %1626 = vmatprep.subr.bf16.mxu0 %v4743_v47  ;;  %1667 = vmatprep.subr.bf16.mxu1 %v4747_v48 }
  0xda   : > { %1408 = vmatmul.mubr.bf16.vlgmr.msra.gmra.mrb[32].mxu0 %v5791_v8  ;;  %1449 = vmatmul.mubr.bf16.vlgmr.msra.gmra.mrb[32].mxu1 %v5791_v8 }
  0xdb   : > { %1627 = vmatpush1.bf16.msra.mxu0 %v4751_v49  ;;  %1668 = vmatpush1.bf16.msra.mxu1 %v4755_v50 }
  0xdc   : > { %1628 = vmatprep.subr.bf16.mxu0 %v4757_v51  ;;  %1669 = vmatprep.subr.bf16.mxu1 %v4760_v52 }
  0xdd   : > { %1658 = vmatprep.mubr.bf16.mxu0 %v5791_v8  ;;  %1699 = vmatprep.mubr.bf16.mxu1 %v5791_v8  ;;  %v4843_v8 = vld [vmem:[#allocation8 + $0xe8] ss:$16 sps:$4 sm:$0xff]  }
  0xdf   : > { %1629 = vmatpush1.bf16.msra.mxu0 %v4765_v53  ;;  %1670 = vmatpush1.bf16.msra.mxu1 %v4769_v54 }
  0xe0   : > { %1630 = vmatprep.subr.bf16.mxu0 %v4771_v55  ;;  %1671 = vmatprep.subr.bf16.mxu1 %v4774_v56 }
  0xe3   : > { %1631 = vmatpush1.bf16.msra.mxu0 %v4779_v57  ;;  %1672 = vmatpush1.bf16.msra.mxu1 %v4783_v58 }
  0xe4   : > { %1632 = vmatprep.subr.bf16.mxu0 %v4785_v59  ;;  %1673 = vmatprep.subr.bf16.mxu1 %v4788_v60 }
  0xe7   : > { %1633 = vmatpush1.bf16.msra.mxu0 %v4791_v61  ;;  %1674 = vmatpush1.bf16.msra.mxu1 %v4795_v62 }
  0xe8   : > { %1634 = vmatprep.subr.bf16.mxu0 %v4797_v63  ;;  %1675 = vmatprep.subr.bf16.mxu1 %v4800_v0 }
  0xeb   : > { %1635 = vmatpush1.bf16.msra.mxu0 %v4803_v1  ;;  %1676 = vmatpush1.bf16.msra.mxu1 %v4807_v2 }
  0xec   : > { %1636 = vmatprep.subr.bf16.mxu0 %v4809_v3  ;;  %1677 = vmatprep.subr.bf16.mxu1 %v4812_v4 }
  0xef   : > { %1637 = vmatpush1.bf16.msra.mxu0 %v4815_v5  ;;  %1678 = vmatpush1.bf16.msra.mxu1 %v4819_v6 }
  0xf0   : > { %1638 = vmatprep.subr.bf16.mxu0 %v4821_v7  ;;  %1679 = vmatprep.subr.bf16.mxu1 %v4824_v9  ;;  %v5930_v9 = vmov 0  }
  0xf3   : > { %1639 = vmatpush1.bf16.msra.mxu0 %v4827_v10  ;;  %1680 = vmatpush1.bf16.msra.mxu1 %v4831_v11 }
  0xf4   : > { %1640 = vmatprep.subr.bf16.mxu0 %v4833_v12  ;;  %1681 = vmatprep.subr.bf16.mxu1 %v4836_v13 }
  0xf7   : > { %1641 = vmatpush1.bf16.msra.mxu0 %v4839_v15  ;;  %1682 = vmatpush1.bf16.msra.mxu1 %v4843_v8 }
  0xf8   : > { %1769 = vmatprep.subr.bf16.mxu0 %v4634_v16  ;;  %1810 = vmatprep.subr.bf16.mxu1 %v4637_v17 }
  0xfa   : > { %1659 = vmatmul.mubr.bf16.vlgmr.msra.gmra.mrb[36].mxu0 %v5930_v9  ;;  %1700 = vmatmul.mubr.bf16.vlgmr.msra.gmra.mrb[36].mxu1 %v5930_v9 }
  0xfb   : > { %1770 = vmatpush1.bf16.msra.mxu0 %v4640_v18  ;;  %1811 = vmatpush1.bf16.msra.mxu1 %v4642_v19 }
  0xfc   : > { %1771 = vmatprep.subr.bf16.mxu0 %v4645_v20  ;;  %1812 = vmatprep.subr.bf16.mxu1 %v4648_v21 }
  0xfd   : > { %1801 = vmatprep.mubr.bf16.mxu0 %v5930_v9  ;;  %1842 = vmatprep.mubr.bf16.mxu1 %v5930_v9 }
  0xff   : > { %1772 = vmatpush1.bf16.msra.mxu0 %v4653_v22  ;;  %1813 = vmatpush1.bf16.msra.mxu1 %v4657_v23 }
 0x100   : > { %1773 = vmatprep.subr.bf16.mxu0 %v4659_v24  ;;  %1814 = vmatprep.subr.bf16.mxu1 %v4663_v25 }
 0x103   : > { %1774 = vmatpush1.bf16.msra.mxu0 %v4667_v14  ;;  %1815 = vmatpush1.bf16.msra.mxu1 %v4671_v26 }
 0x104   : > { %1775 = vmatprep.subr.bf16.mxu0 %v4673_v27  ;;  %1816 = vmatprep.subr.bf16.mxu1 %v4676_v28 }
 0x107   : > { %1776 = vmatpush1.bf16.msra.mxu0 %v4681_v29  ;;  %1817 = vmatpush1.bf16.msra.mxu1 %v4685_v30 }
 0x108   : > { %1777 = vmatprep.subr.bf16.mxu0 %v4687_v32  ;;  %1818 = vmatprep.subr.bf16.mxu1 %v4691_v33 }
 0x10b   : > { %1778 = vmatpush1.bf16.msra.mxu0 %v4695_v31  ;;  %1819 = vmatpush1.bf16.msra.mxu1 %v4699_v34 }
 0x10c   : > { %1779 = vmatprep.subr.bf16.mxu0 %v4701_v35  ;;  %1820 = vmatprep.subr.bf16.mxu1 %v4704_v36 }
 0x10f   : > { %1780 = vmatpush1.bf16.msra.mxu0 %v4709_v37  ;;  %1821 = vmatpush1.bf16.msra.mxu1 %v4713_v38  ;;  %v407_v38 = vlaneseq }
 0x110   : > { %1781 = vmatprep.subr.bf16.mxu0 %v4715_v39  ;;  %1822 = vmatprep.subr.bf16.mxu1 %v4719_v40 }
 0x111   : > { %v4886_v39 = vshrl.u32 %v407_v38, 7 }
 0x113   : > { %1782 = vmatpush1.bf16.msra.mxu0 %v4723_v41  ;;  %1823 = vmatpush1.bf16.msra.mxu1 %v4727_v42  ;;  %v409_v40 = vsub.s32 0, %v4886_v39  ;;  %v4892_v42 = vld [vmem:[%s5785_s4] sm:$0xff] }
 0x114   : > { %1783 = vmatprep.subr.bf16.mxu0 %v4729_v43  ;;  %1824 = vmatprep.subr.bf16.mxu1 %v4732_v44  ;;  %v417_v44 = vsub.s32 2, %v4886_v39 }
 0x116   : > { %v4903_v38 = vrot.slane %v4892_v42, %v417_v44 }
 0x117   : > { %1784 = vmatpush1.bf16.msra.mxu0 %v4737_v45  ;;  %1825 = vmatpush1.bf16.msra.mxu1 %v4741_v46  ;;  %v421_v45 = vsub.s32 3, %v4886_v39  ;;  %v413_v46 = vsub.s32 1, %v4886_v39 }
 0x118   : > { %1861 = vmatprep.subr.bf16.mxu0 %v4743_v47  ;;  %1902 = vmatprep.subr.bf16.mxu1 %v4747_v48  ;;  %v4898_v47 = vrot.slane %v4892_v42, %v409_v40 }
 0x119   : > { %v4910_v37 = vrot.slane %v4892_v42, %v421_v45  ;;  %v4913_v36 = vrot.slane %v4892_v42, %v413_v46 }
 0x16d   : > { %v4900_v48 = vpop.f32.mrb[0].mxu0  ;;  %v4907_v41 = vpop.f32.mrb[0].mxu1 }
 0x16e   : > { %v4905_v43 = vpop.f32.mrb[1].mxu0  ;;  %v4915_v34 = vpop.f32.mrb[1].mxu1 }
 0x16f   : > { %v829_v35 = vpop.f32.mrb[2].mxu0  ;;  %v902_v33 = vpop.f32.mrb[2].mxu1 }
 0x170   : > { %v4918_v40 = vadd.f32 %v829_v35, %v4898_v47  ;;  %v831_v31 = vpop.f32.mrb[3].mxu0  ;;  %v4924_v32 = vadd.f32 %v902_v33, %v4903_v38  ;;  %v904_v30 = vpop.f32.mrb[3].mxu1 }
 0x171   : > { %v4921_v44 = vadd.f32 %v831_v31, %v4913_v36  ;;  %v4927_v45 = vadd.f32 %v904_v30, %v4910_v37 }
 0x172   : > { %5931 = vst [vmem:[#allocation45_spill] sm:$0xff] %v4918_v40  ;;  %5933 = vst [vmem:[#allocation47_spill] sm:$0xff] %v4924_v32 }
 0x173   : > { %5932 = vst [vmem:[#allocation46_spill] sm:$0xff] %v4921_v44  ;;  %5934 = vst [vmem:[#allocation48_spill] sm:$0xff] %v4927_v45 }
 0x175   : > { %v835_v46 = vpop.f32.mrb[4].mxu0  ;;  %v908_v27 = vpop.f32.mrb[4].mxu1 }
 0x176   : > { %v4930_v29 = vadd.f32 %v835_v46, %v4898_v47  ;;  %v837_v28 = vpop.f32.mrb[5].mxu0  ;;  %v4936_v31 = vadd.f32 %v908_v27, %v4903_v38  ;;  %v910_v44 = vpop.f32.mrb[5].mxu1 }
 0x177   : > { %v4933_v35 = vadd.f32 %v837_v28, %v4913_v36  ;;  %v839_v40 = vpop.f32.mrb[6].mxu0  ;;  %v4942_v30 = vadd.f32 %v910_v44, %v4910_v37  ;;  %v912_v45 = vpop.f32.mrb[6].mxu1 }
 0x178   : > { %5935 = vst [vmem:[#allocation49_spill] sm:$0xff] %v4930_v29  ;;  %5937 = vst [vmem:[#allocation51_spill] sm:$0xff] %v4936_v31  ;;  %v4939_v33 = vadd.f32 %v839_v40, %v4898_v47  ;;  %v841_v32 = vpop.f32.mrb[7].mxu0  ;;  %v4948_v29 = vadd.f32 %v912_v45, %v4903_v38  ;;  %v914_v28 = vpop.f32.mrb[7].mxu1 }
 0x179   : > { %5936 = vst [vmem:[#allocation50_spill] sm:$0xff] %v4933_v35  ;;  %5939 = vst [vmem:[#allocation53_spill] sm:$0xff] %v4942_v30  ;;  %v4945_v46 = vadd.f32 %v841_v32, %v4913_v36  ;;  %v4951_v35 = vadd.f32 %v914_v28, %v4910_v37 }
 0x17a   : > { %5938 = vst [vmem:[#allocation52_spill] sm:$0xff] %v4939_v33  ;;  %5941 = vst [vmem:[#allocation55_spill] sm:$0xff] %v4948_v29 }
 0x17b   : > { %5940 = vst [vmem:[#allocation54_spill] sm:$0xff] %v4945_v46  ;;  %5942 = vst [vmem:[#allocation56_spill] sm:$0xff] %v4951_v35 }
 0x17d   : > { %v845_v27 = vpop.f32.mrb[8].mxu0  ;;  %v918_v33 = vpop.f32.mrb[8].mxu1 }
 0x17e   : > { %v4954_v31 = vadd.f32 %v845_v27, %v4898_v47  ;;  %v847_v40 = vpop.f32.mrb[9].mxu0  ;;  %v4960_v32 = vadd.f32 %v918_v33, %v4903_v38  ;;  %v920_v46 = vpop.f32.mrb[9].mxu1 }
 0x17f   : > { %v4957_v44 = vadd.f32 %v847_v40, %v4913_v36  ;;  %v849_v30 = vpop.f32.mrb[10].mxu0  ;;  %v4966_v28 = vadd.f32 %v920_v46, %v4910_v37  ;;  %v922_v35 = vpop.f32.mrb[10].mxu1 }
 0x180   : > { %5943 = vst [vmem:[#allocation57_spill] sm:$0xff] %v4954_v31  ;;  %5945 = vst [vmem:[#allocation59_spill] sm:$0xff] %v4960_v32  ;;  %v4963_v45 = vadd.f32 %v849_v30, %v4898_v47  ;;  %v851_v29 = vpop.f32.mrb[11].mxu0  ;;  %v4972_v31 = vadd.f32 %v922_v35, %v4903_v38  ;;  %v924_v40 = vpop.f32.mrb[11].mxu1 }
 0x181   : > { %5944 = vst [vmem:[#allocation58_spill] sm:$0xff] %v4957_v44  ;;  %5947 = vst [vmem:[#allocation61_spill] sm:$0xff] %v4966_v28  ;;  %v4969_v27 = vadd.f32 %v851_v29, %v4913_v36  ;;  %v4975_v44 = vadd.f32 %v924_v40, %v4910_v37  ;;  %v433_v40 = vsub.s32 6, %v4886_v39 }
 0x182   : > { %5946 = vst [vmem:[#allocation60_spill] sm:$0xff] %v4963_v45  ;;  %5949 = vst [vmem:[#allocation63_spill] sm:$0xff] %v4972_v31  ;;  %v425_v45 = vsub.s32 4, %v4886_v39 }
 0x183   : > { %5948 = vst [vmem:[#allocation62_spill] sm:$0xff] %v4969_v27  ;;  %5950 = vst [vmem:[#allocation64_spill] sm:$0xff] %v4975_v44  ;;  %v429_v27 = vsub.s32 5, %v4886_v39 }
 0x185   : > { %v855_v33 = vpop.f32.mrb[12].mxu0  ;;  %v928_v46 = vpop.f32.mrb[12].mxu1 }
 0x186   : > { %v4978_v32 = vadd.f32 %v855_v33, %v4898_v47  ;;  %v857_v30 = vpop.f32.mrb[13].mxu0  ;;  %v4986_v35 = vadd.f32 %v928_v46, %v4903_v38  ;;  %v930_v31 = vpop.f32.mrb[13].mxu1 }
 0x187   : > { %v4982_v28 = vadd.f32 %v857_v30, %v4913_v36  ;;  %v859_v29 = vpop.f32.mrb[14].mxu0  ;;  %v932_v26 = vpop.f32.mrb[14].mxu1  ;;  %v437_v30 = vsub.s32 7, %v4886_v39 }
 0x188   : > { %5951 = vst [vmem:[#allocation65_spill] sm:$0xff] %v4978_v32  ;;  %5953 = vst [vmem:[#allocation67_spill] sm:$0xff] %v4986_v35  ;;  %v4990_v44 = vadd.f32 %v859_v29, %v4898_v47  ;;  %v861_v33 = vpop.f32.mrb[15].mxu0  ;;  %v4993_v32 = vadd.f32 %v930_v31, %v4910_v37  ;;  %v5000_v14 = vadd.f32 %v932_v26, %v4903_v38  ;;  %v934_v46 = vpop.f32.mrb[15].mxu1 }
 0x189   : > { %5952 = vst [vmem:[#allocation66_spill] sm:$0xff] %v4982_v28  ;;  %v4997_v28 = vadd.f32 %v861_v33, %v4913_v36  ;;  %v5003_v35 = vrot.slane %v4892_v42, %v425_v45  ;;  %v5006_v29 = vadd.f32 %v934_v46, %v4910_v37  ;;  %v5012_v31 = vrot.slane %v4892_v42, %v433_v40 }
 0x18a   : > { %5954 = vst [vmem:[#allocation68_spill] sm:$0xff] %v4990_v44  ;;  %5955 = vst [vmem:[#allocation69_spill] sm:$0xff] %v4993_v32  ;;  %v5009_v44 = vrot.slane %v4892_v42, %v429_v27  ;;  %v5015_v39 = vrot.slane %v4892_v42, %v437_v30 }
 0x18b   : > { %5956 = vst [vmem:[#allocation70_spill] sm:$0xff] %v4997_v28  ;;  %5957 = vst [vmem:[#allocation71_spill] sm:$0xff] %v5000_v14 }
 0x18c   : > { %5958 = vst [vmem:[#allocation72_spill] sm:$0xff] %v5006_v29 }
 0x18d   : > { %v971_v33 = vpop.f32.mrb[16].mxu0  ;;  %v1044_v14 = vpop.f32.mrb[16].mxu1 }
 0x18e   : > { %v5018_v26 = vadd.f32 %v971_v33, %v5003_v35  ;;  %v973_v28 = vpop.f32.mrb[17].mxu0  ;;  %v5024_v29 = vadd.f32 %v1044_v14, %v5012_v31  ;;  %v1046_v27 = vpop.f32.mrb[17].mxu1 }
 0x18f   : > { %v5021_v45 = vadd.f32 %v973_v28, %v5009_v44  ;;  %v975_v46 = vpop.f32.mrb[18].mxu0  ;;  %v5030_v42 = vadd.f32 %v1046_v27, %v5015_v39  ;;  %v1048_v30 = vpop.f32.mrb[18].mxu1 }
 0x190   : > { %5959 = vst [vmem:[#allocation73_spill] sm:$0xff] %v5018_v26  ;;  %5961 = vst [vmem:[#allocation75_spill] sm:$0xff] %v5024_v29  ;;  %v5027_v40 = vadd.f32 %v975_v46, %v5003_v35  ;;  %v977_v32 = vpop.f32.mrb[19].mxu0  ;;  %v5036_v26 = vadd.f32 %v1048_v30, %v5012_v31  ;;  %v1050_v28 = vpop.f32.mrb[19].mxu1 }
 0x191   : > { %5960 = vst [vmem:[#allocation74_spill] sm:$0xff] %v5021_v45  ;;  %5963 = vst [vmem:[#allocation77_spill] sm:$0xff] %v5030_v42  ;;  %v5033_v33 = vadd.f32 %v977_v32, %v5009_v44  ;;  %v5039_v45 = vadd.f32 %v1050_v28, %v5015_v39 }
 0x192   : > { %5962 = vst [vmem:[#allocation76_spill] sm:$0xff] %v5027_v40  ;;  %5965 = vst [vmem:[#allocation79_spill] sm:$0xff] %v5036_v26 }
 0x193   : > { %5964 = vst [vmem:[#allocation78_spill] sm:$0xff] %v5033_v33  ;;  %5966 = vst [vmem:[#allocation80_spill] sm:$0xff] %v5039_v45 }
 0x195   : > { %v981_v14 = vpop.f32.mrb[20].mxu0  ;;  %v1054_v40 = vpop.f32.mrb[20].mxu1 }
 0x196   : > { %v5042_v29 = vadd.f32 %v981_v14, %v5003_v35  ;;  %v983_v46 = vpop.f32.mrb[21].mxu0  ;;  %v5048_v32 = vadd.f32 %v1054_v40, %v5012_v31  ;;  %v1056_v33 = vpop.f32.mrb[21].mxu1 }
 0x197   : > { %v5045_v27 = vadd.f32 %v983_v46, %v5009_v44  ;;  %v985_v42 = vpop.f32.mrb[22].mxu0  ;;  %v5054_v28 = vadd.f32 %v1056_v33, %v5015_v39  ;;  %v1058_v45 = vpop.f32.mrb[22].mxu1 }
 0x198   : > { %5967 = vst [vmem:[#allocation81_spill] sm:$0xff] %v5042_v29  ;;  %5969 = vst [vmem:[#allocation83_spill] sm:$0xff] %v5048_v32  ;;  %v5051_v30 = vadd.f32 %v985_v42, %v5003_v35  ;;  %v987_v26 = vpop.f32.mrb[23].mxu0  ;;  %v5060_v29 = vadd.f32 %v1058_v45, %v5012_v31  ;;  %v1060_v46 = vpop.f32.mrb[23].mxu1 }
 0x199   : > { %5968 = vst [vmem:[#allocation82_spill] sm:$0xff] %v5045_v27  ;;  %5971 = vst [vmem:[#allocation85_spill] sm:$0xff] %v5054_v28  ;;  %v5057_v14 = vadd.f32 %v987_v26, %v5009_v44  ;;  %v5063_v27 = vadd.f32 %v1060_v46, %v5015_v39 }
 0x19a   : > { %5970 = vst [vmem:[#allocation84_spill] sm:$0xff] %v5051_v30  ;;  %5973 = vst [vmem:[#allocation87_spill] sm:$0xff] %v5060_v29 }
 0x19b   : > { %5972 = vst [vmem:[#allocation86_spill] sm:$0xff] %v5057_v14  ;;  %5974 = vst [vmem:[#allocation88_spill] sm:$0xff] %v5063_v27 }
 0x19d   : > { %v991_v40 = vpop.f32.mrb[24].mxu0  ;;  %v1064_v30 = vpop.f32.mrb[24].mxu1 }
 0x19e   : > { %v5066_v32 = vadd.f32 %v991_v40, %v5003_v35  ;;  %v993_v42 = vpop.f32.mrb[25].mxu0  ;;  %v5072_v26 = vadd.f32 %v1064_v30, %v5012_v31  ;;  %v1066_v14 = vpop.f32.mrb[25].mxu1 }
 0x19f   : > { %v5069_v33 = vadd.f32 %v993_v42, %v5009_v44  ;;  %v995_v28 = vpop.f32.mrb[26].mxu0  ;;  %v5078_v46 = vadd.f32 %v1066_v14, %v5015_v39  ;;  %v1068_v27 = vpop.f32.mrb[26].mxu1 }
 0x1a0   : > { %5975 = vst [vmem:[#allocation89_spill] sm:$0xff] %v5066_v32  ;;  %5977 = vst [vmem:[#allocation91_spill] sm:$0xff] %v5072_v26  ;;  %v5075_v45 = vadd.f32 %v995_v28, %v5003_v35  ;;  %v997_v29 = vpop.f32.mrb[27].mxu0  ;;  %v5084_v32 = vadd.f32 %v1068_v27, %v5012_v31  ;;  %v1070_v42 = vpop.f32.mrb[27].mxu1 }
 0x1a1   : > { %5976 = vst [vmem:[#allocation90_spill] sm:$0xff] %v5069_v33  ;;  %5979 = vst [vmem:[#allocation93_spill] sm:$0xff] %v5078_v46  ;;  %v5081_v40 = vadd.f32 %v997_v29, %v5009_v44  ;;  %v5087_v33 = vadd.f32 %v1070_v42, %v5015_v39 }
 0x1a2   : > { %5978 = vst [vmem:[#allocation92_spill] sm:$0xff] %v5075_v45  ;;  %5981 = vst [vmem:[#allocation95_spill] sm:$0xff] %v5084_v32 }
 0x1a3   : > { %5980 = vst [vmem:[#allocation94_spill] sm:$0xff] %v5081_v40  ;;  %5982 = vst [vmem:[#allocation96_spill] sm:$0xff] %v5087_v33 }
 0x1a5   : > { %v1001_v30 = vpop.f32.mrb[28].mxu0  ;;  %v1074_v45 = vpop.f32.mrb[28].mxu1 }
 0x1a6   : > { %v5090_v26 = vadd.f32 %v1001_v30, %v5003_v35  ;;  %v1003_v28 = vpop.f32.mrb[29].mxu0  ;;  %v5096_v29 = vadd.f32 %v1074_v45, %v5012_v31  ;;  %v1076_v40 = vpop.f32.mrb[29].mxu1  ;;  %v826_v30 = vadd.f32 %v4900_v48, %v4898_v47  ;;  %v901_v45 = vadd.f32 %v4915_v34, %v4910_v37 }
 0x1a7   : > { %v5093_v14 = vadd.f32 %v1003_v28, %v5009_v44  ;;  %v1005_v46 = vpop.f32.mrb[30].mxu0  ;;  %v5099_v32 = vadd.f32 %v1076_v40, %v5015_v39  ;;  %v1078_v42 = vpop.f32.mrb[30].mxu1  ;;  %v899_v28 = vadd.f32 %v4907_v41, %v4903_v38 }
 0x1a8   : > { %5983 = vst [vmem:[#allocation97_spill] sm:$0xff] %v5090_v26  ;;  %5985 = vst [vmem:[#allocation99_spill] sm:$0xff] %v5096_v29  ;;  %v1007_v27 = vpop.f32.mrb[31].mxu0  ;;  %v1080_v33 = vpop.f32.mrb[31].mxu1  ;;  %v828_v26 = vadd.f32 %v4905_v43, %v4913_v36 }
 0x1a9   : > { %5984 = vst [vmem:[#allocation98_spill] sm:$0xff] %v5093_v14  ;;  %5986 = vst [vmem:[#allocation100_spill] sm:$0xff] %v5099_v32 }
 0x1ad   : > { %v1409_v14 = vpop.f32.mrb[32].mxu0  ;;  %v1450_v25 = vpop.f32.mrb[32].mxu1 }
 0x1ae   : > { %v1457_v29 = vadd.f32 %v1409_v14, %v826_v30  ;;  %v1411_v24 = vpop.f32.mrb[33].mxu0  ;;  %v1459_v40 = vadd.f32 %v1450_v25, %v899_v28  ;;  %v1452_v23 = vpop.f32.mrb[33].mxu1  ;;  %v1081_v30 = vadd.f32 %v1080_v33, %v5015_v39 }
 0x1af   : > { %v1458_v32 = vadd.f32 %v1411_v24, %v828_v26  ;;  %v1413_v22 = vpop.f32.mrb[34].mxu0  ;;  %v1460_v20 = vadd.f32 %v1452_v23, %v901_v45  ;;  %v1454_v48 = vpop.f32.mrb[34].mxu1 }
 0x1b0   : > { %v3690_v21 = vmul.f32 -1.442695, %v1457_v29  ;;  %v1414_v47 = vpop.f32.mrb[35].mxu0  ;;  %v1455_v36 = vpop.f32.mrb[35].mxu1 }
 0x1b1   : > { %v3691_v19 = vmul.f32 -1.442695, %v1458_v32  ;;  %v3692_v41 = vmul.f32 -1.442695, %v1460_v20  ;;  %v1006_v32 = vadd.f32 %v1005_v46, %v5003_v35  ;;  %v1079_v20 = vadd.f32 %v1078_v42, %v5012_v31 }
 0x1b2   : > { %3918 = vpow2.f32 %v3690_v21 }
 0x1b3   : > { %3920 = vpow2.f32 %v3691_v19  ;;  %v1008_v19 = vadd.f32 %v1007_v27, %v5009_v44 }
 0x1b4   : > { %3922 = vpow2.f32 %v3692_v41 }
 0x1b5   : > { %3924 = vtanh.f32 %v1459_v40 }
 0x1bc   : > { %v3919_v43 = vpop.eup %3918 }
 0x1bd   : > { %v3921_v38 = vpop.eup %3920  ;;  %v1715_v18 = vadd.f32 1.0, %v3919_v43 }
 0x1be   : > { %v1721_v34 = vadd.f32 1.0, %v3921_v38  ;;  %v3923_v24 = vpop.eup %3922 }
 0x1bf   : > { %3926 = vrcp.f32 %v1715_v18  ;;  %v3925_v25 = vpop.eup %3924  ;;  %v1728_v26 = vadd.f32 1.0, %v3923_v24 }
 0x1c0   : > { %3928 = vrcp.f32 %v1721_v34 }
 0x1c1   : > { %3930 = vrcp.f32 %v1728_v26 }
 0x1c9   : > { %v3927_v22 = vpop.eup %3926 }
 0x1ca   : > { %v3929_v37 = vpop.eup %3928  ;;  %v1732_v23 = vmul.f32 %v3927_v22, %v3925_v25 }
 0x1cb   : > { %v1731_v14 = vmul.f32 0.0, %v3929_v37  ;;  %v3931_v39 = vpop.eup %3930 }
 0x1cd   : > { %v5112_v21 = vadd.f32 %v1732_v23, %v1731_v14  ;;  %v1660_v29 = vpop.f32.mrb[36].mxu0  ;;  %v1701_v28 = vpop.f32.mrb[36].mxu1 }
 0x1ce   : > { %v1708_v18 = vadd.f32 %v1660_v29, %v1006_v32  ;;  %v1662_v45 = vpop.f32.mrb[37].mxu0  ;;  %v1710_v40 = vadd.f32 %v1701_v28, %v1079_v20  ;;  %v1703_v48 = vpop.f32.mrb[37].mxu1 }
 0x1cf   : > { %3932 = vtanh.f32 %v5112_v21  ;;  %v1709_v47 = vadd.f32 %v1662_v45, %v1008_v19  ;;  %v1664_v35 = vpop.f32.mrb[38].mxu0  ;;  %v1711_v44 = vadd.f32 %v1703_v48, %v1081_v30  ;;  %v1705_v31 = vpop.f32.mrb[38].mxu1  ;;  %v5987_v30 = vld [vmem:[#allocation44_spill] sm:$0xff]  ;;  %v5989_v48 = vld [vmem:[#allocation13_spill] sm:$0xff] }
 0x1d0   : > { %v3693_v46 = vmul.f32 -1.442695, %v1708_v18  ;;  %v1665_v27 = vpop.f32.mrb[39].mxu0  ;;  %v1706_v36 = vpop.f32.mrb[39].mxu1  ;;  %v5990_v35 = vld [vmem:[#allocation14_spill] sm:$0xff]  ;;  %v5996_v31 = vld [vmem:[#allocation20_spill] sm:$0xff] }
 0x1d1   : > { %v3694_v42 = vmul.f32 -1.442695, %v1709_v47  ;;  %v3695_v41 = vmul.f32 -1.442695, %v1711_v44  ;;  %v5988_v47 = vld [vmem:[#allocation12_spill] sm:$0xff]  ;;  %v5993_v27 = vld [vmem:[#allocation17_spill] sm:$0xff] }
 0x1d2   : > { %3934 = vpow2.f32 %v3693_v46  ;;  %v5991_v46 = vld [vmem:[#allocation15_spill] sm:$0xff]  ;;  %v5992_v44 = vld [vmem:[#allocation16_spill] sm:$0xff]  ;;  %v5998_v36 = vld [vmem:[#allocation22_spill] sm:$0xff] }
 0x1d3   : > { %3936 = vpow2.f32 %v3694_v42  ;;  %v5997_v42 = vld [vmem:[#allocation21_spill] sm:$0xff] }
 0x1d4   : > { %3938 = vpow2.f32 %v3695_v41  ;;  %v6001_v41 = vld [vmem:[#allocation25_spill] sm:$0xff] }
 0x1d5   : > { %3940 = vtanh.f32 %v1710_v40 }
 0x1d9   : > { %v3933_v33 = vpop.eup %3932 }
 0x1da   : > { %v1735_v43 = vmul.f32 %v3933_v33, %v3931_v39  ;;  %v5999_v39 = vld [vmem:[#allocation23_spill] sm:$0xff]  ;;  %v6000_v33 = vld [vmem:[#allocation24_spill] sm:$0xff] }
 0x1dc   : > { %v3935_v38 = vpop.eup %3934  ;;  %1760 = vst [vmem:[%s5118_s30] sm:$0xff] %v1735_v43  ;;  %v1768_v34 = vpack.c.bf16 %v1735_v43, %v1735_v43  ;;  %v6002_v43 = vld [vmem:[#allocation26_spill] sm:$0xff] }
 0x1dd   : > { %v3937_v24 = vpop.eup %3936  ;;  %v1739_v25 = vadd.f32 1.0, %v3935_v38  ;;  %v6003_v38 = vld [vmem:[#allocation27_spill] sm:$0xff] }
 0x1de   : > { %v1745_v22 = vadd.f32 1.0, %v3937_v24  ;;  %1802 = vmatmul.mubr.bf16.vlgmr.msra.gmra.mrb[40].mxu0 %v1768_v34  ;;  %1843 = vmatmul.mubr.bf16.vlgmr.msra.gmra.mrb[40].mxu1 %v1768_v34  ;;  %v3939_v37 = vpop.eup %3938  ;;  %v6004_v34 = vld [vmem:[#allocation28_spill] sm:$0xff]  ;;  %v6005_v24 = vld [vmem:[#allocation29_spill] sm:$0xff] }
 0x1df   : > { %3942 = vrcp.f32 %v1739_v25  ;;  %1862 = vmatpush1.bf16.msra.mxu0 %v4751_v49  ;;  %1903 = vmatpush1.bf16.msra.mxu1 %v4755_v50  ;;  %v3941_v23 = vpop.eup %3940  ;;  %v1752_v19 = vadd.f32 1.0, %v3939_v37  ;;  %v6006_v25 = vld [vmem:[#allocation30_spill] sm:$0xff]  ;;  %v6008_v37 = vld [vmem:[#allocation32_spill] sm:$0xff] }
 0x1e0   : > { %3944 = vrcp.f32 %v1745_v22  ;;  %1863 = vmatprep.subr.bf16.mxu0 %v4757_v51  ;;  %1904 = vmatprep.subr.bf16.mxu1 %v4760_v52  ;;  %v6007_v22 = vld [vmem:[#allocation31_spill] sm:$0xff] }
 0x1e1   : > { %1893 = vmatprep.mubr.bf16.mxu0 %v5930_v9  ;;  %1934 = vmatprep.mubr.bf16.mxu1 %v5930_v9  ;;  %3946 = vrcp.f32 %v1752_v19  ;;  %v6013_v19 = vld [vmem:[#allocation37_spill] sm:$0xff] }
 0x1e3   : > { %1864 = vmatpush1.bf16.msra.mxu0 %v4765_v53  ;;  %1905 = vmatpush1.bf16.msra.mxu1 %v4769_v54 }
 0x1e4   : > { %1865 = vmatprep.subr.bf16.mxu0 %v4771_v55  ;;  %1906 = vmatprep.subr.bf16.mxu1 %v4774_v56 }
 0x1e7   : > { %1866 = vmatpush1.bf16.msra.mxu0 %v4779_v57  ;;  %1907 = vmatpush1.bf16.msra.mxu1 %v4783_v58 }
 0x1e8   : > { %1867 = vmatprep.subr.bf16.mxu0 %v4785_v59  ;;  %1908 = vmatprep.subr.bf16.mxu1 %v4788_v60 }
 0x1e9   : > { %v3943_v26 = vpop.eup %3942 }
 0x1ea   : > { %v3945_v14 = vpop.eup %3944  ;;  %v1756_v32 = vmul.f32 %v3943_v26, %v3941_v23  ;;  %v6009_v23 = vld [vmem:[#allocation33_spill] sm:$0xff]  ;;  %v6010_v26 = vld [vmem:[#allocation34_spill] sm:$0xff] }
 0x1eb   : > { %v1755_v20 = vmul.f32 0.0, %v3945_v14  ;;  %1868 = vmatpush1.bf16.msra.mxu0 %v4791_v61  ;;  %1909 = vmatpush1.bf16.msra.mxu1 %v4795_v62  ;;  %v3947_v18 = vpop.eup %3946  ;;  %v6011_v14 = vld [vmem:[#allocation35_spill] sm:$0xff] }
 0x1ec   : > { %1869 = vmatprep.subr.bf16.mxu0 %v4797_v63  ;;  %1910 = vmatprep.subr.bf16.mxu1 %v4800_v0 }
 0x1ed   : > { %v5139_v29 = vadd.f32 %v1756_v32, %v1755_v20  ;;  %v6012_v32 = vld [vmem:[#allocation36_spill] sm:$0xff]  ;;  %v6014_v20 = vld [vmem:[#allocation38_spill] sm:$0xff] }
 0x1ef   : > { %3948 = vtanh.f32 %v5139_v29  ;;  %1870 = vmatpush1.bf16.msra.mxu0 %v4803_v1  ;;  %1911 = vmatpush1.bf16.msra.mxu1 %v4807_v2 }
 0x1f0   : > { %1871 = vmatprep.subr.bf16.mxu0 %v4809_v3  ;;  %1912 = vmatprep.subr.bf16.mxu1 %v4812_v4 }
 0x1f3   : > { %1872 = vmatpush1.bf16.msra.mxu0 %v4815_v5  ;;  %1913 = vmatpush1.bf16.msra.mxu1 %v4819_v6 }
 0x1f4   : > { %1873 = vmatprep.subr.bf16.mxu0 %v4821_v7  ;;  %1914 = vmatprep.subr.bf16.mxu1 %v5987_v30 }
 0x1f7   : > { %1874 = vmatpush1.bf16.msra.mxu0 %v4827_v10  ;;  %1915 = vmatpush1.bf16.msra.mxu1 %v4831_v11 }
 0x1f8   : > { %1875 = vmatprep.subr.bf16.mxu0 %v4833_v12  ;;  %1916 = vmatprep.subr.bf16.mxu1 %v4836_v13 }
 0x1f9   : > { %v3949_v28 = vpop.eup %3948 }
 0x1fa   : > { %v1759_v45 = vmul.f32 %v3949_v28, %v3947_v18  ;;  %v6015_v18 = vld [vmem:[#allocation39_spill] sm:$0xff]  ;;  %v6016_v28 = vld [vmem:[#allocation40_spill] sm:$0xff] }
 0x1fb   : > { %1876 = vmatpush1.bf16.msra.mxu0 %v4839_v15  ;;  %1917 = vmatpush1.bf16.msra.mxu1 %v4843_v8 }
 0x1fc   : > { %3696 = vst [vmem:[%s5118_s30 + $0x78] sm:$0xff] %v1759_v45  ;;  %v1860_v40 = vpack.c.bf16 %v1759_v45, %v1759_v45  ;;  %2005 = vmatprep.subr.bf16.mxu0 %v4634_v16  ;;  %2046 = vmatprep.subr.bf16.mxu1 %v4637_v17  ;;  %v5994_v16 = vld [vmem:[#allocation18_spill] sm:$0xff]  ;;  %v5995_v17 = vld [vmem:[#allocation19_spill] sm:$0xff]  ;;  %v6017_v45 = vld [vmem:[#allocation41_spill] sm:$0xff] }
 0x1fe   : > { %1894 = vmatmul.mubr.bf16.vlgmr.msra.gmra.mrb[44].mxu0 %v1860_v40  ;;  %1935 = vmatmul.mubr.bf16.vlgmr.msra.gmra.mrb[44].mxu1 %v1860_v40  ;;  %v6018_v40 = vld [vmem:[#allocation42_spill] sm:$0xff] }
 0x1ff   : > { %2006 = vmatpush1.bf16.msra.mxu0 %v5988_v47  ;;  %2047 = vmatpush1.bf16.msra.mxu1 %v5989_v48  ;;  %v6019_v47 = vld [vmem:[#allocation43_spill] sm:$0xff] }
 0x200   : > { %2007 = vmatprep.subr.bf16.mxu0 %v5990_v35  ;;  %2048 = vmatprep.subr.bf16.mxu1 %v5991_v46  ;;  %v6020_v46 = vld [vmem:[#allocation45_spill] sm:$0xff] }
 0x201   : > { %2037 = vmatprep.mubr.bf16.mxu0 %v5930_v9  ;;  %2078 = vmatprep.mubr.bf16.mxu1 %v5930_v9 }
 0x203   : > { %2008 = vmatpush1.bf16.msra.mxu0 %v5992_v44  ;;  %2049 = vmatpush1.bf16.msra.mxu1 %v5993_v27  ;;  %v6021_v27 = vld [vmem:[#allocation47_spill] sm:$0xff] }
 0x204   : > { %2009 = vmatprep.subr.bf16.mxu0 %v5994_v16  ;;  %2050 = vmatprep.subr.bf16.mxu1 %v5995_v17 }
 0x207   : > { %2010 = vmatpush1.bf16.msra.mxu0 %v5996_v31  ;;  %2051 = vmatpush1.bf16.msra.mxu1 %v5997_v42  ;;  %v6022_v42 = vld [vmem:[#allocation46_spill] sm:$0xff] }
 0x208   : > { %2011 = vmatprep.subr.bf16.mxu0 %v5998_v36  ;;  %2052 = vmatprep.subr.bf16.mxu1 %v5999_v39  ;;  %v6023_v39 = vld [vmem:[#allocation48_spill] sm:$0xff] }
 0x20b   : > { %2012 = vmatpush1.bf16.msra.mxu0 %v6000_v33  ;;  %2053 = vmatpush1.bf16.msra.mxu1 %v6001_v41 }
 0x20c   : > { %2013 = vmatprep.subr.bf16.mxu0 %v6002_v43  ;;  %2054 = vmatprep.subr.bf16.mxu1 %v6003_v38 }
 0x20f   : > { %2014 = vmatpush1.bf16.msra.mxu0 %v6004_v34  ;;  %2055 = vmatpush1.bf16.msra.mxu1 %v6005_v24 }
 0x210   : > { %2015 = vmatprep.subr.bf16.mxu0 %v6006_v25  ;;  %2056 = vmatprep.subr.bf16.mxu1 %v6007_v22 }
 0x213   : > { %2016 = vmatpush1.bf16.msra.mxu0 %v6008_v37  ;;  %2057 = vmatpush1.bf16.msra.mxu1 %v6009_v23 }
 0x214   : > { %2017 = vmatprep.subr.bf16.mxu0 %v6010_v26  ;;  %2058 = vmatprep.subr.bf16.mxu1 %v6011_v14 }
 0x217   : > { %2018 = vmatpush1.bf16.msra.mxu0 %v6012_v32  ;;  %2059 = vmatpush1.bf16.msra.mxu1 %v6013_v19 }
 0x218   : > { %2019 = vmatprep.subr.bf16.mxu0 %v6014_v20  ;;  %2060 = vmatprep.subr.bf16.mxu1 %v6015_v18 }
 0x21b   : > { %2020 = vmatpush1.bf16.msra.mxu0 %v6016_v28  ;;  %2061 = vmatpush1.bf16.msra.mxu1 %v6017_v45 }
 0x21c   : > { %2097 = vmatprep.subr.bf16.mxu0 %v6018_v40  ;;  %2138 = vmatprep.subr.bf16.mxu1 %v6019_v47 }
 0x2b1   : > { %v1803_v48 = vpop.f32.mrb[40].mxu0  ;;  %v1844_v35 = vpop.f32.mrb[40].mxu1 }
 0x2b2   : > { %v1851_v44 = vadd.f32 %v1803_v48, %v6020_v46  ;;  %v1853_v16 = vadd.f32 %v1844_v35, %v6021_v27  ;;  %v1805_v17 = vpop.f32.mrb[41].mxu0  ;;  %v1846_v31 = vpop.f32.mrb[41].mxu1  ;;  %v6024_v46 = vld [vmem:[#allocation97_spill] sm:$0xff]  ;;  %v6025_v27 = vld [vmem:[#allocation99_spill] sm:$0xff] }
 0x2b3   : > { %v1852_v36 = vadd.f32 %v1805_v17, %v6022_v42  ;;  %v1854_v33 = vadd.f32 %v1846_v31, %v6023_v39  ;;  %v1807_v41 = vpop.f32.mrb[42].mxu0  ;;  %v1848_v43 = vpop.f32.mrb[42].mxu1  ;;  %v6026_v42 = vld [vmem:[#allocation98_spill] sm:$0xff]  ;;  %v6027_v39 = vld [vmem:[#allocation100_spill] sm:$0xff] }
 0x2b4   : > { %v3697_v38 = vmul.f32 -1.442695, %v1851_v44  ;;  %v1808_v34 = vpop.f32.mrb[43].mxu0  ;;  %v1849_v24 = vpop.f32.mrb[43].mxu1 }
 0x2b5   : > { %v3698_v25 = vmul.f32 -1.442695, %v1852_v36  ;;  %v3699_v22 = vmul.f32 -1.442695, %v1854_v33 }
 0x2b6   : > { %3950 = vpow2.f32 %v3697_v38 }
 0x2b7   : > { %3952 = vpow2.f32 %v3698_v25 }
 0x2b8   : > { %3954 = vpow2.f32 %v3699_v22 }
 0x2b9   : > { %3956 = vtanh.f32 %v1853_v16 }
 0x2c0   : > { %v3951_v37 = vpop.eup %3950 }
 0x2c1   : > { %v3953_v23 = vpop.eup %3952  ;;  %v1950_v26 = vadd.f32 1.0, %v3951_v37 }
 0x2c2   : > { %v1956_v14 = vadd.f32 1.0, %v3953_v23  ;;  %v3955_v32 = vpop.eup %3954 }
 0x2c3   : > { %3958 = vrcp.f32 %v1950_v26  ;;  %v3957_v19 = vpop.eup %3956  ;;  %v1963_v45 = vadd.f32 1.0, %v3955_v32 }
 0x2c4   : > { %3960 = vrcp.f32 %v1956_v14 }
 0x2c5   : > { %3962 = vrcp.f32 %v1963_v45  ;;  %v5308_v45 = vld [vmem:[#allocation6 + $0xac] ss:$16 sps:$4 sm:$0xff]  }
 0x2c6   : > { %6039 = vst [vmem:[#allocation22_spill] sm:$0xff] %v5308_v45 }
 0x2cd   : > { %v3959_v20 = vpop.eup %3958 }
 0x2ce   : > { %v3961_v18 = vpop.eup %3960  ;;  %v1967_v28 = vmul.f32 %v3959_v20, %v3957_v19 }
 0x2cf   : > { %v1966_v40 = vmul.f32 %v3961_v18, %v5112_v21  ;;  %v3963_v25 = vpop.eup %3962 }
 0x2d1   : > { %v5198_v47 = vadd.f32 %v1967_v28, %v1966_v40  ;;  %v1895_v48 = vpop.f32.mrb[44].mxu0  ;;  %v1936_v35 = vpop.f32.mrb[44].mxu1  ;;  %v5305_v28 = vld [vmem:[#allocation6 + $0xa4] ss:$16 sps:$4 sm:$0xff]   ;;  %v5311_v40 = vld [vmem:[#allocation6 + $0xa0] ss:$16 sps:$4 sm:$0xff]  }
 0x2d2   : > { %v1943_v44 = vadd.f32 %v1895_v48, %v6024_v46  ;;  %v1945_v16 = vadd.f32 %v1936_v35, %v6025_v27  ;;  %v1897_v17 = vpop.f32.mrb[45].mxu0  ;;  %v1938_v31 = vpop.f32.mrb[45].mxu1  ;;  %6038 = vst [vmem:[#allocation21_spill] sm:$0xff] %v5305_v28  ;;  %6040 = vst [vmem:[#allocation23_spill] sm:$0xff] %v5311_v40  ;;  %v5314_v48 = vld [vmem:[#allocation6 + $0xa8] ss:$16 sps:$4 sm:$0xff]  }
 0x2d3   : > { %3964 = vtanh.f32 %v5198_v47  ;;  %v1944_v36 = vadd.f32 %v1897_v17, %v6026_v42  ;;  %v1946_v33 = vadd.f32 %v1938_v31, %v6027_v39  ;;  %v1899_v41 = vpop.f32.mrb[46].mxu0  ;;  %v1940_v21 = vpop.f32.mrb[46].mxu1  ;;  %6041 = vst [vmem:[#allocation24_spill] sm:$0xff] %v5314_v48  ;;  %v5317_v35 = vld [vmem:[#allocation6 + $0xc4] ss:$16 sps:$4 sm:$0xff]  }
 0x2d4   : > { %v3700_v43 = vmul.f32 -1.442695, %v1943_v44  ;;  %v1900_v38 = vpop.f32.mrb[47].mxu0  ;;  %v1941_v34 = vpop.f32.mrb[47].mxu1  ;;  %6042 = vst [vmem:[#allocation25_spill] sm:$0xff] %v5317_v35  ;;  %v6052_v21 = vld [vmem:[#allocation49_spill] sm:$0xff] }
 0x2d5   : > { %v3701_v24 = vmul.f32 -1.442695, %v1944_v36  ;;  %v3702_v37 = vmul.f32 -1.442695, %v1946_v33  ;;  %v5320_v46 = vld [vmem:[#allocation6 + $0xcc] ss:$16 sps:$4 sm:$0xff]  }
 0x2d6   : > { %3966 = vpow2.f32 %v3700_v43  ;;  %6043 = vst [vmem:[#allocation26_spill] sm:$0xff] %v5320_v46  ;;  %v5323_v44 = vld [vmem:[#allocation6 + $0xc0] ss:$16 sps:$4 sm:$0xff]   ;;  %v5326_v27 = vld [vmem:[#allocation6 + $0xc8] ss:$16 sps:$4 sm:$0xff]  }
 0x2d7   : > { %3968 = vpow2.f32 %v3701_v24  ;;  %6044 = vst [vmem:[#allocation27_spill] sm:$0xff] %v5323_v44  ;;  %6045 = vst [vmem:[#allocation28_spill] sm:$0xff] %v5326_v27  ;;  %v5332_v17 = vld [vmem:[#allocation6 + $0xec] ss:$16 sps:$4 sm:$0xff]   ;;  %v5335_v31 = vld [vmem:[#allocation6 + $0xe0] ss:$16 sps:$4 sm:$0xff]  }
 0x2d8   : > { %3970 = vpow2.f32 %v3702_v37  ;;  %6047 = vst [vmem:[#allocation30_spill] sm:$0xff] %v5332_v17  ;;  %6048 = vst [vmem:[#allocation31_spill] sm:$0xff] %v5335_v31  ;;  %v5338_v42 = vld [vmem:[#allocation6 + $0xe8] ss:$16 sps:$4 sm:$0xff]   ;;  %v5341_v36 = vld [vmem:[#allocation8 + $0x4] ss:$16 sps:$4 sm:$0xff]  }
 0x2d9   : > { %3972 = vtanh.f32 %v1945_v16  ;;  %v5329_v16 = vld [vmem:[#allocation6 + $0xe4] ss:$16 sps:$4 sm:$0xff]   ;;  %6049 = vst [vmem:[#allocation32_spill] sm:$0xff] %v5338_v42  ;;  %6050 = vst [vmem:[#allocation33_spill] sm:$0xff] %v5341_v36  ;;  %v5344_v39 = vld [vmem:[#allocation8 + $0xc] ss:$16 sps:$4 sm:$0xff]  }
 0x2da   : > { %6046 = vst [vmem:[#allocation29_spill] sm:$0xff] %v5329_v16  ;;  %6051 = vst [vmem:[#allocation34_spill] sm:$0xff] %v5344_v39  ;;  %v6053_v38 = vld [vmem:[#allocation51_spill] sm:$0xff] }
 0x2dd   : > { %v3965_v22 = vpop.eup %3964 }
 0x2de   : > { %v1970_v23 = vmul.f32 %v3965_v22, %v3963_v25  ;;  %v6054_v22 = vld [vmem:[#allocation50_spill] sm:$0xff] }
 0x2e0   : > { %v3967_v26 = vpop.eup %3966  ;;  %3703 = vst [vmem:[%s5118_s30 + $0x10] sm:$0xff] %v1970_v23  ;;  %v2004_v14 = vpack.c.bf16 %v1970_v23, %v1970_v23  ;;  %v6055_v23 = vld [vmem:[#allocation53_spill] sm:$0xff] }
 0x2e1   : > { %v3969_v32 = vpop.eup %3968  ;;  %v1974_v19 = vadd.f32 1.0, %v3967_v26 }
 0x2e2   : > { %v1980_v20 = vadd.f32 1.0, %v3969_v32  ;;  %2038 = vmatmul.mubr.bf16.vlgmr.msra.gmra.mrb[48].mxu0 %v2004_v14  ;;  %2079 = vmatmul.mubr.bf16.vlgmr.msra.gmra.mrb[48].mxu1 %v2004_v14 }
 0x2e3   : > { %3974 = vrcp.f32 %v1974_v19  ;;  %2098 = vmatpush1.bf16.msra.mxu0 %v4751_v49  ;;  %2139 = vmatpush1.bf16.msra.mxu1 %v4755_v50  ;;  %v3971_v49 = vpop.eup %3970 }
 0x2e4   : > { %3976 = vrcp.f32 %v1980_v20  ;;  %2099 = vmatprep.subr.bf16.mxu0 %v4757_v51  ;;  %2140 = vmatprep.subr.bf16.mxu1 %v4760_v52  ;;  %v3973_v50 = vpop.eup %3972 }
 0x2e5   : > { %2129 = vmatprep.mubr.bf16.mxu0 %v5930_v9  ;;  %2170 = vmatprep.mubr.bf16.mxu1 %v5930_v9 }
 0x2e7   : > { %2100 = vmatpush1.bf16.msra.mxu0 %v4765_v53  ;;  %2141 = vmatpush1.bf16.msra.mxu1 %v4769_v54  ;;  %v1987_v53 = vadd.f32 1.0, %v3971_v49 }
 0x2e8   : > { %2101 = vmatprep.subr.bf16.mxu0 %v4771_v55  ;;  %2142 = vmatprep.subr.bf16.mxu1 %v4774_v56 }
 0x2e9   : > { %3978 = vrcp.f32 %v1987_v53 }
 0x2eb   : > { %2102 = vmatpush1.bf16.msra.mxu0 %v4779_v57  ;;  %2143 = vmatpush1.bf16.msra.mxu1 %v4783_v58 }
 0x2ec   : > { %2103 = vmatprep.subr.bf16.mxu0 %v4785_v59  ;;  %2144 = vmatprep.subr.bf16.mxu1 %v4788_v60  ;;  %v5243_v60 = vld [vmem:[#allocation6 + $0x4] ss:$16 sps:$4 sm:$0xff]  }
 0x2ed   : > { %v3975_v51 = vpop.eup %3974 }
 0x2ee   : > { %v3977_v52 = vpop.eup %3976  ;;  %v1991_v18 = vmul.f32 %v3975_v51, %v3973_v50 }
 0x2ef   : > { %v1990_v54 = vmul.f32 %v3977_v52, %v5139_v29  ;;  %2104 = vmatpush1.bf16.msra.mxu0 %v4791_v61  ;;  %2145 = vmatpush1.bf16.msra.mxu1 %v4795_v62  ;;  %v5246_v61 = vld [vmem:[#allocation6 + $0xc] ss:$16 sps:$4 sm:$0xff]   ;;  %v5249_v62 = vld [vmem:[#allocation6] ss:$16 sps:$4 sm:$0xff]  }
 0x2f0   : > { %2105 = vmatprep.subr.bf16.mxu0 %v4797_v63  ;;  %2146 = vmatprep.subr.bf16.mxu1 %v4800_v0  ;;  %v5252_v63 = vld [vmem:[#allocation6 + $0x8] ss:$16 sps:$4 sm:$0xff]   ;;  %v5258_v0 = vld [vmem:[#allocation6 + $0x2c] ss:$16 sps:$4 sm:$0xff]   ;;  %v5299_v29 = vld [vmem:[#allocation6 + $0x80] ss:$16 sps:$4 sm:$0xff]  }
 0x2f1   : > { %v5225_v55 = vadd.f32 %v1991_v18, %v1990_v54  ;;  %6036 = vst [vmem:[#allocation19_spill] sm:$0xff] %v5299_v29 }
 0x2f3   : > { %3980 = vtanh.f32 %v5225_v55  ;;  %2106 = vmatpush1.bf16.msra.mxu0 %v4803_v1  ;;  %2147 = vmatpush1.bf16.msra.mxu1 %v4807_v2  ;;  %v3979_v56 = vpop.eup %3978  ;;  %v5263_v1 = vld [vmem:[#allocation6 + $0x20] ss:$16 sps:$4 sm:$0xff]   ;;  %v5266_v2 = vld [vmem:[#allocation6 + $0x28] ss:$16 sps:$4 sm:$0xff]  }
 0x2f4   : > { %2107 = vmatprep.subr.bf16.mxu0 %v4809_v3  ;;  %2148 = vmatprep.subr.bf16.mxu1 %v4812_v4  ;;  %v5269_v3 = vld [vmem:[#allocation6 + $0x44] ss:$16 sps:$4 sm:$0xff]   ;;  %v5272_v4 = vld [vmem:[#allocation6 + $0x4c] ss:$16 sps:$4 sm:$0xff]  }
 0x2f7   : > { %2108 = vmatpush1.bf16.msra.mxu0 %v4815_v5  ;;  %2149 = vmatpush1.bf16.msra.mxu1 %v4819_v6  ;;  %v5275_v5 = vld [vmem:[#allocation6 + $0x40] ss:$16 sps:$4 sm:$0xff]   ;;  %v5278_v6 = vld [vmem:[#allocation6 + $0x48] ss:$16 sps:$4 sm:$0xff]  }
 0x2f8   : > { %2109 = vmatprep.subr.bf16.mxu0 %v4821_v7  ;;  %2150 = vmatprep.subr.bf16.mxu1 %v5987_v30  ;;  %6028 = vst [vmem:[#allocation44_spill] sm:$0xff] %v5275_v5  ;;  %6029 = vst [vmem:[#allocation12_spill] sm:$0xff] %v5278_v6  ;;  %v5281_v7 = vld [vmem:[#allocation6 + $0x64] ss:$16 sps:$4 sm:$0xff]   ;;  %v5302_v30 = vld [vmem:[#allocation6 + $0x88] ss:$16 sps:$4 sm:$0xff]  }
 0x2f9   : > { %6030 = vst [vmem:[#allocation13_spill] sm:$0xff] %v5281_v7  ;;  %6037 = vst [vmem:[#allocation20_spill] sm:$0xff] %v5302_v30 }
 0x2fb   : > { %2110 = vmatpush1.bf16.msra.mxu0 %v4827_v10  ;;  %2151 = vmatpush1.bf16.msra.mxu1 %v4831_v11  ;;  %v5284_v10 = vld [vmem:[#allocation6 + $0x6c] ss:$16 sps:$4 sm:$0xff]   ;;  %v5287_v11 = vld [vmem:[#allocation6 + $0x60] ss:$16 sps:$4 sm:$0xff]  }
 0x2fc   : > { %2111 = vmatprep.subr.bf16.mxu0 %v4833_v12  ;;  %2152 = vmatprep.subr.bf16.mxu1 %v4836_v13  ;;  %6031 = vst [vmem:[#allocation14_spill] sm:$0xff] %v5284_v10  ;;  %6032 = vst [vmem:[#allocation15_spill] sm:$0xff] %v5287_v11  ;;  %v5290_v12 = vld [vmem:[#allocation6 + $0x68] ss:$16 sps:$4 sm:$0xff]   ;;  %v5293_v13 = vld [vmem:[#allocation6 + $0x84] ss:$16 sps:$4 sm:$0xff]  }
 0x2fd   : > { %v3981_v57 = vpop.eup %3980  ;;  %6033 = vst [vmem:[#allocation16_spill] sm:$0xff] %v5290_v12  ;;  %6034 = vst [vmem:[#allocation17_spill] sm:$0xff] %v5293_v13 }
 0x2fe   : > { %v1994_v58 = vmul.f32 %v3981_v57, %v3979_v56 }
 0x2ff   : > { %2112 = vmatpush1.bf16.msra.mxu0 %v4839_v15  ;;  %2153 = vmatpush1.bf16.msra.mxu1 %v4843_v8  ;;  %v5255_v8 = vld [vmem:[#allocation6 + $0x24] ss:$16 sps:$4 sm:$0xff]   ;;  %v5296_v15 = vld [vmem:[#allocation6 + $0x8c] ss:$16 sps:$4 sm:$0xff]  }
 0x300   : > { %3704 = vst [vmem:[%s5118_s30 + $0x68] sm:$0xff] %v1994_v58  ;;  %v2096_v59 = vpack.c.bf16 %v1994_v58, %v1994_v58  ;;  %2241 = vmatprep.subr.bf16.mxu0 %v5243_v60  ;;  %2282 = vmatprep.subr.bf16.mxu1 %v5246_v61  ;;  %6035 = vst [vmem:[#allocation18_spill] sm:$0xff] %v5296_v15 }
 0x302   : > { %2130 = vmatmul.mubr.bf16.vlgmr.msra.gmra.mrb[52].mxu0 %v2096_v59  ;;  %2171 = vmatmul.mubr.bf16.vlgmr.msra.gmra.mrb[52].mxu1 %v2096_v59 }
 0x303   : > { %2242 = vmatpush1.bf16.msra.mxu0 %v5249_v62  ;;  %2283 = vmatpush1.bf16.msra.mxu1 %v5252_v63 }
 0x304   : > { %2243 = vmatprep.subr.bf16.mxu0 %v5255_v8  ;;  %2284 = vmatprep.subr.bf16.mxu1 %v5258_v0 }
 0x305   : > { %2273 = vmatprep.mubr.bf16.mxu0 %v5930_v9  ;;  %2314 = vmatprep.mubr.bf16.mxu1 %v5930_v9 }
 0x307   : > { %2244 = vmatpush1.bf16.msra.mxu0 %v5263_v1  ;;  %2285 = vmatpush1.bf16.msra.mxu1 %v5266_v2 }
 0x308   : > { %2245 = vmatprep.subr.bf16.mxu0 %v5269_v3  ;;  %2286 = vmatprep.subr.bf16.mxu1 %v5272_v4 }
 0x30b   : > { %2246 = vmatpush1.bf16.msra.mxu0 %v5275_v5  ;;  %2287 = vmatpush1.bf16.msra.mxu1 %v5278_v6 }
 0x30c   : > { %2247 = vmatprep.subr.bf16.mxu0 %v5281_v7  ;;  %2288 = vmatprep.subr.bf16.mxu1 %v5284_v10 }
 0x30f   : > { %2248 = vmatpush1.bf16.msra.mxu0 %v5287_v11  ;;  %2289 = vmatpush1.bf16.msra.mxu1 %v5290_v12 }
 0x310   : > { %2249 = vmatprep.subr.bf16.mxu0 %v5293_v13  ;;  %2290 = vmatprep.subr.bf16.mxu1 %v5296_v15 }
 0x313   : > { %2250 = vmatpush1.bf16.msra.mxu0 %v5299_v29  ;;  %2291 = vmatpush1.bf16.msra.mxu1 %v5302_v30 }
 0x314   : > { %2251 = vmatprep.subr.bf16.mxu0 %v5305_v28  ;;  %2292 = vmatprep.subr.bf16.mxu1 %v5308_v45 }
 0x317   : > { %2252 = vmatpush1.bf16.msra.mxu0 %v5311_v40  ;;  %2293 = vmatpush1.bf16.msra.mxu1 %v5314_v48 }
 0x318   : > { %2253 = vmatprep.subr.bf16.mxu0 %v5317_v35  ;;  %2294 = vmatprep.subr.bf16.mxu1 %v5320_v46 }
 0x31b   : > { %2254 = vmatpush1.bf16.msra.mxu0 %v5323_v44  ;;  %2295 = vmatpush1.bf16.msra.mxu1 %v5326_v27 }
 0x31c   : > { %2255 = vmatprep.subr.bf16.mxu0 %v5329_v16  ;;  %2296 = vmatprep.subr.bf16.mxu1 %v5332_v17 }
 0x31f   : > { %2256 = vmatpush1.bf16.msra.mxu0 %v5335_v31  ;;  %2297 = vmatpush1.bf16.msra.mxu1 %v5338_v42 }
 0x320   : > { %2333 = vmatprep.subr.bf16.mxu0 %v5341_v36  ;;  %2374 = vmatprep.subr.bf16.mxu1 %v5344_v39 }
 0x3b5   : > { %v2039_v33 = vpop.f32.mrb[48].mxu0  ;;  %v2080_v41 = vpop.f32.mrb[48].mxu1 }
 0x3b6   : > { %v2087_v43 = vadd.f32 %v2039_v33, %v6052_v21  ;;  %v2089_v34 = vadd.f32 %v2080_v41, %v6053_v38  ;;  %v2041_v24 = vpop.f32.mrb[49].mxu0  ;;  %v2082_v25 = vpop.f32.mrb[49].mxu1 }
 0x3b7   : > { %v2088_v37 = vadd.f32 %v2041_v24, %v6054_v22  ;;  %v2090_v26 = vadd.f32 %v2082_v25, %v6055_v23  ;;  %v2043_v14 = vpop.f32.mrb[50].mxu0  ;;  %v2084_v32 = vpop.f32.mrb[50].mxu1  ;;  %v6056_v25 = vld [vmem:[#allocation92_spill] sm:$0xff] }
 0x3b8   : > { %v3705_v19 = vmul.f32 -1.442695, %v2087_v43  ;;  %v2044_v20 = vpop.f32.mrb[51].mxu0  ;;  %v2085_v49 = vpop.f32.mrb[51].mxu1  ;;  %v6058_v14 = vld [vmem:[#allocation94_spill] sm:$0xff] }
 0x3b9   : > { %v3706_v50 = vmul.f32 -1.442695, %v2088_v37  ;;  %v3707_v51 = vmul.f32 -1.442695, %v2090_v26  ;;  %v6057_v37 = vld [vmem:[#allocation95_spill] sm:$0xff] }
 0x3ba   : > { %3982 = vpow2.f32 %v3705_v19  ;;  %v6059_v19 = vld [vmem:[#allocation96_spill] sm:$0xff] }
 0x3bb   : > { %3984 = vpow2.f32 %v3706_v50 }
 0x3bc   : > { %3986 = vpow2.f32 %v3707_v51 }
 0x3bd   : > { %3988 = vtanh.f32 %v2089_v34 }
 0x3c4   : > { %v3983_v52 = vpop.eup %3982 }
 0x3c5   : > { %v3985_v18 = vpop.eup %3984  ;;  %v2186_v53 = vadd.f32 1.0, %v3983_v52 }
 0x3c6   : > { %v2192_v54 = vadd.f32 1.0, %v3985_v18  ;;  %v3987_v56 = vpop.eup %3986 }
 0x3c7   : > { %3990 = vrcp.f32 %v2186_v53  ;;  %v3989_v57 = vpop.eup %3988  ;;  %v2199_v41 = vadd.f32 1.0, %v3987_v56 }
 0x3c8   : > { %3992 = vrcp.f32 %v2192_v54 }
 0x3c9   : > { %3994 = vrcp.f32 %v2199_v41 }
 0x3d1   : > { %v3991_v58 = vpop.eup %3990 }
 0x3d2   : > { %v3993_v59 = vpop.eup %3992  ;;  %v2203_v33 = vmul.f32 %v3991_v58, %v3989_v57 }
 0x3d3   : > { %v2202_v21 = vmul.f32 %v3993_v59, %v5198_v47  ;;  %v3995_v53 = vpop.eup %3994 }
 0x3d5   : > { %v5352_v43 = vadd.f32 %v2203_v33, %v2202_v21  ;;  %v2131_v38 = vpop.f32.mrb[52].mxu0  ;;  %v2172_v24 = vpop.f32.mrb[52].mxu1 }
 0x3d6   : > { %v2179_v22 = vadd.f32 %v2131_v38, %v6056_v25  ;;  %v2181_v34 = vadd.f32 %v2172_v24, %v6057_v37  ;;  %v2133_v23 = vpop.f32.mrb[53].mxu0  ;;  %v2174_v26 = vpop.f32.mrb[53].mxu1  ;;  %v5360_v38 = vld [vmem:[#allocation8] ss:$16 sps:$4 sm:$0xff]   ;;  %v5363_v24 = vld [vmem:[#allocation8 + $0x8] ss:$16 sps:$4 sm:$0xff]  }
 0x3d7   : > { %3996 = vtanh.f32 %v5352_v43  ;;  %v2180_v32 = vadd.f32 %v2133_v23, %v6058_v14  ;;  %v2182_v20 = vadd.f32 %v2174_v26, %v6059_v19  ;;  %v2135_v49 = vpop.f32.mrb[54].mxu0  ;;  %v2176_v47 = vpop.f32.mrb[54].mxu1  ;;  %v5366_v25 = vld [vmem:[#allocation8 + $0x24] ss:$16 sps:$4 sm:$0xff]   ;;  %v5374_v37 = vld [vmem:[#allocation8 + $0x20] ss:$16 sps:$4 sm:$0xff]  }
 0x3d8   : > { %v3708_v50 = vmul.f32 -1.442695, %v2179_v22  ;;  %v2136_v51 = vpop.f32.mrb[55].mxu0  ;;  %v2177_v52 = vpop.f32.mrb[55].mxu1  ;;  %v5369_v22 = vld [vmem:[#allocation8 + $0x2c] ss:$16 sps:$4 sm:$0xff]  }
 0x3d9   : > { %v3709_v18 = vmul.f32 -1.442695, %v2180_v32  ;;  %v3710_v56 = vmul.f32 -1.442695, %v2182_v20  ;;  %v5380_v23 = vld [vmem:[#allocation8 + $0x44] ss:$16 sps:$4 sm:$0xff]  }
 0x3da   : > { %3998 = vpow2.f32 %v3708_v50  ;;  %v5383_v26 = vld [vmem:[#allocation8 + $0x4c] ss:$16 sps:$4 sm:$0xff]   ;;  %v5386_v32 = vld [vmem:[#allocation8 + $0x40] ss:$16 sps:$4 sm:$0xff]   ;;  %v5389_v19 = vld [vmem:[#allocation8 + $0x48] ss:$16 sps:$4 sm:$0xff]  }
 0x3db   : > { %4000 = vpow2.f32 %v3709_v18  ;;  %v5392_v49 = vld [vmem:[#allocation8 + $0x64] ss:$16 sps:$4 sm:$0xff]   ;;  %v5395_v47 = vld [vmem:[#allocation8 + $0x6c] ss:$16 sps:$4 sm:$0xff]  }
 0x3dc   : > { %4002 = vpow2.f32 %v3710_v56  ;;  %v5402_v56 = vld [vmem:[#allocation8 + $0x68] ss:$16 sps:$4 sm:$0xff]  }
 0x3dd   : > { %4004 = vtanh.f32 %v2181_v34  ;;  %v5377_v34 = vld [vmem:[#allocation8 + $0x28] ss:$16 sps:$4 sm:$0xff]  }
 0x3e1   : > { %v3997_v54 = vpop.eup %3996 }
 0x3e2   : > { %v2206_v57 = vmul.f32 %v3997_v54, %v3995_v53  ;;  %v5399_v54 = vld [vmem:[#allocation8 + $0x60] ss:$16 sps:$4 sm:$0xff]  }
 0x3e4   : > { %v3999_v58 = vpop.eup %3998  ;;  %3711 = vst [vmem:[%s5118_s30 + $0x20] sm:$0xff] %v2206_v57  ;;  %v2240_v59 = vpack.c.bf16 %v2206_v57, %v2206_v57  ;;  %v5405_v57 = vld [vmem:[#allocation8 + $0x84] ss:$16 sps:$4 sm:$0xff]  }
 0x3e5   : > { %v4001_v33 = vpop.eup %4000  ;;  %v2210_v41 = vadd.f32 1.0, %v3999_v58  ;;  %v5408_v58 = vld [vmem:[#allocation8 + $0x8c] ss:$16 sps:$4 sm:$0xff]  }
 0x3e6   : > { %v2216_v21 = vadd.f32 1.0, %v4001_v33  ;;  %2274 = vmatmul.mubr.bf16.vlgmr.msra.gmra.mrb[56].mxu0 %v2240_v59  ;;  %2315 = vmatmul.mubr.bf16.vlgmr.msra.gmra.mrb[56].mxu1 %v2240_v59  ;;  %v4003_v14 = vpop.eup %4002  ;;  %v5417_v33 = vld [vmem:[#allocation8 + $0x88] ss:$16 sps:$4 sm:$0xff]  }
 0x3e7   : > { %4006 = vrcp.f32 %v2210_v41  ;;  %2334 = vmatpush1.bf16.msra.mxu0 %v5360_v38  ;;  %2375 = vmatpush1.bf16.msra.mxu1 %v5363_v24  ;;  %v4005_v20 = vpop.eup %4004  ;;  %v2223_v18 = vadd.f32 1.0, %v4003_v14  ;;  %v5420_v41 = vld [vmem:[#allocation8 + $0xa4] ss:$16 sps:$4 sm:$0xff]   ;;  %v5426_v14 = vld [vmem:[#allocation8 + $0xa0] ss:$16 sps:$4 sm:$0xff]  }
 0x3e8   : > { %4008 = vrcp.f32 %v2216_v21  ;;  %2335 = vmatprep.subr.bf16.mxu0 %v5366_v25  ;;  %2376 = vmatprep.subr.bf16.mxu1 %v5369_v22  ;;  %v5423_v21 = vld [vmem:[#allocation8 + $0xac] ss:$16 sps:$4 sm:$0xff]   ;;  %6061 = vst [vmem:[#allocation36_spill] sm:$0xff] %v5426_v14 }
 0x3e9   : > { %2365 = vmatprep.mubr.bf16.mxu0 %v5930_v9  ;;  %2406 = vmatprep.mubr.bf16.mxu1 %v5930_v9  ;;  %4010 = vrcp.f32 %v2223_v18  ;;  %6060 = vst [vmem:[#allocation35_spill] sm:$0xff] %v5423_v21  ;;  %v5441_v18 = vld [vmem:[#allocation8 + $0xc8] ss:$16 sps:$4 sm:$0xff]  }
 0x3ea   : > { %6066 = vst [vmem:[#allocation41_spill] sm:$0xff] %v5441_v18 }
 0x3eb   : > { %2336 = vmatpush1.bf16.msra.mxu0 %v5374_v37  ;;  %2377 = vmatpush1.bf16.msra.mxu1 %v5377_v34 }
 0x3ec   : > { %2337 = vmatprep.subr.bf16.mxu0 %v5380_v23  ;;  %2378 = vmatprep.subr.bf16.mxu1 %v5383_v26 }
 0x3ef   : > { %2338 = vmatpush1.bf16.msra.mxu0 %v5386_v32  ;;  %2379 = vmatpush1.bf16.msra.mxu1 %v5389_v19 }
 0x3f0   : > { %2339 = vmatprep.subr.bf16.mxu0 %v5392_v49  ;;  %2380 = vmatprep.subr.bf16.mxu1 %v5395_v47 }
 0x3f1   : > { %v4007_v50 = vpop.eup %4006 }
 0x3f2   : > { %v4009_v51 = vpop.eup %4008  ;;  %v2227_v52 = vmul.f32 %v4007_v50, %v4005_v20  ;;  %v5429_v20 = vld [vmem:[#allocation8 + $0xa8] ss:$16 sps:$4 sm:$0xff]   ;;  %v5432_v50 = vld [vmem:[#allocation8 + $0xc4] ss:$16 sps:$4 sm:$0xff]  }
 0x3f3   : > { %v2226_v53 = vmul.f32 %v4009_v51, %v5225_v55  ;;  %2340 = vmatpush1.bf16.msra.mxu0 %v5399_v54  ;;  %2381 = vmatpush1.bf16.msra.mxu1 %v5402_v56  ;;  %v5414_v55 = vld [vmem:[#allocation8 + $0x80] ss:$16 sps:$4 sm:$0xff]   ;;  %6062 = vst [vmem:[#allocation37_spill] sm:$0xff] %v5429_v20  ;;  %6063 = vst [vmem:[#allocation38_spill] sm:$0xff] %v5432_v50  ;;  %v5435_v51 = vld [vmem:[#allocation8 + $0xcc] ss:$16 sps:$4 sm:$0xff]  }
 0x3f4   : > { %2341 = vmatprep.subr.bf16.mxu0 %v5405_v57  ;;  %2382 = vmatprep.subr.bf16.mxu1 %v5408_v58  ;;  %6064 = vst [vmem:[#allocation39_spill] sm:$0xff] %v5435_v51 }
 0x3f5   : > { %v5411_v59 = vadd.f32 %v2227_v52, %v2226_v53  ;;  %v5438_v52 = vld [vmem:[#allocation8 + $0xc0] ss:$16 sps:$4 sm:$0xff]   ;;  %v4011_v53 = vpop.eup %4010 }
 0x3f6   : > { %6065 = vst [vmem:[#allocation40_spill] sm:$0xff] %v5438_v52 }
 0x3f7   : > { %4012 = vtanh.f32 %v5411_v59  ;;  %2342 = vmatpush1.bf16.msra.mxu0 %v5414_v55  ;;  %2383 = vmatpush1.bf16.msra.mxu1 %v5417_v33 }
 0x3f8   : > { %2343 = vmatprep.subr.bf16.mxu0 %v5420_v41  ;;  %2384 = vmatprep.subr.bf16.mxu1 %v5423_v21  ;;  %v5450_v21 = vld [vmem:[#allocation8 + $0xe0] ss:$16 sps:$4 sm:$0xff]  }
 0x3fb   : > { %2344 = vmatpush1.bf16.msra.mxu0 %v5426_v14  ;;  %2385 = vmatpush1.bf16.msra.mxu1 %v5429_v20  ;;  %v5444_v14 = vld [vmem:[#allocation8 + $0xe4] ss:$16 sps:$4 sm:$0xff]   ;;  %v5447_v20 = vld [vmem:[#allocation8 + $0xec] ss:$16 sps:$4 sm:$0xff]  }
 0x3fc   : > { %2345 = vmatprep.subr.bf16.mxu0 %v5432_v50  ;;  %2386 = vmatprep.subr.bf16.mxu1 %v5435_v51 }
 0x3ff   : > { %2346 = vmatpush1.bf16.msra.mxu0 %v5438_v52  ;;  %2387 = vmatpush1.bf16.msra.mxu1 %v5441_v18  ;;  %v5453_v52 = vld [vmem:[#allocation8 + $0xe8] ss:$16 sps:$4 sm:$0xff]  }
 0x400   : > { %2347 = vmatprep.subr.bf16.mxu0 %v5444_v14  ;;  %2388 = vmatprep.subr.bf16.mxu1 %v5447_v20 }
 0x401   : > { %v4013_v50 = vpop.eup %4012 }
 0x402   : > { %v2230_v51 = vmul.f32 %v4013_v50, %v4011_v53 }
 0x403   : > { %2348 = vmatpush1.bf16.msra.mxu0 %v5450_v21  ;;  %2389 = vmatpush1.bf16.msra.mxu1 %v5453_v52 }
 0x404   : > { %3712 = vst [vmem:[%s5118_s30 + $0x58] sm:$0xff] %v2230_v51  ;;  %v2332_v18 = vpack.c.bf16 %v2230_v51, %v2230_v51  ;;  %2476 = vmatprep.subr.bf16.mxu0 %v5243_v60  ;;  %2517 = vmatprep.subr.bf16.mxu1 %v5246_v61 }
 0x406   : > { %2366 = vmatmul.mubr.bf16.vlgmr.msra.gmra.mrb[60].mxu0 %v2332_v18  ;;  %2407 = vmatmul.mubr.bf16.vlgmr.msra.gmra.mrb[60].mxu1 %v2332_v18  ;;  %v6067_v18 = vld [vmem:[#allocation52_spill] sm:$0xff] }
 0x407   : > { %2477 = vmatpush1.bf16.msra.mxu0 %v5249_v62  ;;  %2518 = vmatpush1.bf16.msra.mxu1 %v5252_v63 }
 0x408   : > { %2478 = vmatprep.subr.bf16.mxu0 %v5255_v8  ;;  %2519 = vmatprep.subr.bf16.mxu1 %v5258_v0 }
 0x409   : > { %2508 = vmatprep.mubr.bf16.mxu0 %v5930_v9  ;;  %2549 = vmatprep.mubr.bf16.mxu1 %v5930_v9 }
 0x40b   : > { %2479 = vmatpush1.bf16.msra.mxu0 %v5263_v1  ;;  %2520 = vmatpush1.bf16.msra.mxu1 %v5266_v2 }
 0x40c   : > { %2480 = vmatprep.subr.bf16.mxu0 %v5269_v3  ;;  %2521 = vmatprep.subr.bf16.mxu1 %v5272_v4 }
 0x40f   : > { %2481 = vmatpush1.bf16.msra.mxu0 %v5275_v5  ;;  %2522 = vmatpush1.bf16.msra.mxu1 %v5278_v6 }
 0x410   : > { %2482 = vmatprep.subr.bf16.mxu0 %v5281_v7  ;;  %2523 = vmatprep.subr.bf16.mxu1 %v5284_v10 }
 0x413   : > { %2483 = vmatpush1.bf16.msra.mxu0 %v5287_v11  ;;  %2524 = vmatpush1.bf16.msra.mxu1 %v5290_v12 }
 0x414   : > { %2484 = vmatprep.subr.bf16.mxu0 %v5293_v13  ;;  %2525 = vmatprep.subr.bf16.mxu1 %v5296_v15 }
 0x417   : > { %2485 = vmatpush1.bf16.msra.mxu0 %v5299_v29  ;;  %2526 = vmatpush1.bf16.msra.mxu1 %v5302_v30 }
 0x418   : > { %2486 = vmatprep.subr.bf16.mxu0 %v5305_v28  ;;  %2527 = vmatprep.subr.bf16.mxu1 %v5308_v45 }
 0x41b   : > { %2487 = vmatpush1.bf16.msra.mxu0 %v5311_v40  ;;  %2528 = vmatpush1.bf16.msra.mxu1 %v5314_v48  ;;  %v6069_v48 = vld [vmem:[#allocation54_spill] sm:$0xff]  ;;  %v6070_v40 = vld [vmem:[#allocation56_spill] sm:$0xff] }
 0x41c   : > { %2488 = vmatprep.subr.bf16.mxu0 %v5317_v35  ;;  %2529 = vmatprep.subr.bf16.mxu1 %v5320_v46  ;;  %v6068_v46 = vld [vmem:[#allocation55_spill] sm:$0xff] }
 0x41f   : > { %2489 = vmatpush1.bf16.msra.mxu0 %v5323_v44  ;;  %2530 = vmatpush1.bf16.msra.mxu1 %v5326_v27 }
 0x420   : > { %2490 = vmatprep.subr.bf16.mxu0 %v5329_v16  ;;  %2531 = vmatprep.subr.bf16.mxu1 %v5332_v17 }
 0x423   : > { %2491 = vmatpush1.bf16.msra.mxu0 %v5335_v31  ;;  %2532 = vmatpush1.bf16.msra.mxu1 %v5338_v42 }
 0x424   : > { %2567 = vmatprep.subr.bf16.mxu0 %v5341_v36  ;;  %2608 = vmatprep.subr.bf16.mxu1 %v5344_v39 }
 0x4b9   : > { %v2275_v50 = vpop.f32.mrb[56].mxu0  ;;  %v2316_v51 = vpop.f32.mrb[56].mxu1 }
 0x4ba   : > { %v2323_v53 = vadd.f32 %v2275_v50, %v6067_v18  ;;  %v2325_v44 = vadd.f32 %v2316_v51, %v6068_v46  ;;  %v2277_v35 = vpop.f32.mrb[57].mxu0  ;;  %v2318_v27 = vpop.f32.mrb[57].mxu1  ;;  %v6074_v51 = vld [vmem:[#allocation90_spill] sm:$0xff] }
 0x4bb   : > { %v2324_v16 = vadd.f32 %v2277_v35, %v6069_v48  ;;  %v2326_v17 = vadd.f32 %v2318_v27, %v6070_v40  ;;  %v2279_v45 = vpop.f32.mrb[58].mxu0  ;;  %v2320_v31 = vpop.f32.mrb[58].mxu1 }
 0x4bc   : > { %v3713_v28 = vmul.f32 -1.442695, %v2323_v53  ;;  %v2280_v42 = vpop.f32.mrb[59].mxu0  ;;  %v2321_v30 = vpop.f32.mrb[59].mxu1  ;;  %v6075_v53 = vld [vmem:[#allocation93_spill] sm:$0xff] }
 0x4bd   : > { %v3714_v36 = vmul.f32 -1.442695, %v2324_v16  ;;  %v3715_v39 = vmul.f32 -1.442695, %v2326_v17  ;;  %v6072_v42 = vld [vmem:[#allocation89_spill] sm:$0xff] }
 0x4be   : > { %4014 = vpow2.f32 %v3713_v28 }
 0x4bf   : > { %4016 = vpow2.f32 %v3714_v36  ;;  %v6073_v36 = vld [vmem:[#allocation91_spill] sm:$0xff] }
 0x4c0   : > { %4018 = vpow2.f32 %v3715_v39 }
 0x4c1   : > { %4020 = vtanh.f32 %v2325_v44 }
 0x4c8   : > { %v4015_v29 = vpop.eup %4014 }
 0x4c9   : > { %v4017_v15 = vpop.eup %4016  ;;  %v2422_v50 = vadd.f32 1.0, %v4015_v29 }
 0x4ca   : > { %v2428_v46 = vadd.f32 1.0, %v4017_v15  ;;  %v4019_v48 = vpop.eup %4018 }
 0x4cb   : > { %4022 = vrcp.f32 %v2422_v50  ;;  %v4021_v35 = vpop.eup %4020  ;;  %v2435_v31 = vadd.f32 1.0, %v4019_v48 }
 0x4cc   : > { %4024 = vrcp.f32 %v2428_v46 }
 0x4cd   : > { %4026 = vrcp.f32 %v2435_v31 }
 0x4d5   : > { %v4023_v40 = vpop.eup %4022 }
 0x4d6   : > { %v4025_v45 = vpop.eup %4024  ;;  %v2439_v27 = vmul.f32 %v4023_v40, %v4021_v35 }
 0x4d7   : > { %v2438_v30 = vmul.f32 %v4025_v45, %v5352_v43 }
 0x4d9   : > { %v5498_v16 = vadd.f32 %v2439_v27, %v2438_v30  ;;  %v2367_v28 = vpop.f32.mrb[60].mxu0  ;;  %v2408_v17 = vpop.f32.mrb[60].mxu1 }
 0x4da   : > { %v2415_v29 = vadd.f32 %v2367_v28, %v6072_v42  ;;  %v2417_v44 = vadd.f32 %v2408_v17, %v6073_v36  ;;  %v2369_v15 = vpop.f32.mrb[61].mxu0  ;;  %v2410_v39 = vpop.f32.mrb[61].mxu1 }
 0x4db   : > { %6071 = vst [vmem:[#allocation42_spill] sm:$0xff] %v5498_v16  ;;  %4028 = vtanh.f32 %v5498_v16  ;;  %v2416_v18 = vadd.f32 %v2369_v15, %v6074_v51  ;;  %v2418_v50 = vadd.f32 %v2410_v39, %v6075_v53  ;;  %v2371_v46 = vpop.f32.mrb[62].mxu0  ;;  %v2412_v43 = vpop.f32.mrb[62].mxu1 }
 0x4dc   : > { %v3716_v48 = vmul.f32 -1.442695, %v2415_v29  ;;  %v2372_v35 = vpop.f32.mrb[63].mxu0  ;;  %v2413_v40 = vpop.f32.mrb[63].mxu1  ;;  %v6077_v46 = vld [vmem:[#allocation36_spill] sm:$0xff]  ;;  %v6078_v43 = vld [vmem:[#allocation37_spill] sm:$0xff] }
 0x4dd   : > { %v3717_v45 = vmul.f32 -1.442695, %v2416_v18  ;;  %v4027_v27 = vpop.eup %4026  ;;  %v3718_v30 = vmul.f32 -1.442695, %v2418_v50  ;;  %v6080_v35 = vld [vmem:[#allocation39_spill] sm:$0xff]  ;;  %v6081_v40 = vld [vmem:[#allocation40_spill] sm:$0xff] }
 0x4de   : > { %4030 = vpow2.f32 %v3716_v48  ;;  %v6079_v48 = vld [vmem:[#allocation38_spill] sm:$0xff] }
 0x4df   : > { %4032 = vpow2.f32 %v3717_v45  ;;  %v6082_v45 = vld [vmem:[#allocation41_spill] sm:$0xff] }
 0x4e0   : > { %4034 = vpow2.f32 %v3718_v30 }
 0x4e1   : > { %4036 = vtanh.f32 %v2417_v44 }
 0x4e5   : > { %v4029_v31 = vpop.eup %4028 }
 0x4e6   : > { %v2442_v28 = vmul.f32 %v4029_v31, %v4027_v27 }
 0x4e8   : > { %v4031_v17 = vpop.eup %4030  ;;  %3719 = vst [vmem:[%s5118_s30 + $0x30] sm:$0xff] %v2442_v28  ;;  %v2475_v42 = vpack.c.bf16 %v2442_v28, %v2442_v28 }
 0x4e9   : > { %v4033_v36 = vpop.eup %4032  ;;  %v2446_v16 = vadd.f32 1.0, %v4031_v17  ;;  %v6083_v17 = vld [vmem:[#allocation18_spill] sm:$0xff] }
 0x4ea   : > { %v2452_v15 = vadd.f32 1.0, %v4033_v36  ;;  %2509 = vmatmul.mubr.bf16.vlgmr.msra.gmra.mrb[64].mxu0 %v2475_v42  ;;  %2550 = vmatmul.mubr.bf16.vlgmr.msra.gmra.mrb[64].mxu1 %v2475_v42  ;;  %v6084_v42 = vld [vmem:[#allocation19_spill] sm:$0xff]  ;;  %v6085_v36 = vld [vmem:[#allocation20_spill] sm:$0xff] }
 0x4eb   : > { %4038 = vrcp.f32 %v2446_v16  ;;  %2568 = vmatpush1.bf16.msra.mxu0 %v5360_v38  ;;  %2609 = vmatpush1.bf16.msra.mxu1 %v5363_v24  ;;  %v4035_v16 = vpop.eup %4034 }
 0x4ec   : > { %4040 = vrcp.f32 %v2452_v15  ;;  %2569 = vmatprep.subr.bf16.mxu0 %v5366_v25  ;;  %2610 = vmatprep.subr.bf16.mxu1 %v5369_v22  ;;  %v4037_v29 = vpop.eup %4036  ;;  %v2459_v18 = vadd.f32 1.0, %v4035_v16  ;;  %v6086_v15 = vld [vmem:[#allocation21_spill] sm:$0xff]  ;;  %v6087_v16 = vld [vmem:[#allocation22_spill] sm:$0xff] }
 0x4ed   : > { %2599 = vmatprep.mubr.bf16.mxu0 %v5930_v9  ;;  %2640 = vmatprep.mubr.bf16.mxu1 %v5930_v9 }
 0x4ee   : > { %4042 = vrcp.f32 %v2459_v18  ;;  %v6092_v18 = vld [vmem:[#allocation27_spill] sm:$0xff] }
 0x4ef   : > { %2570 = vmatpush1.bf16.msra.mxu0 %v5374_v37  ;;  %2611 = vmatpush1.bf16.msra.mxu1 %v5377_v34 }
 0x4f0   : > { %2571 = vmatprep.subr.bf16.mxu0 %v5380_v23  ;;  %2612 = vmatprep.subr.bf16.mxu1 %v5383_v26 }
 0x4f3   : > { %2572 = vmatpush1.bf16.msra.mxu0 %v5386_v32  ;;  %2613 = vmatpush1.bf16.msra.mxu1 %v5389_v19 }
 0x4f4   : > { %2573 = vmatprep.subr.bf16.mxu0 %v5392_v49  ;;  %2614 = vmatprep.subr.bf16.mxu1 %v5395_v47 }
 0x4f5   : > { %v4039_v44 = vpop.eup %4038 }
 0x4f6   : > { %v4041_v39 = vpop.eup %4040  ;;  %v2463_v51 = vmul.f32 %v4039_v44, %v4037_v29  ;;  %v6088_v29 = vld [vmem:[#allocation23_spill] sm:$0xff]  ;;  %v6089_v44 = vld [vmem:[#allocation24_spill] sm:$0xff] }
 0x4f7   : > { %v2462_v53 = vmul.f32 %v4041_v39, %v5411_v59  ;;  %2574 = vmatpush1.bf16.msra.mxu0 %v5399_v54  ;;  %2615 = vmatpush1.bf16.msra.mxu1 %v5402_v56  ;;  %v6076_v59 = vld [vmem:[#allocation35_spill] sm:$0xff]  ;;  %v6090_v39 = vld [vmem:[#allocation25_spill] sm:$0xff] }
 0x4f8   : > { %2575 = vmatprep.subr.bf16.mxu0 %v5405_v57  ;;  %2616 = vmatprep.subr.bf16.mxu1 %v5408_v58  ;;  %v4043_v27 = vpop.eup %4042 }
 0x4f9   : > { %v5525_v50 = vadd.f32 %v2463_v51, %v2462_v53  ;;  %v6091_v51 = vld [vmem:[#allocation26_spill] sm:$0xff]  ;;  %v6093_v53 = vld [vmem:[#allocation28_spill] sm:$0xff] }
 0x4fb   : > { %4044 = vtanh.f32 %v5525_v50  ;;  %2576 = vmatpush1.bf16.msra.mxu0 %v5414_v55  ;;  %2617 = vmatpush1.bf16.msra.mxu1 %v5417_v33 }
 0x4fc   : > { %2577 = vmatprep.subr.bf16.mxu0 %v5420_v41  ;;  %2618 = vmatprep.subr.bf16.mxu1 %v6076_v59 }
 0x4ff   : > { %2578 = vmatpush1.bf16.msra.mxu0 %v6077_v46  ;;  %2619 = vmatpush1.bf16.msra.mxu1 %v6078_v43 }
 0x500   : > { %2579 = vmatprep.subr.bf16.mxu0 %v6079_v48  ;;  %2620 = vmatprep.subr.bf16.mxu1 %v6080_v35 }
 0x503   : > { %2580 = vmatpush1.bf16.msra.mxu0 %v6081_v40  ;;  %2621 = vmatpush1.bf16.msra.mxu1 %v6082_v45 }
 0x504   : > { %2581 = vmatprep.subr.bf16.mxu0 %v5444_v14  ;;  %2622 = vmatprep.subr.bf16.mxu1 %v5447_v20 }
 0x505   : > { %v4045_v31 = vpop.eup %4044 }
 0x506   : > { %v2466_v30 = vmul.f32 %v4045_v31, %v4043_v27  ;;  %v6094_v27 = vld [vmem:[#allocation29_spill] sm:$0xff]  ;;  %v6095_v31 = vld [vmem:[#allocation30_spill] sm:$0xff] }
 0x507   : > { %2582 = vmatpush1.bf16.msra.mxu0 %v5450_v21  ;;  %2623 = vmatpush1.bf16.msra.mxu1 %v5453_v52 }
 0x508   : > { %3720 = vst [vmem:[%s5118_s30 + $0x48] sm:$0xff] %v2466_v30  ;;  %v2566_v28 = vpack.c.bf16 %v2466_v30, %v2466_v30  ;;  %2708 = vmatprep.subr.bf16.mxu0 %v5243_v60  ;;  %2749 = vmatprep.subr.bf16.mxu1 %v5246_v61  ;;  %v6096_v30 = vld [vmem:[#allocation31_spill] sm:$0xff] }
 0x50a   : > { %2600 = vmatmul.mubr.bf16.vlgmr.msra.gmra.mrb[68].mxu0 %v2566_v28  ;;  %2641 = vmatmul.mubr.bf16.vlgmr.msra.gmra.mrb[68].mxu1 %v2566_v28  ;;  %v6097_v28 = vld [vmem:[#allocation32_spill] sm:$0xff] }
 0x50b   : > { %2709 = vmatpush1.bf16.msra.mxu0 %v5249_v62  ;;  %2750 = vmatpush1.bf16.msra.mxu1 %v5252_v63 }
 0x50c   : > { %2710 = vmatprep.subr.bf16.mxu0 %v5255_v8  ;;  %2751 = vmatprep.subr.bf16.mxu1 %v5258_v0 }
 0x50d   : > { %2740 = vmatprep.mubr.bf16.mxu0 %v5930_v9  ;;  %2781 = vmatprep.mubr.bf16.mxu1 %v5930_v9 }
 0x50f   : > { %2711 = vmatpush1.bf16.msra.mxu0 %v5263_v1  ;;  %2752 = vmatpush1.bf16.msra.mxu1 %v5266_v2 }
 0x510   : > { %2712 = vmatprep.subr.bf16.mxu0 %v5269_v3  ;;  %2753 = vmatprep.subr.bf16.mxu1 %v5272_v4 }
 0x513   : > { %2713 = vmatpush1.bf16.msra.mxu0 %v5275_v5  ;;  %2754 = vmatpush1.bf16.msra.mxu1 %v5278_v6 }
 0x514   : > { %2714 = vmatprep.subr.bf16.mxu0 %v5281_v7  ;;  %2755 = vmatprep.subr.bf16.mxu1 %v5284_v10 }
 0x517   : > { %2715 = vmatpush1.bf16.msra.mxu0 %v5287_v11  ;;  %2756 = vmatpush1.bf16.msra.mxu1 %v5290_v12 }
 0x518   : > { %2716 = vmatprep.subr.bf16.mxu0 %v5293_v13  ;;  %2757 = vmatprep.subr.bf16.mxu1 %v6083_v17  ;;  %v6102_v17 = vld [vmem:[#allocation58_spill] sm:$0xff]  ;;  %v6103_v13 = vld [vmem:[#allocation61_spill] sm:$0xff] }
 0x51b   : > { %2717 = vmatpush1.bf16.msra.mxu0 %v6084_v42  ;;  %2758 = vmatpush1.bf16.msra.mxu1 %v6085_v36  ;;  %v6101_v36 = vld [vmem:[#allocation59_spill] sm:$0xff] }
 0x51c   : > { %2718 = vmatprep.subr.bf16.mxu0 %v6086_v15  ;;  %2759 = vmatprep.subr.bf16.mxu1 %v6087_v16  ;;  %v6098_v16 = vld [vmem:[#allocation33_spill] sm:$0xff] }
 0x51d   : > { %v6100_v15 = vld [vmem:[#allocation57_spill] sm:$0xff] }
 0x51f   : > { %2719 = vmatpush1.bf16.msra.mxu0 %v6088_v29  ;;  %2760 = vmatpush1.bf16.msra.mxu1 %v6089_v44  ;;  %v6099_v29 = vld [vmem:[#allocation34_spill] sm:$0xff] }
 0x520   : > { %2720 = vmatprep.subr.bf16.mxu0 %v6090_v39  ;;  %2761 = vmatprep.subr.bf16.mxu1 %v6091_v51 }
 0x523   : > { %2721 = vmatpush1.bf16.msra.mxu0 %v6092_v18  ;;  %2762 = vmatpush1.bf16.msra.mxu1 %v6093_v53 }
 0x524   : > { %2722 = vmatprep.subr.bf16.mxu0 %v6094_v27  ;;  %2763 = vmatprep.subr.bf16.mxu1 %v6095_v31 }
 0x527   : > { %2723 = vmatpush1.bf16.msra.mxu0 %v6096_v30  ;;  %2764 = vmatpush1.bf16.msra.mxu1 %v6097_v28 }
 0x528   : > { %2799 = vmatprep.subr.bf16.mxu0 %v6098_v16  ;;  %2840 = vmatprep.subr.bf16.mxu1 %v6099_v29 }
 0x5bd   : > { %v2510_v44 = vpop.f32.mrb[64].mxu0  ;;  %v2551_v39 = vpop.f32.mrb[64].mxu1 }
 0x5be   : > { %v2558_v51 = vadd.f32 %v2510_v44, %v6100_v15  ;;  %v2560_v18 = vadd.f32 %v2551_v39, %v6101_v36  ;;  %v2512_v42 = vpop.f32.mrb[65].mxu0  ;;  %v2553_v53 = vpop.f32.mrb[65].mxu1 }
 0x5bf   : > { %v2559_v27 = vadd.f32 %v2512_v42, %v6102_v17  ;;  %v2561_v31 = vadd.f32 %v2553_v53, %v6103_v13  ;;  %v2514_v12 = vpop.f32.mrb[66].mxu0  ;;  %v2555_v30 = vpop.f32.mrb[66].mxu1 }
 0x5c0   : > { %v3721_v11 = vmul.f32 -1.442695, %v2558_v51  ;;  %v2515_v28 = vpop.f32.mrb[67].mxu0  ;;  %v2556_v10 = vpop.f32.mrb[67].mxu1  ;;  %v6104_v51 = vld [vmem:[#allocation42_spill] sm:$0xff] }
 0x5c1   : > { %v3722_v16 = vmul.f32 -1.442695, %v2559_v27  ;;  %v3723_v29 = vmul.f32 -1.442695, %v2561_v31  ;;  %v6106_v27 = vld [vmem:[#allocation84_spill] sm:$0xff]  ;;  %v6108_v30 = vld [vmem:[#allocation86_spill] sm:$0xff] }
 0x5c2   : > { %4046 = vpow2.f32 %v3721_v11 }
 0x5c3   : > { %4048 = vpow2.f32 %v3722_v16 }
 0x5c4   : > { %4050 = vpow2.f32 %v3723_v29  ;;  %v6107_v29 = vld [vmem:[#allocation87_spill] sm:$0xff] }
 0x5c5   : > { %4052 = vtanh.f32 %v2560_v18 }
 0x5cc   : > { %v4047_v7 = vpop.eup %4046 }
 0x5cd   : > { %v4049_v6 = vpop.eup %4048  ;;  %v2656_v15 = vadd.f32 1.0, %v4047_v7 }
 0x5ce   : > { %v2662_v36 = vadd.f32 1.0, %v4049_v6  ;;  %v4051_v17 = vpop.eup %4050 }
 0x5cf   : > { %4054 = vrcp.f32 %v2656_v15  ;;  %v4053_v42 = vpop.eup %4052  ;;  %v2669_v39 = vadd.f32 1.0, %v4051_v17  ;;  %v6109_v15 = vld [vmem:[#allocation88_spill] sm:$0xff] }
 0x5d0   : > { %4056 = vrcp.f32 %v2662_v36 }
 0x5d1   : > { %4058 = vrcp.f32 %v2669_v39 }
 0x5d9   : > { %v4055_v13 = vpop.eup %4054 }
 0x5da   : > { %v4057_v12 = vpop.eup %4056  ;;  %v2673_v44 = vmul.f32 %v4055_v13, %v4053_v42 }
 0x5db   : > { %v2672_v10 = vmul.f32 %v4057_v12, %v6104_v51  ;;  %v4059_v39 = vpop.eup %4058 }
 0x5dd   : > { %v5584_v53 = vadd.f32 %v2673_v44, %v2672_v10  ;;  %v2601_v11 = vpop.f32.mrb[68].mxu0  ;;  %v2642_v16 = vpop.f32.mrb[68].mxu1 }
 0x5de   : > { %v2649_v7 = vadd.f32 %v2601_v11, %v6106_v27  ;;  %v2651_v18 = vadd.f32 %v2642_v16, %v6107_v29  ;;  %v2603_v6 = vpop.f32.mrb[69].mxu0  ;;  %v2644_v31 = vpop.f32.mrb[69].mxu1 }
 0x5df   : > { %6105 = vst [vmem:[#allocation43_spill] sm:$0xff] %v5584_v53  ;;  %4060 = vtanh.f32 %v5584_v53  ;;  %v2650_v28 = vadd.f32 %v2603_v6, %v6108_v30  ;;  %v2652_v36 = vadd.f32 %v2644_v31, %v6109_v15  ;;  %v2605_v17 = vpop.f32.mrb[70].mxu0  ;;  %v2646_v42 = vpop.f32.mrb[70].mxu1 }
 0x5e0   : > { %v3724_v13 = vmul.f32 -1.442695, %v2649_v7  ;;  %v2606_v12 = vpop.f32.mrb[71].mxu0  ;;  %v2647_v44 = vpop.f32.mrb[71].mxu1 }
 0x5e1   : > { %v3725_v51 = vmul.f32 -1.442695, %v2650_v28  ;;  %v3726_v11 = vmul.f32 -1.442695, %v2652_v36  ;;  %v6121_v12 = vld [vmem:[#allocation22_spill] sm:$0xff]  ;;  %v6122_v44 = vld [vmem:[#allocation23_spill] sm:$0xff] }
 0x5e2   : > { %4062 = vpow2.f32 %v3724_v13  ;;  %v6116_v13 = vld [vmem:[#allocation17_spill] sm:$0xff] }
 0x5e3   : > { %4064 = vpow2.f32 %v3725_v51  ;;  %v6123_v51 = vld [vmem:[#allocation24_spill] sm:$0xff] }
 0x5e4   : > { %4066 = vpow2.f32 %v3726_v11  ;;  %v6126_v11 = vld [vmem:[#allocation27_spill] sm:$0xff] }
 0x5e5   : > { %4068 = vtanh.f32 %v2651_v18 }
 0x5e9   : > { %v4061_v10 = vpop.eup %4060 }
 0x5ea   : > { %v2676_v16 = vmul.f32 %v4061_v10, %v4059_v39  ;;  %v6124_v39 = vld [vmem:[#allocation25_spill] sm:$0xff]  ;;  %v6125_v10 = vld [vmem:[#allocation26_spill] sm:$0xff] }
 0x5ec   : > { %v4063_v27 = vpop.eup %4062  ;;  %3727 = vst [vmem:[%s5118_s30 + $0x40] sm:$0xff] %v2676_v16  ;;  %v2707_v29 = vpack.c.bf16 %v2676_v16, %v2676_v16  ;;  %v6127_v16 = vld [vmem:[#allocation28_spill] sm:$0xff] }
 0x5ed   : > { %v4065_v53 = vpop.eup %4064  ;;  %v2680_v5 = vadd.f32 1.0, %v4063_v27  ;;  %v6128_v27 = vld [vmem:[#allocation29_spill] sm:$0xff] }
 0x5ee   : > { %v2686_v6 = vadd.f32 1.0, %v4065_v53  ;;  %2741 = vmatmul.mubr.bf16.vlgmr.msra.gmra.mrb[72].mxu0 %v2707_v29  ;;  %2782 = vmatmul.mubr.bf16.vlgmr.msra.gmra.mrb[72].mxu1 %v2707_v29  ;;  %v6129_v29 = vld [vmem:[#allocation30_spill] sm:$0xff] }
 0x5ef   : > { %4070 = vrcp.f32 %v2680_v5  ;;  %2800 = vmatpush1.bf16.msra.mxu0 %v5360_v38  ;;  %2841 = vmatpush1.bf16.msra.mxu1 %v5363_v24  ;;  %v4067_v5 = vpop.eup %4066 }
 0x5f0   : > { %4072 = vrcp.f32 %v2686_v6  ;;  %2801 = vmatprep.subr.bf16.mxu0 %v5366_v25  ;;  %2842 = vmatprep.subr.bf16.mxu1 %v5369_v22  ;;  %v4069_v53 = vpop.eup %4068  ;;  %v2693_v30 = vadd.f32 1.0, %v4067_v5  ;;  %v6130_v6 = vld [vmem:[#allocation31_spill] sm:$0xff]  ;;  %v6131_v5 = vld [vmem:[#allocation32_spill] sm:$0xff] }
 0x5f1   : > { %2831 = vmatprep.mubr.bf16.mxu0 %v5930_v9  ;;  %2872 = vmatprep.mubr.bf16.mxu1 %v5930_v9 }
 0x5f2   : > { %4074 = vrcp.f32 %v2693_v30  ;;  %v6134_v30 = vld [vmem:[#allocation60_spill] sm:$0xff] }
 0x5f3   : > { %2802 = vmatpush1.bf16.msra.mxu0 %v5374_v37  ;;  %2843 = vmatpush1.bf16.msra.mxu1 %v5377_v34 }
 0x5f4   : > { %2803 = vmatprep.subr.bf16.mxu0 %v5380_v23  ;;  %2844 = vmatprep.subr.bf16.mxu1 %v5383_v26 }
 0x5f7   : > { %2804 = vmatpush1.bf16.msra.mxu0 %v5386_v32  ;;  %2845 = vmatpush1.bf16.msra.mxu1 %v5389_v19 }
 0x5f8   : > { %2805 = vmatprep.subr.bf16.mxu0 %v5392_v49  ;;  %2846 = vmatprep.subr.bf16.mxu1 %v5395_v47 }
 0x5f9   : > { %v4071_v7 = vpop.eup %4070 }
 0x5fa   : > { %v4073_v18 = vpop.eup %4072  ;;  %v2697_v31 = vmul.f32 %v4071_v7, %v4069_v53  ;;  %v6132_v53 = vld [vmem:[#allocation33_spill] sm:$0xff]  ;;  %v6133_v7 = vld [vmem:[#allocation34_spill] sm:$0xff] }
 0x5fb   : > { %v2696_v28 = vmul.f32 %v4073_v18, %v5525_v50  ;;  %2806 = vmatpush1.bf16.msra.mxu0 %v5399_v54  ;;  %2847 = vmatpush1.bf16.msra.mxu1 %v5402_v56 }
 0x5fc   : > { %2807 = vmatprep.subr.bf16.mxu0 %v5405_v57  ;;  %2848 = vmatprep.subr.bf16.mxu1 %v5408_v58  ;;  %v4075_v50 = vpop.eup %4074 }
 0x5fd   : > { %v5611_v15 = vadd.f32 %v2697_v31, %v2696_v28 }
 0x5ff   : > { %4076 = vtanh.f32 %v5611_v15  ;;  %2808 = vmatpush1.bf16.msra.mxu0 %v5414_v55  ;;  %2849 = vmatpush1.bf16.msra.mxu1 %v5417_v33 }
 0x600   : > { %2809 = vmatprep.subr.bf16.mxu0 %v5420_v41  ;;  %2850 = vmatprep.subr.bf16.mxu1 %v6076_v59 }
 0x603   : > { %2810 = vmatpush1.bf16.msra.mxu0 %v6077_v46  ;;  %2851 = vmatpush1.bf16.msra.mxu1 %v6078_v43 }
 0x604   : > { %2811 = vmatprep.subr.bf16.mxu0 %v6079_v48  ;;  %2852 = vmatprep.subr.bf16.mxu1 %v6080_v35 }
 0x607   : > { %2812 = vmatpush1.bf16.msra.mxu0 %v6081_v40  ;;  %2853 = vmatpush1.bf16.msra.mxu1 %v6082_v45 }
 0x608   : > { %2813 = vmatprep.subr.bf16.mxu0 %v5444_v14  ;;  %2854 = vmatprep.subr.bf16.mxu1 %v5447_v20 }
 0x609   : > { %v4077_v36 = vpop.eup %4076 }
 0x60a   : > { %v2700_v17 = vmul.f32 %v4077_v36, %v4075_v50  ;;  %v6135_v50 = vld [vmem:[#allocation63_spill] sm:$0xff] }
 0x60b   : > { %2814 = vmatpush1.bf16.msra.mxu0 %v5450_v21  ;;  %2855 = vmatpush1.bf16.msra.mxu1 %v5453_v52 }
 0x60c   : > { %3728 = vst [vmem:[%s5118_s30 + $0x38] sm:$0xff] %v2700_v17  ;;  %v2798_v42 = vpack.c.bf16 %v2700_v17, %v2700_v17  ;;  %2940 = vmatprep.subr.bf16.mxu0 %v5243_v60  ;;  %2981 = vmatprep.subr.bf16.mxu1 %v5246_v61  ;;  %v6110_v60 = vld [vmem:[#allocation44_spill] sm:$0xff] }
 0x60d   : > { %v6111_v61 = vld [vmem:[#allocation12_spill] sm:$0xff] }
 0x60e   : > { %2832 = vmatmul.mubr.bf16.vlgmr.msra.gmra.mrb[76].mxu0 %v2798_v42  ;;  %2873 = vmatmul.mubr.bf16.vlgmr.msra.gmra.mrb[76].mxu1 %v2798_v42 }
 0x60f   : > { %2941 = vmatpush1.bf16.msra.mxu0 %v5249_v62  ;;  %2982 = vmatpush1.bf16.msra.mxu1 %v5252_v63  ;;  %v6112_v62 = vld [vmem:[#allocation13_spill] sm:$0xff]  ;;  %v6113_v63 = vld [vmem:[#allocation14_spill] sm:$0xff] }
 0x610   : > { %2942 = vmatprep.subr.bf16.mxu0 %v5255_v8  ;;  %2983 = vmatprep.subr.bf16.mxu1 %v5258_v0  ;;  %v6114_v8 = vld [vmem:[#allocation15_spill] sm:$0xff]  ;;  %v6115_v0 = vld [vmem:[#allocation16_spill] sm:$0xff] }
 0x611   : > { %2972 = vmatprep.mubr.bf16.mxu0 %v5930_v9  ;;  %3013 = vmatprep.mubr.bf16.mxu1 %v5930_v9 }
 0x613   : > { %2943 = vmatpush1.bf16.msra.mxu0 %v5263_v1  ;;  %2984 = vmatpush1.bf16.msra.mxu1 %v5266_v2  ;;  %v6117_v1 = vld [vmem:[#allocation18_spill] sm:$0xff]  ;;  %v6118_v2 = vld [vmem:[#allocation19_spill] sm:$0xff] }
 0x614   : > { %2944 = vmatprep.subr.bf16.mxu0 %v5269_v3  ;;  %2985 = vmatprep.subr.bf16.mxu1 %v5272_v4  ;;  %v6119_v3 = vld [vmem:[#allocation20_spill] sm:$0xff]  ;;  %v6120_v4 = vld [vmem:[#allocation21_spill] sm:$0xff] }
 0x617   : > { %2945 = vmatpush1.bf16.msra.mxu0 %v6110_v60  ;;  %2986 = vmatpush1.bf16.msra.mxu1 %v6111_v61  ;;  %v6136_v60 = vld [vmem:[#allocation62_spill] sm:$0xff] }
 0x618   : > { %2946 = vmatprep.subr.bf16.mxu0 %v6112_v62  ;;  %2987 = vmatprep.subr.bf16.mxu1 %v6113_v63  ;;  %v6137_v62 = vld [vmem:[#allocation64_spill] sm:$0xff] }
 0x61b   : > { %2947 = vmatpush1.bf16.msra.mxu0 %v6114_v8  ;;  %2988 = vmatpush1.bf16.msra.mxu1 %v6115_v0 }
 0x61c   : > { %2948 = vmatprep.subr.bf16.mxu0 %v6116_v13  ;;  %2989 = vmatprep.subr.bf16.mxu1 %v6117_v1 }
 0x61f   : > { %2949 = vmatpush1.bf16.msra.mxu0 %v6118_v2  ;;  %2990 = vmatpush1.bf16.msra.mxu1 %v6119_v3 }
 0x620   : > { %2950 = vmatprep.subr.bf16.mxu0 %v6120_v4  ;;  %2991 = vmatprep.subr.bf16.mxu1 %v6121_v12 }
 0x623   : > { %2951 = vmatpush1.bf16.msra.mxu0 %v6122_v44  ;;  %2992 = vmatpush1.bf16.msra.mxu1 %v6123_v51 }
 0x624   : > { %2952 = vmatprep.subr.bf16.mxu0 %v6124_v39  ;;  %2993 = vmatprep.subr.bf16.mxu1 %v6125_v10 }
 0x627   : > { %2953 = vmatpush1.bf16.msra.mxu0 %v6126_v11  ;;  %2994 = vmatpush1.bf16.msra.mxu1 %v6127_v16 }
 0x628   : > { %2954 = vmatprep.subr.bf16.mxu0 %v6128_v27  ;;  %2995 = vmatprep.subr.bf16.mxu1 %v6129_v29 }
 0x62b   : > { %2955 = vmatpush1.bf16.msra.mxu0 %v6130_v6  ;;  %2996 = vmatpush1.bf16.msra.mxu1 %v6131_v5  ;;  %v6138_v5 = vld [vmem:[#allocation43_spill] sm:$0xff] }
 0x62c   : > { %3031 = vmatprep.subr.bf16.mxu0 %v6132_v53  ;;  %3072 = vmatprep.subr.bf16.mxu1 %v6133_v7 }
 0x6c1   : > { %v2742_v18 = vpop.f32.mrb[72].mxu0  ;;  %v2783_v31 = vpop.f32.mrb[72].mxu1 }
 0x6c2   : > { %v2790_v28 = vadd.f32 %v2742_v18, %v6134_v30  ;;  %v2792_v36 = vadd.f32 %v2783_v31, %v6135_v50  ;;  %v2744_v17 = vpop.f32.mrb[73].mxu0  ;;  %v2785_v42 = vpop.f32.mrb[73].mxu1  ;;  %v6139_v30 = vld [vmem:[#allocation81_spill] sm:$0xff]  ;;  %v6140_v50 = vld [vmem:[#allocation83_spill] sm:$0xff] }
 0x6c3   : > { %v2791_v61 = vadd.f32 %v2744_v17, %v6136_v60  ;;  %v2793_v63 = vadd.f32 %v2785_v42, %v6137_v62  ;;  %v2746_v8 = vpop.f32.mrb[74].mxu0  ;;  %v2787_v0 = vpop.f32.mrb[74].mxu1  ;;  %v6141_v60 = vld [vmem:[#allocation82_spill] sm:$0xff]  ;;  %v6142_v62 = vld [vmem:[#allocation85_spill] sm:$0xff] }
 0x6c4   : > { %v3729_v13 = vmul.f32 -1.442695, %v2790_v28  ;;  %v2747_v1 = vpop.f32.mrb[75].mxu0  ;;  %v2788_v2 = vpop.f32.mrb[75].mxu1 }
 0x6c5   : > { %v3730_v3 = vmul.f32 -1.442695, %v2791_v61  ;;  %v3731_v4 = vmul.f32 -1.442695, %v2793_v63 }
 0x6c6   : > { %4078 = vpow2.f32 %v3729_v13 }
 0x6c7   : > { %4080 = vpow2.f32 %v3730_v3 }
 0x6c8   : > { %4082 = vpow2.f32 %v3731_v4 }
 0x6c9   : > { %4084 = vtanh.f32 %v2792_v36 }
 0x6d0   : > { %v4079_v12 = vpop.eup %4078 }
 0x6d1   : > { %v4081_v44 = vpop.eup %4080  ;;  %v2888_v51 = vadd.f32 1.0, %v4079_v12 }
 0x6d2   : > { %v2894_v39 = vadd.f32 1.0, %v4081_v44  ;;  %v4083_v10 = vpop.eup %4082 }
 0x6d3   : > { %4086 = vrcp.f32 %v2888_v51  ;;  %v4085_v11 = vpop.eup %4084  ;;  %v2901_v6 = vadd.f32 1.0, %v4083_v10 }
 0x6d4   : > { %4088 = vrcp.f32 %v2894_v39 }
 0x6d5   : > { %4090 = vrcp.f32 %v2901_v6  ;;  %v4258_v6 = vld [vmem:[#allocation6 + $0xa4] ss:$16 sps:$4 sm:$0xff]  }
 0x6dd   : > { %v4087_v16 = vpop.eup %4086 }
 0x6de   : > { %v4089_v27 = vpop.eup %4088  ;;  %v2905_v29 = vmul.f32 %v4087_v16, %v4085_v11 }
 0x6df   : > { %v2904_v53 = vmul.f32 %v4089_v27, %v6138_v5  ;;  %v4091_v4 = vpop.eup %4090  ;;  %v4259_v5 = vld [vmem:[#allocation6 + $0xac] ss:$16 sps:$4 sm:$0xff]  }
 0x6e1   : > { %v5670_v7 = vadd.f32 %v2905_v29, %v2904_v53  ;;  %v2833_v18 = vpop.f32.mrb[76].mxu0  ;;  %v2874_v31 = vpop.f32.mrb[76].mxu1  ;;  %v4260_v53 = vld [vmem:[#allocation6 + $0xa0] ss:$16 sps:$4 sm:$0xff]  }
 0x6e2   : > { %v2881_v28 = vadd.f32 %v2833_v18, %v6139_v30  ;;  %v2883_v36 = vadd.f32 %v2874_v31, %v6140_v50  ;;  %v2835_v17 = vpop.f32.mrb[77].mxu0  ;;  %v2876_v42 = vpop.f32.mrb[77].mxu1  ;;  %v4261_v18 = vld [vmem:[#allocation6 + $0xa8] ss:$16 sps:$4 sm:$0xff]   ;;  %v4262_v31 = vld [vmem:[#allocation6 + $0xc4] ss:$16 sps:$4 sm:$0xff]  }
 0x6e3   : > { %4092 = vtanh.f32 %v5670_v7  ;;  %v2882_v61 = vadd.f32 %v2835_v17, %v6141_v60  ;;  %v2884_v63 = vadd.f32 %v2876_v42, %v6142_v62  ;;  %v2837_v8 = vpop.f32.mrb[78].mxu0  ;;  %v2878_v0 = vpop.f32.mrb[78].mxu1  ;;  %v4263_v30 = vld [vmem:[#allocation6 + $0xcc] ss:$16 sps:$4 sm:$0xff]   ;;  %v4265_v50 = vld [vmem:[#allocation6 + $0xc8] ss:$16 sps:$4 sm:$0xff]  }
 0x6e4   : > { %v3732_v13 = vmul.f32 -1.442695, %v2881_v28  ;;  %v2838_v1 = vpop.f32.mrb[79].mxu0  ;;  %v2879_v2 = vpop.f32.mrb[79].mxu1  ;;  %v4264_v28 = vld [vmem:[#allocation6 + $0xc0] ss:$16 sps:$4 sm:$0xff]  }
 0x6e5   : > { %v3733_v3 = vmul.f32 -1.442695, %v2882_v61  ;;  %v3734_v44 = vmul.f32 -1.442695, %v2884_v63  ;;  %v4267_v17 = vld [vmem:[#allocation6 + $0xec] ss:$16 sps:$4 sm:$0xff]  }
 0x6e6   : > { %4094 = vpow2.f32 %v3732_v13  ;;  %v4268_v42 = vld [vmem:[#allocation6 + $0xe0] ss:$16 sps:$4 sm:$0xff]   ;;  %v4269_v60 = vld [vmem:[#allocation6 + $0xe8] ss:$16 sps:$4 sm:$0xff]   ;;  %v4270_v61 = vld [vmem:[#allocation8 + $0x4] ss:$16 sps:$4 sm:$0xff]  }
 0x6e7   : > { %4096 = vpow2.f32 %v3733_v3  ;;  %v4271_v62 = vld [vmem:[#allocation8 + $0xc] ss:$16 sps:$4 sm:$0xff]  }
 0x6e8   : > { %4098 = vpow2.f32 %v3734_v44  ;;  %v6143_v0 = vld [vmem:[#allocation65_spill] sm:$0xff]  ;;  %v6144_v1 = vld [vmem:[#allocation67_spill] sm:$0xff] }
 0x6e9   : > { %4100 = vtanh.f32 %v2883_v36  ;;  %v4266_v36 = vld [vmem:[#allocation6 + $0xe4] ss:$16 sps:$4 sm:$0xff]  }
 0x6ed   : > { %v4093_v12 = vpop.eup %4092 }
 0x6ee   : > { %v2908_v51 = vmul.f32 %v4093_v12, %v4091_v4  ;;  %v6145_v12 = vld [vmem:[#allocation66_spill] sm:$0xff] }
 0x6f0   : > { %v4095_v39 = vpop.eup %4094  ;;  %3735 = vst [vmem:[%s5118_s30 + $0x50] sm:$0xff] %v2908_v51  ;;  %v2939_v10 = vpack.c.bf16 %v2908_v51, %v2908_v51  ;;  %v6146_v51 = vld [vmem:[#allocation69_spill] sm:$0xff] }
 0x6f1   : > { %v4097_v11 = vpop.eup %4096  ;;  %v2912_v16 = vadd.f32 1.0, %v4095_v39 }
 0x6f2   : > { %v2918_v27 = vadd.f32 1.0, %v4097_v11  ;;  %2973 = vmatmul.mubr.bf16.vlgmr.msra.gmra.mrb[80].mxu0 %v2939_v10  ;;  %3014 = vmatmul.mubr.bf16.vlgmr.msra.gmra.mrb[80].mxu1 %v2939_v10 }
 0x6f3   : > { %4102 = vrcp.f32 %v2912_v16  ;;  %3032 = vmatpush1.bf16.msra.mxu0 %v5360_v38  ;;  %3073 = vmatpush1.bf16.msra.mxu1 %v5363_v24  ;;  %v4099_v38 = vpop.eup %4098 }
 0x6f4   : > { %4104 = vrcp.f32 %v2918_v27  ;;  %3033 = vmatprep.subr.bf16.mxu0 %v5366_v25  ;;  %3074 = vmatprep.subr.bf16.mxu1 %v5369_v22  ;;  %v4101_v24 = vpop.eup %4100 }
 0x6f5   : > { %3063 = vmatprep.mubr.bf16.mxu0 %v5930_v9  ;;  %3104 = vmatprep.mubr.bf16.mxu1 %v5930_v9 }
 0x6f7   : > { %3034 = vmatpush1.bf16.msra.mxu0 %v5374_v37  ;;  %3075 = vmatpush1.bf16.msra.mxu1 %v5377_v34  ;;  %v2925_v37 = vadd.f32 1.0, %v4099_v38 }
 0x6f8   : > { %3035 = vmatprep.subr.bf16.mxu0 %v5380_v23  ;;  %3076 = vmatprep.subr.bf16.mxu1 %v5383_v26 }
 0x6f9   : > { %4106 = vrcp.f32 %v2925_v37 }
 0x6fb   : > { %3036 = vmatpush1.bf16.msra.mxu0 %v5386_v32  ;;  %3077 = vmatpush1.bf16.msra.mxu1 %v5389_v19 }
 0x6fc   : > { %3037 = vmatprep.subr.bf16.mxu0 %v5392_v49  ;;  %3078 = vmatprep.subr.bf16.mxu1 %v5395_v47  ;;  %v4238_v47 = vld [vmem:[#allocation6 + $0x4] ss:$16 sps:$4 sm:$0xff]  }
 0x6fd   : > { %v4103_v25 = vpop.eup %4102 }
 0x6fe   : > { %v4105_v22 = vpop.eup %4104  ;;  %v2929_v29 = vmul.f32 %v4103_v25, %v4101_v24 }
 0x6ff   : > { %v2928_v34 = vmul.f32 %v4105_v22, %v5611_v15  ;;  %3038 = vmatpush1.bf16.msra.mxu0 %v5399_v54  ;;  %3079 = vmatpush1.bf16.msra.mxu1 %v5402_v56  ;;  %v4239_v54 = vld [vmem:[#allocation6 + $0xc] ss:$16 sps:$4 sm:$0xff]   ;;  %v4240_v56 = vld [vmem:[#allocation6] ss:$16 sps:$4 sm:$0xff]   ;;  %v4257_v15 = vld [vmem:[#allocation6 + $0x88] ss:$16 sps:$4 sm:$0xff]  }
 0x700   : > { %3039 = vmatprep.subr.bf16.mxu0 %v5405_v57  ;;  %3080 = vmatprep.subr.bf16.mxu1 %v5408_v58  ;;  %v4241_v57 = vld [vmem:[#allocation6 + $0x8] ss:$16 sps:$4 sm:$0xff]   ;;  %v4242_v58 = vld [vmem:[#allocation6 + $0x24] ss:$16 sps:$4 sm:$0xff]  }
 0x701   : > { %v5697_v23 = vadd.f32 %v2929_v29, %v2928_v34 }
 0x703   : > { %4108 = vtanh.f32 %v5697_v23  ;;  %3040 = vmatpush1.bf16.msra.mxu0 %v5414_v55  ;;  %3081 = vmatpush1.bf16.msra.mxu1 %v5417_v33  ;;  %v4107_v26 = vpop.eup %4106  ;;  %v4243_v55 = vld [vmem:[#allocation6 + $0x2c] ss:$16 sps:$4 sm:$0xff]   ;;  %v4244_v33 = vld [vmem:[#allocation6 + $0x20] ss:$16 sps:$4 sm:$0xff]  }
 0x704   : > { %3041 = vmatprep.subr.bf16.mxu0 %v5420_v41  ;;  %3082 = vmatprep.subr.bf16.mxu1 %v6076_v59  ;;  %v4245_v41 = vld [vmem:[#allocation6 + $0x28] ss:$16 sps:$4 sm:$0xff]   ;;  %v4250_v59 = vld [vmem:[#allocation6 + $0x64] ss:$16 sps:$4 sm:$0xff]  }
 0x707   : > { %3042 = vmatpush1.bf16.msra.mxu0 %v6077_v46  ;;  %3083 = vmatpush1.bf16.msra.mxu1 %v6078_v43  ;;  %v4251_v46 = vld [vmem:[#allocation6 + $0x6c] ss:$16 sps:$4 sm:$0xff]   ;;  %v4252_v43 = vld [vmem:[#allocation6 + $0x60] ss:$16 sps:$4 sm:$0xff]  }
 0x708   : > { %3043 = vmatprep.subr.bf16.mxu0 %v6079_v48  ;;  %3084 = vmatprep.subr.bf16.mxu1 %v6080_v35  ;;  %v4253_v48 = vld [vmem:[#allocation6 + $0x68] ss:$16 sps:$4 sm:$0xff]   ;;  %v4254_v35 = vld [vmem:[#allocation6 + $0x84] ss:$16 sps:$4 sm:$0xff]  }
 0x70b   : > { %3044 = vmatpush1.bf16.msra.mxu0 %v6081_v40  ;;  %3085 = vmatpush1.bf16.msra.mxu1 %v6082_v45  ;;  %v4255_v40 = vld [vmem:[#allocation6 + $0x8c] ss:$16 sps:$4 sm:$0xff]   ;;  %v4256_v45 = vld [vmem:[#allocation6 + $0x80] ss:$16 sps:$4 sm:$0xff]  }
 0x70c   : > { %3045 = vmatprep.subr.bf16.mxu0 %v5444_v14  ;;  %3086 = vmatprep.subr.bf16.mxu1 %v5447_v20  ;;  %v4247_v14 = vld [vmem:[#allocation6 + $0x4c] ss:$16 sps:$4 sm:$0xff]   ;;  %v4248_v20 = vld [vmem:[#allocation6 + $0x40] ss:$16 sps:$4 sm:$0xff]  }
 0x70d   : > { %v4109_v32 = vpop.eup %4108 }
 0x70e   : > { %v2932_v19 = vmul.f32 %v4109_v32, %v4107_v26 }
 0x70f   : > { %3046 = vmatpush1.bf16.msra.mxu0 %v5450_v21  ;;  %3087 = vmatpush1.bf16.msra.mxu1 %v5453_v52  ;;  %v4246_v21 = vld [vmem:[#allocation6 + $0x44] ss:$16 sps:$4 sm:$0xff]   ;;  %v4249_v52 = vld [vmem:[#allocation6 + $0x48] ss:$16 sps:$4 sm:$0xff]  }
 0x710   : > { %3736 = vst [vmem:[%s5118_s30 + $0x28] sm:$0xff] %v2932_v19  ;;  %v3030_v49 = vpack.c.bf16 %v2932_v19, %v2932_v19  ;;  %3172 = vmatprep.subr.bf16.mxu0 %v4238_v47  ;;  %3213 = vmatprep.subr.bf16.mxu1 %v4239_v54 }
 0x712   : > { %3064 = vmatmul.mubr.bf16.vlgmr.msra.gmra.mrb[84].mxu0 %v3030_v49  ;;  %3105 = vmatmul.mubr.bf16.vlgmr.msra.gmra.mrb[84].mxu1 %v3030_v49 }
 0x713   : > { %3173 = vmatpush1.bf16.msra.mxu0 %v4240_v56  ;;  %3214 = vmatpush1.bf16.msra.mxu1 %v4241_v57 }
 0x714   : > { %3174 = vmatprep.subr.bf16.mxu0 %v4242_v58  ;;  %3215 = vmatprep.subr.bf16.mxu1 %v4243_v55 }
 0x715   : > { %3204 = vmatprep.mubr.bf16.mxu0 %v5930_v9  ;;  %3245 = vmatprep.mubr.bf16.mxu1 %v5930_v9 }
 0x717   : > { %3175 = vmatpush1.bf16.msra.mxu0 %v4244_v33  ;;  %3216 = vmatpush1.bf16.msra.mxu1 %v4245_v41  ;;  %v6147_v33 = vld [vmem:[#allocation76_spill] sm:$0xff] }
 0x718   : > { %3176 = vmatprep.subr.bf16.mxu0 %v4246_v21  ;;  %3217 = vmatprep.subr.bf16.mxu1 %v4247_v14  ;;  %v6148_v21 = vld [vmem:[#allocation79_spill] sm:$0xff] }
 0x71b   : > { %3177 = vmatpush1.bf16.msra.mxu0 %v4248_v20  ;;  %3218 = vmatpush1.bf16.msra.mxu1 %v4249_v52 }
 0x71c   : > { %3178 = vmatprep.subr.bf16.mxu0 %v4250_v59  ;;  %3219 = vmatprep.subr.bf16.mxu1 %v4251_v46  ;;  %v6149_v59 = vld [vmem:[#allocation78_spill] sm:$0xff] }
 0x71f   : > { %3179 = vmatpush1.bf16.msra.mxu0 %v4252_v43  ;;  %3220 = vmatpush1.bf16.msra.mxu1 %v4253_v48  ;;  %v6150_v43 = vld [vmem:[#allocation80_spill] sm:$0xff] }
 0x720   : > { %3180 = vmatprep.subr.bf16.mxu0 %v4254_v35  ;;  %3221 = vmatprep.subr.bf16.mxu1 %v4255_v40 }
 0x723   : > { %3181 = vmatpush1.bf16.msra.mxu0 %v4256_v45  ;;  %3222 = vmatpush1.bf16.msra.mxu1 %v4257_v15 }
 0x724   : > { %3182 = vmatprep.subr.bf16.mxu0 %v4258_v6  ;;  %3223 = vmatprep.subr.bf16.mxu1 %v4259_v5 }
 0x727   : > { %3183 = vmatpush1.bf16.msra.mxu0 %v4260_v53  ;;  %3224 = vmatpush1.bf16.msra.mxu1 %v4261_v18 }
 0x728   : > { %3184 = vmatprep.subr.bf16.mxu0 %v4262_v31  ;;  %3225 = vmatprep.subr.bf16.mxu1 %v4263_v30 }
 0x72b   : > { %3185 = vmatpush1.bf16.msra.mxu0 %v4264_v28  ;;  %3226 = vmatpush1.bf16.msra.mxu1 %v4265_v50 }
 0x72c   : > { %3186 = vmatprep.subr.bf16.mxu0 %v4266_v36  ;;  %3227 = vmatprep.subr.bf16.mxu1 %v4267_v17 }
 0x72f   : > { %3187 = vmatpush1.bf16.msra.mxu0 %v4268_v42  ;;  %3228 = vmatpush1.bf16.msra.mxu1 %v4269_v60  ;;  %v4272_v42 = vld [vmem:[#allocation8] ss:$16 sps:$4 sm:$0xff]   ;;  %v4273_v60 = vld [vmem:[#allocation8 + $0x8] ss:$16 sps:$4 sm:$0xff]  }
 0x730   : > { %3263 = vmatprep.subr.bf16.mxu0 %v4270_v61  ;;  %3304 = vmatprep.subr.bf16.mxu1 %v4271_v62  ;;  %v4274_v61 = vld [vmem:[#allocation8 + $0x24] ss:$16 sps:$4 sm:$0xff]   ;;  %v4275_v62 = vld [vmem:[#allocation8 + $0x2c] ss:$16 sps:$4 sm:$0xff]  }
 0x7c5   : > { %v2974_v63 = vpop.f32.mrb[80].mxu0  ;;  %v3015_v8 = vpop.f32.mrb[80].mxu1 }
 0x7c6   : > { %v3022_v13 = vadd.f32 %v2974_v63, %v6143_v0  ;;  %v3024_v2 = vadd.f32 %v3015_v8, %v6144_v1  ;;  %v2976_v3 = vpop.f32.mrb[81].mxu0  ;;  %v3017_v4 = vpop.f32.mrb[81].mxu1  ;;  %v4276_v63 = vld [vmem:[#allocation8 + $0x20] ss:$16 sps:$4 sm:$0xff]   ;;  %v4277_v8 = vld [vmem:[#allocation8 + $0x28] ss:$16 sps:$4 sm:$0xff]  }
 0x7c7   : > { %v3023_v44 = vadd.f32 %v2976_v3, %v6145_v12  ;;  %v3025_v39 = vadd.f32 %v3017_v4, %v6146_v51  ;;  %v2978_v10 = vpop.f32.mrb[82].mxu0  ;;  %v3019_v11 = vpop.f32.mrb[82].mxu1  ;;  %v4278_v0 = vld [vmem:[#allocation8 + $0x44] ss:$16 sps:$4 sm:$0xff]   ;;  %v4281_v3 = vld [vmem:[#allocation8 + $0x48] ss:$16 sps:$4 sm:$0xff]  }
 0x7c8   : > { %v3737_v16 = vmul.f32 -1.442695, %v3022_v13  ;;  %v2979_v27 = vpop.f32.mrb[83].mxu0  ;;  %v3020_v38 = vpop.f32.mrb[83].mxu1  ;;  %v4279_v13 = vld [vmem:[#allocation8 + $0x4c] ss:$16 sps:$4 sm:$0xff]  }
 0x7c9   : > { %v3738_v24 = vmul.f32 -1.442695, %v3023_v44  ;;  %v3739_v25 = vmul.f32 -1.442695, %v3025_v39  ;;  %v4282_v12 = vld [vmem:[#allocation8 + $0x64] ss:$16 sps:$4 sm:$0xff]  }
 0x7ca   : > { %4110 = vpow2.f32 %v3737_v16  ;;  %v4283_v44 = vld [vmem:[#allocation8 + $0x6c] ss:$16 sps:$4 sm:$0xff]   ;;  %v4284_v16 = vld [vmem:[#allocation8 + $0x60] ss:$16 sps:$4 sm:$0xff]   ;;  %v4285_v27 = vld [vmem:[#allocation8 + $0x68] ss:$16 sps:$4 sm:$0xff]  }
 0x7cb   : > { %4112 = vpow2.f32 %v3738_v24  ;;  %v4286_v38 = vld [vmem:[#allocation8 + $0x84] ss:$16 sps:$4 sm:$0xff]   ;;  %v4287_v24 = vld [vmem:[#allocation8 + $0x8c] ss:$16 sps:$4 sm:$0xff]  }
 0x7cc   : > { %4114 = vpow2.f32 %v3739_v25 }
 0x7cd   : > { %4116 = vtanh.f32 %v3024_v2  ;;  %v4280_v2 = vld [vmem:[#allocation8 + $0x40] ss:$16 sps:$4 sm:$0xff]  }
 0x7d4   : > { %v4111_v22 = vpop.eup %4110 }
 0x7d5   : > { %v4113_v29 = vpop.eup %4112  ;;  %v3120_v37 = vadd.f32 1.0, %v4111_v22  ;;  %v4288_v22 = vld [vmem:[#allocation8 + $0x80] ss:$16 sps:$4 sm:$0xff]  }
 0x7d6   : > { %v3126_v34 = vadd.f32 1.0, %v4113_v29  ;;  %v4115_v26 = vpop.eup %4114  ;;  %v4289_v29 = vld [vmem:[#allocation8 + $0x88] ss:$16 sps:$4 sm:$0xff]  }
 0x7d7   : > { %4118 = vrcp.f32 %v3120_v37  ;;  %v4117_v32 = vpop.eup %4116  ;;  %v3133_v54 = vadd.f32 1.0, %v4115_v26  ;;  %v4290_v37 = vld [vmem:[#allocation8 + $0xa4] ss:$16 sps:$4 sm:$0xff]   ;;  %v4293_v26 = vld [vmem:[#allocation8 + $0xa8] ss:$16 sps:$4 sm:$0xff]  }
 0x7d8   : > { %4120 = vrcp.f32 %v3126_v34  ;;  %v4292_v34 = vld [vmem:[#allocation8 + $0xa0] ss:$16 sps:$4 sm:$0xff]  }
 0x7d9   : > { %4122 = vrcp.f32 %v3133_v54 }
 0x7e1   : > { %v4119_v19 = vpop.eup %4118 }
 0x7e2   : > { %v4121_v49 = vpop.eup %4120  ;;  %v3137_v47 = vmul.f32 %v4119_v19, %v4117_v32  ;;  %v4294_v32 = vld [vmem:[#allocation8 + $0xc4] ss:$16 sps:$4 sm:$0xff]   ;;  %v4295_v19 = vld [vmem:[#allocation8 + $0xcc] ss:$16 sps:$4 sm:$0xff]  }
 0x7e3   : > { %v3136_v56 = vmul.f32 %v4121_v49, %v5670_v7  ;;  %v4123_v5 = vpop.eup %4122  ;;  %v4296_v49 = vld [vmem:[#allocation8 + $0xc0] ss:$16 sps:$4 sm:$0xff]  }
 0x7e5   : > { %v5722_v57 = vadd.f32 %v3137_v47, %v3136_v56  ;;  %v3065_v58 = vpop.f32.mrb[84].mxu0  ;;  %v3106_v55 = vpop.f32.mrb[84].mxu1  ;;  %v4297_v47 = vld [vmem:[#allocation8 + $0xc8] ss:$16 sps:$4 sm:$0xff]   ;;  %v4298_v56 = vld [vmem:[#allocation8 + $0xe4] ss:$16 sps:$4 sm:$0xff]  }
 0x7e6   : > { %v3113_v41 = vadd.f32 %v3065_v58, %v6147_v33  ;;  %v3115_v14 = vadd.f32 %v3106_v55, %v6148_v21  ;;  %v3067_v20 = vpop.f32.mrb[85].mxu0  ;;  %v3108_v52 = vpop.f32.mrb[85].mxu1  ;;  %v4299_v58 = vld [vmem:[#allocation8 + $0xec] ss:$16 sps:$4 sm:$0xff]   ;;  %v4301_v21 = vld [vmem:[#allocation8 + $0xe8] ss:$16 sps:$4 sm:$0xff]  }
 0x7e7   : > { %4124 = vtanh.f32 %v5722_v57  ;;  %v3114_v46 = vadd.f32 %v3067_v20, %v6149_v59  ;;  %v3116_v48 = vadd.f32 %v3108_v52, %v6150_v43  ;;  %v3069_v35 = vpop.f32.mrb[86].mxu0  ;;  %v3110_v7 = vpop.f32.mrb[86].mxu1  ;;  %v6151_v59 = vld [vmem:[#allocation68_spill] sm:$0xff]  ;;  %v6152_v43 = vld [vmem:[#allocation71_spill] sm:$0xff] }
 0x7e8   : > { %v3740_v40 = vmul.f32 -1.442695, %v3113_v41  ;;  %v3070_v45 = vpop.f32.mrb[87].mxu0  ;;  %v3111_v15 = vpop.f32.mrb[87].mxu1  ;;  %v4300_v41 = vld [vmem:[#allocation8 + $0xe0] ss:$16 sps:$4 sm:$0xff]  }
 0x7e9   : > { %v3741_v6 = vmul.f32 -1.442695, %v3114_v46  ;;  %v3742_v18 = vmul.f32 -1.442695, %v3116_v48  ;;  %v6154_v15 = vld [vmem:[#allocation72_spill] sm:$0xff] }
 0x7ea   : > { %4126 = vpow2.f32 %v3740_v40  ;;  %v6153_v40 = vld [vmem:[#allocation70_spill] sm:$0xff] }
 0x7eb   : > { %4128 = vpow2.f32 %v3741_v6 }
 0x7ec   : > { %4130 = vpow2.f32 %v3742_v18 }
 0x7ed   : > { %4132 = vtanh.f32 %v3115_v14 }
 0x7f1   : > { %v4125_v53 = vpop.eup %4124 }
 0x7f2   : > { %v3140_v31 = vmul.f32 %v4125_v53, %v4123_v5 }
 0x7f4   : > { %v4127_v30 = vpop.eup %4126  ;;  %3743 = vst [vmem:[%s5118_s30 + $0x60] sm:$0xff] %v3140_v31  ;;  %v3171_v28 = vpack.c.bf16 %v3140_v31, %v3140_v31 }
 0x7f5   : > { %v4129_v50 = vpop.eup %4128  ;;  %v3144_v36 = vadd.f32 1.0, %v4127_v30 }
 0x7f6   : > { %v3150_v17 = vadd.f32 1.0, %v4129_v50  ;;  %3205 = vmatmul.mubr.bf16.vlgmr.msra.gmra.mrb[88].mxu0 %v3171_v28  ;;  %3246 = vmatmul.mubr.bf16.vlgmr.msra.gmra.mrb[88].mxu1 %v3171_v28  ;;  %v4131_v1 = vpop.eup %4130 }
 0x7f7   : > { %4134 = vrcp.f32 %v3144_v36  ;;  %3264 = vmatpush1.bf16.msra.mxu0 %v4272_v42  ;;  %3305 = vmatpush1.bf16.msra.mxu1 %v4273_v60  ;;  %v4133_v4 = vpop.eup %4132  ;;  %v3157_v10 = vadd.f32 1.0, %v4131_v1 }
 0x7f8   : > { %4136 = vrcp.f32 %v3150_v17  ;;  %3265 = vmatprep.subr.bf16.mxu0 %v4274_v61  ;;  %3306 = vmatprep.subr.bf16.mxu1 %v4275_v62 }
 0x7f9   : > { %3295 = vmatprep.mubr.bf16.mxu0 %v5930_v9  ;;  %3336 = vmatprep.mubr.bf16.mxu1 %v5930_v9  ;;  %4138 = vrcp.f32 %v3157_v10 }
 0x7fb   : > { %3266 = vmatpush1.bf16.msra.mxu0 %v4276_v63  ;;  %3307 = vmatpush1.bf16.msra.mxu1 %v4277_v8 }
 0x7fc   : > { %3267 = vmatprep.subr.bf16.mxu0 %v4278_v0  ;;  %3308 = vmatprep.subr.bf16.mxu1 %v4279_v13 }
 0x7ff   : > { %3268 = vmatpush1.bf16.msra.mxu0 %v4280_v2  ;;  %3309 = vmatpush1.bf16.msra.mxu1 %v4281_v3 }
 0x800   : > { %3269 = vmatprep.subr.bf16.mxu0 %v4282_v12  ;;  %3310 = vmatprep.subr.bf16.mxu1 %v4283_v44  ;;  %v6155_v12 = vld [vmem:[#allocation73_spill] sm:$0xff] }
 0x801   : > { %v4135_v51 = vpop.eup %4134 }
 0x802   : > { %v4137_v9 = vpop.eup %4136  ;;  %v3161_v39 = vmul.f32 %v4135_v51, %v4133_v4  ;;  %v6156_v51 = vld [vmem:[#allocation75_spill] sm:$0xff] }
 0x803   : > { %v3160_v11 = vmul.f32 %v4137_v9, %v5697_v23  ;;  %3270 = vmatpush1.bf16.msra.mxu0 %v4284_v16  ;;  %3311 = vmatpush1.bf16.msra.mxu1 %v4285_v27  ;;  %v4291_v23 = vld [vmem:[#allocation8 + $0xac] ss:$16 sps:$4 sm:$0xff]   ;;  %v4139_v54 = vpop.eup %4138 }
 0x804   : > { %3271 = vmatprep.subr.bf16.mxu0 %v4286_v38  ;;  %3312 = vmatprep.subr.bf16.mxu1 %v4287_v24  ;;  %v6158_v27 = vld [vmem:[#allocation77_spill] sm:$0xff] }
 0x805   : > { %v5733_v25 = vadd.f32 %v3161_v39, %v3160_v11  ;;  %v6157_v11 = vld [vmem:[#allocation74_spill] sm:$0xff] }
 0x807   : > { %4140 = vtanh.f32 %v5733_v25  ;;  %3272 = vmatpush1.bf16.msra.mxu0 %v4288_v22  ;;  %3313 = vmatpush1.bf16.msra.mxu1 %v4289_v29 }
 0x808   : > { %3273 = vmatprep.subr.bf16.mxu0 %v4290_v37  ;;  %3314 = vmatprep.subr.bf16.mxu1 %v4291_v23 }
 0x80b   : > { %3274 = vmatpush1.bf16.msra.mxu0 %v4292_v34  ;;  %3315 = vmatpush1.bf16.msra.mxu1 %v4293_v26 }
 0x80c   : > { %3275 = vmatprep.subr.bf16.mxu0 %v4294_v32  ;;  %3316 = vmatprep.subr.bf16.mxu1 %v4295_v19 }
 0x80f   : > { %3276 = vmatpush1.bf16.msra.mxu0 %v4296_v49  ;;  %3317 = vmatpush1.bf16.msra.mxu1 %v4297_v47 }
 0x810   : > { %3277 = vmatprep.subr.bf16.mxu0 %v4298_v56  ;;  %3318 = vmatprep.subr.bf16.mxu1 %v4299_v58 }
 0x811   : > { %v4141_v55 = vpop.eup %4140 }
 0x812   : > { %v3164_v33 = vmul.f32 %v4141_v55, %v4139_v54 }
 0x813   : > { %3278 = vmatpush1.bf16.msra.mxu0 %v4300_v41  ;;  %3319 = vmatpush1.bf16.msra.mxu1 %v4301_v21 }
 0x814   : > { %3744 = vst [vmem:[%s5118_s30 + $0x18] sm:$0xff] %v3164_v33  ;;  %v3262_v14 = vpack.c.bf16 %v3164_v33, %v3164_v33 }
 0x816   : > { %3296 = vmatmul.mubr.bf16.vlgmr.msra.gmra.mrb[92].mxu0 %v3262_v14  ;;  %3337 = vmatmul.mubr.bf16.vlgmr.msra.gmra.mrb[92].mxu1 %v3262_v14 }
 0x8c9   : > { %v3206_v20 = vpop.f32.mrb[88].mxu0  ;;  %v3247_v52 = vpop.f32.mrb[88].mxu1 }
 0x8ca   : > { %v3254_v46 = vadd.f32 %v3206_v20, %v6151_v59  ;;  %v3256_v48 = vadd.f32 %v3247_v52, %v6152_v43  ;;  %v3208_v35 = vpop.f32.mrb[89].mxu0  ;;  %v3249_v7 = vpop.f32.mrb[89].mxu1 }
 0x8cb   : > { %v3255_v45 = vadd.f32 %v3208_v35, %v6153_v40  ;;  %v3257_v6 = vadd.f32 %v3249_v7, %v6154_v15  ;;  %v3210_v5 = vpop.f32.mrb[90].mxu0  ;;  %v3251_v53 = vpop.f32.mrb[90].mxu1  ;;  %v3425_v35 = vld [vmem:[%s5118_s30 + $0x10] sm:$0xff] (%p6159_p0)  ;;  %v3427_v7 = vld [vmem:[%s5118_s30 + $0x18] sm:$0xff] (%p6159_p0)  ;;  %v3429_v40 = vld [vmem:[%s5118_s30 + $0x20] sm:$0xff] (%p6159_p0) }
 0x8cc   : > { %v3745_v18 = vmul.f32 -1.442695, %v3254_v46  ;;  %v3211_v31 = vpop.f32.mrb[91].mxu0  ;;  %v3252_v30 = vpop.f32.mrb[91].mxu1  ;;  %3426 = vst [vmem:[%s3408_s29 + $0x20] sm:$0xff] (%p6159_p0), %v3425_v35  ;;  %3428 = vst [vmem:[%s3408_s29 + $0x28] sm:$0xff] (%p6159_p0), %v3427_v7 }
 0x8cd   : > { %v3746_v28 = vmul.f32 -1.442695, %v3255_v45  ;;  %v3747_v50 = vmul.f32 -1.442695, %v3257_v6  ;;  %v3431_v45 = vld [vmem:[%s5118_s30 + $0x28] sm:$0xff] (%p6159_p0)  ;;  %3430 = vst [vmem:[%s3408_s29 + $0x40] sm:$0xff] (%p6159_p0), %v3429_v40 }
 0x8ce   : > { %4142 = vpow2.f32 %v3745_v18  ;;  %3432 = vst [vmem:[%s3408_s29 + $0x48] sm:$0xff] (%p6159_p0), %v3431_v45  ;;  %v3433_v15 = vld [vmem:[%s5118_s30 + $0x30] sm:$0xff] (%p6159_p0)  ;;  %v3435_v6 = vld [vmem:[%s5118_s30 + $0x38] sm:$0xff] (%p6159_p0)  ;;  %v3437_v5 = vld [vmem:[%s5118_s30 + $0x40] sm:$0xff] (%p6159_p0) }
 0x8cf   : > { %4144 = vpow2.f32 %v3746_v28  ;;  %3434 = vst [vmem:[%s3408_s29 + $0x60] sm:$0xff] (%p6159_p0), %v3433_v15  ;;  %3436 = vst [vmem:[%s3408_s29 + $0x68] sm:$0xff] (%p6159_p0), %v3435_v6  ;;  %v3439_v53 = vld [vmem:[%s5118_s30 + $0x48] sm:$0xff] (%p6159_p0)  ;;  %v3441_v18 = vld [vmem:[%s5118_s30 + $0x50] sm:$0xff] (%p6159_p0) }
 0x8d0   : > { %4146 = vpow2.f32 %v3747_v50  ;;  %3438 = vst [vmem:[%s3408_s29 + $0x80] sm:$0xff] (%p6159_p0), %v3437_v5  ;;  %v3443_v31 = vld [vmem:[%s5118_s30 + $0x58] sm:$0xff] (%p6159_p0)  ;;  %3440 = vst [vmem:[%s3408_s29 + $0x88] sm:$0xff] (%p6159_p0), %v3439_v53  ;;  %v3445_v30 = vld [vmem:[%s5118_s30 + $0x60] sm:$0xff] (%p6159_p0) }
 0x8d1   : > { %4148 = vtanh.f32 %v3256_v48  ;;  %3442 = vst [vmem:[%s3408_s29 + $0xa0] sm:$0xff] (%p6159_p0), %v3441_v18  ;;  %3444 = vst [vmem:[%s3408_s29 + $0xa8] sm:$0xff] (%p6159_p0), %v3443_v31  ;;  %v3447_v28 = vld [vmem:[%s5118_s30 + $0x68] sm:$0xff] (%p6159_p0) }
 0x8d2   : > { %3446 = vst [vmem:[%s3408_s29 + $0xc0] sm:$0xff] (%p6159_p0), %v3445_v30  ;;  %3448 = vst [vmem:[%s3408_s29 + $0xc8] sm:$0xff] (%p6159_p0), %v3447_v28 }
 0x8d8   : > { %v4143_v36 = vpop.eup %4142 }
 0x8d9   : > { %v4145_v17 = vpop.eup %4144  ;;  %v3352_v42 = vadd.f32 1.0, %v4143_v36  ;;  %v3451_v36 = vld [vmem:[%s5118_s30 + $0x78] sm:$0xff] (%p6159_p0) }
 0x8da   : > { %v3358_v60 = vadd.f32 1.0, %v4145_v17  ;;  %v4147_v61 = vpop.eup %4146  ;;  %3452 = vst [vmem:[%s3408_s29 + $0xe8] sm:$0xff] (%p6159_p0), %v3451_v36 }
 0x8db   : > { %4150 = vrcp.f32 %v3352_v42  ;;  %v4149_v62 = vpop.eup %4148  ;;  %v3365_v13 = vadd.f32 1.0, %v4147_v61 }
 0x8dc   : > { %4152 = vrcp.f32 %v3358_v60 }
 0x8dd   : > { %4154 = vrcp.f32 %v3365_v13 }
 0x8e5   : > { %v4151_v63 = vpop.eup %4150 }
 0x8e6   : > { %v4153_v8 = vpop.eup %4152  ;;  %v3369_v0 = vmul.f32 %v4151_v63, %v4149_v62 }
 0x8e7   : > { %v3368_v1 = vmul.f32 %v4153_v8, %v5722_v57  ;;  %v4155_v34 = vpop.eup %4154 }
 0x8e9   : > { %v3370_v2 = vadd.f32 %v3369_v0, %v3368_v1  ;;  %v3297_v3 = vpop.f32.mrb[92].mxu0  ;;  %v3338_v4 = vpop.f32.mrb[92].mxu1 }
 0x8ea   : > { %v3345_v44 = vadd.f32 %v3297_v3, %v6155_v12  ;;  %v3347_v9 = vadd.f32 %v3338_v4, %v6156_v51  ;;  %v3299_v39 = vpop.f32.mrb[93].mxu0  ;;  %v3340_v10 = vpop.f32.mrb[93].mxu1 }
 0x8eb   : > { %4156 = vtanh.f32 %v3370_v2  ;;  %v3346_v16 = vadd.f32 %v3299_v39, %v6157_v11  ;;  %v3348_v38 = vadd.f32 %v3340_v10, %v6158_v27  ;;  %v3301_v24 = vpop.f32.mrb[94].mxu0  ;;  %v3342_v22 = vpop.f32.mrb[94].mxu1 }
 0x8ec   : > { %v3748_v29 = vmul.f32 -1.442695, %v3345_v44  ;;  %v3302_v57 = vpop.f32.mrb[95].mxu0  ;;  %v3343_v37 = vpop.f32.mrb[95].mxu1 }
 0x8ed   : > { %v3749_v23 = vmul.f32 -1.442695, %v3346_v16  ;;  %v3750_v32 = vmul.f32 -1.442695, %v3348_v38 }
 0x8ee   : > { %4158 = vpow2.f32 %v3748_v29 }
 0x8ef   : > { %4160 = vpow2.f32 %v3749_v23 }
 0x8f0   : > { %4162 = vpow2.f32 %v3750_v32 }
 0x8f1   : > { %4164 = vtanh.f32 %v3347_v9 }
 0x8f5   : > { %v4157_v26 = vpop.eup %4156 }
 0x8f6   : > { %v3372_v19 = vmul.f32 %v4157_v26, %v4155_v34 }
 0x8f8   : > { %v4159_v49 = vpop.eup %4158  ;;  %3751 = vst [vmem:[%s5118_s30 + $0x70] sm:$0xff] %v3372_v19 }
 0x8f9   : > { %v4161_v47 = vpop.eup %4160  ;;  %v3376_v54 = vadd.f32 1.0, %v4159_v49 }
 0x8fa   : > { %v3382_v56 = vadd.f32 1.0, %v4161_v47  ;;  %v4163_v58 = vpop.eup %4162 }
 0x8fb   : > { %4166 = vrcp.f32 %v3376_v54  ;;  %v4165_v55 = vpop.eup %4164  ;;  %v3389_v14 = vadd.f32 1.0, %v4163_v58 }
 0x8fc   : > { %4168 = vrcp.f32 %v3382_v56 }
 0x8fd   : > { %4170 = vrcp.f32 %v3389_v14 }
 0x8ff   : > { %v3449_v50 = vld [vmem:[%s5118_s30 + $0x70] sm:$0xff] (%p6159_p0) }
 0x900   : > { %3450 = vst [vmem:[%s3408_s29 + $0xe0] sm:$0xff] (%p6159_p0), %v3449_v50 }
 0x905   : > { %v4167_v33 = vpop.eup %4166 }
 0x906   : > { %v4169_v41 = vpop.eup %4168  ;;  %v3393_v21 = vmul.f32 %v4167_v33, %v4165_v55 }
 0x907   : > { %v3392_v20 = vmul.f32 %v4169_v41, %v5733_v25  ;;  %v4171_v59 = vpop.eup %4170  ;;  %v3421_v25 = vld [vmem:[%s5118_s30] sm:$0xff] (%p6159_p0) }
 0x908   : > { %3422 = vst [vmem:[%s3408_s29] sm:$0xff] (%p6159_p0), %v3421_v25 }
 0x909   : > { %v3394_v52 = vadd.f32 %v3393_v21, %v3392_v20 }
 0x90b   : > { %4172 = vtanh.f32 %v3394_v52 }
 0x912   : > { %3405 = sbr.rel (!%p6159_p0) target bundleno = 2337 (0x921), region = 97 }
 0x915   : > { %v4173_v46 = vpop.eup %4172 }
 0x916   : > { %v3396_v43 = vmul.f32 %v4173_v46, %v4171_v59 }
 0x918   : > { %3398 = vst [vmem:[%s5118_s30 + $0x8] sm:$0xff] %v3396_v43 }
 0x91f   : > { %v3423_v48 = vld [vmem:[%s5118_s30 + $0x8] sm:$0xff] }
 0x920   : > { %3424 = vst [vmem:[%s3408_s29 + $0x8] sm:$0xff] %v3423_v48 }
 0x921 PF: > { %p14_p1 = scmp.ge.s32.totalorder %s4475_s22, 4   ;;  %s6160_s18 = smov %s4412_s19 }
 0x922   : > { %s6161_s19 = smov %s4485_s25  ;;  %s6162_s20 = smov %s4475_s22 }
 0x923   :  { %16 = sbr.rel (!%p14_p1) target bundleno = 3 (0x3), region = 166 }
 0x92a   :  { %3468 = vsyncpa [#allocation5], 1 }
 0x92b   :  { %3470 = vsyncpa [#allocation5 + $0x1], 1 }
 0x92c   :  { %3471 = vsyncpa [#allocation7], 1 }

// kernel: rnn_layer_forward.3
= control target key start
LH: loop header
LB: loop body
LE: loop exit
PB: predicated region body
PF: predicated region fallthrough
CT: control target
= control target key end

     0   :  { %s5072_s24 = smov 0   ;;  %s5074_s25 = smov 0   ;;  %s7385_s0 = inlined_call_operand.vmem [shape: bf16[8,16,256], index: 0, kind: input, shape index: {}]   ;;  %s7386_s1 = inlined_call_operand.vmem [shape: bf16[256,1024], index: 1, kind: input, shape index: {}]   ;;  %s7387_s2 = inlined_call_operand.vmem [shape: bf16[128,512], index: 2, kind: input, shape index: {}]   ;;  %s7388_s3 = inlined_call_operand.vmem [shape: bf16[128,512], index: 3, kind: input, shape index: {}]   ;;  %s7389_s4 = inlined_call_operand.vmem [shape: f32[1,1024], index: 4, kind: input, shape index: {}]   ;;  %s7390_s5 = inlined_call_operand.vmem [shape: bf16[256,128], index: 5, kind: input, shape index: {}]   ;;  %s7391_s6 = inlined_call_operand.vmem [shape: f32[1,128], index: 6, kind: input, shape index: {}]   ;;  %s7392_s7 = inlined_call_operand.vmem [shape: f32[8,16,128], index: 7, kind: output, shape index: {}]  }
   0x1   :  { %s5076_s26 = smov 0  }
   0x2 LB: > { %s4160_s27 = sadd.s32 4294967295, %s5029_s26   ;;  %s5089_s28 = sadd.s32 1, %s5029_s26   ;;  %s5029_s26 = sphi %s5076_s26, %s7761_s26   ;;  %s5025_s25 = sphi %s5074_s25, %s7760_s25   ;;  %s5021_s24 = sphi %s5072_s24, %s7759_s24  }
   0x3   : > { %s21_s29 = ssub.s32 %s5029_s26, %s5089_s28  ;;  %s24_s30 = sadd.s32 1, %s5025_s25 }
   0x4   : > { %p22_p0 = scmp.eq.s32.totalorder %s21_s29, 0  ;;  %p31_p1 = scmp.ne.s32.totalorder %s5025_s25, %s5021_s24 }
   0x5   : > { %p32_p2 = scmp.eq.s32.totalorder %s5029_s26, 0  ;;  %p187_p3 = scmp.eq.s32.totalorder %s4160_s27, 1 }
   0x6   : > { %s5100_s8 = scalar_select %p22_p0, %s5025_s25, %s24_s30  }
   0x7   : > { %p33_p4 = por %p32_p2, %p31_p1  ;;  %p5102_p5 = por %p187_p3, %p31_p1 }
   0x8   : > { %p4163_p6 = scmp.ge.s32.totalorder %s5029_s26, 2 }
   0xa   : > { %227 = sbr.rel (%p4163_p6) target bundleno = 25 (0x19), region = 40 }
  0x11   : > { %230 = sbr.rel (!%p33_p4) target bundleno = 25 (0x19), region = 44  ;;  %s232_s10 = sand.u32 (%p33_p4), 1, %s5025_s25  }
  0x12   : > { %s4439_s11 = sshll.u32 (%p33_p4), %s5029_s26, 3  ;;  %s4164_s12 = sshll.u32 (%p33_p4), %s232_s10, 6 }
  0x13   : > { %s237_s15 = scalar_lea.vmem (%p33_p4), %s7385_s0, %s4439_s11  ;;  %s234_s16 = scalar_lea.vmem (%p33_p4), [#allocation4], %s4164_s12 }
  0x14   : > { %v279_v0 = vld [vmem:[%s237_s15] sm:$0xff] (%p33_p4)  ;;  %v281_v1 = vld [vmem:[%s237_s15 + $0x10] sm:$0xff] (%p33_p4) }
  0x15   : > { %v283_v2 = vld [vmem:[%s237_s15 + $0x20] sm:$0xff] (%p33_p4)  ;;  %280 = vst [vmem:[%s234_s16] sm:$0xff] (%p33_p4), %v279_v0  ;;  %282 = vst [vmem:[%s234_s16 + $0x8] sm:$0xff] (%p33_p4), %v281_v1  ;;  %v285_v3 = vld [vmem:[%s237_s15 + $0x30] sm:$0xff] (%p33_p4) }
  0x16   : > { %284 = vst [vmem:[%s234_s16 + $0x10] sm:$0xff] (%p33_p4), %v283_v2  ;;  %v287_v4 = vld [vmem:[%s237_s15 + $0x40] sm:$0xff] (%p33_p4)  ;;  %v289_v5 = vld [vmem:[%s237_s15 + $0x50] sm:$0xff] (%p33_p4)  ;;  %286 = vst [vmem:[%s234_s16 + $0x18] sm:$0xff] (%p33_p4), %v285_v3 }
  0x17   : > { %288 = vst [vmem:[%s234_s16 + $0x20] sm:$0xff] (%p33_p4), %v287_v4  ;;  %290 = vst [vmem:[%s234_s16 + $0x28] sm:$0xff] (%p33_p4), %v289_v5  ;;  %v291_v6 = vld [vmem:[%s237_s15 + $0x60] sm:$0xff] (%p33_p4)  ;;  %v293_v7 = vld [vmem:[%s237_s15 + $0x70] sm:$0xff] (%p33_p4) }
  0x18   : > { %292 = vst [vmem:[%s234_s16 + $0x30] sm:$0xff] %v291_v6  ;;  %294 = vst [vmem:[%s234_s16 + $0x38] sm:$0xff] %v293_v7 }
  0x19 PF: > { %p4167_p7 = scmp.ge.s32.totalorder %s5029_s26, 1  ;;  %p299_p8 = scmp.lt.s32.totalorder %s5029_s26, 3 }
  0x1b   : > { %p300_p9 = pnand %p4167_p7, %p299_p8 }
  0x1d   : > { %303 = sbr.rel (%p300_p9) target bundleno = 2582 (0xa16), region = 82 }
  0x24   : > { %v346_v8 = vld [vmem:[%s7386_s1 + $0x8] sm:$0xff]  ;;  %s306_s17 = sand.u32 1, %s5021_s24   ;;  %v345_v21 = vld [vmem:[%s7386_s1] sm:$0xff] }
  0x25   : > { %v350_v9 = vld [vmem:[%s7386_s1 + $0x28] sm:$0xff]  ;;  %v349_v22 = vld [vmem:[%s7386_s1 + $0x20] sm:$0xff]  ;;  %s5154_s11 = sshll.u32 %s306_s17, 6 }
  0x26   : > { %v354_v10 = vld [vmem:[%s7386_s1 + $0x48] sm:$0xff]  ;;  %v4181_v11 = vcombine.high %v346_v8, %v350_v9  ;;  %v4180_v12 = vcombine.low %v346_v8, %v350_v9  ;;  %v4179_v24 = vcombine.high %v345_v21, %v349_v22  ;;  %v4178_v25 = vcombine.low %v345_v21, %v349_v22  ;;  %v353_v26 = vld [vmem:[%s7386_s1 + $0x40] sm:$0xff]  ;;  %s5178_s30 = scalar_lea.vmem [#allocation4], %s5154_s11  ;;  %s7350_s20 = scalar_lea.vmem [#allocation5], %s5154_s11 }
  0x27   : > { %v358_v13 = vld [vmem:[%s7386_s1 + $0x68] sm:$0xff]  ;;  %v357_v29 = vld [vmem:[%s7386_s1 + $0x60] sm:$0xff]  ;;  %s4436_s11 = sshll.u32 (%p5102_p5), %s4160_s27, 3 }
  0x28   : > { %v4189_v14 = vcombine.high %v354_v10, %v358_v13  ;;  %v362_v15 = vld [vmem:[%s7386_s1 + $0x88] sm:$0xff]  ;;  %1268 = vmatprep.subr.bf16.mxu1 %v4181_v11  ;;  %v4188_v17 = vcombine.low %v354_v10, %v358_v13  ;;  %1195 = vmatprep.subr.bf16.mxu0 %v4179_v24  ;;  %v4187_v31 = vcombine.high %v353_v26, %v357_v29  ;;  %v361_v32 = vld [vmem:[%s7386_s1 + $0x80] sm:$0xff]  ;;  %s4043_s23 = scalar_lea.vmem (%p5102_p5), %s7392_s7, %s4436_s11 }
  0x29   : > { %v366_v16 = vld [vmem:[%s7386_s1 + $0xa8] sm:$0xff]  ;;  %1269 = vmatpush1.bf16.msra.mxu1 %v4180_v12  ;;  %v365_v33 = vld [vmem:[%s7386_s1 + $0xa0] sm:$0xff]  ;;  %1196 = vmatpush1.bf16.msra.mxu0 %v4178_v25  ;;  %v4186_v34 = vcombine.low %v353_v26, %v357_v29 }
  0x2a   : > { %1270 = vmatprep.subr.bf16.mxu1 %v4189_v14  ;;  %v4197_v18 = vcombine.high %v362_v15, %v366_v16  ;;  %v370_v19 = vld [vmem:[%s7386_s1 + $0xc8] sm:$0xff]  ;;  %v4196_v23 = vcombine.low %v362_v15, %v366_v16  ;;  %1197 = vmatprep.subr.bf16.mxu0 %v4187_v31  ;;  %v4195_v36 = vcombine.high %v361_v32, %v365_v33  ;;  %v369_v38 = vld [vmem:[%s7386_s1 + $0xc0] sm:$0xff] }
  0x2b   : > { %v374_v20 = vld [vmem:[%s7386_s1 + $0xe8] sm:$0xff]  ;;  %v373_v39 = vld [vmem:[%s7386_s1 + $0xe0] sm:$0xff]  ;;  %v4194_v42 = vcombine.low %v361_v32, %v365_v33 }
  0x2c   : > { %v4205_v27 = vcombine.high %v370_v19, %v374_v20  ;;  %v378_v28 = vld [vmem:[%s7386_s1 + $0x108] sm:$0xff]  ;;  %v4204_v35 = vcombine.low %v370_v19, %v374_v20  ;;  %v4203_v45 = vcombine.high %v369_v38, %v373_v39  ;;  %v377_v47 = vld [vmem:[%s7386_s1 + $0x100] sm:$0xff]  ;;  %v4202_v51 = vcombine.low %v369_v38, %v373_v39 }
  0x2d   : > { %1271 = vmatpush1.bf16.msra.mxu1 %v4188_v17  ;;  %v382_v30 = vld [vmem:[%s7386_s1 + $0x128] sm:$0xff]  ;;  %1198 = vmatpush1.bf16.msra.mxu0 %v4186_v34  ;;  %v381_v48 = vld [vmem:[%s7386_s1 + $0x120] sm:$0xff] }
  0x2e   : > { %1272 = vmatprep.subr.bf16.mxu1 %v4197_v18  ;;  %v4213_v37 = vcombine.high %v378_v28, %v382_v30  ;;  %v386_v40 = vld [vmem:[%s7386_s1 + $0x148] sm:$0xff]  ;;  %v4212_v44 = vcombine.low %v378_v28, %v382_v30  ;;  %1199 = vmatprep.subr.bf16.mxu0 %v4195_v36  ;;  %v4211_v53 = vcombine.high %v377_v47, %v381_v48  ;;  %v385_v55 = vld [vmem:[%s7386_s1 + $0x140] sm:$0xff] }
  0x2f   : > { %v390_v41 = vld [vmem:[%s7386_s1 + $0x168] sm:$0xff]  ;;  %v389_v56 = vld [vmem:[%s7386_s1 + $0x160] sm:$0xff]  ;;  %v4210_v59 = vcombine.low %v377_v47, %v381_v48 }
  0x30   : > { %v5181_v43 = vld [vmem:[%s5178_s30 + $0x4] ss:$8 sps:$4 sm:$0xff]   ;;  %v4221_v46 = vcombine.high %v386_v40, %v390_v41  ;;  %v4220_v52 = vcombine.low %v386_v40, %v390_v41  ;;  %v4219_v61 = vcombine.high %v385_v55, %v389_v56  ;;  %v4218_v3 = vcombine.low %v385_v55, %v389_v56 }
  0x31   : > { %1273 = vmatpush1.bf16.msra.mxu1 %v4196_v23  ;;  %1300 = vmatprep.mubr.bf16.mxu1 %v5181_v43  ;;  %v394_v49 = vld [vmem:[%s7386_s1 + $0x188] sm:$0xff]  ;;  %v393_v63 = vld [vmem:[%s7386_s1 + $0x180] sm:$0xff] }
  0x32   : > { %1274 = vmatprep.subr.bf16.mxu1 %v4205_v27  ;;  %v398_v50 = vld [vmem:[%s7386_s1 + $0x1a8] sm:$0xff]  ;;  %1227 = vmatprep.mubr.bf16.mxu0 %v5181_v43  ;;  %v397_v0 = vld [vmem:[%s7386_s1 + $0x1a0] sm:$0xff] }
  0x33   : > { %1200 = vmatpush1.bf16.msra.mxu0 %v4194_v42  ;;  %v4229_v54 = vcombine.high %v394_v49, %v398_v50  ;;  %v402_v57 = vld [vmem:[%s7386_s1 + $0x1c8] sm:$0xff]  ;;  %v4228_v60 = vcombine.low %v394_v49, %v398_v50  ;;  %v4227_v5 = vcombine.high %v393_v63, %v397_v0  ;;  %v401_v7 = vld [vmem:[%s7386_s1 + $0x1c0] sm:$0xff]  ;;  %v4226_v11 = vcombine.low %v393_v63, %v397_v0 }
  0x34   : > { %1201 = vmatprep.subr.bf16.mxu0 %v4203_v45  ;;  %v406_v58 = vld [vmem:[%s7386_s1 + $0x1e8] sm:$0xff]  ;;  %v405_v8 = vld [vmem:[%s7386_s1 + $0x1e0] sm:$0xff] }
  0x35   : > { %1275 = vmatpush1.bf16.msra.mxu1 %v4204_v35  ;;  %v4237_v62 = vcombine.high %v402_v57, %v406_v58  ;;  %v410_v1 = vld [vmem:[%s7386_s1 + $0x208] sm:$0xff]  ;;  %v4236_v4 = vcombine.low %v402_v57, %v406_v58  ;;  %v4235_v13 = vcombine.high %v401_v7, %v405_v8  ;;  %v409_v15 = vld [vmem:[%s7386_s1 + $0x200] sm:$0xff]  ;;  %v4234_v19 = vcombine.low %v401_v7, %v405_v8 }
  0x36   : > { %1276 = vmatprep.subr.bf16.mxu1 %v4213_v37  ;;  %v414_v2 = vld [vmem:[%s7386_s1 + $0x228] sm:$0xff]  ;;  %v413_v16 = vld [vmem:[%s7386_s1 + $0x220] sm:$0xff] }
  0x37   : > { %1202 = vmatpush1.bf16.msra.mxu0 %v4202_v51  ;;  %v4245_v6 = vcombine.high %v410_v1, %v414_v2  ;;  %v418_v9 = vld [vmem:[%s7386_s1 + $0x248] sm:$0xff]  ;;  %v4244_v12 = vcombine.low %v410_v1, %v414_v2  ;;  %v4243_v21 = vcombine.high %v409_v15, %v413_v16  ;;  %v417_v23 = vld [vmem:[%s7386_s1 + $0x240] sm:$0xff]  ;;  %v4242_v27 = vcombine.low %v409_v15, %v413_v16  ;;  %v348_v2 = vld [vmem:[%s7386_s1 + $0x18] sm:$0xff] }
  0x38   : > { %1203 = vmatprep.subr.bf16.mxu0 %v4211_v53  ;;  %v422_v10 = vld [vmem:[%s7386_s1 + $0x268] sm:$0xff]  ;;  %v421_v24 = vld [vmem:[%s7386_s1 + $0x260] sm:$0xff]  ;;  %v347_v16 = vld [vmem:[%s7386_s1 + $0x10] sm:$0xff] }
  0x39   : > { %1277 = vmatpush1.bf16.msra.mxu1 %v4212_v44  ;;  %v4253_v14 = vcombine.high %v418_v9, %v422_v10  ;;  %v426_v17 = vld [vmem:[%s7386_s1 + $0x288] sm:$0xff]  ;;  %v4252_v20 = vcombine.low %v418_v9, %v422_v10  ;;  %v4251_v29 = vcombine.high %v417_v23, %v421_v24  ;;  %v425_v30 = vld [vmem:[%s7386_s1 + $0x280] sm:$0xff]  ;;  %v4250_v35 = vcombine.low %v417_v23, %v421_v24  ;;  %v360_v9 = vld [vmem:[%s7386_s1 + $0x78] sm:$0xff] }
  0x3a   : > { %1278 = vmatprep.subr.bf16.mxu1 %v4221_v46  ;;  %v430_v18 = vld [vmem:[%s7386_s1 + $0x2a8] sm:$0xff]  ;;  %v429_v32 = vld [vmem:[%s7386_s1 + $0x2a0] sm:$0xff]  ;;  %v372_v24 = vld [vmem:[%s7386_s1 + $0xd8] sm:$0xff] }
  0x3b   : > { %1204 = vmatpush1.bf16.msra.mxu0 %v4210_v59  ;;  %v4261_v22 = vcombine.high %v426_v17, %v430_v18  ;;  %v434_v25 = vld [vmem:[%s7386_s1 + $0x2c8] sm:$0xff]  ;;  %v4260_v28 = vcombine.low %v426_v17, %v430_v18  ;;  %v4259_v37 = vcombine.high %v425_v30, %v429_v32  ;;  %v433_v38 = vld [vmem:[%s7386_s1 + $0x2c0] sm:$0xff]  ;;  %v4258_v44 = vcombine.low %v425_v30, %v429_v32  ;;  %v5362_v30 = vld [vmem:[%s5178_s30 + $0x10] ss:$8 sps:$4 sm:$0xff]  }
  0x3c   : > { %1205 = vmatprep.subr.bf16.mxu0 %v4219_v61  ;;  %v438_v26 = vld [vmem:[%s7386_s1 + $0x2e8] sm:$0xff]  ;;  %v437_v40 = vld [vmem:[%s7386_s1 + $0x2e0] sm:$0xff] }
  0x3d   : > { %1279 = vmatpush1.bf16.msra.mxu1 %v4220_v52  ;;  %v4269_v31 = vcombine.high %v434_v25, %v438_v26  ;;  %v442_v33 = vld [vmem:[%s7386_s1 + $0x308] sm:$0xff]  ;;  %v4268_v36 = vcombine.low %v434_v25, %v438_v26  ;;  %v4267_v46 = vcombine.high %v433_v38, %v437_v40  ;;  %v441_v47 = vld [vmem:[%s7386_s1 + $0x300] sm:$0xff]  ;;  %v4266_v52 = vcombine.low %v433_v38, %v437_v40  ;;  %v380_v38 = vld [vmem:[%s7386_s1 + $0x118] sm:$0xff] }
  0x3e   : > { %1280 = vmatprep.subr.bf16.mxu1 %v4229_v54  ;;  %v446_v34 = vld [vmem:[%s7386_s1 + $0x328] sm:$0xff]  ;;  %v445_v49 = vld [vmem:[%s7386_s1 + $0x320] sm:$0xff] }
  0x3f   : > { %1206 = vmatpush1.bf16.msra.mxu0 %v4218_v3  ;;  %v4277_v39 = vcombine.high %v442_v33, %v446_v34  ;;  %v450_v41 = vld [vmem:[%s7386_s1 + $0x348] sm:$0xff]  ;;  %v4276_v45 = vcombine.low %v442_v33, %v446_v34  ;;  %v4275_v54 = vcombine.high %v441_v47, %v445_v49  ;;  %v449_v55 = vld [vmem:[%s7386_s1 + $0x340] sm:$0xff]  ;;  %v352_v3 = vld [vmem:[%s7386_s1 + $0x38] sm:$0xff] }
  0x40   : > { %1207 = vmatprep.subr.bf16.mxu0 %v4227_v5  ;;  %v454_v42 = vld [vmem:[%s7386_s1 + $0x368] sm:$0xff]  ;;  %v453_v57 = vld [vmem:[%s7386_s1 + $0x360] sm:$0xff]  ;;  %v4185_v8 = vcombine.high %v348_v2, %v352_v3  ;;  %v4184_v15 = vcombine.low %v348_v2, %v352_v3  ;;  %v363_v34 = vld [vmem:[%s7386_s1 + $0x90] sm:$0xff] }
  0x41   : > { %1281 = vmatpush1.bf16.msra.mxu1 %v4228_v60  ;;  %v4285_v48 = vcombine.high %v450_v41, %v454_v42  ;;  %v458_v50 = vld [vmem:[%s7386_s1 + $0x388] sm:$0xff]  ;;  %v4284_v53 = vcombine.low %v450_v41, %v454_v42  ;;  %v4274_v60 = vcombine.low %v441_v47, %v445_v49  ;;  %v457_v63 = vld [vmem:[%s7386_s1 + $0x380] sm:$0xff]  ;;  %v388_v42 = vld [vmem:[%s7386_s1 + $0x158] sm:$0xff] }
  0x42   : > { %1282 = vmatprep.subr.bf16.mxu1 %v4237_v62  ;;  %v462_v51 = vld [vmem:[%s7386_s1 + $0x3a8] sm:$0xff]  ;;  %v4283_v62 = vcombine.high %v449_v55, %v453_v57  ;;  %v461_v1 = vld [vmem:[%s7386_s1 + $0x3a0] sm:$0xff]  ;;  %v371_v47 = vld [vmem:[%s7386_s1 + $0xd0] sm:$0xff] }
  0x43   : > { %1208 = vmatpush1.bf16.msra.mxu0 %v4226_v11  ;;  %v4293_v56 = vcombine.high %v458_v50, %v462_v51  ;;  %v466_v58 = vld [vmem:[%s7386_s1 + $0x3c8] sm:$0xff]  ;;  %v4292_v61 = vcombine.low %v458_v50, %v462_v51  ;;  %v4291_v7 = vcombine.high %v457_v63, %v461_v1  ;;  %v465_v10 = vld [vmem:[%s7386_s1 + $0x3c0] sm:$0xff]  ;;  %v5399_v51 = vld [vmem:[%s5178_s30 + $0x34] ss:$8 sps:$4 sm:$0xff]  }
  0x44   : > { %1209 = vmatprep.subr.bf16.mxu0 %v4235_v13  ;;  %v470_v59 = vld [vmem:[%s7386_s1 + $0x3e8] sm:$0xff]  ;;  %v469_v11 = vld [vmem:[%s7386_s1 + $0x3e0] sm:$0xff]  ;;  %v4290_v13 = vcombine.low %v457_v63, %v461_v1  ;;  %v404_v1 = vld [vmem:[%s7386_s1 + $0x1d8] sm:$0xff] }
  0x45   : > { %1283 = vmatpush1.bf16.msra.mxu1 %v4236_v4  ;;  %v4301_v0 = vcombine.high %v466_v58, %v470_v59  ;;  %v4282_v4 = vcombine.low %v449_v55, %v453_v57  ;;  %v4300_v5 = vcombine.low %v466_v58, %v470_v59  ;;  %v4299_v18 = vcombine.high %v465_v10, %v469_v11  ;;  %v5365_v32 = vld [vmem:[%s5178_s30 + $0x24] ss:$8 sps:$4 sm:$0xff]   ;;  %v5396_v49 = vld [vmem:[%s5178_s30 + $0x20] ss:$8 sps:$4 sm:$0xff]   ;;  %v396_v57 = vld [vmem:[%s7386_s1 + $0x198] sm:$0xff] }
  0x46   : > { %1284 = vmatprep.subr.bf16.mxu1 %v4245_v6  ;;  %v356_v6 = vld [vmem:[%s7386_s1 + $0x58] sm:$0xff] }
  0x47   : > { %1210 = vmatpush1.bf16.msra.mxu0 %v4234_v19  ;;  %v4193_v17 = vcombine.high %v356_v6, %v360_v9  ;;  %v351_v19 = vld [vmem:[%s7386_s1 + $0x30] sm:$0xff]  ;;  %v4192_v23 = vcombine.low %v356_v6, %v360_v9  ;;  %v400_v58 = vld [vmem:[%s7386_s1 + $0x1b8] sm:$0xff] }
  0x48   : > { %1211 = vmatprep.subr.bf16.mxu0 %v4243_v21  ;;  %v368_v21 = vld [vmem:[%s7386_s1 + $0xb8] sm:$0xff]  ;;  %v4183_v25 = vcombine.high %v347_v16, %v351_v19  ;;  %v4233_v63 = vcombine.high %v396_v57, %v400_v58  ;;  %v395_v9 = vld [vmem:[%s7386_s1 + $0x190] sm:$0xff] }
  0x49   : > { %1285 = vmatpush1.bf16.msra.mxu1 %v4244_v12  ;;  %v5330_v12 = vld [vmem:[%s5178_s30] ss:$8 sps:$4 sm:$0xff]   ;;  %v408_v2 = vld [vmem:[%s7386_s1 + $0x1f8] sm:$0xff] }
  0x4a   : > { %1286 = vmatprep.subr.bf16.mxu1 %v4253_v14  ;;  %v5333_v14 = vld [vmem:[%s5178_s30 + $0x14] ss:$8 sps:$4 sm:$0xff]   ;;  %v5430_v3 = vld [vmem:[%s5178_s30 + $0x30] ss:$8 sps:$4 sm:$0xff]  }
  0x4b   : > { %1212 = vmatpush1.bf16.msra.mxu0 %v4242_v27  ;;  %v376_v27 = vld [vmem:[%s7386_s1 + $0xf8] sm:$0xff] }
  0x4c   : > { %1213 = vmatprep.subr.bf16.mxu0 %v4251_v29  ;;  %v359_v29 = vld [vmem:[%s7386_s1 + $0x70] sm:$0xff]  ;;  %v4208_v41 = vcombine.low %v372_v24, %v376_v27  ;;  %v412_v6 = vld [vmem:[%s7386_s1 + $0x218] sm:$0xff] }
  0x4d   : > { %1287 = vmatpush1.bf16.msra.mxu1 %v4252_v20  ;;  %v364_v20 = vld [vmem:[%s7386_s1 + $0x98] sm:$0xff] }
  0x4e   : > { %1288 = vmatprep.subr.bf16.mxu1 %v4261_v22  ;;  %v4298_v22 = vcombine.low %v465_v10, %v469_v11  ;;  %v4201_v26 = vcombine.high %v364_v20, %v368_v21  ;;  %v4200_v33 = vcombine.low %v364_v20, %v368_v21  ;;  %v4241_v10 = vcombine.high %v404_v1, %v408_v2  ;;  %v399_v11 = vld [vmem:[%s7386_s1 + $0x1b0] sm:$0xff] }
  0x4f   : > { %1214 = vmatpush1.bf16.msra.mxu0 %v4250_v35  ;;  %v4209_v35 = vcombine.high %v372_v24, %v376_v27  ;;  %v407_v21 = vld [vmem:[%s7386_s1 + $0x1f0] sm:$0xff]  ;;  %v432_v27 = vld [vmem:[%s7386_s1 + $0x2b8] sm:$0xff] }
  0x50   : > { %1215 = vmatprep.subr.bf16.mxu0 %v4259_v37  ;;  %v367_v37 = vld [vmem:[%s7386_s1 + $0xb0] sm:$0xff] }
  0x51   : > { %1289 = vmatpush1.bf16.msra.mxu1 %v4260_v28  ;;  %v355_v28 = vld [vmem:[%s7386_s1 + $0x50] sm:$0xff]  ;;  %v4198_v50 = vcombine.low %v363_v34, %v367_v37 }
  0x52   : > { %1290 = vmatprep.subr.bf16.mxu1 %v4269_v31  ;;  %v4182_v31 = vcombine.low %v347_v16, %v351_v19  ;;  %v4190_v40 = vcombine.low %v355_v28, %v359_v29  ;;  %v420_v16 = vld [vmem:[%s7386_s1 + $0x258] sm:$0xff]  ;;  %v403_v19 = vld [vmem:[%s7386_s1 + $0x1d0] sm:$0xff] }
  0x53   : > { %1216 = vmatpush1.bf16.msra.mxu0 %v4258_v44  ;;  %v4199_v44 = vcombine.high %v363_v34, %v367_v37  ;;  %v415_v24 = vld [vmem:[%s7386_s1 + $0x230] sm:$0xff] }
  0x54   : > { %1217 = vmatprep.subr.bf16.mxu0 %v4267_v46  ;;  %v392_v46 = vld [vmem:[%s7386_s1 + $0x178] sm:$0xff]  ;;  %v423_v37 = vld [vmem:[%s7386_s1 + $0x270] sm:$0xff] }
  0x55   : > { %1291 = vmatpush1.bf16.msra.mxu1 %v4268_v36  ;;  %v4191_v36 = vcombine.high %v355_v28, %v359_v29  ;;  %v4239_v28 = vcombine.high %v403_v19, %v407_v21 }
  0x56   : > { %1292 = vmatprep.subr.bf16.mxu1 %v4277_v39  ;;  %v384_v39 = vld [vmem:[%s7386_s1 + $0x138] sm:$0xff] }
  0x57   : > { %1218 = vmatpush1.bf16.msra.mxu0 %v4266_v52  ;;  %v4216_v52 = vcombine.low %v380_v38, %v384_v39 }
  0x58   : > { %1219 = vmatprep.subr.bf16.mxu0 %v4275_v54  ;;  %v4225_v54 = vcombine.high %v388_v42, %v392_v46 }
  0x59   : > { %1293 = vmatpush1.bf16.msra.mxu1 %v4276_v45  ;;  %v4217_v45 = vcombine.high %v380_v38, %v384_v39  ;;  %v436_v38 = vld [vmem:[%s7386_s1 + $0x2d8] sm:$0xff] }
  0x5a   : > { %1294 = vmatprep.subr.bf16.mxu1 %v4285_v48  ;;  %v375_v48 = vld [vmem:[%s7386_s1 + $0xf0] sm:$0xff]  ;;  %v440_v39 = vld [vmem:[%s7386_s1 + $0x2f8] sm:$0xff] }
  0x5b   : > { %1220 = vmatpush1.bf16.msra.mxu0 %v4274_v60  ;;  %v4207_v55 = vcombine.high %v371_v47, %v375_v48  ;;  %v4206_v59 = vcombine.low %v371_v47, %v375_v48  ;;  %v4224_v60 = vcombine.low %v388_v42, %v392_v46  ;;  %v4273_v42 = vcombine.high %v436_v38, %v440_v39  ;;  %v444_v46 = vld [vmem:[%s7386_s1 + $0x318] sm:$0xff] }
  0x5c   : > { %1221 = vmatprep.subr.bf16.mxu0 %v4283_v62  ;;  %v387_v62 = vld [vmem:[%s7386_s1 + $0x150] sm:$0xff]  ;;  %v448_v47 = vld [vmem:[%s7386_s1 + $0x338] sm:$0xff] }
  0x5d   : > { %1295 = vmatpush1.bf16.msra.mxu1 %v4284_v53  ;;  %v379_v53 = vld [vmem:[%s7386_s1 + $0x110] sm:$0xff] }
  0x5e   : > { %1296 = vmatprep.subr.bf16.mxu1 %v4293_v56  ;;  %v383_v56 = vld [vmem:[%s7386_s1 + $0x130] sm:$0xff] }
  0x5f   : > { %1222 = vmatpush1.bf16.msra.mxu0 %v4282_v4  ;;  %v4214_v4 = vcombine.low %v379_v53, %v383_v56 }
  0x60   : > { %1223 = vmatprep.subr.bf16.mxu0 %v4291_v7  ;;  %v416_v7 = vld [vmem:[%s7386_s1 + $0x238] sm:$0xff] }
  0x61   : > { %1297 = vmatpush1.bf16.msra.mxu1 %v4292_v61  ;;  %v4215_v61 = vcombine.high %v379_v53, %v383_v56  ;;  %v4249_v20 = vcombine.high %v412_v6, %v416_v7  ;;  %v4281_v53 = vcombine.high %v444_v46, %v448_v47  ;;  %v452_v56 = vld [vmem:[%s7386_s1 + $0x358] sm:$0xff] }
  0x62   : > { %1298 = vmatprep.subr.bf16.mxu1 %v4301_v0  ;;  %v391_v0 = vld [vmem:[%s7386_s1 + $0x170] sm:$0xff] }
  0x63   : > { %1224 = vmatpush1.bf16.msra.mxu0 %v4290_v13  ;;  %v4222_v13 = vcombine.low %v387_v62, %v391_v0 }
  0x64   : > { %1225 = vmatprep.subr.bf16.mxu0 %v4299_v18  ;;  %v4231_v18 = vcombine.high %v395_v9, %v399_v11 }
  0x65   : > { %1299 = vmatpush1.bf16.msra.mxu1 %v4300_v5  ;;  %v4232_v5 = vcombine.low %v396_v57, %v400_v58  ;;  %v456_v57 = vld [vmem:[%s7386_s1 + $0x378] sm:$0xff] }
  0x66   : > { %1414 = vmatprep.subr.bf16.mxu1 %v4185_v8  ;;  %v4223_v8 = vcombine.high %v387_v62, %v391_v0  ;;  %v443_v62 = vld [vmem:[%s7386_s1 + $0x310] sm:$0xff]  ;;  %v460_v0 = vld [vmem:[%s7386_s1 + $0x398] sm:$0xff] }
  0x67   : > { %1226 = vmatpush1.bf16.msra.mxu0 %v4298_v22  ;;  %v4230_v22 = vcombine.low %v395_v9, %v399_v11  ;;  %v468_v9 = vld [vmem:[%s7386_s1 + $0x3d8] sm:$0xff] }
  0x68   : > { %1301 = vmatmul.mubr.bf16.vlgmr.msra.gmra.mrb[0].mxu1 %v5330_v12  ;;  %1341 = vmatprep.subr.bf16.mxu0 %v4183_v25  ;;  %v4248_v25 = vcombine.low %v412_v6, %v416_v7  ;;  %v451_v7 = vld [vmem:[%s7386_s1 + $0x350] sm:$0xff] }
  0x69   : > { %1415 = vmatpush1.bf16.msra.mxu1 %v4184_v15  ;;  %1310 = vmatprep.mubr.bf16.mxu1 %v5333_v14  ;;  %v4240_v15 = vcombine.low %v404_v1, %v408_v2  ;;  %v464_v1 = vld [vmem:[%s7386_s1 + $0x3b8] sm:$0xff] }
  0x6a   : > { %1416 = vmatprep.subr.bf16.mxu1 %v4193_v17  ;;  %1228 = vmatmul.mubr.bf16.vlgmr.msra.gmra.mrb[0].mxu0 %v5330_v12  ;;  %v424_v17 = vld [vmem:[%s7386_s1 + $0x278] sm:$0xff]  ;;  %v4297_v6 = vcombine.high %v460_v0, %v464_v1 }
  0x6b   : > { %1342 = vmatpush1.bf16.msra.mxu0 %v4182_v31  ;;  %1237 = vmatprep.mubr.bf16.mxu0 %v5333_v14  ;;  %v4257_v29 = vcombine.high %v420_v16, %v424_v17  ;;  %v4238_v31 = vcombine.low %v403_v19, %v407_v21  ;;  %v4256_v34 = vcombine.low %v420_v16, %v424_v17  ;;  %v459_v17 = vld [vmem:[%s7386_s1 + $0x390] sm:$0xff] }
  0x6c   : > { %1343 = vmatprep.subr.bf16.mxu0 %v4191_v36 }
  0x6d   : > { %1417 = vmatpush1.bf16.msra.mxu1 %v4192_v23  ;;  %v411_v23 = vld [vmem:[%s7386_s1 + $0x210] sm:$0xff] }
  0x6e   : > { %1418 = vmatprep.subr.bf16.mxu1 %v4201_v26  ;;  %v428_v26 = vld [vmem:[%s7386_s1 + $0x298] sm:$0xff] }
  0x6f   : > { %1344 = vmatpush1.bf16.msra.mxu0 %v4190_v40  ;;  %v4265_v36 = vcombine.high %v428_v26, %v432_v27  ;;  %v4264_v40 = vcombine.low %v428_v26, %v432_v27  ;;  %v5554_v26 = vld [vmem:[%s7387_s2] ss:$16 sps:$4 sm:$0xff]   ;;  %v5560_v27 = vld [vmem:[%s7387_s2 + $0x24] ss:$16 sps:$4 sm:$0xff]  }
  0x70   : > { %1311 = vmatmul.mubr.bf16.gmra.mrb[4].mxu1 %v5362_v30  ;;  %1345 = vmatprep.subr.bf16.mxu0 %v4199_v44  ;;  %v427_v44 = vld [vmem:[%s7386_s1 + $0x290] sm:$0xff]  ;;  %7491 = vst [vmem:[#allocation6_spill] sm:$0xff] %v5554_v26  ;;  %7492 = vst [vmem:[#allocation7_spill] sm:$0xff] %v5560_v27 }
  0x71   : > { %1419 = vmatpush1.bf16.msra.mxu1 %v4200_v33  ;;  %1320 = vmatprep.mubr.bf16.mxu1 %v5365_v32  ;;  %v419_v33 = vld [vmem:[%s7386_s1 + $0x250] sm:$0xff] }
  0x72   : > { %1420 = vmatprep.subr.bf16.mxu1 %v4209_v35  ;;  %1238 = vmatmul.mubr.bf16.gmra.mrb[4].mxu0 %v5362_v30  ;;  %v4247_v35 = vcombine.high %v411_v23, %v415_v24  ;;  %v4254_v48 = vcombine.low %v419_v33, %v423_v37 }
  0x73   : > { %1346 = vmatpush1.bf16.msra.mxu0 %v4198_v50  ;;  %1247 = vmatprep.mubr.bf16.mxu0 %v5365_v32  ;;  %v4272_v50 = vcombine.low %v436_v38, %v440_v39  ;;  %v5602_v38 = vld [vmem:[%s7388_s3 + $0x24] ss:$16 sps:$4 sm:$0xff]   ;;  %v5610_v39 = vld [vmem:[%s7388_s3 + $0x20] ss:$16 sps:$4 sm:$0xff]  }
  0x74   : > { %1347 = vmatprep.subr.bf16.mxu0 %v4207_v55  ;;  %v439_v55 = vld [vmem:[%s7386_s1 + $0x2f0] sm:$0xff] }
  0x75   : > { %1421 = vmatpush1.bf16.msra.mxu1 %v4208_v41  ;;  %v4255_v41 = vcombine.high %v419_v33, %v423_v37  ;;  %v5573_v33 = vld [vmem:[%s7388_s3 + $0x4] ss:$16 sps:$4 sm:$0xff]  }
  0x76   : > { %1422 = vmatprep.subr.bf16.mxu1 %v4217_v45  ;;  %v431_v45 = vld [vmem:[%s7386_s1 + $0x2b0] sm:$0xff]  ;;  %7494 = vst [vmem:[#allocation9_spill] sm:$0xff] %v5573_v33 }
  0x77   : > { %1348 = vmatpush1.bf16.msra.mxu0 %v4206_v59  ;;  %v4262_v58 = vcombine.low %v427_v44, %v431_v45  ;;  %v4280_v59 = vcombine.low %v444_v46, %v448_v47  ;;  %v5597_v37 = vld [vmem:[%s7387_s2 + $0x64] ss:$16 sps:$4 sm:$0xff]   ;;  %v5668_v46 = vld [vmem:[%s7387_s2 + $0xa0] ss:$16 sps:$4 sm:$0xff]  }
  0x78   : > { %1321 = vmatmul.mubr.bf16.gmra.mrb[8].mxu1 %v5396_v49  ;;  %1349 = vmatprep.subr.bf16.mxu0 %v4215_v61  ;;  %v4289_v61 = vcombine.high %v452_v56, %v456_v57  ;;  %7497 = vst [vmem:[#allocation12_spill] sm:$0xff] %v5597_v37  ;;  %7502 = vst [vmem:[#allocation17_spill] sm:$0xff] %v5668_v46  ;;  %v5680_v47 = vld [vmem:[%s7387_s2 + $0xc4] ss:$16 sps:$4 sm:$0xff]  }
  0x79   : > { %1423 = vmatpush1.bf16.msra.mxu1 %v4216_v52  ;;  %1330 = vmatprep.mubr.bf16.mxu1 %v5399_v51  ;;  %v4263_v52 = vcombine.high %v427_v44, %v431_v45  ;;  %v5654_v44 = vld [vmem:[%s7388_s3 + $0x64] ss:$16 sps:$4 sm:$0xff]   ;;  %v5662_v45 = vld [vmem:[%s7388_s3 + $0x60] ss:$16 sps:$4 sm:$0xff]   ;;  %7503 = vst [vmem:[#allocation18_spill] sm:$0xff] %v5680_v47 }
  0x7a   : > { %1424 = vmatprep.subr.bf16.mxu1 %v4225_v54  ;;  %1248 = vmatmul.mubr.bf16.gmra.mrb[8].mxu0 %v5396_v49  ;;  %v435_v54 = vld [vmem:[%s7386_s1 + $0x2d0] sm:$0xff] }
  0x7b   : > { %1350 = vmatpush1.bf16.msra.mxu0 %v4214_v4  ;;  %1257 = vmatprep.mubr.bf16.mxu0 %v5399_v51  ;;  %v4270_v2 = vcombine.low %v435_v54, %v439_v55  ;;  %v4288_v4 = vcombine.low %v452_v56, %v456_v57  ;;  %v5732_v56 = vld [vmem:[%s7387_s2 + $0xc] ss:$16 sps:$4 sm:$0xff]   ;;  %v5740_v57 = vld [vmem:[%s7388_s3 + $0xc0] ss:$16 sps:$4 sm:$0xff]  }
  0x7c   : > { %1351 = vmatprep.subr.bf16.mxu0 %v4223_v8  ;;  %v455_v8 = vld [vmem:[%s7386_s1 + $0x370] sm:$0xff]  ;;  %7507 = vst [vmem:[#allocation22_spill] sm:$0xff] %v5732_v56 }
  0x7d   : > { %1425 = vmatpush1.bf16.msra.mxu1 %v4224_v60  ;;  %v4271_v60 = vcombine.high %v435_v54, %v439_v55  ;;  %v4286_v19 = vcombine.low %v451_v7, %v455_v8  ;;  %v5720_v54 = vld [vmem:[%s7387_s2 + $0xe0] ss:$16 sps:$4 sm:$0xff]   ;;  %v7393_v55 = vmov 0  }
  0x7e   : > { %1426 = vmatprep.subr.bf16.mxu1 %v4233_v63  ;;  %v447_v63 = vld [vmem:[%s7386_s1 + $0x330] sm:$0xff]  ;;  %7506 = vst [vmem:[#allocation21_spill] sm:$0xff] %v5720_v54 }
  0x7f   : > { %1352 = vmatpush1.bf16.msra.mxu0 %v4222_v13  ;;  %v4278_v11 = vcombine.low %v443_v62, %v447_v63  ;;  %v4296_v13 = vcombine.low %v460_v0, %v464_v1  ;;  %v5804_v0 = vld [vmem:[%s7387_s2 + $0x68] ss:$16 sps:$4 sm:$0xff]   ;;  %v5811_v1 = vld [vmem:[%s7387_s2 + $0x8c] ss:$16 sps:$4 sm:$0xff]  }
  0x80   : > { %1331 = vmatmul.mubr.bf16.gmra.mrb[12].mxu1 %v5430_v3  ;;  %1353 = vmatprep.subr.bf16.mxu0 %v4231_v18  ;;  %v463_v18 = vld [vmem:[%s7386_s1 + $0x3b0] sm:$0xff]  ;;  %7514 = vst [vmem:[#allocation29_spill] sm:$0xff] %v5804_v0  ;;  %7515 = vst [vmem:[#allocation30_spill] sm:$0xff] %v5811_v1 }
  0x81   : > { %1427 = vmatpush1.bf16.msra.mxu1 %v4232_v5  ;;  %1446 = vmatprep.mubr.bf16.mxu1 %v5181_v43  ;;  %v4279_v5 = vcombine.high %v443_v62, %v447_v63  ;;  %v4295_v21 = vcombine.high %v459_v17, %v463_v18  ;;  %v5788_v62 = vld [vmem:[%s7387_s2 + $0x48] ss:$16 sps:$4 sm:$0xff]   ;;  %v5795_v63 = vld [vmem:[%s7387_s2 + $0x6c] ss:$16 sps:$4 sm:$0xff]  }
  0x82   : > { %1428 = vmatprep.subr.bf16.mxu1 %v4241_v10  ;;  %1258 = vmatmul.mubr.bf16.gmra.mrb[12].mxu0 %v5430_v3  ;;  %v472_v10 = vld [vmem:[%s7386_s1 + $0x3f8] sm:$0xff]  ;;  %7512 = vst [vmem:[#allocation27_spill] sm:$0xff] %v5788_v62  ;;  %7513 = vst [vmem:[#allocation28_spill] sm:$0xff] %v5795_v63 }
  0x83   : > { %1354 = vmatpush1.bf16.msra.mxu0 %v4230_v22  ;;  %1373 = vmatprep.mubr.bf16.mxu0 %v5181_v43  ;;  %v4246_v43 = vcombine.low %v411_v23, %v415_v24  ;;  %v4305_v16 = vcombine.high %v468_v9, %v472_v10  ;;  %v5543_v22 = vld [vmem:[%s7387_s2 + $0x4] ss:$16 sps:$4 sm:$0xff]  }
  0x84   : > { %1355 = vmatprep.subr.bf16.mxu0 %v4239_v28  ;;  %v467_v23 = vld [vmem:[%s7386_s1 + $0x3d0] sm:$0xff] }
  0x85   : > { %1429 = vmatpush1.bf16.msra.mxu1 %v4240_v15  ;;  %v4287_v15 = vcombine.high %v451_v7, %v455_v8  ;;  %v471_v24 = vld [vmem:[%s7386_s1 + $0x3f0] sm:$0xff]  ;;  %v5846_v7 = vld [vmem:[%s7387_s2 + $0xc8] ss:$16 sps:$4 sm:$0xff]   ;;  %v5853_v8 = vld [vmem:[%s7387_s2 + $0xec] ss:$16 sps:$4 sm:$0xff]  }
  0x86   : > { %1430 = vmatprep.subr.bf16.mxu1 %v4249_v20  ;;  %v4304_v20 = vcombine.low %v468_v9, %v472_v10  ;;  %v4303_v28 = vcombine.high %v467_v23, %v471_v24  ;;  %7520 = vst [vmem:[#allocation35_spill] sm:$0xff] %v5846_v7  ;;  %7521 = vst [vmem:[#allocation36_spill] sm:$0xff] %v5853_v8  ;;  %v5860_v9 = vld [vmem:[%s7387_s2 + $0xe8] ss:$16 sps:$4 sm:$0xff]   ;;  %v5867_v10 = vld [vmem:[%s7388_s3 + $0xc] ss:$16 sps:$4 sm:$0xff]  }
  0x87   : > { %1356 = vmatpush1.bf16.msra.mxu0 %v4238_v31  ;;  %v5567_v31 = vld [vmem:[%s7387_s2 + $0x20] ss:$16 sps:$4 sm:$0xff]   ;;  %7522 = vst [vmem:[#allocation37_spill] sm:$0xff] %v5860_v9  ;;  %7523 = vst [vmem:[#allocation38_spill] sm:$0xff] %v5867_v10 }
  0x88   : > { %1357 = vmatprep.subr.bf16.mxu0 %v4247_v35  ;;  %7493 = vst [vmem:[#allocation8_spill] sm:$0xff] %v5567_v31  ;;  %v5584_v35 = vld [vmem:[%s7388_s3] ss:$16 sps:$4 sm:$0xff]  }
  0x89   : > { %1431 = vmatpush1.bf16.msra.mxu1 %v4248_v25  ;;  %v4294_v25 = vcombine.low %v459_v17, %v463_v18  ;;  %v5904_v17 = vld [vmem:[%s7388_s3 + $0x48] ss:$16 sps:$4 sm:$0xff]   ;;  %v5911_v18 = vld [vmem:[%s7388_s3 + $0x6c] ss:$16 sps:$4 sm:$0xff]  }
  0x8a   : > { %1432 = vmatprep.subr.bf16.mxu1 %v4257_v29  ;;  %v4302_v29 = vcombine.low %v467_v23, %v471_v24  ;;  %v5935_v23 = vld [vmem:[%s7388_s3 + $0xac] ss:$16 sps:$4 sm:$0xff]   ;;  %v5941_v24 = vld [vmem:[%s7388_s3 + $0xa8] ss:$16 sps:$4 sm:$0xff]  }
  0x8b   : > { %1358 = vmatpush1.bf16.msra.mxu0 %v4246_v43  ;;  %v5616_v43 = vld [vmem:[%s7387_s2 + $0x60] ss:$16 sps:$4 sm:$0xff]  }
  0x8c   : > { %1359 = vmatprep.subr.bf16.mxu0 %v4255_v41  ;;  %7498 = vst [vmem:[#allocation13_spill] sm:$0xff] %v5616_v43  ;;  %v5636_v41 = vld [vmem:[%s7388_s3 + $0x40] ss:$16 sps:$4 sm:$0xff]  }
  0x8d   : > { %1433 = vmatpush1.bf16.msra.mxu1 %v4256_v34  ;;  %v5579_v34 = vld [vmem:[%s7387_s2 + $0x44] ss:$16 sps:$4 sm:$0xff]  }
  0x8e   : > { %1434 = vmatprep.subr.bf16.mxu1 %v4265_v36  ;;  %7495 = vst [vmem:[#allocation10_spill] sm:$0xff] %v5579_v34  ;;  %v5590_v36 = vld [vmem:[%s7387_s2 + $0x40] ss:$16 sps:$4 sm:$0xff]  }
  0x8f   : > { %1360 = vmatpush1.bf16.msra.mxu0 %v4254_v48  ;;  %7496 = vst [vmem:[#allocation11_spill] sm:$0xff] %v5590_v36  ;;  %v5688_v48 = vld [vmem:[%s7388_s3 + $0x80] ss:$16 sps:$4 sm:$0xff]  }
  0x90   : > { %1361 = vmatprep.subr.bf16.mxu0 %v4263_v52  ;;  %v5706_v52 = vld [vmem:[%s7388_s3 + $0xa4] ss:$16 sps:$4 sm:$0xff]  }
  0x91   : > { %1435 = vmatpush1.bf16.msra.mxu1 %v4264_v40  ;;  %v5628_v40 = vld [vmem:[%s7387_s2 + $0x84] ss:$16 sps:$4 sm:$0xff]  }
  0x92   : > { %1436 = vmatprep.subr.bf16.mxu1 %v4273_v42  ;;  %7499 = vst [vmem:[#allocation14_spill] sm:$0xff] %v5628_v40  ;;  %v5642_v42 = vld [vmem:[%s7387_s2 + $0x80] ss:$16 sps:$4 sm:$0xff]  }
  0x93   : > { %1362 = vmatpush1.bf16.msra.mxu0 %v4262_v58  ;;  %7500 = vst [vmem:[#allocation15_spill] sm:$0xff] %v5642_v42  ;;  %v5746_v58 = vld [vmem:[%s7387_s2 + $0x8] ss:$16 sps:$4 sm:$0xff]  }
  0x94   : > { %1363 = vmatprep.subr.bf16.mxu0 %v4271_v60  ;;  %7508 = vst [vmem:[#allocation23_spill] sm:$0xff] %v5746_v58  ;;  %v5766_v60 = vld [vmem:[%s7388_s3 + $0xe0] ss:$16 sps:$4 sm:$0xff]  }
  0x95   : > { %1437 = vmatpush1.bf16.msra.mxu1 %v4272_v50  ;;  %v5694_v50 = vld [vmem:[%s7387_s2 + $0xc0] ss:$16 sps:$4 sm:$0xff]  }
  0x96   : > { %1438 = vmatprep.subr.bf16.mxu1 %v4281_v53  ;;  %7504 = vst [vmem:[#allocation19_spill] sm:$0xff] %v5694_v50  ;;  %v5714_v53 = vld [vmem:[%s7388_s3 + $0xa0] ss:$16 sps:$4 sm:$0xff]  }
  0x97   : > { %1364 = vmatpush1.bf16.msra.mxu0 %v4270_v2  ;;  %v5818_v2 = vld [vmem:[%s7387_s2 + $0x88] ss:$16 sps:$4 sm:$0xff]  }
  0x98   : > { %1365 = vmatprep.subr.bf16.mxu0 %v4279_v5  ;;  %7516 = vst [vmem:[#allocation31_spill] sm:$0xff] %v5818_v2  ;;  %v5832_v5 = vld [vmem:[%s7387_s2 + $0xa8] ss:$16 sps:$4 sm:$0xff]  }
  0x99   : > { %1439 = vmatpush1.bf16.msra.mxu1 %v4280_v59  ;;  %v5758_v59 = vld [vmem:[%s7388_s3 + $0xe4] ss:$16 sps:$4 sm:$0xff]   ;;  %7518 = vst [vmem:[#allocation33_spill] sm:$0xff] %v5832_v5 }
  0x9a   : > { %1440 = vmatprep.subr.bf16.mxu1 %v4289_v61  ;;  %v5772_v61 = vld [vmem:[%s7387_s2 + $0x28] ss:$16 sps:$4 sm:$0xff]  }
  0x9b   : > { %1366 = vmatpush1.bf16.msra.mxu0 %v4278_v11  ;;  %7510 = vst [vmem:[#allocation25_spill] sm:$0xff] %v5772_v61  ;;  %v5874_v11 = vld [vmem:[%s7388_s3 + $0x8] ss:$16 sps:$4 sm:$0xff]  }
  0x9c   : > { %1367 = vmatprep.subr.bf16.mxu0 %v4287_v15  ;;  %v5889_v15 = vld [vmem:[%s7388_s3 + $0x28] ss:$16 sps:$4 sm:$0xff]  }
  0x9d   : > { %1441 = vmatpush1.bf16.msra.mxu1 %v4288_v4  ;;  %v5825_v4 = vld [vmem:[%s7387_s2 + $0xac] ss:$16 sps:$4 sm:$0xff]  }
  0x9e   : > { %1442 = vmatprep.subr.bf16.mxu1 %v4297_v6  ;;  %7517 = vst [vmem:[#allocation32_spill] sm:$0xff] %v5825_v4  ;;  %v5839_v6 = vld [vmem:[%s7387_s2 + $0xcc] ss:$16 sps:$4 sm:$0xff]  }
  0x9f   : > { %1368 = vmatpush1.bf16.msra.mxu0 %v4286_v19  ;;  %7519 = vst [vmem:[#allocation34_spill] sm:$0xff] %v5839_v6  ;;  %v5917_v19 = vld [vmem:[%s7388_s3 + $0x68] ss:$16 sps:$4 sm:$0xff]  }
  0xa0   : > { %1369 = vmatprep.subr.bf16.mxu0 %v4295_v21  ;;  %v5929_v21 = vld [vmem:[%s7388_s3 + $0x88] ss:$16 sps:$4 sm:$0xff]  }
  0xa1   : > { %1443 = vmatpush1.bf16.msra.mxu1 %v4296_v13  ;;  %v5881_v13 = vld [vmem:[%s7388_s3 + $0x2c] ss:$16 sps:$4 sm:$0xff]  }
  0xa2   : > { %1444 = vmatprep.subr.bf16.mxu1 %v4305_v16  ;;  %v5896_v16 = vld [vmem:[%s7388_s3 + $0x4c] ss:$16 sps:$4 sm:$0xff]  }
  0xa3   : > { %1370 = vmatpush1.bf16.msra.mxu0 %v4294_v25  ;;  %v5947_v25 = vld [vmem:[%s7388_s3 + $0xcc] ss:$16 sps:$4 sm:$0xff]  }
  0xa4   : > { %1371 = vmatprep.subr.bf16.mxu0 %v4303_v28  ;;  %v5953_v28 = vld [vmem:[%s7388_s3 + $0xc8] ss:$16 sps:$4 sm:$0xff]  }
  0xa5   : > { %1445 = vmatpush1.bf16.msra.mxu1 %v4304_v20  ;;  %v5923_v20 = vld [vmem:[%s7388_s3 + $0x8c] ss:$16 sps:$4 sm:$0xff]  }
  0xa6   : > { %1779 = vmatprep.subr.bf16.mxu1 %v5543_v22 }
  0xa7   : > { %1372 = vmatpush1.bf16.msra.mxu0 %v4302_v29  ;;  %v5959_v29 = vld [vmem:[%s7388_s3 + $0xec] ss:$16 sps:$4 sm:$0xff]  }
  0xa8   : > { %1447 = vmatmul.mubr.bf16.vlgmr.msra.gmra.mrb[16].mxu1 %v5330_v12  ;;  %2030 = vmatprep.subr.bf16.mxu0 %v5573_v33 }
  0xa9   : > { %1780 = vmatpush1.bf16.msra.mxu1 %v5554_v26  ;;  %1456 = vmatprep.mubr.bf16.mxu1 %v5333_v14 }
  0xaa   : > { %1781 = vmatprep.subr.bf16.mxu1 %v5560_v27  ;;  %1374 = vmatmul.mubr.bf16.vlgmr.msra.gmra.mrb[16].mxu0 %v5330_v12  ;;  %v5622_v12 = vld [vmem:[%s7388_s3 + $0x44] ss:$16 sps:$4 sm:$0xff]  }
  0xab   : > { %2031 = vmatpush1.bf16.msra.mxu0 %v5584_v35  ;;  %1383 = vmatprep.mubr.bf16.mxu0 %v5333_v14  ;;  %v5649_v14 = vld [vmem:[%s7387_s2 + $0xa4] ss:$16 sps:$4 sm:$0xff]  }
  0xac   : > { %2032 = vmatprep.subr.bf16.mxu0 %v5602_v38  ;;  %7501 = vst [vmem:[#allocation16_spill] sm:$0xff] %v5649_v14 }
  0xad   : > { %1782 = vmatpush1.bf16.msra.mxu1 %v5567_v31 }
  0xae   : > { %1783 = vmatprep.subr.bf16.mxu1 %v5579_v34 }
  0xaf   : > { %2033 = vmatpush1.bf16.msra.mxu0 %v5610_v39 }
  0xb0   : > { %1457 = vmatmul.mubr.bf16.gmra.mrb[20].mxu1 %v5362_v30  ;;  %2034 = vmatprep.subr.bf16.mxu0 %v5622_v12 }
  0xb1   : > { %1784 = vmatpush1.bf16.msra.mxu1 %v5590_v36  ;;  %1466 = vmatprep.mubr.bf16.mxu1 %v5365_v32 }
  0xb2   : > { %1785 = vmatprep.subr.bf16.mxu1 %v5597_v37  ;;  %1384 = vmatmul.mubr.bf16.gmra.mrb[20].mxu0 %v5362_v30  ;;  %v5674_v30 = vld [vmem:[%s7388_s3 + $0x84] ss:$16 sps:$4 sm:$0xff]  }
  0xb3   : > { %2035 = vmatpush1.bf16.msra.mxu0 %v5636_v41  ;;  %1393 = vmatprep.mubr.bf16.mxu0 %v5365_v32  ;;  %v5701_v32 = vld [vmem:[%s7387_s2 + $0xe4] ss:$16 sps:$4 sm:$0xff]  }
  0xb4   : > { %2036 = vmatprep.subr.bf16.mxu0 %v5654_v44  ;;  %7505 = vst [vmem:[#allocation20_spill] sm:$0xff] %v5701_v32 }
  0xb5   : > { %1786 = vmatpush1.bf16.msra.mxu1 %v5616_v43 }
  0xb6   : > { %1787 = vmatprep.subr.bf16.mxu1 %v5628_v40 }
  0xb7   : > { %2037 = vmatpush1.bf16.msra.mxu0 %v5662_v45 }
  0xb8   : > { %1467 = vmatmul.mubr.bf16.gmra.mrb[24].mxu1 %v5396_v49  ;;  %2038 = vmatprep.subr.bf16.mxu0 %v5674_v30 }
  0xb9   : > { %1788 = vmatpush1.bf16.msra.mxu1 %v5642_v42  ;;  %1476 = vmatprep.mubr.bf16.mxu1 %v5399_v51 }
  0xba   : > { %1789 = vmatprep.subr.bf16.mxu1 %v5649_v14  ;;  %1394 = vmatmul.mubr.bf16.gmra.mrb[24].mxu0 %v5396_v49  ;;  %v5726_v49 = vld [vmem:[%s7388_s3 + $0xc4] ss:$16 sps:$4 sm:$0xff]  }
  0xbb   : > { %2039 = vmatpush1.bf16.msra.mxu0 %v5688_v48  ;;  %1403 = vmatprep.mubr.bf16.mxu0 %v5399_v51  ;;  %v5753_v51 = vld [vmem:[%s7387_s2 + $0x2c] ss:$16 sps:$4 sm:$0xff]  }
  0xbc   : > { %2040 = vmatprep.subr.bf16.mxu0 %v5706_v52  ;;  %7509 = vst [vmem:[#allocation24_spill] sm:$0xff] %v5753_v51 }
  0xbd   : > { %1790 = vmatpush1.bf16.msra.mxu1 %v5668_v46 }
  0xbe   : > { %1791 = vmatprep.subr.bf16.mxu1 %v5680_v47 }
  0xbf   : > { %2041 = vmatpush1.bf16.msra.mxu0 %v5714_v53 }
  0xc0   : > { %1477 = vmatmul.mubr.bf16.gmra.mrb[28].mxu1 %v5430_v3  ;;  %2042 = vmatprep.subr.bf16.mxu0 %v5726_v49 }
  0xc1   : > { %1792 = vmatpush1.bf16.msra.mxu1 %v5694_v50  ;;  %1811 = vmatprep.mubr.bf16.mxu1 %v7393_v55 }
  0xc2   : > { %1793 = vmatprep.subr.bf16.mxu1 %v5701_v32  ;;  %1404 = vmatmul.mubr.bf16.gmra.mrb[28].mxu0 %v5430_v3  ;;  %v5779_v3 = vld [vmem:[%s7387_s2 + $0x4c] ss:$16 sps:$4 sm:$0xff]  }
  0xc3   : > { %2043 = vmatpush1.bf16.msra.mxu0 %v5740_v57  ;;  %7511 = vst [vmem:[#allocation26_spill] sm:$0xff] %v5779_v3  ;;  %2062 = vmatprep.mubr.bf16.mxu0 %v7393_v55 }
  0xc4   : > { %2044 = vmatprep.subr.bf16.mxu0 %v5758_v59 }
  0xc5   : > { %1794 = vmatpush1.bf16.msra.mxu1 %v5720_v54 }
  0xc6   : > { %1820 = vmatprep.subr.bf16.mxu1 %v5732_v56 }
  0xc7   : > { %2045 = vmatpush1.bf16.msra.mxu0 %v5766_v60 }
  0xc8   : > { %1812 = vmatmul.mubr.bf16.vlgmr.msra.gmra.mrb[32].mxu1 %v7393_v55  ;;  %2173 = vmatprep.subr.bf16.mxu0 %v5543_v22 }
  0xc9   : > { %1821 = vmatpush1.bf16.msra.mxu1 %v5746_v58  ;;  %1852 = vmatprep.mubr.bf16.mxu1 %v7393_v55 }
  0xca   : > { %1822 = vmatprep.subr.bf16.mxu1 %v5753_v51  ;;  %2063 = vmatmul.mubr.bf16.vlgmr.msra.gmra.mrb[32].mxu0 %v7393_v55 }
  0xcb   : > { %2174 = vmatpush1.bf16.msra.mxu0 %v5554_v26  ;;  %2205 = vmatprep.mubr.bf16.mxu0 %v7393_v55 }
  0xcc   : > { %2175 = vmatprep.subr.bf16.mxu0 %v5560_v27 }
  0xcd   : > { %1823 = vmatpush1.bf16.msra.mxu1 %v5772_v61 }
  0xce   : > { %1824 = vmatprep.subr.bf16.mxu1 %v5779_v3 }
  0xcf   : > { %2176 = vmatpush1.bf16.msra.mxu0 %v5567_v31 }
  0xd0   : > { %2177 = vmatprep.subr.bf16.mxu0 %v5579_v34 }
  0xd1   : > { %1825 = vmatpush1.bf16.msra.mxu1 %v5788_v62 }
  0xd2   : > { %1826 = vmatprep.subr.bf16.mxu1 %v5795_v63 }
  0xd3   : > { %2178 = vmatpush1.bf16.msra.mxu0 %v5590_v36 }
  0xd4   : > { %2179 = vmatprep.subr.bf16.mxu0 %v5597_v37 }
  0xd5   : > { %1827 = vmatpush1.bf16.msra.mxu1 %v5804_v0 }
  0xd6   : > { %1828 = vmatprep.subr.bf16.mxu1 %v5811_v1 }
  0xd7   : > { %2180 = vmatpush1.bf16.msra.mxu0 %v5616_v43 }
  0xd8   : > { %2181 = vmatprep.subr.bf16.mxu0 %v5628_v40 }
  0xd9   : > { %1829 = vmatpush1.bf16.msra.mxu1 %v5818_v2 }
  0xda   : > { %1830 = vmatprep.subr.bf16.mxu1 %v5825_v4 }
  0xdb   : > { %2182 = vmatpush1.bf16.msra.mxu0 %v5642_v42 }
  0xdc   : > { %2183 = vmatprep.subr.bf16.mxu0 %v5649_v14 }
  0xdd   : > { %1831 = vmatpush1.bf16.msra.mxu1 %v5832_v5 }
  0xde   : > { %1832 = vmatprep.subr.bf16.mxu1 %v5839_v6 }
  0xdf   : > { %2184 = vmatpush1.bf16.msra.mxu0 %v5668_v46 }
  0xe0   : > { %2185 = vmatprep.subr.bf16.mxu0 %v5680_v47  ;;  %v5994_v47 = vld [vmem:[%s7389_s4] sm:$0xff] }
  0xe1   : > { %1833 = vmatpush1.bf16.msra.mxu1 %v5846_v7 }
  0xe2   : > { %1834 = vmatprep.subr.bf16.mxu1 %v5853_v8 }
  0xe3   : > { %2186 = vmatpush1.bf16.msra.mxu0 %v5694_v50 }
  0xe4   : > { %2187 = vmatprep.subr.bf16.mxu0 %v5701_v32 }
  0xe5   : > { %1835 = vmatpush1.bf16.msra.mxu1 %v5860_v9 }
  0xe6   : > { %2071 = vmatprep.subr.bf16.mxu1 %v5867_v10 }
  0xe7   : > { %2188 = vmatpush1.bf16.msra.mxu0 %v5720_v54  ;;  %v475_v54 = vlaneseq }
  0xe8   : > { %1853 = vmatmul.mubr.bf16.vlgmr.msra.gmra.mrb[36].mxu1 %v7393_v55  ;;  %2265 = vmatprep.subr.bf16.mxu0 %v5573_v33  ;;  %v7524_v33 = vmov 0  }
  0xe9   : > { %2072 = vmatpush1.bf16.msra.mxu1 %v5874_v11  ;;  %2103 = vmatprep.mubr.bf16.mxu1 %v7393_v55  ;;  %v5965_v55 = vld [vmem:[%s7388_s3 + $0xe8] ss:$16 sps:$4 sm:$0xff]   ;;  %v5988_v32 = vshrl.u32 %v475_v54, 7 }
  0xea   : > { %2073 = vmatprep.subr.bf16.mxu1 %v5881_v13 }
  0xeb   : > { %v485_v50 = vsub.s32 2, %v5988_v32  ;;  %v481_v14 = vsub.s32 1, %v5988_v32 }
  0xed   : > { %2074 = vmatpush1.bf16.msra.mxu1 %v5889_v15 }
  0xee   : > { %2075 = vmatprep.subr.bf16.mxu1 %v5896_v16 }
  0xf1   : > { %2076 = vmatpush1.bf16.msra.mxu1 %v5904_v17 }
  0xf2   : > { %2077 = vmatprep.subr.bf16.mxu1 %v5911_v18 }
  0xf5   : > { %2078 = vmatpush1.bf16.msra.mxu1 %v5917_v19 }
  0xf6   : > { %2079 = vmatprep.subr.bf16.mxu1 %v5923_v20 }
  0xf9   : > { %2080 = vmatpush1.bf16.msra.mxu1 %v5929_v21 }
  0xfa   : > { %2081 = vmatprep.subr.bf16.mxu1 %v5935_v23 }
  0xfd   : > { %2082 = vmatpush1.bf16.msra.mxu1 %v5941_v24 }
  0xfe   : > { %2083 = vmatprep.subr.bf16.mxu1 %v5947_v25 }
 0x101   : > { %2084 = vmatpush1.bf16.msra.mxu1 %v5953_v28 }
 0x102   : > { %2085 = vmatprep.subr.bf16.mxu1 %v5959_v29 }
 0x105   : > { %2086 = vmatpush1.bf16.msra.mxu1 %v5965_v55 }
 0x106   : > { %2214 = vmatprep.subr.bf16.mxu1 %v5732_v56 }
 0x108   : > { %2104 = vmatmul.mubr.bf16.vlgmr.msra.gmra.mrb[40].mxu1 %v7524_v33 }
 0x109   : > { %2215 = vmatpush1.bf16.msra.mxu1 %v5746_v58  ;;  %2246 = vmatprep.mubr.bf16.mxu1 %v7524_v33 }
 0x10a   : > { %2216 = vmatprep.subr.bf16.mxu1 %v5753_v51 }
 0x10d   : > { %2217 = vmatpush1.bf16.msra.mxu1 %v5772_v61 }
 0x10e   : > { %2218 = vmatprep.subr.bf16.mxu1 %v5779_v3 }
 0x111   : > { %2219 = vmatpush1.bf16.msra.mxu1 %v5788_v62 }
 0x112   : > { %2220 = vmatprep.subr.bf16.mxu1 %v5795_v63 }
 0x115   : > { %2221 = vmatpush1.bf16.msra.mxu1 %v5804_v0 }
 0x116   : > { %2222 = vmatprep.subr.bf16.mxu1 %v5811_v1 }
 0x119   : > { %2223 = vmatpush1.bf16.msra.mxu1 %v5818_v2 }
 0x11a   : > { %2224 = vmatprep.subr.bf16.mxu1 %v5825_v4 }
 0x11d   : > { %2225 = vmatpush1.bf16.msra.mxu1 %v5832_v5  ;;  %v477_v5 = vsub.s32 0, %v5988_v32 }
 0x11e   : > { %2226 = vmatprep.subr.bf16.mxu1 %v5839_v6  ;;  %v489_v6 = vsub.s32 3, %v5988_v32 }
 0x121   : > { %2227 = vmatpush1.bf16.msra.mxu1 %v5846_v7  ;;  %v5998_v7 = vrot.slane %v5994_v47, %v485_v50  ;;  %v6016_v50 = vrot.slane %v5994_v47, %v477_v5 }
 0x122   : > { %2228 = vmatprep.subr.bf16.mxu1 %v5853_v8 }
 0x125   : > { %2229 = vmatpush1.bf16.msra.mxu1 %v5860_v9 }
 0x126   : > { %2306 = vmatprep.subr.bf16.mxu1 %v5867_v10  ;;  %v6005_v10 = vrot.slane %v5994_v47, %v489_v6  ;;  %v6021_v6 = vrot.slane %v5994_v47, %v481_v14 }
 0x13b   : > { %v6000_v8 = vpop.f32.mrb[0].mxu1 }
 0x13c   : > { %v6002_v9 = vpop.f32.mrb[1].mxu1 }
 0x13d   : > { %v1306_v54 = vpop.f32.mrb[2].mxu1  ;;  %v6018_v42 = vpop.f32.mrb[0].mxu0 }
 0x13e   : > { %v6009_v46 = vadd.f32 %v1306_v54, %v5998_v7  ;;  %v1308_v4 = vpop.f32.mrb[3].mxu1  ;;  %v6023_v40 = vpop.f32.mrb[1].mxu0 }
 0x13f   : > { %v6013_v2 = vadd.f32 %v1308_v4, %v6005_v10  ;;  %v1233_v0 = vpop.f32.mrb[2].mxu0 }
 0x140   : > { %7525 = vst [vmem:[#allocation39_spill] sm:$0xff] %v6009_v46  ;;  %v6032_v5 = vadd.f32 %v1233_v0, %v6016_v50 }
 0x141   : > { %7526 = vst [vmem:[#allocation40_spill] sm:$0xff] %v6013_v2  ;;  %v1235_v2 = vpop.f32.mrb[3].mxu0 }
 0x142   : > { %7529 = vst [vmem:[#allocation43_spill] sm:$0xff] %v6032_v5  ;;  %v6038_v37 = vadd.f32 %v1235_v2, %v6021_v6 }
 0x143   : > { %v1312_v1 = vpop.f32.mrb[4].mxu1 }
 0x144   : > { %v6026_v54 = vadd.f32 %v1312_v1, %v5998_v7  ;;  %v1314_v46 = vpop.f32.mrb[5].mxu1  ;;  %7531 = vst [vmem:[#allocation45_spill] sm:$0xff] %v6038_v37 }
 0x145   : > { %v6029_v43 = vadd.f32 %v1314_v46, %v6005_v10  ;;  %v1316_v4 = vpop.f32.mrb[6].mxu1 }
 0x146   : > { %7527 = vst [vmem:[#allocation41_spill] sm:$0xff] %v6026_v54  ;;  %v6035_v63 = vadd.f32 %v1316_v4, %v5998_v7  ;;  %v1318_v14 = vpop.f32.mrb[7].mxu1  ;;  %v1239_v54 = vpop.f32.mrb[4].mxu0 }
 0x147   : > { %7528 = vst [vmem:[#allocation42_spill] sm:$0xff] %v6029_v43  ;;  %v6041_v1 = vadd.f32 %v1318_v14, %v6005_v10  ;;  %v6044_v46 = vadd.f32 %v1239_v54, %v6016_v50  ;;  %v1241_v43 = vpop.f32.mrb[5].mxu0 }
 0x148   : > { %7530 = vst [vmem:[#allocation44_spill] sm:$0xff] %v6035_v63  ;;  %v6050_v4 = vadd.f32 %v1241_v43, %v6021_v6  ;;  %v1243_v63 = vpop.f32.mrb[6].mxu0 }
 0x149   : > { %7532 = vst [vmem:[#allocation46_spill] sm:$0xff] %v6041_v1  ;;  %7533 = vst [vmem:[#allocation47_spill] sm:$0xff] %v6044_v46  ;;  %v6056_v14 = vadd.f32 %v1243_v63, %v6016_v50  ;;  %v1245_v1 = vpop.f32.mrb[7].mxu0 }
 0x14a   : > { %7535 = vst [vmem:[#allocation49_spill] sm:$0xff] %v6050_v4 }
 0x14b   : > { %v1322_v62 = vpop.f32.mrb[8].mxu1  ;;  %7537 = vst [vmem:[#allocation51_spill] sm:$0xff] %v6056_v14 }
 0x14c   : > { %v6047_v0 = vadd.f32 %v1322_v62, %v5998_v7  ;;  %v1324_v5 = vpop.f32.mrb[9].mxu1  ;;  %v6062_v62 = vadd.f32 %v1245_v1, %v6021_v6 }
 0x14d   : > { %v6053_v2 = vadd.f32 %v1324_v5, %v6005_v10  ;;  %v1326_v37 = vpop.f32.mrb[10].mxu1  ;;  %v1249_v43 = vpop.f32.mrb[8].mxu0 }
 0x14e   : > { %7534 = vst [vmem:[#allocation48_spill] sm:$0xff] %v6047_v0  ;;  %v6059_v54 = vadd.f32 %v1326_v37, %v5998_v7  ;;  %v1328_v46 = vpop.f32.mrb[11].mxu1  ;;  %7539 = vst [vmem:[#allocation53_spill] sm:$0xff] %v6062_v62  ;;  %v6068_v5 = vadd.f32 %v1249_v43, %v6016_v50 }
 0x14f   : > { %7536 = vst [vmem:[#allocation50_spill] sm:$0xff] %v6053_v2  ;;  %v6065_v0 = vadd.f32 %v1328_v46, %v6005_v10  ;;  %v1251_v2 = vpop.f32.mrb[9].mxu0 }
 0x150   : > { %7538 = vst [vmem:[#allocation52_spill] sm:$0xff] %v6059_v54  ;;  %7541 = vst [vmem:[#allocation55_spill] sm:$0xff] %v6068_v5  ;;  %v6074_v37 = vadd.f32 %v1251_v2, %v6021_v6  ;;  %v1253_v54 = vpop.f32.mrb[10].mxu0 }
 0x151   : > { %7540 = vst [vmem:[#allocation54_spill] sm:$0xff] %v6065_v0  ;;  %v6080_v46 = vadd.f32 %v1253_v54, %v6016_v50  ;;  %v1255_v0 = vpop.f32.mrb[11].mxu0 }
 0x152   : > { %7543 = vst [vmem:[#allocation57_spill] sm:$0xff] %v6074_v37 }
 0x153   : > { %v1332_v4 = vpop.f32.mrb[12].mxu1  ;;  %7545 = vst [vmem:[#allocation59_spill] sm:$0xff] %v6080_v46 }
 0x154   : > { %v6071_v63 = vadd.f32 %v1332_v4, %v5998_v7  ;;  %v1334_v14 = vpop.f32.mrb[13].mxu1  ;;  %v6086_v4 = vadd.f32 %v1255_v0, %v6021_v6  ;;  %v501_v0 = vsub.s32 6, %v5988_v32 }
 0x155   : > { %v6077_v1 = vadd.f32 %v1334_v14, %v6005_v10  ;;  %v1336_v62 = vpop.f32.mrb[14].mxu1  ;;  %v1259_v2 = vpop.f32.mrb[12].mxu0 }
 0x156   : > { %7542 = vst [vmem:[#allocation56_spill] sm:$0xff] %v6071_v63  ;;  %v6083_v43 = vadd.f32 %v1336_v62, %v5998_v7  ;;  %v1338_v5 = vpop.f32.mrb[15].mxu1  ;;  %7547 = vst [vmem:[#allocation61_spill] sm:$0xff] %v6086_v4  ;;  %v6092_v37 = vadd.f32 %v1259_v2, %v6016_v50  ;;  %v1261_v14 = vpop.f32.mrb[13].mxu0 }
 0x157   : > { %7544 = vst [vmem:[#allocation58_spill] sm:$0xff] %v6077_v1  ;;  %v6089_v63 = vadd.f32 %v1338_v5, %v6005_v10  ;;  %v6095_v1 = vadd.f32 %v1261_v14, %v6021_v6  ;;  %v1263_v54 = vpop.f32.mrb[14].mxu0  ;;  %v505_v5 = vsub.s32 7, %v5988_v32 }
 0x158   : > { %7546 = vst [vmem:[#allocation60_spill] sm:$0xff] %v6083_v43  ;;  %7549 = vst [vmem:[#allocation63_spill] sm:$0xff] %v6092_v37  ;;  %v6098_v46 = vadd.f32 %v1263_v54, %v6016_v50  ;;  %v1265_v62 = vpop.f32.mrb[15].mxu0 }
 0x159   : > { %7548 = vst [vmem:[#allocation62_spill] sm:$0xff] %v6089_v63  ;;  %7550 = vst [vmem:[#allocation64_spill] sm:$0xff] %v6095_v1  ;;  %v6101_v43 = vadd.f32 %v1265_v62, %v6021_v6  ;;  %v6106_v63 = vrot.slane %v5994_v47, %v501_v0  ;;  %v6109_v2 = vrot.slane %v5994_v47, %v505_v5  ;;  %v493_v1 = vsub.s32 4, %v5988_v32 }
 0x15a   : > { %7551 = vst [vmem:[#allocation65_spill] sm:$0xff] %v6098_v46  ;;  %v497_v62 = vsub.s32 5, %v5988_v32 }
 0x15b   : > { %7552 = vst [vmem:[#allocation66_spill] sm:$0xff] %v6101_v43  ;;  %v494_v36 = vrot.slane %v5994_v47, %v493_v1 }
 0x15c   : > { %v498_v3 = vrot.slane %v5994_v47, %v497_v62 }
 0x17b   : > { %v1448_v14 = vpop.f32.mrb[16].mxu1 }
 0x17c   : > { %v6113_v54 = vadd.f32 %v1448_v14, %v6106_v63  ;;  %v1450_v46 = vpop.f32.mrb[17].mxu1 }
 0x17d   : > { %v6117_v43 = vadd.f32 %v1450_v46, %v6109_v2  ;;  %v1452_v37 = vpop.f32.mrb[18].mxu1  ;;  %v1375_v14 = vpop.f32.mrb[16].mxu0 }
 0x17e   : > { %7553 = vst [vmem:[#allocation67_spill] sm:$0xff] %v6113_v54  ;;  %v6120_v4 = vadd.f32 %v1452_v37, %v6106_v63  ;;  %v1454_v0 = vpop.f32.mrb[19].mxu1  ;;  %v6127_v34 = vadd.f32 %v1375_v14, %v494_v36  ;;  %v1377_v32 = vpop.f32.mrb[17].mxu0 }
 0x17f   : > { %7554 = vst [vmem:[#allocation68_spill] sm:$0xff] %v6117_v43  ;;  %v6123_v5 = vadd.f32 %v1454_v0, %v6109_v2  ;;  %v6132_v61 = vadd.f32 %v1377_v32, %v498_v3  ;;  %v1379_v37 = vpop.f32.mrb[18].mxu0 }
 0x180   : > { %7555 = vst [vmem:[#allocation69_spill] sm:$0xff] %v6120_v4  ;;  %7557 = vst [vmem:[#allocation71_spill] sm:$0xff] %v6127_v34  ;;  %v1381_v1 = vpop.f32.mrb[19].mxu0 }
 0x181   : > { %7556 = vst [vmem:[#allocation70_spill] sm:$0xff] %v6123_v5  ;;  %7559 = vst [vmem:[#allocation73_spill] sm:$0xff] %v6132_v61  ;;  %v6137_v5 = vadd.f32 %v1379_v37, %v494_v36  ;;  %v6142_v14 = vadd.f32 %v1381_v1, %v498_v3 }
 0x183   : > { %v1458_v54 = vpop.f32.mrb[20].mxu1  ;;  %7561 = vst [vmem:[#allocation75_spill] sm:$0xff] %v6137_v5  ;;  %7563 = vst [vmem:[#allocation77_spill] sm:$0xff] %v6142_v14 }
 0x184   : > { %v6130_v46 = vadd.f32 %v1458_v54, %v6106_v63  ;;  %v1460_v43 = vpop.f32.mrb[21].mxu1 }
 0x185   : > { %v6135_v4 = vadd.f32 %v1460_v43, %v6109_v2  ;;  %v1462_v0 = vpop.f32.mrb[22].mxu1  ;;  %v1385_v34 = vpop.f32.mrb[20].mxu0 }
 0x186   : > { %7558 = vst [vmem:[#allocation72_spill] sm:$0xff] %v6130_v46  ;;  %v6140_v47 = vadd.f32 %v1462_v0, %v6106_v63  ;;  %v1464_v62 = vpop.f32.mrb[23].mxu1  ;;  %v6147_v61 = vadd.f32 %v1385_v34, %v494_v36  ;;  %v1387_v46 = vpop.f32.mrb[21].mxu0 }
 0x187   : > { %7560 = vst [vmem:[#allocation74_spill] sm:$0xff] %v6135_v4  ;;  %v6145_v54 = vadd.f32 %v1464_v62, %v6109_v2  ;;  %v6152_v5 = vadd.f32 %v1387_v46, %v498_v3  ;;  %v1389_v4 = vpop.f32.mrb[22].mxu0 }
 0x188   : > { %7562 = vst [vmem:[#allocation76_spill] sm:$0xff] %v6140_v47  ;;  %7565 = vst [vmem:[#allocation79_spill] sm:$0xff] %v6147_v61  ;;  %v6157_v14 = vadd.f32 %v1389_v4, %v494_v36  ;;  %v1391_v62 = vpop.f32.mrb[23].mxu0 }
 0x189   : > { %7564 = vst [vmem:[#allocation78_spill] sm:$0xff] %v6145_v54  ;;  %7567 = vst [vmem:[#allocation81_spill] sm:$0xff] %v6152_v5  ;;  %v6162_v61 = vadd.f32 %v1391_v62, %v498_v3 }
 0x18a   : > { %7569 = vst [vmem:[#allocation83_spill] sm:$0xff] %v6157_v14 }
 0x18b   : > { %v1468_v32 = vpop.f32.mrb[24].mxu1  ;;  %7571 = vst [vmem:[#allocation85_spill] sm:$0xff] %v6162_v61 }
 0x18c   : > { %v6150_v43 = vadd.f32 %v1468_v32, %v6106_v63  ;;  %v1470_v37 = vpop.f32.mrb[25].mxu1 }
 0x18d   : > { %v6155_v0 = vadd.f32 %v1470_v37, %v6109_v2  ;;  %v1472_v1 = vpop.f32.mrb[26].mxu1  ;;  %v1395_v47 = vpop.f32.mrb[24].mxu0 }
 0x18e   : > { %7566 = vst [vmem:[#allocation80_spill] sm:$0xff] %v6150_v43  ;;  %v6160_v54 = vadd.f32 %v1472_v1, %v6106_v63  ;;  %v1474_v34 = vpop.f32.mrb[27].mxu1  ;;  %v6167_v5 = vadd.f32 %v1395_v47, %v494_v36  ;;  %v1397_v43 = vpop.f32.mrb[25].mxu0 }
 0x18f   : > { %7568 = vst [vmem:[#allocation82_spill] sm:$0xff] %v6155_v0  ;;  %v6165_v32 = vadd.f32 %v1474_v34, %v6109_v2  ;;  %v6172_v14 = vadd.f32 %v1397_v43, %v498_v3  ;;  %v1399_v0 = vpop.f32.mrb[26].mxu0  ;;  %v1232_v43 = vadd.f32 %v6023_v40, %v6021_v6 }
 0x190   : > { %7570 = vst [vmem:[#allocation84_spill] sm:$0xff] %v6160_v54  ;;  %7573 = vst [vmem:[#allocation87_spill] sm:$0xff] %v6167_v5  ;;  %v6179_v61 = vadd.f32 %v1399_v0, %v494_v36  ;;  %v1401_v34 = vpop.f32.mrb[27].mxu0 }
 0x191   : > { %7572 = vst [vmem:[#allocation86_spill] sm:$0xff] %v6165_v32  ;;  %7575 = vst [vmem:[#allocation89_spill] sm:$0xff] %v6172_v14  ;;  %v6183_v47 = vadd.f32 %v1401_v34, %v498_v3 }
 0x192   : > { %7577 = vst [vmem:[#allocation91_spill] sm:$0xff] %v6179_v61 }
 0x193   : > { %v1478_v46 = vpop.f32.mrb[28].mxu1  ;;  %7578 = vst [vmem:[#allocation92_spill] sm:$0xff] %v6183_v47 }
 0x194   : > { %v6170_v37 = vadd.f32 %v1478_v46, %v6106_v63  ;;  %v1480_v4 = vpop.f32.mrb[29].mxu1  ;;  %v1230_v46 = vadd.f32 %v6018_v42, %v6016_v50 }
 0x195   : > { %v6175_v1 = vadd.f32 %v1480_v4, %v6109_v2  ;;  %v6177_v62 = vpop.f32.mrb[30].mxu1  ;;  %v1405_v5 = vpop.f32.mrb[28].mxu0 }
 0x196   : > { %7574 = vst [vmem:[#allocation88_spill] sm:$0xff] %v6170_v37  ;;  %v6181_v32 = vpop.f32.mrb[31].mxu1  ;;  %v6189_v54 = vadd.f32 %v1405_v5, %v494_v36  ;;  %v1407_v4 = vpop.f32.mrb[29].mxu0 }
 0x197   : > { %7576 = vst [vmem:[#allocation90_spill] sm:$0xff] %v6175_v1  ;;  %v6191_v0 = vadd.f32 %v1407_v4, %v498_v3  ;;  %v1409_v61 = vpop.f32.mrb[30].mxu0 }
 0x198   : > { %7579 = vst [vmem:[#allocation93_spill] sm:$0xff] %v6189_v54  ;;  %v1411_v34 = vpop.f32.mrb[31].mxu0  ;;  %v1410_v27 = vadd.f32 %v1409_v61, %v494_v36  ;;  %v1305_v36 = vadd.f32 %v6002_v9, %v6005_v10 }
 0x199   : > { %7580 = vst [vmem:[#allocation94_spill] sm:$0xff] %v6191_v0  ;;  %v1412_v58 = vadd.f32 %v1411_v34, %v498_v3 }
 0x19b   : > { %v1813_v14 = vpop.f32.mrb[32].mxu1 }
 0x19c   : > { %v1861_v1 = vadd.f32 %v1813_v14, %v1230_v46  ;;  %v1815_v37 = vpop.f32.mrb[33].mxu1 }
 0x19d   : > { %v1862_v31 = vadd.f32 %v1815_v37, %v1232_v43  ;;  %v1817_v51 = vpop.f32.mrb[34].mxu1  ;;  %v2064_v42 = vpop.f32.mrb[32].mxu0 }
 0x19e   : > { %v1818_v47 = vpop.f32.mrb[35].mxu1  ;;  %v2112_v50 = vadd.f32 %v2064_v42, %v1410_v27  ;;  %v2066_v26 = vpop.f32.mrb[33].mxu0  ;;  %v4370_v54 = vmul.f32 -1.442695, %v1861_v1  ;;  %v1303_v51 = vadd.f32 %v6000_v8, %v5998_v7 }
 0x19f   : > { %v2113_v56 = vadd.f32 %v2066_v26, %v1412_v58  ;;  %v2068_v40 = vpop.f32.mrb[34].mxu0  ;;  %v4371_v5 = vmul.f32 -1.442695, %v1862_v31 }
 0x1a0   : > { %v2069_v6 = vpop.f32.mrb[35].mxu0  ;;  %v4373_v34 = vmul.f32 -1.442695, %v2112_v50  ;;  %v1483_v50 = vadd.f32 %v6177_v62, %v6106_v63 }
 0x1a1   : > { %4629 = vpow2.f32 %v4371_v5  ;;  %v4374_v47 = vmul.f32 -1.442695, %v2113_v56 }
 0x1a2   : > { %4631 = vpow2.f32 %v4370_v54 }
 0x1ab   : > { %v4630_v14 = vpop.eup %4629 }
 0x1ac   : > { %v4632_v46 = vpop.eup %4631  ;;  %v2125_v4 = vadd.f32 1.0, %v4630_v14 }
 0x1ad   : > { %v2119_v0 = vadd.f32 1.0, %v4632_v46 }
 0x1ae   : > { %4633 = vrcp.f32 %v2125_v4  ;;  %v1485_v4 = vadd.f32 %v6181_v32, %v6109_v2 }
 0x1af   : > { %4635 = vrcp.f32 %v2119_v0 }
 0x1b8   : > { %v4634_v37 = vpop.eup %4633 }
 0x1b9   : > { %v4636_v1 = vpop.eup %4635  ;;  %v2135_v7 = vmul.f32 0.0, %v4634_v37  ;;  %v7589_v37 = vld [vmem:[#allocation25_spill] sm:$0xff] }
 0x1bb   : > { %v1854_v61 = vpop.f32.mrb[36].mxu1 }
 0x1bc   : > { %v1863_v27 = vadd.f32 %v1854_v61, %v1303_v51  ;;  %v1856_v26 = vpop.f32.mrb[37].mxu1 }
 0x1bd   : > { %v1864_v58 = vadd.f32 %v1856_v26, %v1305_v36  ;;  %v1858_v31 = vpop.f32.mrb[38].mxu1 }
 0x1be   : > { %4637 = vtanh.f32 %v1863_v27  ;;  %v1859_v3 = vpop.f32.mrb[39].mxu1 }
 0x1bf   : > { %v4372_v54 = vmul.f32 -1.442695, %v1864_v58  ;;  %v7587_v3 = vld [vmem:[#allocation24_spill] sm:$0xff] }
 0x1c1   : > { %4639 = vpow2.f32 %v4372_v54  ;;  %v7588_v54 = vld [vmem:[#allocation8_spill] sm:$0xff] }
 0x1c2   : > { %4641 = vpow2.f32 %v4374_v47  ;;  %v7592_v47 = vld [vmem:[#allocation11_spill] sm:$0xff] }
 0x1c3   : > { %4643 = vpow2.f32 %v4373_v34  ;;  %v7594_v34 = vld [vmem:[#allocation12_spill] sm:$0xff] }
 0x1c8   : > { %v4638_v43 = vpop.eup %4637 }
 0x1c9   : > { %v2136_v8 = vmul.f32 %v4638_v43, %v4636_v1  ;;  %v7591_v1 = vld [vmem:[#allocation26_spill] sm:$0xff]  ;;  %v7593_v43 = vld [vmem:[#allocation27_spill] sm:$0xff] }
 0x1cb   : > { %v4640_v42 = vpop.eup %4639  ;;  %v6197_v9 = vadd.f32 %v2136_v8, %v2135_v7  ;;  %v7595_v7 = vld [vmem:[#allocation28_spill] sm:$0xff]  ;;  %v7596_v8 = vld [vmem:[#allocation13_spill] sm:$0xff] }
 0x1cc   : > { %v2132_v10 = vadd.f32 1.0, %v4640_v42  ;;  %v4642_v0 = vpop.eup %4641  ;;  %v7597_v42 = vld [vmem:[#allocation29_spill] sm:$0xff] }
 0x1cd   : > { %4645 = vtanh.f32 %v6197_v9  ;;  %v4644_v40 = vpop.eup %4643  ;;  %v2149_v14 = vadd.f32 1.0, %v4642_v0  ;;  %v7599_v0 = vld [vmem:[#allocation30_spill] sm:$0xff] }
 0x1ce   : > { %4647 = vrcp.f32 %v2132_v10  ;;  %v2143_v46 = vadd.f32 1.0, %v4644_v40  ;;  %v7598_v10 = vld [vmem:[#allocation14_spill] sm:$0xff]  ;;  %v7600_v40 = vld [vmem:[#allocation15_spill] sm:$0xff] }
 0x1cf   : > { %4649 = vrcp.f32 %v2149_v14  ;;  %v7603_v14 = vld [vmem:[#allocation32_spill] sm:$0xff] }
 0x1d0   : > { %4651 = vrcp.f32 %v2143_v46  ;;  %v7604_v46 = vld [vmem:[#allocation17_spill] sm:$0xff] }
 0x1d7   : > { %v4646_v6 = vpop.eup %4645 }
 0x1d8   : > { %v4648_v5 = vpop.eup %4647 }
 0x1d9   : > { %v6200_v56 = vmul.f32 %v4648_v5, %v4646_v6  ;;  %v7601_v6 = vld [vmem:[#allocation31_spill] sm:$0xff]  ;;  %v7602_v5 = vld [vmem:[#allocation16_spill] sm:$0xff] }
 0x1db   : > { %7581 = vst [vmem:[#allocation95_spill] sm:$0xff] %v6200_v56  ;;  %v2105_v51 = vpop.f32.mrb[40].mxu1  ;;  %v2172_v36 = vpack.c.bf16 %v6200_v56, %v6200_v56 }
 0x1dc   : > { %v2114_v61 = vadd.f32 %v2105_v51, %v1483_v50  ;;  %v2107_v27 = vpop.f32.mrb[41].mxu1  ;;  %v7605_v50 = vld [vmem:[#allocation33_spill] sm:$0xff]  ;;  %v7607_v51 = vld [vmem:[#allocation34_spill] sm:$0xff] }
 0x1dd   : > { %v2115_v26 = vadd.f32 %v2107_v27, %v1485_v4  ;;  %v2109_v58 = vpop.f32.mrb[42].mxu1  ;;  %2206 = vmatmul.mubr.bf16.vlgmr.msra.gmra.mrb[36].mxu0 %v2172_v36  ;;  %2247 = vmatmul.mubr.bf16.vlgmr.msra.gmra.mrb[44].mxu1 %v2172_v36  ;;  %v7606_v4 = vld [vmem:[#allocation18_spill] sm:$0xff]  ;;  %v7608_v36 = vld [vmem:[#allocation19_spill] sm:$0xff]  ;;  %v7610_v27 = vld [vmem:[#allocation20_spill] sm:$0xff] }
 0x1de   : > { %4653 = vtanh.f32 %v2114_v61  ;;  %v2110_v31 = vpop.f32.mrb[43].mxu1  ;;  %2266 = vmatpush1.bf16.msra.mxu0 %v5584_v35  ;;  %2307 = vmatpush1.bf16.msra.mxu1 %v5874_v11  ;;  %v4650_v35 = vpop.eup %4649  ;;  %v7609_v61 = vld [vmem:[#allocation35_spill] sm:$0xff]  ;;  %v7612_v58 = vld [vmem:[#allocation21_spill] sm:$0xff] }
 0x1df   : > { %v4375_v63 = vmul.f32 -1.442695, %v2115_v26  ;;  %2267 = vmatprep.subr.bf16.mxu0 %v5602_v38  ;;  %2308 = vmatprep.subr.bf16.mxu1 %v5881_v13  ;;  %v4652_v38 = vpop.eup %4651  ;;  %v2159_v32 = vmul.f32 0.0, %v4650_v35  ;;  %v7611_v26 = vld [vmem:[#allocation36_spill] sm:$0xff]  ;;  %v7613_v31 = vld [vmem:[#allocation37_spill] sm:$0xff]  ;;  %v7615_v35 = vld [vmem:[#allocation38_spill] sm:$0xff] }
 0x1e0   : > { %2297 = vmatprep.mubr.bf16.mxu0 %v7524_v33  ;;  %2338 = vmatprep.mubr.bf16.mxu1 %v7524_v33 }
 0x1e1   : > { %4655 = vpow2.f32 %v4375_v63  ;;  %v7614_v63 = vld [vmem:[#allocation9_spill] sm:$0xff] }
 0x1e2   : > { %2268 = vmatpush1.bf16.msra.mxu0 %v5610_v39  ;;  %2309 = vmatpush1.bf16.msra.mxu1 %v5889_v15 }
 0x1e3   : > { %2269 = vmatprep.subr.bf16.mxu0 %v5622_v12  ;;  %2310 = vmatprep.subr.bf16.mxu1 %v5896_v16 }
 0x1e6   : > { %2270 = vmatpush1.bf16.msra.mxu0 %v5636_v41  ;;  %2311 = vmatpush1.bf16.msra.mxu1 %v5904_v17 }
 0x1e7   : > { %2271 = vmatprep.subr.bf16.mxu0 %v5654_v44  ;;  %2312 = vmatprep.subr.bf16.mxu1 %v5911_v18 }
 0x1e8   : > { %v4654_v2 = vpop.eup %4653 }
 0x1e9   : > { %v2160_v62 = vmul.f32 %v4654_v2, %v4652_v38 }
 0x1ea   : > { %2272 = vmatpush1.bf16.msra.mxu0 %v5662_v45  ;;  %2313 = vmatpush1.bf16.msra.mxu1 %v5917_v19 }
 0x1eb   : > { %v4656_v39 = vpop.eup %4655  ;;  %v6224_v12 = vadd.f32 %v2160_v62, %v2159_v32  ;;  %2273 = vmatprep.subr.bf16.mxu0 %v5674_v30  ;;  %2314 = vmatprep.subr.bf16.mxu1 %v5923_v20  ;;  %v7616_v32 = vld [vmem:[#allocation43_spill] sm:$0xff] }
 0x1ec   : > { %v2156_v41 = vadd.f32 1.0, %v4656_v39  ;;  %v7617_v39 = vld [vmem:[#allocation39_spill] sm:$0xff] }
 0x1ed   : > { %4657 = vtanh.f32 %v6224_v12 }
 0x1ee   : > { %4659 = vrcp.f32 %v2156_v41  ;;  %2274 = vmatpush1.bf16.msra.mxu0 %v5688_v48  ;;  %2315 = vmatpush1.bf16.msra.mxu1 %v5929_v21 }
 0x1ef   : > { %2275 = vmatprep.subr.bf16.mxu0 %v5706_v52  ;;  %2316 = vmatprep.subr.bf16.mxu1 %v5935_v23  ;;  %v7583_v52 = vld [vmem:[#allocation22_spill] sm:$0xff] }
 0x1f2   : > { %2276 = vmatpush1.bf16.msra.mxu0 %v5714_v53  ;;  %2317 = vmatpush1.bf16.msra.mxu1 %v5941_v24  ;;  %v7584_v53 = vld [vmem:[#allocation6_spill] sm:$0xff] }
 0x1f3   : > { %2277 = vmatprep.subr.bf16.mxu0 %v5726_v49  ;;  %2318 = vmatprep.subr.bf16.mxu1 %v5947_v25  ;;  %v7585_v49 = vld [vmem:[#allocation23_spill] sm:$0xff] }
 0x1f6   : > { %2278 = vmatpush1.bf16.msra.mxu0 %v5740_v57  ;;  %2319 = vmatpush1.bf16.msra.mxu1 %v5953_v28  ;;  %v7586_v57 = vld [vmem:[#allocation7_spill] sm:$0xff] }
 0x1f7   : > { %v4658_v44 = vpop.eup %4657  ;;  %2279 = vmatprep.subr.bf16.mxu0 %v5758_v59  ;;  %2320 = vmatprep.subr.bf16.mxu1 %v5959_v29 }
 0x1f8   : > { %v4660_v45 = vpop.eup %4659 }
 0x1f9   : > { %v6241_v30 = vmul.f32 %v4660_v45, %v4658_v44 }
 0x1fa   : > { %2280 = vmatpush1.bf16.msra.mxu0 %v5766_v60  ;;  %2321 = vmatpush1.bf16.msra.mxu1 %v5965_v55 }
 0x1fb   : > { %7582 = vst [vmem:[#allocation96_spill] sm:$0xff] %v6241_v30  ;;  %v2264_v48 = vpack.c.bf16 %v6241_v30, %v6241_v30  ;;  %2409 = vmatprep.subr.bf16.mxu0 %v5543_v22  ;;  %2450 = vmatprep.subr.bf16.mxu1 %v7583_v52  ;;  %v7590_v22 = vld [vmem:[#allocation10_spill] sm:$0xff] }
 0x1fd   : > { %2298 = vmatmul.mubr.bf16.vlgmr.msra.gmra.mrb[40].mxu0 %v2264_v48  ;;  %2339 = vmatmul.mubr.bf16.vlgmr.msra.gmra.mrb[48].mxu1 %v2264_v48  ;;  %v7618_v48 = vld [vmem:[#allocation45_spill] sm:$0xff] }
 0x1fe   : > { %2410 = vmatpush1.bf16.msra.mxu0 %v7584_v53  ;;  %2451 = vmatpush1.bf16.msra.mxu1 %v7585_v49  ;;  %v7619_v53 = vld [vmem:[#allocation40_spill] sm:$0xff] }
 0x1ff   : > { %2411 = vmatprep.subr.bf16.mxu0 %v7586_v57  ;;  %2452 = vmatprep.subr.bf16.mxu1 %v7587_v3 }
 0x200   : > { %2441 = vmatprep.mubr.bf16.mxu0 %v7524_v33  ;;  %2482 = vmatprep.mubr.bf16.mxu1 %v7524_v33 }
 0x202   : > { %2412 = vmatpush1.bf16.msra.mxu0 %v7588_v54  ;;  %2453 = vmatpush1.bf16.msra.mxu1 %v7589_v37 }
 0x203   : > { %2413 = vmatprep.subr.bf16.mxu0 %v7590_v22  ;;  %2454 = vmatprep.subr.bf16.mxu1 %v7591_v1 }
 0x206   : > { %2414 = vmatpush1.bf16.msra.mxu0 %v7592_v47  ;;  %2455 = vmatpush1.bf16.msra.mxu1 %v7593_v43 }
 0x207   : > { %2415 = vmatprep.subr.bf16.mxu0 %v7594_v34  ;;  %2456 = vmatprep.subr.bf16.mxu1 %v7595_v7 }
 0x20a   : > { %2416 = vmatpush1.bf16.msra.mxu0 %v7596_v8  ;;  %2457 = vmatpush1.bf16.msra.mxu1 %v7597_v42 }
 0x20b   : > { %2417 = vmatprep.subr.bf16.mxu0 %v7598_v10  ;;  %2458 = vmatprep.subr.bf16.mxu1 %v7599_v0 }
 0x20e   : > { %2418 = vmatpush1.bf16.msra.mxu0 %v7600_v40  ;;  %2459 = vmatpush1.bf16.msra.mxu1 %v7601_v6 }
 0x20f   : > { %2419 = vmatprep.subr.bf16.mxu0 %v7602_v5  ;;  %2460 = vmatprep.subr.bf16.mxu1 %v7603_v14 }
 0x212   : > { %2420 = vmatpush1.bf16.msra.mxu0 %v7604_v46  ;;  %2461 = vmatpush1.bf16.msra.mxu1 %v7605_v50 }
 0x213   : > { %2421 = vmatprep.subr.bf16.mxu0 %v7606_v4  ;;  %2462 = vmatprep.subr.bf16.mxu1 %v7607_v51 }
 0x216   : > { %2422 = vmatpush1.bf16.msra.mxu0 %v7608_v36  ;;  %2463 = vmatpush1.bf16.msra.mxu1 %v7609_v61 }
 0x217   : > { %2423 = vmatprep.subr.bf16.mxu0 %v7610_v27  ;;  %2464 = vmatprep.subr.bf16.mxu1 %v7611_v26  ;;  %v7620_v27 = vld [vmem:[#allocation93_spill] sm:$0xff] }
 0x21a   : > { %2424 = vmatpush1.bf16.msra.mxu0 %v7612_v58  ;;  %2465 = vmatpush1.bf16.msra.mxu1 %v7613_v31 }
 0x21b   : > { %2501 = vmatprep.subr.bf16.mxu0 %v7614_v63  ;;  %2542 = vmatprep.subr.bf16.mxu1 %v7615_v35  ;;  %v7621_v63 = vld [vmem:[#allocation88_spill] sm:$0xff] }
 0x2b0   : > { %v2207_v38 = vpop.f32.mrb[36].mxu0  ;;  %v2248_v2 = vpop.f32.mrb[44].mxu1 }
 0x2b1   : > { %v2255_v62 = vadd.f32 %v2207_v38, %v7616_v32  ;;  %v2257_v41 = vadd.f32 %v2248_v2, %v7617_v39  ;;  %v2209_v44 = vpop.f32.mrb[37].mxu0  ;;  %v2250_v45 = vpop.f32.mrb[45].mxu1 }
 0x2b2   : > { %v2256_v52 = vadd.f32 %v2209_v44, %v7618_v48  ;;  %v2258_v49 = vadd.f32 %v2250_v45, %v7619_v53  ;;  %v2211_v57 = vpop.f32.mrb[38].mxu0  ;;  %v2252_v3 = vpop.f32.mrb[46].mxu1 }
 0x2b3   : > { %v4376_v54 = vmul.f32 -1.442695, %v2255_v62  ;;  %v2212_v37 = vpop.f32.mrb[39].mxu0  ;;  %v2253_v22 = vpop.f32.mrb[47].mxu1  ;;  %v7622_v62 = vld [vmem:[#allocation94_spill] sm:$0xff] }
 0x2b4   : > { %v4377_v1 = vmul.f32 -1.442695, %v2256_v52  ;;  %v4378_v47 = vmul.f32 -1.442695, %v2258_v49 }
 0x2b5   : > { %4661 = vpow2.f32 %v4376_v54 }
 0x2b6   : > { %4663 = vpow2.f32 %v4377_v1 }
 0x2b7   : > { %4665 = vpow2.f32 %v4378_v47 }
 0x2b8   : > { %4667 = vtanh.f32 %v2257_v41  ;;  %v7623_v41 = vld [vmem:[#allocation90_spill] sm:$0xff] }
 0x2bf   : > { %v4662_v43 = vpop.eup %4661 }
 0x2c0   : > { %v4664_v34 = vpop.eup %4663  ;;  %v2354_v7 = vadd.f32 1.0, %v4662_v43 }
 0x2c1   : > { %v2360_v8 = vadd.f32 1.0, %v4664_v34  ;;  %v4666_v42 = vpop.eup %4665 }
 0x2c2   : > { %4669 = vrcp.f32 %v2354_v7  ;;  %v4668_v10 = vpop.eup %4667  ;;  %v2367_v5 = vadd.f32 1.0, %v4666_v42  ;;  %v6302_v7 = vld [vmem:[%s7388_s3] ss:$16 sps:$4 sm:$0xff]  }
 0x2c3   : > { %4671 = vrcp.f32 %v2360_v8  ;;  %v6309_v8 = vld [vmem:[%s7388_s3 + $0x24] ss:$16 sps:$4 sm:$0xff]   ;;  %v6318_v42 = vld [vmem:[%s7388_s3 + $0x20] ss:$16 sps:$4 sm:$0xff]  }
 0x2c4   : > { %4673 = vrcp.f32 %v2367_v5 }
 0x2cc   : > { %v4670_v0 = vpop.eup %4669 }
 0x2cd   : > { %v4672_v40 = vpop.eup %4671  ;;  %v2371_v6 = vmul.f32 %v4670_v0, %v4668_v10  ;;  %v6332_v10 = vld [vmem:[%s7388_s3 + $0x40] ss:$16 sps:$4 sm:$0xff]   ;;  %v6339_v0 = vld [vmem:[%s7388_s3 + $0x64] ss:$16 sps:$4 sm:$0xff]  }
 0x2ce   : > { %v2370_v14 = vmul.f32 %v4672_v40, %v6197_v9  ;;  %v4674_v57 = vpop.eup %4673 }
 0x2d0   : > { %v6288_v46 = vadd.f32 %v2371_v6, %v2370_v14  ;;  %v2299_v4 = vpop.f32.mrb[40].mxu0  ;;  %v2340_v36 = vpop.f32.mrb[48].mxu1 }
 0x2d1   : > { %v2347_v58 = vadd.f32 %v2299_v4, %v7620_v27  ;;  %v2349_v38 = vadd.f32 %v2340_v36, %v7621_v63  ;;  %v2301_v2 = vpop.f32.mrb[41].mxu0  ;;  %v2342_v32 = vpop.f32.mrb[49].mxu1  ;;  %v6354_v4 = vld [vmem:[%s7388_s3 + $0x84] ss:$16 sps:$4 sm:$0xff]   ;;  %v6445_v63 = vld [vmem:[%s7387_s2 + $0x20] ss:$16 sps:$4 sm:$0xff]  }
 0x2d2   : > { %4675 = vtanh.f32 %v6288_v46  ;;  %v2348_v39 = vadd.f32 %v2301_v2, %v7622_v62  ;;  %v2350_v44 = vadd.f32 %v2342_v32, %v7623_v41  ;;  %v2303_v45 = vpop.f32.mrb[42].mxu0  ;;  %v2344_v48 = vpop.f32.mrb[50].mxu1  ;;  %v6457_v2 = vld [vmem:[%s7387_s2 + $0x44] ss:$16 sps:$4 sm:$0xff]   ;;  %v6463_v32 = vld [vmem:[%s7387_s2 + $0x4c] ss:$16 sps:$4 sm:$0xff]  }
 0x2d3   : > { %v4379_v9 = vmul.f32 -1.442695, %v2347_v58  ;;  %v2304_v52 = vpop.f32.mrb[43].mxu0  ;;  %v2345_v53 = vpop.f32.mrb[51].mxu1  ;;  %v6407_v58 = vld [vmem:[%s7387_s2 + $0x4] ss:$16 sps:$4 sm:$0xff]  }
 0x2d4   : > { %v4380_v49 = vmul.f32 -1.442695, %v2348_v39  ;;  %v4381_v54 = vmul.f32 -1.442695, %v2350_v44  ;;  %v6469_v62 = vld [vmem:[%s7387_s2 + $0x40] ss:$16 sps:$4 sm:$0xff]  }
 0x2d5   : > { %4677 = vpow2.f32 %v4379_v9  ;;  %7626 = vst [vmem:[#allocation23_spill] sm:$0xff] %v6469_v62  ;;  %v6475_v39 = vld [vmem:[%s7387_s2 + $0x48] ss:$16 sps:$4 sm:$0xff]   ;;  %v6481_v41 = vld [vmem:[%s7387_s2 + $0x64] ss:$16 sps:$4 sm:$0xff]  }
 0x2d6   : > { %4679 = vpow2.f32 %v4380_v49  ;;  %7627 = vst [vmem:[#allocation7_spill] sm:$0xff] %v6475_v39  ;;  %7628 = vst [vmem:[#allocation24_spill] sm:$0xff] %v6481_v41  ;;  %v6487_v44 = vld [vmem:[%s7387_s2 + $0x6c] ss:$16 sps:$4 sm:$0xff]   ;;  %v6493_v45 = vld [vmem:[%s7387_s2 + $0x60] ss:$16 sps:$4 sm:$0xff]  }
 0x2d7   : > { %4681 = vpow2.f32 %v4381_v54  ;;  %7629 = vst [vmem:[#allocation8_spill] sm:$0xff] %v6487_v44  ;;  %7630 = vst [vmem:[#allocation25_spill] sm:$0xff] %v6493_v45  ;;  %v6499_v48 = vld [vmem:[%s7387_s2 + $0x68] ss:$16 sps:$4 sm:$0xff]   ;;  %v6505_v9 = vld [vmem:[%s7387_s2 + $0x84] ss:$16 sps:$4 sm:$0xff]  }
 0x2d8   : > { %4683 = vtanh.f32 %v2349_v38  ;;  %v6451_v38 = vld [vmem:[%s7387_s2 + $0x28] ss:$16 sps:$4 sm:$0xff]   ;;  %7631 = vst [vmem:[#allocation10_spill] sm:$0xff] %v6499_v48  ;;  %7632 = vst [vmem:[#allocation26_spill] sm:$0xff] %v6505_v9  ;;  %v6511_v52 = vld [vmem:[%s7387_s2 + $0x8c] ss:$16 sps:$4 sm:$0xff]  }
 0x2d9   : > { %7633 = vst [vmem:[#allocation11_spill] sm:$0xff] %v6511_v52  ;;  %v6517_v53 = vld [vmem:[%s7387_s2 + $0x80] ss:$16 sps:$4 sm:$0xff]   ;;  %v6523_v49 = vld [vmem:[%s7387_s2 + $0x88] ss:$16 sps:$4 sm:$0xff]  }
 0x2da   : > { %7634 = vst [vmem:[#allocation27_spill] sm:$0xff] %v6517_v53  ;;  %7635 = vst [vmem:[#allocation12_spill] sm:$0xff] %v6523_v49  ;;  %v6541_v54 = vld [vmem:[%s7387_s2 + $0xa0] ss:$16 sps:$4 sm:$0xff]  }
 0x2db   : > { %7638 = vst [vmem:[#allocation29_spill] sm:$0xff] %v6541_v54 }
 0x2dc   : > { %v4676_v3 = vpop.eup %4675 }
 0x2dd   : > { %v6295_v37 = vmul.f32 %v4676_v3, %v4674_v57  ;;  %v6529_v57 = vld [vmem:[%s7387_s2 + $0xa4] ss:$16 sps:$4 sm:$0xff]   ;;  %v6535_v3 = vld [vmem:[%s7387_s2 + $0xac] ss:$16 sps:$4 sm:$0xff]  }
 0x2de   : > { %7636 = vst [vmem:[#allocation28_spill] sm:$0xff] %v6529_v57  ;;  %7637 = vst [vmem:[#allocation13_spill] sm:$0xff] %v6535_v3 }
 0x2df   : > { %7624 = vst [vmem:[#allocation22_spill] sm:$0xff] %v6295_v37  ;;  %v4678_v22 = vpop.eup %4677  ;;  %v2408_v1 = vpack.c.bf16 %v6295_v37, %v6295_v37 }
 0x2e0   : > { %v4680_v47 = vpop.eup %4679  ;;  %v2378_v43 = vadd.f32 1.0, %v4678_v22  ;;  %v6548_v22 = vld [vmem:[%s7387_s2 + $0xc4] ss:$16 sps:$4 sm:$0xff]  }
 0x2e1   : > { %v2384_v34 = vadd.f32 1.0, %v4680_v47  ;;  %2442 = vmatmul.mubr.bf16.vlgmr.msra.gmra.mrb[44].mxu0 %v2408_v1  ;;  %2483 = vmatmul.mubr.bf16.vlgmr.msra.gmra.mrb[52].mxu1 %v2408_v1  ;;  %7639 = vst [vmem:[#allocation14_spill] sm:$0xff] %v6548_v22  ;;  %v6555_v1 = vld [vmem:[%s7387_s2 + $0xc0] ss:$16 sps:$4 sm:$0xff]  }
 0x2e2   : > { %4685 = vrcp.f32 %v2378_v43  ;;  %2502 = vmatpush1.bf16.msra.mxu0 %v6302_v7  ;;  %2543 = vmatpush1.bf16.msra.mxu1 %v5874_v11  ;;  %v6325_v11 = vld [vmem:[%s7388_s3 + $0x44] ss:$16 sps:$4 sm:$0xff]   ;;  %7640 = vst [vmem:[#allocation30_spill] sm:$0xff] %v6555_v1  ;;  %v7644_v43 = vld [vmem:[#allocation47_spill] sm:$0xff] }
 0x2e3   : > { %4687 = vrcp.f32 %v2384_v34  ;;  %2503 = vmatprep.subr.bf16.mxu0 %v6309_v8  ;;  %2544 = vmatprep.subr.bf16.mxu1 %v5881_v13  ;;  %v4682_v13 = vpop.eup %4681 }
 0x2e4   : > { %2533 = vmatprep.mubr.bf16.mxu0 %v7524_v33  ;;  %2574 = vmatprep.mubr.bf16.mxu1 %v7524_v33  ;;  %v2391_v5 = vadd.f32 1.0, %v4682_v13  ;;  %v7645_v13 = vld [vmem:[#allocation41_spill] sm:$0xff] }
 0x2e6   : > { %2504 = vmatpush1.bf16.msra.mxu0 %v6318_v42  ;;  %2545 = vmatpush1.bf16.msra.mxu1 %v5889_v15  ;;  %v4684_v15 = vpop.eup %4683  ;;  %4689 = vrcp.f32 %v2391_v5 }
 0x2e7   : > { %2505 = vmatprep.subr.bf16.mxu0 %v6325_v11  ;;  %2546 = vmatprep.subr.bf16.mxu1 %v5896_v16 }
 0x2ea   : > { %2506 = vmatpush1.bf16.msra.mxu0 %v6332_v10  ;;  %2547 = vmatpush1.bf16.msra.mxu1 %v5904_v17  ;;  %v6347_v17 = vld [vmem:[%s7388_s3 + $0x60] ss:$16 sps:$4 sm:$0xff]  }
 0x2eb   : > { %2507 = vmatprep.subr.bf16.mxu0 %v6339_v0  ;;  %2548 = vmatprep.subr.bf16.mxu1 %v5911_v18 }
 0x2ec   : > { %v4686_v16 = vpop.eup %4685 }
 0x2ed   : > { %v4688_v40 = vpop.eup %4687  ;;  %v2395_v6 = vmul.f32 %v4686_v16, %v4684_v15 }
 0x2ee   : > { %v2394_v14 = vmul.f32 %v4688_v40, %v6224_v12  ;;  %2508 = vmatpush1.bf16.msra.mxu0 %v6347_v17  ;;  %2549 = vmatpush1.bf16.msra.mxu1 %v5917_v19  ;;  %v6364_v12 = vld [vmem:[%s7388_s3 + $0x80] ss:$16 sps:$4 sm:$0xff]   ;;  %v6371_v19 = vld [vmem:[%s7388_s3 + $0xa4] ss:$16 sps:$4 sm:$0xff]  }
 0x2ef   : > { %2509 = vmatprep.subr.bf16.mxu0 %v6354_v4  ;;  %2550 = vmatprep.subr.bf16.mxu1 %v5923_v20  ;;  %v6378_v20 = vld [vmem:[%s7388_s3 + $0xa0] ss:$16 sps:$4 sm:$0xff]  }
 0x2f0   : > { %v6358_v18 = vadd.f32 %v2395_v6, %v2394_v14  ;;  %v4690_v36 = vpop.eup %4689  ;;  %v7646_v6 = vld [vmem:[#allocation49_spill] sm:$0xff] }
 0x2f2   : > { %4691 = vtanh.f32 %v6358_v18  ;;  %2510 = vmatpush1.bf16.msra.mxu0 %v6364_v12  ;;  %2551 = vmatpush1.bf16.msra.mxu1 %v5929_v21  ;;  %v6385_v21 = vld [vmem:[%s7388_s3 + $0xc4] ss:$16 sps:$4 sm:$0xff]  }
 0x2f3   : > { %2511 = vmatprep.subr.bf16.mxu0 %v6371_v19  ;;  %2552 = vmatprep.subr.bf16.mxu1 %v5935_v23  ;;  %v6392_v23 = vld [vmem:[%s7388_s3 + $0xc0] ss:$16 sps:$4 sm:$0xff]  }
 0x2f6   : > { %2512 = vmatpush1.bf16.msra.mxu0 %v6378_v20  ;;  %2553 = vmatpush1.bf16.msra.mxu1 %v5941_v24 }
 0x2f7   : > { %2513 = vmatprep.subr.bf16.mxu0 %v6385_v21  ;;  %2554 = vmatprep.subr.bf16.mxu1 %v5947_v25 }
 0x2fa   : > { %2514 = vmatpush1.bf16.msra.mxu0 %v6392_v23  ;;  %2555 = vmatpush1.bf16.msra.mxu1 %v5953_v28  ;;  %v6431_v28 = vld [vmem:[%s7387_s2 + $0x24] ss:$16 sps:$4 sm:$0xff]  }
 0x2fb   : > { %2515 = vmatprep.subr.bf16.mxu0 %v5758_v59  ;;  %2556 = vmatprep.subr.bf16.mxu1 %v5959_v29  ;;  %v6413_v59 = vld [vmem:[%s7387_s2 + $0xc] ss:$16 sps:$4 sm:$0xff]  }
 0x2fc   : > { %v4692_v24 = vpop.eup %4691  ;;  %v6437_v29 = vld [vmem:[%s7387_s2 + $0x2c] ss:$16 sps:$4 sm:$0xff]  }
 0x2fd   : > { %v6398_v27 = vmul.f32 %v4692_v24, %v4690_v36 }
 0x2fe   : > { %2516 = vmatpush1.bf16.msra.mxu0 %v5766_v60  ;;  %2557 = vmatpush1.bf16.msra.mxu1 %v5965_v55  ;;  %v6419_v55 = vld [vmem:[%s7387_s2] ss:$16 sps:$4 sm:$0xff]   ;;  %v6425_v60 = vld [vmem:[%s7387_s2 + $0x8] ss:$16 sps:$4 sm:$0xff]  }
 0x2ff   : > { %7625 = vst [vmem:[#allocation6_spill] sm:$0xff] %v6398_v27  ;;  %v2500_v25 = vpack.c.bf16 %v6398_v27, %v6398_v27  ;;  %2645 = vmatprep.subr.bf16.mxu0 %v6407_v58  ;;  %2686 = vmatprep.subr.bf16.mxu1 %v6413_v59 }
 0x301   : > { %2534 = vmatmul.mubr.bf16.vlgmr.msra.gmra.mrb[48].mxu0 %v2500_v25  ;;  %2575 = vmatmul.mubr.bf16.vlgmr.msra.gmra.mrb[56].mxu1 %v2500_v25 }
 0x302   : > { %2646 = vmatpush1.bf16.msra.mxu0 %v6419_v55  ;;  %2687 = vmatpush1.bf16.msra.mxu1 %v6425_v60 }
 0x303   : > { %2647 = vmatprep.subr.bf16.mxu0 %v6431_v28  ;;  %2688 = vmatprep.subr.bf16.mxu1 %v6437_v29 }
 0x304   : > { %2677 = vmatprep.mubr.bf16.mxu0 %v7524_v33  ;;  %2718 = vmatprep.mubr.bf16.mxu1 %v7524_v33 }
 0x306   : > { %2648 = vmatpush1.bf16.msra.mxu0 %v6445_v63  ;;  %2689 = vmatpush1.bf16.msra.mxu1 %v6451_v38 }
 0x307   : > { %2649 = vmatprep.subr.bf16.mxu0 %v6457_v2  ;;  %2690 = vmatprep.subr.bf16.mxu1 %v6463_v32 }
 0x30a   : > { %2650 = vmatpush1.bf16.msra.mxu0 %v6469_v62  ;;  %2691 = vmatpush1.bf16.msra.mxu1 %v6475_v39 }
 0x30b   : > { %2651 = vmatprep.subr.bf16.mxu0 %v6481_v41  ;;  %2692 = vmatprep.subr.bf16.mxu1 %v6487_v44 }
 0x30e   : > { %2652 = vmatpush1.bf16.msra.mxu0 %v6493_v45  ;;  %2693 = vmatpush1.bf16.msra.mxu1 %v6499_v48 }
 0x30f   : > { %2653 = vmatprep.subr.bf16.mxu0 %v6505_v9  ;;  %2694 = vmatprep.subr.bf16.mxu1 %v6511_v52 }
 0x312   : > { %2654 = vmatpush1.bf16.msra.mxu0 %v6517_v53  ;;  %2695 = vmatpush1.bf16.msra.mxu1 %v6523_v49 }
 0x313   : > { %2655 = vmatprep.subr.bf16.mxu0 %v6529_v57  ;;  %2696 = vmatprep.subr.bf16.mxu1 %v6535_v3 }
 0x316   : > { %2656 = vmatpush1.bf16.msra.mxu0 %v6541_v54  ;;  %2697 = vmatpush1.bf16.msra.mxu1 %v7605_v50  ;;  %v6562_v50 = vld [vmem:[%s7387_s2 + $0xe4] ss:$16 sps:$4 sm:$0xff]  }
 0x317   : > { %2657 = vmatprep.subr.bf16.mxu0 %v6548_v22  ;;  %2698 = vmatprep.subr.bf16.mxu1 %v7607_v51  ;;  %7641 = vst [vmem:[#allocation15_spill] sm:$0xff] %v6562_v50  ;;  %v6569_v51 = vld [vmem:[%s7387_s2 + $0xe0] ss:$16 sps:$4 sm:$0xff]  }
 0x318   : > { %7642 = vst [vmem:[#allocation31_spill] sm:$0xff] %v6569_v51 }
 0x31a   : > { %2658 = vmatpush1.bf16.msra.mxu0 %v6555_v1  ;;  %2699 = vmatpush1.bf16.msra.mxu1 %v7609_v61  ;;  %v6576_v61 = vld [vmem:[%s7388_s3 + $0x4] ss:$16 sps:$4 sm:$0xff]  }
 0x31b   : > { %2659 = vmatprep.subr.bf16.mxu0 %v6562_v50  ;;  %2700 = vmatprep.subr.bf16.mxu1 %v7611_v26  ;;  %7643 = vst [vmem:[#allocation16_spill] sm:$0xff] %v6576_v61 }
 0x31e   : > { %2660 = vmatpush1.bf16.msra.mxu0 %v6569_v51  ;;  %2701 = vmatpush1.bf16.msra.mxu1 %v7613_v31  ;;  %v7647_v31 = vld [vmem:[#allocation42_spill] sm:$0xff] }
 0x31f   : > { %2737 = vmatprep.subr.bf16.mxu0 %v6576_v61  ;;  %2778 = vmatprep.subr.bf16.mxu1 %v7615_v35 }
 0x3b4   : > { %v2443_v47 = vpop.f32.mrb[44].mxu0  ;;  %v2484_v26 = vpop.f32.mrb[52].mxu1 }
 0x3b5   : > { %v2491_v34 = vadd.f32 %v2443_v47, %v7644_v43  ;;  %v2493_v15 = vadd.f32 %v2484_v26, %v7645_v13  ;;  %v2445_v16 = vpop.f32.mrb[45].mxu0  ;;  %v2486_v40 = vpop.f32.mrb[53].mxu1 }
 0x3b6   : > { %v2492_v5 = vadd.f32 %v2445_v16, %v7646_v6  ;;  %v2494_v14 = vadd.f32 %v2486_v40, %v7647_v31  ;;  %v2447_v36 = vpop.f32.mrb[46].mxu0  ;;  %v2488_v24 = vpop.f32.mrb[54].mxu1  ;;  %v7648_v31 = vld [vmem:[#allocation91_spill] sm:$0xff] }
 0x3b7   : > { %v4382_v25 = vmul.f32 -1.442695, %v2491_v34  ;;  %v2448_v30 = vpop.f32.mrb[47].mxu0  ;;  %v2489_v27 = vpop.f32.mrb[55].mxu1  ;;  %v7650_v24 = vld [vmem:[#allocation92_spill] sm:$0xff] }
 0x3b8   : > { %v4383_v37 = vmul.f32 -1.442695, %v2492_v5  ;;  %v4384_v35 = vmul.f32 -1.442695, %v2494_v14  ;;  %v7649_v14 = vld [vmem:[#allocation84_spill] sm:$0xff] }
 0x3b9   : > { %4693 = vpow2.f32 %v4382_v25 }
 0x3ba   : > { %4695 = vpow2.f32 %v4383_v37 }
 0x3bb   : > { %4697 = vpow2.f32 %v4384_v35  ;;  %v7651_v35 = vld [vmem:[#allocation86_spill] sm:$0xff] }
 0x3bc   : > { %4699 = vtanh.f32 %v2493_v15 }
 0x3c3   : > { %v4694_v56 = vpop.eup %4693 }
 0x3c4   : > { %v4696_v61 = vpop.eup %4695  ;;  %v2590_v47 = vadd.f32 1.0, %v4694_v56 }
 0x3c5   : > { %v2596_v26 = vadd.f32 1.0, %v4696_v61  ;;  %v4698_v43 = vpop.eup %4697 }
 0x3c6   : > { %4701 = vrcp.f32 %v2590_v47  ;;  %v4700_v13 = vpop.eup %4699  ;;  %v2603_v34 = vadd.f32 1.0, %v4698_v43 }
 0x3c7   : > { %4703 = vrcp.f32 %v2596_v26 }
 0x3c8   : > { %4705 = vrcp.f32 %v2603_v34 }
 0x3d0   : > { %v4702_v16 = vpop.eup %4701 }
 0x3d1   : > { %v4704_v40 = vpop.eup %4703  ;;  %v2607_v6 = vmul.f32 %v4702_v16, %v4700_v13 }
 0x3d2   : > { %v2606_v30 = vmul.f32 %v4704_v40, %v6288_v46 }
 0x3d4   : > { %v6585_v27 = vadd.f32 %v2607_v6, %v2606_v30  ;;  %v2535_v37 = vpop.f32.mrb[48].mxu0  ;;  %v2576_v5 = vpop.f32.mrb[56].mxu1 }
 0x3d5   : > { %v2583_v56 = vadd.f32 %v2535_v37, %v7648_v31  ;;  %v2585_v15 = vadd.f32 %v2576_v5, %v7649_v14  ;;  %v2537_v61 = vpop.f32.mrb[49].mxu0  ;;  %v2578_v36 = vpop.f32.mrb[57].mxu1 }
 0x3d6   : > { %4707 = vtanh.f32 %v6585_v27  ;;  %v2584_v25 = vadd.f32 %v2537_v61, %v7650_v24  ;;  %v2586_v47 = vadd.f32 %v2578_v36, %v7651_v35  ;;  %v2539_v26 = vpop.f32.mrb[50].mxu0  ;;  %v2580_v43 = vpop.f32.mrb[58].mxu1  ;;  %v6616_v24 = vld [vmem:[%s7388_s3 + $0x28] ss:$16 sps:$4 sm:$0xff]  }
 0x3d7   : > { %v4385_v46 = vmul.f32 -1.442695, %v2583_v56  ;;  %v2540_v13 = vpop.f32.mrb[51].mxu0  ;;  %v2581_v16 = vpop.f32.mrb[59].mxu1  ;;  %v6600_v56 = vld [vmem:[%s7388_s3 + $0x8] ss:$16 sps:$4 sm:$0xff]  }
 0x3d8   : > { %v4386_v40 = vmul.f32 -1.442695, %v2584_v25  ;;  %v4706_v6 = vpop.eup %4705  ;;  %v4387_v30 = vmul.f32 -1.442695, %v2586_v47  ;;  %v6623_v25 = vld [vmem:[%s7388_s3 + $0x4c] ss:$16 sps:$4 sm:$0xff]  }
 0x3d9   : > { %4709 = vpow2.f32 %v4385_v46  ;;  %v6630_v47 = vld [vmem:[%s7388_s3 + $0x48] ss:$16 sps:$4 sm:$0xff]   ;;  %v6637_v43 = vld [vmem:[%s7388_s3 + $0x6c] ss:$16 sps:$4 sm:$0xff]  }
 0x3da   : > { %4711 = vpow2.f32 %v4386_v40 }
 0x3db   : > { %4713 = vpow2.f32 %v4387_v30  ;;  %v6652_v30 = vld [vmem:[%s7388_s3 + $0x8c] ss:$16 sps:$4 sm:$0xff]  }
 0x3dc   : > { %4715 = vtanh.f32 %v2585_v15  ;;  %v6607_v15 = vld [vmem:[%s7388_s3 + $0x2c] ss:$16 sps:$4 sm:$0xff]  }
 0x3e0   : > { %v4708_v34 = vpop.eup %4707 }
 0x3e1   : > { %v6592_v37 = vmul.f32 %v4708_v34, %v4706_v6  ;;  %v6645_v34 = vld [vmem:[%s7388_s3 + $0x68] ss:$16 sps:$4 sm:$0xff]  }
 0x3e3   : > { %7652 = vst [vmem:[#allocation32_spill] sm:$0xff] %v6592_v37  ;;  %v4710_v5 = vpop.eup %4709  ;;  %v2644_v31 = vpack.c.bf16 %v6592_v37, %v6592_v37 }
 0x3e4   : > { %v4712_v14 = vpop.eup %4711  ;;  %v2614_v61 = vadd.f32 1.0, %v4710_v5 }
 0x3e5   : > { %v2620_v36 = vadd.f32 1.0, %v4712_v14  ;;  %2678 = vmatmul.mubr.bf16.vlgmr.msra.gmra.mrb[52].mxu0 %v2644_v31  ;;  %2719 = vmatmul.mubr.bf16.vlgmr.msra.gmra.mrb[60].mxu1 %v2644_v31  ;;  %v4714_v35 = vpop.eup %4713  ;;  %v6669_v31 = vld [vmem:[%s7388_s3 + $0xac] ss:$16 sps:$4 sm:$0xff]   ;;  %v6676_v14 = vld [vmem:[%s7388_s3 + $0xa8] ss:$16 sps:$4 sm:$0xff]  }
 0x3e6   : > { %4717 = vrcp.f32 %v2614_v61  ;;  %2738 = vmatpush1.bf16.msra.mxu0 %v6302_v7  ;;  %2779 = vmatpush1.bf16.msra.mxu1 %v6600_v56  ;;  %v4716_v26 = vpop.eup %4715  ;;  %v2627_v40 = vadd.f32 1.0, %v4714_v35  ;;  %v6683_v61 = vld [vmem:[%s7388_s3 + $0xcc] ss:$16 sps:$4 sm:$0xff]  }
 0x3e7   : > { %4719 = vrcp.f32 %v2620_v36  ;;  %2739 = vmatprep.subr.bf16.mxu0 %v6309_v8  ;;  %2780 = vmatprep.subr.bf16.mxu1 %v6607_v15  ;;  %v6690_v36 = vld [vmem:[%s7388_s3 + $0xc8] ss:$16 sps:$4 sm:$0xff]  }
 0x3e8   : > { %2769 = vmatprep.mubr.bf16.mxu0 %v7524_v33  ;;  %2810 = vmatprep.mubr.bf16.mxu1 %v7524_v33  ;;  %4721 = vrcp.f32 %v2627_v40  ;;  %v6710_v40 = vld [vmem:[%s7388_s3 + $0xe0] ss:$16 sps:$4 sm:$0xff]  }
 0x3ea   : > { %2740 = vmatpush1.bf16.msra.mxu0 %v6318_v42  ;;  %2781 = vmatpush1.bf16.msra.mxu1 %v6616_v24 }
 0x3eb   : > { %2741 = vmatprep.subr.bf16.mxu0 %v6325_v11  ;;  %2782 = vmatprep.subr.bf16.mxu1 %v6623_v25 }
 0x3ee   : > { %2742 = vmatpush1.bf16.msra.mxu0 %v6332_v10  ;;  %2783 = vmatpush1.bf16.msra.mxu1 %v6630_v47 }
 0x3ef   : > { %2743 = vmatprep.subr.bf16.mxu0 %v6339_v0  ;;  %2784 = vmatprep.subr.bf16.mxu1 %v6637_v43 }
 0x3f0   : > { %v4718_v46 = vpop.eup %4717 }
 0x3f1   : > { %v4720_v13 = vpop.eup %4719  ;;  %v2631_v16 = vmul.f32 %v4718_v46, %v4716_v26  ;;  %v6696_v26 = vld [vmem:[%s7388_s3 + $0xe4] ss:$16 sps:$4 sm:$0xff]   ;;  %v6702_v46 = vld [vmem:[%s7388_s3 + $0xec] ss:$16 sps:$4 sm:$0xff]  }
 0x3f2   : > { %v2630_v6 = vmul.f32 %v4720_v13, %v6358_v18  ;;  %2744 = vmatpush1.bf16.msra.mxu0 %v6347_v17  ;;  %2785 = vmatpush1.bf16.msra.mxu1 %v6645_v34  ;;  %v6662_v18 = vld [vmem:[%s7388_s3 + $0x88] ss:$16 sps:$4 sm:$0xff]   ;;  %v4722_v35 = vpop.eup %4721 }
 0x3f3   : > { %2745 = vmatprep.subr.bf16.mxu0 %v6354_v4  ;;  %2786 = vmatprep.subr.bf16.mxu1 %v6652_v30 }
 0x3f4   : > { %v6655_v5 = vadd.f32 %v2631_v16, %v2630_v6  ;;  %v6716_v6 = vld [vmem:[%s7388_s3 + $0xe8] ss:$16 sps:$4 sm:$0xff]  }
 0x3f6   : > { %4723 = vtanh.f32 %v6655_v5  ;;  %2746 = vmatpush1.bf16.msra.mxu0 %v6364_v12  ;;  %2787 = vmatpush1.bf16.msra.mxu1 %v6662_v18 }
 0x3f7   : > { %2747 = vmatprep.subr.bf16.mxu0 %v6371_v19  ;;  %2788 = vmatprep.subr.bf16.mxu1 %v6669_v31 }
 0x3fa   : > { %2748 = vmatpush1.bf16.msra.mxu0 %v6378_v20  ;;  %2789 = vmatpush1.bf16.msra.mxu1 %v6676_v14 }
 0x3fb   : > { %2749 = vmatprep.subr.bf16.mxu0 %v6385_v21  ;;  %2790 = vmatprep.subr.bf16.mxu1 %v6683_v61 }
 0x3fe   : > { %2750 = vmatpush1.bf16.msra.mxu0 %v6392_v23  ;;  %2791 = vmatpush1.bf16.msra.mxu1 %v6690_v36 }
 0x3ff   : > { %2751 = vmatprep.subr.bf16.mxu0 %v6696_v26  ;;  %2792 = vmatprep.subr.bf16.mxu1 %v6702_v46 }
 0x400   : > { %v4724_v13 = vpop.eup %4723 }
 0x401   : > { %v6705_v16 = vmul.f32 %v4724_v13, %v4722_v35  ;;  %v6756_v35 = vld [vmem:[%s7387_s2 + $0xcc] ss:$16 sps:$4 sm:$0xff]   ;;  %v6763_v13 = vld [vmem:[%s7387_s2 + $0xc8] ss:$16 sps:$4 sm:$0xff]  }
 0x402   : > { %2752 = vmatpush1.bf16.msra.mxu0 %v6710_v40  ;;  %2793 = vmatpush1.bf16.msra.mxu1 %v6716_v6  ;;  %7655 = vst [vmem:[#allocation18_spill] sm:$0xff] %v6756_v35  ;;  %7656 = vst [vmem:[#allocation34_spill] sm:$0xff] %v6763_v13 }
 0x403   : > { %7653 = vst [vmem:[#allocation17_spill] sm:$0xff] %v6705_v16  ;;  %v2736_v37 = vpack.c.bf16 %v6705_v16, %v6705_v16  ;;  %2880 = vmatprep.subr.bf16.mxu0 %v6407_v58  ;;  %2921 = vmatprep.subr.bf16.mxu1 %v6413_v59  ;;  %v6770_v16 = vld [vmem:[%s7387_s2 + $0xec] ss:$16 sps:$4 sm:$0xff]  }
 0x404   : > { %7657 = vst [vmem:[#allocation19_spill] sm:$0xff] %v6770_v16 }
 0x405   : > { %2770 = vmatmul.mubr.bf16.vlgmr.msra.gmra.mrb[56].mxu0 %v2736_v37  ;;  %2811 = vmatmul.mubr.bf16.vlgmr.msra.gmra.mrb[64].mxu1 %v2736_v37  ;;  %v6749_v37 = vld [vmem:[%s7387_s2 + $0xa8] ss:$16 sps:$4 sm:$0xff]  }
 0x406   : > { %2881 = vmatpush1.bf16.msra.mxu0 %v6419_v55  ;;  %2922 = vmatpush1.bf16.msra.mxu1 %v6425_v60  ;;  %7654 = vst [vmem:[#allocation33_spill] sm:$0xff] %v6749_v37 }
 0x407   : > { %2882 = vmatprep.subr.bf16.mxu0 %v6431_v28  ;;  %2923 = vmatprep.subr.bf16.mxu1 %v6437_v29 }
 0x408   : > { %2912 = vmatprep.mubr.bf16.mxu0 %v7524_v33  ;;  %2953 = vmatprep.mubr.bf16.mxu1 %v7524_v33 }
 0x40a   : > { %2883 = vmatpush1.bf16.msra.mxu0 %v6445_v63  ;;  %2924 = vmatpush1.bf16.msra.mxu1 %v6451_v38 }
 0x40b   : > { %2884 = vmatprep.subr.bf16.mxu0 %v6457_v2  ;;  %2925 = vmatprep.subr.bf16.mxu1 %v6463_v32 }
 0x40e   : > { %2885 = vmatpush1.bf16.msra.mxu0 %v6469_v62  ;;  %2926 = vmatpush1.bf16.msra.mxu1 %v6475_v39 }
 0x40f   : > { %2886 = vmatprep.subr.bf16.mxu0 %v6481_v41  ;;  %2927 = vmatprep.subr.bf16.mxu1 %v6487_v44 }
 0x412   : > { %2887 = vmatpush1.bf16.msra.mxu0 %v6493_v45  ;;  %2928 = vmatpush1.bf16.msra.mxu1 %v6499_v48 }
 0x413   : > { %2888 = vmatprep.subr.bf16.mxu0 %v6505_v9  ;;  %2929 = vmatprep.subr.bf16.mxu1 %v6511_v52 }
 0x416   : > { %2889 = vmatpush1.bf16.msra.mxu0 %v6517_v53  ;;  %2930 = vmatpush1.bf16.msra.mxu1 %v6523_v49  ;;  %v7663_v49 = vld [vmem:[#allocation53_spill] sm:$0xff] }
 0x417   : > { %2890 = vmatprep.subr.bf16.mxu0 %v6529_v57  ;;  %2931 = vmatprep.subr.bf16.mxu1 %v6535_v3 }
 0x41a   : > { %2891 = vmatpush1.bf16.msra.mxu0 %v6541_v54  ;;  %2932 = vmatpush1.bf16.msra.mxu1 %v6749_v37  ;;  %v7662_v37 = vld [vmem:[#allocation44_spill] sm:$0xff] }
 0x41b   : > { %2892 = vmatprep.subr.bf16.mxu0 %v6548_v22  ;;  %2933 = vmatprep.subr.bf16.mxu1 %v6756_v35  ;;  %v7659_v35 = vld [vmem:[#allocation16_spill] sm:$0xff]  ;;  %v7661_v22 = vld [vmem:[#allocation51_spill] sm:$0xff] }
 0x41e   : > { %2893 = vmatpush1.bf16.msra.mxu0 %v6555_v1  ;;  %2934 = vmatpush1.bf16.msra.mxu1 %v6763_v13  ;;  %v6777_v1 = vld [vmem:[%s7387_s2 + $0xe8] ss:$16 sps:$4 sm:$0xff]  }
 0x41f   : > { %2894 = vmatprep.subr.bf16.mxu0 %v6562_v50  ;;  %2935 = vmatprep.subr.bf16.mxu1 %v6770_v16  ;;  %7658 = vst [vmem:[#allocation35_spill] sm:$0xff] %v6777_v1  ;;  %v6784_v50 = vld [vmem:[%s7388_s3 + $0xc] ss:$16 sps:$4 sm:$0xff]  }
 0x420   : > { %7660 = vst [vmem:[#allocation20_spill] sm:$0xff] %v6784_v50 }
 0x422   : > { %2895 = vmatpush1.bf16.msra.mxu0 %v6569_v51  ;;  %2936 = vmatpush1.bf16.msra.mxu1 %v6777_v1  ;;  %v7664_v1 = vld [vmem:[#allocation46_spill] sm:$0xff] }
 0x423   : > { %2971 = vmatprep.subr.bf16.mxu0 %v7659_v35  ;;  %3012 = vmatprep.subr.bf16.mxu1 %v6784_v50 }
 0x4b8   : > { %v2679_v13 = vpop.f32.mrb[52].mxu0  ;;  %v2720_v16 = vpop.f32.mrb[60].mxu1 }
 0x4b9   : > { %v2727_v51 = vadd.f32 %v2679_v13, %v7661_v22  ;;  %v2729_v54 = vadd.f32 %v2720_v16, %v7662_v37  ;;  %v2681_v3 = vpop.f32.mrb[53].mxu0  ;;  %v2722_v57 = vpop.f32.mrb[61].mxu1  ;;  %v7667_v37 = vld [vmem:[#allocation89_spill] sm:$0xff]  ;;  %v7668_v13 = vld [vmem:[#allocation82_spill] sm:$0xff] }
 0x4ba   : > { %v2728_v53 = vadd.f32 %v2681_v3, %v7663_v49  ;;  %v2730_v52 = vadd.f32 %v2722_v57, %v7664_v1  ;;  %v2683_v35 = vpop.f32.mrb[54].mxu0  ;;  %v2724_v9 = vpop.f32.mrb[62].mxu1 }
 0x4bb   : > { %v4388_v48 = vmul.f32 -1.442695, %v2727_v51  ;;  %v2684_v45 = vpop.f32.mrb[55].mxu0  ;;  %v2725_v44 = vpop.f32.mrb[63].mxu1 }
 0x4bc   : > { %v4389_v41 = vmul.f32 -1.442695, %v2728_v53  ;;  %v4390_v50 = vmul.f32 -1.442695, %v2730_v52  ;;  %v7665_v52 = vld [vmem:[#allocation87_spill] sm:$0xff]  ;;  %v7666_v53 = vld [vmem:[#allocation80_spill] sm:$0xff] }
 0x4bd   : > { %4725 = vpow2.f32 %v4388_v48 }
 0x4be   : > { %4727 = vpow2.f32 %v4389_v41 }
 0x4bf   : > { %4729 = vpow2.f32 %v4390_v50 }
 0x4c0   : > { %4731 = vtanh.f32 %v2729_v54 }
 0x4c7   : > { %v4726_v39 = vpop.eup %4725 }
 0x4c8   : > { %v4728_v62 = vpop.eup %4727  ;;  %v2826_v22 = vadd.f32 1.0, %v4726_v39 }
 0x4c9   : > { %v2832_v16 = vadd.f32 1.0, %v4728_v62  ;;  %v4730_v49 = vpop.eup %4729 }
 0x4ca   : > { %4733 = vrcp.f32 %v2826_v22  ;;  %v4732_v3 = vpop.eup %4731  ;;  %v2839_v51 = vadd.f32 1.0, %v4730_v49 }
 0x4cb   : > { %4735 = vrcp.f32 %v2832_v16 }
 0x4cc   : > { %4737 = vrcp.f32 %v2839_v51 }
 0x4d4   : > { %v4734_v57 = vpop.eup %4733 }
 0x4d5   : > { %v4736_v1 = vpop.eup %4735  ;;  %v2843_v9 = vmul.f32 %v4734_v57, %v4732_v3 }
 0x4d6   : > { %v2842_v44 = vmul.f32 %v4736_v1, %v6585_v27 }
 0x4d8   : > { %v6792_v45 = vadd.f32 %v2843_v9, %v2842_v44  ;;  %v2771_v41 = vpop.f32.mrb[56].mxu0  ;;  %v2812_v48 = vpop.f32.mrb[64].mxu1 }
 0x4d9   : > { %v2819_v39 = vadd.f32 %v2771_v41, %v7665_v52  ;;  %v2821_v54 = vadd.f32 %v2812_v48, %v7666_v53  ;;  %v2773_v62 = vpop.f32.mrb[57].mxu0  ;;  %v2814_v50 = vpop.f32.mrb[65].mxu1 }
 0x4da   : > { %4739 = vtanh.f32 %v6792_v45  ;;  %v2820_v35 = vadd.f32 %v2773_v62, %v7667_v37  ;;  %v2822_v22 = vadd.f32 %v2814_v50, %v7668_v13  ;;  %v2775_v16 = vpop.f32.mrb[58].mxu0  ;;  %v2816_v49 = vpop.f32.mrb[66].mxu1 }
 0x4db   : > { %v4391_v27 = vmul.f32 -1.442695, %v2819_v39  ;;  %v2776_v3 = vpop.f32.mrb[59].mxu0  ;;  %v2817_v57 = vpop.f32.mrb[67].mxu1 }
 0x4dc   : > { %v4392_v1 = vmul.f32 -1.442695, %v2820_v35  ;;  %v4738_v9 = vpop.eup %4737  ;;  %v4393_v44 = vmul.f32 -1.442695, %v2822_v22 }
 0x4dd   : > { %4741 = vpow2.f32 %v4391_v27 }
 0x4de   : > { %4743 = vpow2.f32 %v4392_v1  ;;  %v7671_v1 = vld [vmem:[#allocation23_spill] sm:$0xff] }
 0x4df   : > { %4745 = vpow2.f32 %v4393_v44  ;;  %v7674_v44 = vld [vmem:[#allocation8_spill] sm:$0xff] }
 0x4e0   : > { %4747 = vtanh.f32 %v2821_v54 }
 0x4e4   : > { %v4740_v51 = vpop.eup %4739 }
 0x4e5   : > { %v6799_v41 = vmul.f32 %v4740_v51, %v4738_v9  ;;  %v7672_v9 = vld [vmem:[#allocation7_spill] sm:$0xff]  ;;  %v7673_v51 = vld [vmem:[#allocation24_spill] sm:$0xff] }
 0x4e7   : > { %7669 = vst [vmem:[#allocation36_spill] sm:$0xff] %v6799_v41  ;;  %v4742_v48 = vpop.eup %4741  ;;  %v2879_v52 = vpack.c.bf16 %v6799_v41, %v6799_v41  ;;  %v7691_v41 = vld [vmem:[#allocation31_spill] sm:$0xff] }
 0x4e8   : > { %v4744_v53 = vpop.eup %4743  ;;  %v2850_v62 = vadd.f32 1.0, %v4742_v48  ;;  %v7675_v48 = vld [vmem:[#allocation25_spill] sm:$0xff] }
 0x4e9   : > { %v2856_v50 = vadd.f32 1.0, %v4744_v53  ;;  %2913 = vmatmul.mubr.bf16.vlgmr.msra.gmra.mrb[60].mxu0 %v2879_v52  ;;  %2954 = vmatmul.mubr.bf16.vlgmr.msra.gmra.mrb[68].mxu1 %v2879_v52  ;;  %v4746_v39 = vpop.eup %4745  ;;  %v7676_v52 = vld [vmem:[#allocation10_spill] sm:$0xff] }
 0x4ea   : > { %4749 = vrcp.f32 %v2850_v62  ;;  %2972 = vmatpush1.bf16.msra.mxu0 %v6302_v7  ;;  %3013 = vmatpush1.bf16.msra.mxu1 %v6600_v56  ;;  %v4748_v54 = vpop.eup %4747  ;;  %v2863_v22 = vadd.f32 1.0, %v4746_v39  ;;  %v7677_v53 = vld [vmem:[#allocation26_spill] sm:$0xff]  ;;  %v7678_v62 = vld [vmem:[#allocation11_spill] sm:$0xff]  ;;  %v7680_v39 = vld [vmem:[#allocation12_spill] sm:$0xff] }
 0x4eb   : > { %4751 = vrcp.f32 %v2856_v50  ;;  %2973 = vmatprep.subr.bf16.mxu0 %v6309_v8  ;;  %3014 = vmatprep.subr.bf16.mxu1 %v6607_v15  ;;  %v7679_v50 = vld [vmem:[#allocation27_spill] sm:$0xff] }
 0x4ec   : > { %3003 = vmatprep.mubr.bf16.mxu0 %v7524_v33  ;;  %3044 = vmatprep.mubr.bf16.mxu1 %v7524_v33  ;;  %4753 = vrcp.f32 %v2863_v22  ;;  %v7685_v22 = vld [vmem:[#allocation14_spill] sm:$0xff] }
 0x4ee   : > { %2974 = vmatpush1.bf16.msra.mxu0 %v6318_v42  ;;  %3015 = vmatpush1.bf16.msra.mxu1 %v6616_v24 }
 0x4ef   : > { %2975 = vmatprep.subr.bf16.mxu0 %v6325_v11  ;;  %3016 = vmatprep.subr.bf16.mxu1 %v6623_v25 }
 0x4f2   : > { %2976 = vmatpush1.bf16.msra.mxu0 %v6332_v10  ;;  %3017 = vmatpush1.bf16.msra.mxu1 %v6630_v47 }
 0x4f3   : > { %2977 = vmatprep.subr.bf16.mxu0 %v6339_v0  ;;  %3018 = vmatprep.subr.bf16.mxu1 %v6637_v43 }
 0x4f4   : > { %v4750_v37 = vpop.eup %4749 }
 0x4f5   : > { %v4752_v35 = vpop.eup %4751  ;;  %v2867_v13 = vmul.f32 %v4750_v37, %v4748_v54  ;;  %v7681_v54 = vld [vmem:[#allocation28_spill] sm:$0xff]  ;;  %v7682_v37 = vld [vmem:[#allocation13_spill] sm:$0xff] }
 0x4f6   : > { %v2866_v16 = vmul.f32 %v4752_v35, %v6655_v5  ;;  %2978 = vmatpush1.bf16.msra.mxu0 %v6347_v17  ;;  %3019 = vmatpush1.bf16.msra.mxu1 %v6645_v34  ;;  %v4754_v5 = vpop.eup %4753  ;;  %v7683_v35 = vld [vmem:[#allocation29_spill] sm:$0xff] }
 0x4f7   : > { %2979 = vmatprep.subr.bf16.mxu0 %v6354_v4  ;;  %3020 = vmatprep.subr.bf16.mxu1 %v6652_v30 }
 0x4f8   : > { %v6822_v49 = vadd.f32 %v2867_v13, %v2866_v16  ;;  %v7684_v13 = vld [vmem:[#allocation33_spill] sm:$0xff]  ;;  %v7686_v16 = vld [vmem:[#allocation18_spill] sm:$0xff] }
 0x4fa   : > { %4755 = vtanh.f32 %v6822_v49  ;;  %2980 = vmatpush1.bf16.msra.mxu0 %v6364_v12  ;;  %3021 = vmatpush1.bf16.msra.mxu1 %v6662_v18 }
 0x4fb   : > { %2981 = vmatprep.subr.bf16.mxu0 %v6371_v19  ;;  %3022 = vmatprep.subr.bf16.mxu1 %v6669_v31 }
 0x4fe   : > { %2982 = vmatpush1.bf16.msra.mxu0 %v6378_v20  ;;  %3023 = vmatpush1.bf16.msra.mxu1 %v6676_v14 }
 0x4ff   : > { %2983 = vmatprep.subr.bf16.mxu0 %v6385_v21  ;;  %3024 = vmatprep.subr.bf16.mxu1 %v6683_v61 }
 0x502   : > { %2984 = vmatpush1.bf16.msra.mxu0 %v6392_v23  ;;  %3025 = vmatpush1.bf16.msra.mxu1 %v6690_v36 }
 0x503   : > { %2985 = vmatprep.subr.bf16.mxu0 %v6696_v26  ;;  %3026 = vmatprep.subr.bf16.mxu1 %v6702_v46 }
 0x504   : > { %v4756_v27 = vpop.eup %4755 }
 0x505   : > { %v6837_v3 = vmul.f32 %v4756_v27, %v4754_v5  ;;  %v7687_v5 = vld [vmem:[#allocation30_spill] sm:$0xff] }
 0x506   : > { %2986 = vmatpush1.bf16.msra.mxu0 %v6710_v40  ;;  %3027 = vmatpush1.bf16.msra.mxu1 %v6716_v6  ;;  %v7688_v27 = vld [vmem:[#allocation34_spill] sm:$0xff] }
 0x507   : > { %7670 = vst [vmem:[#allocation21_spill] sm:$0xff] %v6837_v3  ;;  %v2970_v57 = vpack.c.bf16 %v6837_v3, %v6837_v3  ;;  %3112 = vmatprep.subr.bf16.mxu0 %v6407_v58  ;;  %3153 = vmatprep.subr.bf16.mxu1 %v6413_v59  ;;  %v7690_v3 = vld [vmem:[#allocation19_spill] sm:$0xff] }
 0x509   : > { %3004 = vmatmul.mubr.bf16.vlgmr.msra.gmra.mrb[64].mxu0 %v2970_v57  ;;  %3045 = vmatmul.mubr.bf16.vlgmr.msra.gmra.mrb[72].mxu1 %v2970_v57  ;;  %v7689_v57 = vld [vmem:[#allocation15_spill] sm:$0xff] }
 0x50a   : > { %3113 = vmatpush1.bf16.msra.mxu0 %v6419_v55  ;;  %3154 = vmatpush1.bf16.msra.mxu1 %v6425_v60 }
 0x50b   : > { %3114 = vmatprep.subr.bf16.mxu0 %v6431_v28  ;;  %3155 = vmatprep.subr.bf16.mxu1 %v6437_v29 }
 0x50c   : > { %3144 = vmatprep.mubr.bf16.mxu0 %v7524_v33  ;;  %3185 = vmatprep.mubr.bf16.mxu1 %v7524_v33 }
 0x50e   : > { %3115 = vmatpush1.bf16.msra.mxu0 %v6445_v63  ;;  %3156 = vmatpush1.bf16.msra.mxu1 %v6451_v38 }
 0x50f   : > { %3116 = vmatprep.subr.bf16.mxu0 %v6457_v2  ;;  %3157 = vmatprep.subr.bf16.mxu1 %v6463_v32 }
 0x512   : > { %3117 = vmatpush1.bf16.msra.mxu0 %v7671_v1  ;;  %3158 = vmatpush1.bf16.msra.mxu1 %v7672_v9 }
 0x513   : > { %3118 = vmatprep.subr.bf16.mxu0 %v7673_v51  ;;  %3159 = vmatprep.subr.bf16.mxu1 %v7674_v44 }
 0x516   : > { %3119 = vmatpush1.bf16.msra.mxu0 %v7675_v48  ;;  %3160 = vmatpush1.bf16.msra.mxu1 %v7676_v52  ;;  %v7698_v52 = vld [vmem:[#allocation50_spill] sm:$0xff] }
 0x517   : > { %3120 = vmatprep.subr.bf16.mxu0 %v7677_v53  ;;  %3161 = vmatprep.subr.bf16.mxu1 %v7678_v62  ;;  %v7697_v53 = vld [vmem:[#allocation57_spill] sm:$0xff] }
 0x51a   : > { %3121 = vmatpush1.bf16.msra.mxu0 %v7679_v50  ;;  %3162 = vmatpush1.bf16.msra.mxu1 %v7680_v39  ;;  %v7695_v39 = vld [vmem:[#allocation55_spill] sm:$0xff]  ;;  %v7696_v50 = vld [vmem:[#allocation48_spill] sm:$0xff] }
 0x51b   : > { %3122 = vmatprep.subr.bf16.mxu0 %v7681_v54  ;;  %3163 = vmatprep.subr.bf16.mxu1 %v7682_v37  ;;  %v7692_v54 = vld [vmem:[#allocation35_spill] sm:$0xff]  ;;  %v7693_v37 = vld [vmem:[#allocation16_spill] sm:$0xff] }
 0x51e   : > { %3123 = vmatpush1.bf16.msra.mxu0 %v7683_v35  ;;  %3164 = vmatpush1.bf16.msra.mxu1 %v7684_v13  ;;  %v7694_v35 = vld [vmem:[#allocation20_spill] sm:$0xff] }
 0x51f   : > { %3124 = vmatprep.subr.bf16.mxu0 %v7685_v22  ;;  %3165 = vmatprep.subr.bf16.mxu1 %v7686_v16 }
 0x522   : > { %3125 = vmatpush1.bf16.msra.mxu0 %v7687_v5  ;;  %3166 = vmatpush1.bf16.msra.mxu1 %v7688_v27 }
 0x523   : > { %3126 = vmatprep.subr.bf16.mxu0 %v7689_v57  ;;  %3167 = vmatprep.subr.bf16.mxu1 %v7690_v3 }
 0x526   : > { %3127 = vmatpush1.bf16.msra.mxu0 %v7691_v41  ;;  %3168 = vmatpush1.bf16.msra.mxu1 %v7692_v54 }
 0x527   : > { %3203 = vmatprep.subr.bf16.mxu0 %v7693_v37  ;;  %3244 = vmatprep.subr.bf16.mxu1 %v7694_v35 }
 0x5bc   : > { %v2914_v13 = vpop.f32.mrb[60].mxu0  ;;  %v2955_v22 = vpop.f32.mrb[68].mxu1 }
 0x5bd   : > { %v2962_v16 = vadd.f32 %v2914_v13, %v7695_v39  ;;  %v2964_v5 = vadd.f32 %v2955_v22, %v7696_v50  ;;  %v2916_v62 = vpop.f32.mrb[61].mxu0  ;;  %v2957_v27 = vpop.f32.mrb[69].mxu1 }
 0x5be   : > { %v2963_v57 = vadd.f32 %v2916_v62, %v7697_v53  ;;  %v2965_v3 = vadd.f32 %v2957_v27, %v7698_v52  ;;  %v2918_v48 = vpop.f32.mrb[62].mxu0  ;;  %v2959_v41 = vpop.f32.mrb[70].mxu1 }
 0x5bf   : > { %v4394_v44 = vmul.f32 -1.442695, %v2962_v16  ;;  %v2919_v54 = vpop.f32.mrb[63].mxu0  ;;  %v2960_v51 = vpop.f32.mrb[71].mxu1 }
 0x5c0   : > { %v4395_v37 = vmul.f32 -1.442695, %v2963_v57  ;;  %v4396_v35 = vmul.f32 -1.442695, %v2965_v3  ;;  %v7702_v57 = vld [vmem:[#allocation78_spill] sm:$0xff] }
 0x5c1   : > { %4757 = vpow2.f32 %v4394_v44 }
 0x5c2   : > { %4759 = vpow2.f32 %v4395_v37  ;;  %v7699_v37 = vld [vmem:[#allocation83_spill] sm:$0xff] }
 0x5c3   : > { %4761 = vpow2.f32 %v4396_v35  ;;  %v7700_v35 = vld [vmem:[#allocation76_spill] sm:$0xff] }
 0x5c4   : > { %4763 = vtanh.f32 %v2964_v5  ;;  %v7701_v5 = vld [vmem:[#allocation85_spill] sm:$0xff] }
 0x5cb   : > { %v4758_v9 = vpop.eup %4757 }
 0x5cc   : > { %v4760_v1 = vpop.eup %4759  ;;  %v3060_v39 = vadd.f32 1.0, %v4758_v9 }
 0x5cd   : > { %v3066_v50 = vadd.f32 1.0, %v4760_v1  ;;  %v4762_v53 = vpop.eup %4761 }
 0x5ce   : > { %4765 = vrcp.f32 %v3060_v39  ;;  %v4764_v62 = vpop.eup %4763  ;;  %v3073_v13 = vadd.f32 1.0, %v4762_v53 }
 0x5cf   : > { %4767 = vrcp.f32 %v3066_v50 }
 0x5d0   : > { %4769 = vrcp.f32 %v3073_v13 }
 0x5d8   : > { %v4766_v52 = vpop.eup %4765 }
 0x5d9   : > { %v4768_v48 = vpop.eup %4767  ;;  %v3077_v41 = vmul.f32 %v4766_v52, %v4764_v62 }
 0x5da   : > { %v3076_v51 = vmul.f32 %v4768_v48, %v6792_v45 }
 0x5dc   : > { %v6884_v54 = vadd.f32 %v3077_v41, %v3076_v51  ;;  %v3005_v44 = vpop.f32.mrb[64].mxu0  ;;  %v3046_v3 = vpop.f32.mrb[72].mxu1 }
 0x5dd   : > { %v3053_v9 = vadd.f32 %v3005_v44, %v7699_v37  ;;  %v3055_v22 = vadd.f32 %v3046_v3, %v7700_v35  ;;  %v3007_v1 = vpop.f32.mrb[65].mxu0  ;;  %v3048_v16 = vpop.f32.mrb[73].mxu1 }
 0x5de   : > { %4771 = vtanh.f32 %v6884_v54  ;;  %v3054_v27 = vadd.f32 %v3007_v1, %v7701_v5  ;;  %v3056_v39 = vadd.f32 %v3048_v16, %v7702_v57  ;;  %v3009_v50 = vpop.f32.mrb[66].mxu0  ;;  %v3050_v53 = vpop.f32.mrb[74].mxu1  ;;  %v7719_v57 = vld [vmem:[#allocation30_spill] sm:$0xff] }
 0x5df   : > { %v4397_v45 = vmul.f32 -1.442695, %v3053_v9  ;;  %v3010_v62 = vpop.f32.mrb[67].mxu0  ;;  %v3051_v52 = vpop.f32.mrb[75].mxu1  ;;  %v7721_v50 = vld [vmem:[#allocation15_spill] sm:$0xff] }
 0x5e0   : > { %v4398_v48 = vmul.f32 -1.442695, %v3054_v27  ;;  %v4770_v41 = vpop.eup %4769  ;;  %v4399_v51 = vmul.f32 -1.442695, %v3056_v39  ;;  %v7720_v39 = vld [vmem:[#allocation34_spill] sm:$0xff]  ;;  %v7722_v53 = vld [vmem:[#allocation19_spill] sm:$0xff] }
 0x5e1   : > { %4773 = vpow2.f32 %v4397_v45  ;;  %v7723_v45 = vld [vmem:[#allocation31_spill] sm:$0xff]  ;;  %v7725_v52 = vld [vmem:[#allocation16_spill] sm:$0xff] }
 0x5e2   : > { %4775 = vpow2.f32 %v4398_v48  ;;  %v7724_v62 = vld [vmem:[#allocation35_spill] sm:$0xff]  ;;  %v7726_v48 = vld [vmem:[#allocation20_spill] sm:$0xff] }
 0x5e3   : > { %4777 = vpow2.f32 %v4399_v51  ;;  %v7727_v51 = vld [vmem:[#allocation59_spill] sm:$0xff] }
 0x5e4   : > { %4779 = vtanh.f32 %v3055_v22 }
 0x5e8   : > { %v4772_v13 = vpop.eup %4771 }
 0x5e9   : > { %v6891_v44 = vmul.f32 %v4772_v13, %v4770_v41 }
 0x5eb   : > { %v4774_v3 = vpop.eup %4773  ;;  %v3111_v37 = vpack.c.bf16 %v6891_v44, %v6891_v44 }
 0x5ec   : > { %v4776_v35 = vpop.eup %4775  ;;  %v3084_v1 = vadd.f32 1.0, %v4774_v3 }
 0x5ed   : > { %v3090_v16 = vadd.f32 1.0, %v4776_v35  ;;  %3145 = vmatmul.mubr.bf16.vlgmr.msra.gmra.mrb[68].mxu0 %v3111_v37  ;;  %3186 = vmatmul.mubr.bf16.vlgmr.msra.gmra.mrb[76].mxu1 %v3111_v37  ;;  %v7728_v37 = vld [vmem:[#allocation52_spill] sm:$0xff] }
 0x5ee   : > { %4781 = vrcp.f32 %v3084_v1  ;;  %3204 = vmatpush1.bf16.msra.mxu0 %v6302_v7  ;;  %3245 = vmatpush1.bf16.msra.mxu1 %v6600_v56  ;;  %v4778_v7 = vpop.eup %4777 }
 0x5ef   : > { %4783 = vrcp.f32 %v3090_v16  ;;  %3205 = vmatprep.subr.bf16.mxu0 %v6309_v8  ;;  %3246 = vmatprep.subr.bf16.mxu1 %v6607_v15  ;;  %v4780_v8 = vpop.eup %4779 }
 0x5f0   : > { %3235 = vmatprep.mubr.bf16.mxu0 %v7524_v33  ;;  %3276 = vmatprep.mubr.bf16.mxu1 %v7524_v33 }
 0x5f2   : > { %3206 = vmatpush1.bf16.msra.mxu0 %v6318_v42  ;;  %3247 = vmatpush1.bf16.msra.mxu1 %v6616_v24  ;;  %v3097_v42 = vadd.f32 1.0, %v4778_v7  ;;  %v7729_v7 = vld [vmem:[#allocation61_spill] sm:$0xff] }
 0x5f3   : > { %3207 = vmatprep.subr.bf16.mxu0 %v6325_v11  ;;  %3248 = vmatprep.subr.bf16.mxu1 %v6623_v25 }
 0x5f4   : > { %4785 = vrcp.f32 %v3097_v42 }
 0x5f6   : > { %3208 = vmatpush1.bf16.msra.mxu0 %v6332_v10  ;;  %3249 = vmatpush1.bf16.msra.mxu1 %v6630_v47 }
 0x5f7   : > { %3209 = vmatprep.subr.bf16.mxu0 %v6339_v0  ;;  %3250 = vmatprep.subr.bf16.mxu1 %v6637_v43 }
 0x5f8   : > { %v4782_v9 = vpop.eup %4781 }
 0x5f9   : > { %v4784_v22 = vpop.eup %4783  ;;  %v3101_v5 = vmul.f32 %v4782_v9, %v4780_v8  ;;  %v7730_v9 = vld [vmem:[#allocation54_spill] sm:$0xff] }
 0x5fa   : > { %v3100_v27 = vmul.f32 %v4784_v22, %v6822_v49  ;;  %3210 = vmatpush1.bf16.msra.mxu0 %v6347_v17  ;;  %3251 = vmatpush1.bf16.msra.mxu1 %v6645_v34  ;;  %v7718_v49 = vld [vmem:[#allocation18_spill] sm:$0xff] }
 0x5fb   : > { %3211 = vmatprep.subr.bf16.mxu0 %v6354_v4  ;;  %3252 = vmatprep.subr.bf16.mxu1 %v6652_v30 }
 0x5fc   : > { %v6914_v11 = vadd.f32 %v3101_v5, %v3100_v27 }
 0x5fe   : > { %4787 = vtanh.f32 %v6914_v11  ;;  %3212 = vmatpush1.bf16.msra.mxu0 %v6364_v12  ;;  %3253 = vmatpush1.bf16.msra.mxu1 %v6662_v18  ;;  %v4786_v10 = vpop.eup %4785  ;;  %v7703_v12 = vld [vmem:[#allocation23_spill] sm:$0xff] }
 0x5ff   : > { %3213 = vmatprep.subr.bf16.mxu0 %v6371_v19  ;;  %3254 = vmatprep.subr.bf16.mxu1 %v6669_v31  ;;  %v7704_v19 = vld [vmem:[#allocation7_spill] sm:$0xff] }
 0x602   : > { %3214 = vmatpush1.bf16.msra.mxu0 %v6378_v20  ;;  %3255 = vmatpush1.bf16.msra.mxu1 %v6676_v14  ;;  %v7705_v20 = vld [vmem:[#allocation24_spill] sm:$0xff] }
 0x603   : > { %3215 = vmatprep.subr.bf16.mxu0 %v6385_v21  ;;  %3256 = vmatprep.subr.bf16.mxu1 %v6683_v61  ;;  %v7706_v21 = vld [vmem:[#allocation8_spill] sm:$0xff] }
 0x606   : > { %3216 = vmatpush1.bf16.msra.mxu0 %v6392_v23  ;;  %3257 = vmatpush1.bf16.msra.mxu1 %v6690_v36  ;;  %v7707_v23 = vld [vmem:[#allocation25_spill] sm:$0xff] }
 0x607   : > { %3217 = vmatprep.subr.bf16.mxu0 %v6696_v26  ;;  %3258 = vmatprep.subr.bf16.mxu1 %v6702_v46 }
 0x608   : > { %v4788_v0 = vpop.eup %4787 }
 0x609   : > { %v6929_v17 = vmul.f32 %v4788_v0, %v4786_v10 }
 0x60a   : > { %3218 = vmatpush1.bf16.msra.mxu0 %v6710_v40  ;;  %3259 = vmatpush1.bf16.msra.mxu1 %v6716_v6 }
 0x60b   : > { %v3202_v4 = vpack.c.bf16 %v6929_v17, %v6929_v17  ;;  %3344 = vmatprep.subr.bf16.mxu0 %v6407_v58  ;;  %3385 = vmatprep.subr.bf16.mxu1 %v6413_v59  ;;  %v7708_v58 = vld [vmem:[#allocation10_spill] sm:$0xff] }
 0x60c   : > { %v7709_v59 = vld [vmem:[#allocation26_spill] sm:$0xff] }
 0x60d   : > { %3236 = vmatmul.mubr.bf16.vlgmr.msra.gmra.mrb[72].mxu0 %v3202_v4  ;;  %3277 = vmatmul.mubr.bf16.vlgmr.msra.gmra.mrb[80].mxu1 %v3202_v4 }
 0x60e   : > { %3345 = vmatpush1.bf16.msra.mxu0 %v6419_v55  ;;  %3386 = vmatpush1.bf16.msra.mxu1 %v6425_v60  ;;  %v7710_v55 = vld [vmem:[#allocation11_spill] sm:$0xff] }
 0x60f   : > { %3346 = vmatprep.subr.bf16.mxu0 %v6431_v28  ;;  %3387 = vmatprep.subr.bf16.mxu1 %v6437_v29  ;;  %v7711_v60 = vld [vmem:[#allocation27_spill] sm:$0xff]  ;;  %v7712_v28 = vld [vmem:[#allocation12_spill] sm:$0xff] }
 0x610   : > { %3376 = vmatprep.mubr.bf16.mxu0 %v7524_v33  ;;  %3417 = vmatprep.mubr.bf16.mxu1 %v7524_v33  ;;  %v7713_v29 = vld [vmem:[#allocation28_spill] sm:$0xff] }
 0x612   : > { %3347 = vmatpush1.bf16.msra.mxu0 %v6445_v63  ;;  %3388 = vmatpush1.bf16.msra.mxu1 %v6451_v38  ;;  %v7714_v63 = vld [vmem:[#allocation13_spill] sm:$0xff] }
 0x613   : > { %3348 = vmatprep.subr.bf16.mxu0 %v6457_v2  ;;  %3389 = vmatprep.subr.bf16.mxu1 %v6463_v32  ;;  %v7715_v38 = vld [vmem:[#allocation29_spill] sm:$0xff]  ;;  %v7717_v32 = vld [vmem:[#allocation14_spill] sm:$0xff] }
 0x614   : > { %v7716_v2 = vld [vmem:[#allocation33_spill] sm:$0xff] }
 0x616   : > { %3349 = vmatpush1.bf16.msra.mxu0 %v7703_v12  ;;  %3390 = vmatpush1.bf16.msra.mxu1 %v7704_v19 }
 0x617   : > { %3350 = vmatprep.subr.bf16.mxu0 %v7705_v20  ;;  %3391 = vmatprep.subr.bf16.mxu1 %v7706_v21 }
 0x61a   : > { %3351 = vmatpush1.bf16.msra.mxu0 %v7707_v23  ;;  %3392 = vmatpush1.bf16.msra.mxu1 %v7708_v58 }
 0x61b   : > { %3352 = vmatprep.subr.bf16.mxu0 %v7709_v59  ;;  %3393 = vmatprep.subr.bf16.mxu1 %v7710_v55 }
 0x61e   : > { %3353 = vmatpush1.bf16.msra.mxu0 %v7711_v60  ;;  %3394 = vmatpush1.bf16.msra.mxu1 %v7712_v28 }
 0x61f   : > { %3354 = vmatprep.subr.bf16.mxu0 %v7713_v29  ;;  %3395 = vmatprep.subr.bf16.mxu1 %v7714_v63 }
 0x622   : > { %3355 = vmatpush1.bf16.msra.mxu0 %v7715_v38  ;;  %3396 = vmatpush1.bf16.msra.mxu1 %v7716_v2 }
 0x623   : > { %3356 = vmatprep.subr.bf16.mxu0 %v7717_v32  ;;  %3397 = vmatprep.subr.bf16.mxu1 %v7718_v49 }
 0x626   : > { %3357 = vmatpush1.bf16.msra.mxu0 %v7719_v57  ;;  %3398 = vmatpush1.bf16.msra.mxu1 %v7720_v39 }
 0x627   : > { %3358 = vmatprep.subr.bf16.mxu0 %v7721_v50  ;;  %3399 = vmatprep.subr.bf16.mxu1 %v7722_v53  ;;  %v7731_v50 = vld [vmem:[#allocation79_spill] sm:$0xff] }
 0x62a   : > { %3359 = vmatpush1.bf16.msra.mxu0 %v7723_v45  ;;  %3400 = vmatpush1.bf16.msra.mxu1 %v7724_v62 }
 0x62b   : > { %3435 = vmatprep.subr.bf16.mxu0 %v7725_v52  ;;  %3476 = vmatprep.subr.bf16.mxu1 %v7726_v48  ;;  %v7732_v52 = vld [vmem:[#allocation72_spill] sm:$0xff] }
 0x6c0   : > { %v3146_v41 = vpop.f32.mrb[68].mxu0  ;;  %v3187_v13 = vpop.f32.mrb[76].mxu1 }
 0x6c1   : > { %v3194_v3 = vadd.f32 %v3146_v41, %v7727_v51  ;;  %v3196_v35 = vadd.f32 %v3187_v13, %v7728_v37  ;;  %v3148_v1 = vpop.f32.mrb[69].mxu0  ;;  %v3189_v16 = vpop.f32.mrb[77].mxu1 }
 0x6c2   : > { %v3195_v8 = vadd.f32 %v3148_v1, %v7729_v7  ;;  %v3197_v22 = vadd.f32 %v3189_v16, %v7730_v9  ;;  %v3150_v5 = vpop.f32.mrb[70].mxu0  ;;  %v3191_v42 = vpop.f32.mrb[78].mxu1 }
 0x6c3   : > { %v4400_v27 = vmul.f32 -1.442695, %v3194_v3  ;;  %v3151_v10 = vpop.f32.mrb[71].mxu0  ;;  %v3192_v0 = vpop.f32.mrb[79].mxu1  ;;  %v7733_v3 = vld [vmem:[#allocation81_spill] sm:$0xff] }
 0x6c4   : > { %v4401_v4 = vmul.f32 -1.442695, %v3195_v8  ;;  %v4402_v12 = vmul.f32 -1.442695, %v3197_v22 }
 0x6c5   : > { %4789 = vpow2.f32 %v4400_v27 }
 0x6c6   : > { %4791 = vpow2.f32 %v4401_v4 }
 0x6c7   : > { %4793 = vpow2.f32 %v4402_v12 }
 0x6c8   : > { %4795 = vtanh.f32 %v3196_v35  ;;  %v7734_v35 = vld [vmem:[#allocation74_spill] sm:$0xff] }
 0x6cf   : > { %v4790_v19 = vpop.eup %4789 }
 0x6d0   : > { %v4792_v20 = vpop.eup %4791  ;;  %v3292_v21 = vadd.f32 1.0, %v4790_v19 }
 0x6d1   : > { %v3298_v23 = vadd.f32 1.0, %v4792_v20  ;;  %v4794_v58 = vpop.eup %4793 }
 0x6d2   : > { %4797 = vrcp.f32 %v3292_v21  ;;  %v4796_v59 = vpop.eup %4795  ;;  %v3305_v29 = vadd.f32 1.0, %v4794_v58  ;;  %v6990_v21 = vld [vmem:[%s7388_s3] ss:$16 sps:$4 sm:$0xff]  }
 0x6d3   : > { %4799 = vrcp.f32 %v3298_v23  ;;  %v6997_v23 = vld [vmem:[%s7388_s3 + $0x24] ss:$16 sps:$4 sm:$0xff]   ;;  %v7006_v58 = vld [vmem:[%s7388_s3 + $0x20] ss:$16 sps:$4 sm:$0xff]  }
 0x6d4   : > { %4801 = vrcp.f32 %v3305_v29 }
 0x6dc   : > { %v4798_v55 = vpop.eup %4797 }
 0x6dd   : > { %v4800_v60 = vpop.eup %4799  ;;  %v3309_v28 = vmul.f32 %v4798_v55, %v4796_v59  ;;  %v7020_v59 = vld [vmem:[%s7388_s3 + $0x40] ss:$16 sps:$4 sm:$0xff]   ;;  %v7027_v55 = vld [vmem:[%s7388_s3 + $0x64] ss:$16 sps:$4 sm:$0xff]  }
 0x6de   : > { %v3308_v63 = vmul.f32 %v4800_v60, %v6884_v54  ;;  %v4802_v5 = vpop.eup %4801 }
 0x6e0   : > { %v6976_v38 = vadd.f32 %v3309_v28, %v3308_v63  ;;  %v3237_v32 = vpop.f32.mrb[72].mxu0  ;;  %v3278_v57 = vpop.f32.mrb[80].mxu1 }
 0x6e1   : > { %v3285_v45 = vadd.f32 %v3237_v32, %v7731_v50  ;;  %v3287_v41 = vadd.f32 %v3278_v57, %v7732_v52  ;;  %v3239_v13 = vpop.f32.mrb[73].mxu0  ;;  %v3280_v51 = vpop.f32.mrb[81].mxu1  ;;  %v7042_v32 = vld [vmem:[%s7388_s3 + $0x84] ss:$16 sps:$4 sm:$0xff]   ;;  %v4968_v52 = vld [vmem:[%s7387_s2 + $0x20] ss:$16 sps:$4 sm:$0xff]  }
 0x6e2   : > { %4803 = vtanh.f32 %v6976_v38  ;;  %v3286_v37 = vadd.f32 %v3239_v13, %v7733_v3  ;;  %v3288_v1 = vadd.f32 %v3280_v51, %v7734_v35  ;;  %v3241_v16 = vpop.f32.mrb[74].mxu0  ;;  %v3282_v7 = vpop.f32.mrb[82].mxu1  ;;  %v4970_v13 = vld [vmem:[%s7387_s2 + $0x44] ss:$16 sps:$4 sm:$0xff]   ;;  %v4971_v51 = vld [vmem:[%s7387_s2 + $0x4c] ss:$16 sps:$4 sm:$0xff]  }
 0x6e3   : > { %v4403_v54 = vmul.f32 -1.442695, %v3285_v45  ;;  %v3242_v8 = vpop.f32.mrb[75].mxu0  ;;  %v3283_v9 = vpop.f32.mrb[83].mxu1  ;;  %v4962_v45 = vld [vmem:[%s7387_s2 + $0x4] ss:$16 sps:$4 sm:$0xff]  }
 0x6e4   : > { %v4404_v22 = vmul.f32 -1.442695, %v3286_v37  ;;  %v4405_v27 = vmul.f32 -1.442695, %v3288_v1  ;;  %v4972_v3 = vld [vmem:[%s7387_s2 + $0x40] ss:$16 sps:$4 sm:$0xff]  }
 0x6e5   : > { %4805 = vpow2.f32 %v4403_v54  ;;  %v4973_v37 = vld [vmem:[%s7387_s2 + $0x48] ss:$16 sps:$4 sm:$0xff]   ;;  %v4974_v35 = vld [vmem:[%s7387_s2 + $0x64] ss:$16 sps:$4 sm:$0xff]   ;;  %v4975_v1 = vld [vmem:[%s7387_s2 + $0x6c] ss:$16 sps:$4 sm:$0xff]  }
 0x6e6   : > { %4807 = vpow2.f32 %v4404_v22  ;;  %v4976_v16 = vld [vmem:[%s7387_s2 + $0x60] ss:$16 sps:$4 sm:$0xff]   ;;  %v4977_v7 = vld [vmem:[%s7387_s2 + $0x68] ss:$16 sps:$4 sm:$0xff]   ;;  %v4978_v54 = vld [vmem:[%s7387_s2 + $0x84] ss:$16 sps:$4 sm:$0xff]  }
 0x6e7   : > { %4809 = vpow2.f32 %v4405_v27  ;;  %v4979_v8 = vld [vmem:[%s7387_s2 + $0x8c] ss:$16 sps:$4 sm:$0xff]   ;;  %v4980_v9 = vld [vmem:[%s7387_s2 + $0x80] ss:$16 sps:$4 sm:$0xff]   ;;  %v4981_v22 = vld [vmem:[%s7387_s2 + $0x88] ss:$16 sps:$4 sm:$0xff]  }
 0x6e8   : > { %4811 = vtanh.f32 %v3287_v41  ;;  %v4969_v41 = vld [vmem:[%s7387_s2 + $0x28] ss:$16 sps:$4 sm:$0xff]   ;;  %v4984_v27 = vld [vmem:[%s7387_s2 + $0xa0] ss:$16 sps:$4 sm:$0xff]  }
 0x6ec   : > { %v4804_v42 = vpop.eup %4803 }
 0x6ed   : > { %v6983_v10 = vmul.f32 %v4804_v42, %v4802_v5  ;;  %v4982_v5 = vld [vmem:[%s7387_s2 + $0xa4] ss:$16 sps:$4 sm:$0xff]   ;;  %v4983_v42 = vld [vmem:[%s7387_s2 + $0xac] ss:$16 sps:$4 sm:$0xff]  }
 0x6ef   : > { %v4806_v0 = vpop.eup %4805  ;;  %v3343_v4 = vpack.c.bf16 %v6983_v10, %v6983_v10 }
 0x6f0   : > { %v4808_v12 = vpop.eup %4807  ;;  %v3316_v19 = vadd.f32 1.0, %v4806_v0  ;;  %v4985_v0 = vld [vmem:[%s7387_s2 + $0xc4] ss:$16 sps:$4 sm:$0xff]  }
 0x6f1   : > { %v3322_v20 = vadd.f32 1.0, %v4808_v12  ;;  %3377 = vmatmul.mubr.bf16.vlgmr.msra.gmra.mrb[76].mxu0 %v3343_v4  ;;  %3418 = vmatmul.mubr.bf16.vlgmr.msra.gmra.mrb[84].mxu1 %v3343_v4  ;;  %v4986_v4 = vld [vmem:[%s7387_s2 + $0xc0] ss:$16 sps:$4 sm:$0xff]   ;;  %v4987_v12 = vld [vmem:[%s7387_s2 + $0xe4] ss:$16 sps:$4 sm:$0xff]  }
 0x6f2   : > { %4813 = vrcp.f32 %v3316_v19  ;;  %3436 = vmatpush1.bf16.msra.mxu0 %v6990_v21  ;;  %3477 = vmatpush1.bf16.msra.mxu1 %v6600_v56  ;;  %v7013_v56 = vld [vmem:[%s7388_s3 + $0x44] ss:$16 sps:$4 sm:$0xff]  }
 0x6f3   : > { %4815 = vrcp.f32 %v3322_v20  ;;  %3437 = vmatprep.subr.bf16.mxu0 %v6997_v23  ;;  %3478 = vmatprep.subr.bf16.mxu1 %v6607_v15  ;;  %v4810_v15 = vpop.eup %4809  ;;  %v7735_v20 = vld [vmem:[#allocation63_spill] sm:$0xff] }
 0x6f4   : > { %3467 = vmatprep.mubr.bf16.mxu0 %v7524_v33  ;;  %3508 = vmatprep.mubr.bf16.mxu1 %v7524_v33  ;;  %v3329_v29 = vadd.f32 1.0, %v4810_v15 }
 0x6f6   : > { %3438 = vmatpush1.bf16.msra.mxu0 %v7006_v58  ;;  %3479 = vmatpush1.bf16.msra.mxu1 %v6616_v24  ;;  %v4812_v24 = vpop.eup %4811  ;;  %4817 = vrcp.f32 %v3329_v29 }
 0x6f7   : > { %3439 = vmatprep.subr.bf16.mxu0 %v7013_v56  ;;  %3480 = vmatprep.subr.bf16.mxu1 %v6623_v25 }
 0x6fa   : > { %3440 = vmatpush1.bf16.msra.mxu0 %v7020_v59  ;;  %3481 = vmatpush1.bf16.msra.mxu1 %v6630_v47  ;;  %v7035_v47 = vld [vmem:[%s7388_s3 + $0x60] ss:$16 sps:$4 sm:$0xff]  }
 0x6fb   : > { %3441 = vmatprep.subr.bf16.mxu0 %v7027_v55  ;;  %3482 = vmatprep.subr.bf16.mxu1 %v6637_v43 }
 0x6fc   : > { %v4814_v25 = vpop.eup %4813 }
 0x6fd   : > { %v4816_v60 = vpop.eup %4815  ;;  %v3333_v28 = vmul.f32 %v4814_v25, %v4812_v24  ;;  %v7736_v24 = vld [vmem:[#allocation56_spill] sm:$0xff] }
 0x6fe   : > { %v3332_v63 = vmul.f32 %v4816_v60, %v6914_v11  ;;  %3442 = vmatpush1.bf16.msra.mxu0 %v7035_v47  ;;  %3483 = vmatpush1.bf16.msra.mxu1 %v6645_v34  ;;  %v7052_v11 = vld [vmem:[%s7388_s3 + $0x80] ss:$16 sps:$4 sm:$0xff]   ;;  %v7059_v34 = vld [vmem:[%s7388_s3 + $0xa4] ss:$16 sps:$4 sm:$0xff]  }
 0x6ff   : > { %3443 = vmatprep.subr.bf16.mxu0 %v7042_v32  ;;  %3484 = vmatprep.subr.bf16.mxu1 %v6652_v30  ;;  %v7066_v30 = vld [vmem:[%s7388_s3 + $0xa0] ss:$16 sps:$4 sm:$0xff]  }
 0x700   : > { %v7046_v43 = vadd.f32 %v3333_v28, %v3332_v63  ;;  %v4818_v57 = vpop.eup %4817  ;;  %v7737_v28 = vld [vmem:[#allocation64_spill] sm:$0xff]  ;;  %v7738_v63 = vld [vmem:[#allocation58_spill] sm:$0xff] }
 0x702   : > { %4819 = vtanh.f32 %v7046_v43  ;;  %3444 = vmatpush1.bf16.msra.mxu0 %v7052_v11  ;;  %3485 = vmatpush1.bf16.msra.mxu1 %v6662_v18  ;;  %v7073_v18 = vld [vmem:[%s7388_s3 + $0xc4] ss:$16 sps:$4 sm:$0xff]  }
 0x703   : > { %3445 = vmatprep.subr.bf16.mxu0 %v7059_v34  ;;  %3486 = vmatprep.subr.bf16.mxu1 %v6669_v31  ;;  %v7080_v31 = vld [vmem:[%s7388_s3 + $0xc0] ss:$16 sps:$4 sm:$0xff]  }
 0x706   : > { %3446 = vmatpush1.bf16.msra.mxu0 %v7066_v30  ;;  %3487 = vmatpush1.bf16.msra.mxu1 %v6676_v14 }
 0x707   : > { %3447 = vmatprep.subr.bf16.mxu0 %v7073_v18  ;;  %3488 = vmatprep.subr.bf16.mxu1 %v6683_v61 }
 0x70a   : > { %3448 = vmatpush1.bf16.msra.mxu0 %v7080_v31  ;;  %3489 = vmatpush1.bf16.msra.mxu1 %v6690_v36  ;;  %v4963_v36 = vld [vmem:[%s7387_s2 + $0xc] ss:$16 sps:$4 sm:$0xff]  }
 0x70b   : > { %3449 = vmatprep.subr.bf16.mxu0 %v6696_v26  ;;  %3490 = vmatprep.subr.bf16.mxu1 %v6702_v46  ;;  %v4964_v26 = vld [vmem:[%s7387_s2] ss:$16 sps:$4 sm:$0xff]   ;;  %v4965_v46 = vld [vmem:[%s7387_s2 + $0x8] ss:$16 sps:$4 sm:$0xff]  }
 0x70c   : > { %v4820_v14 = vpop.eup %4819 }
 0x70d   : > { %v7086_v50 = vmul.f32 %v4820_v14, %v4818_v57 }
 0x70e   : > { %3450 = vmatpush1.bf16.msra.mxu0 %v6710_v40  ;;  %3491 = vmatpush1.bf16.msra.mxu1 %v6716_v6  ;;  %v4966_v40 = vld [vmem:[%s7387_s2 + $0x24] ss:$16 sps:$4 sm:$0xff]   ;;  %v4967_v6 = vld [vmem:[%s7387_s2 + $0x2c] ss:$16 sps:$4 sm:$0xff]  }
 0x70f   : > { %v3434_v61 = vpack.c.bf16 %v7086_v50, %v7086_v50  ;;  %3576 = vmatprep.subr.bf16.mxu0 %v4962_v45  ;;  %3617 = vmatprep.subr.bf16.mxu1 %v4963_v36 }
 0x711   : > { %3468 = vmatmul.mubr.bf16.vlgmr.msra.gmra.mrb[80].mxu0 %v3434_v61  ;;  %3509 = vmatmul.mubr.bf16.vlgmr.msra.gmra.mrb[88].mxu1 %v3434_v61 }
 0x712   : > { %3577 = vmatpush1.bf16.msra.mxu0 %v4964_v26  ;;  %3618 = vmatpush1.bf16.msra.mxu1 %v4965_v46 }
 0x713   : > { %3578 = vmatprep.subr.bf16.mxu0 %v4966_v40  ;;  %3619 = vmatprep.subr.bf16.mxu1 %v4967_v6 }
 0x714   : > { %3608 = vmatprep.mubr.bf16.mxu0 %v7524_v33  ;;  %3649 = vmatprep.mubr.bf16.mxu1 %v7524_v33 }
 0x716   : > { %3579 = vmatpush1.bf16.msra.mxu0 %v4968_v52  ;;  %3620 = vmatpush1.bf16.msra.mxu1 %v4969_v41 }
 0x717   : > { %3580 = vmatprep.subr.bf16.mxu0 %v4970_v13  ;;  %3621 = vmatprep.subr.bf16.mxu1 %v4971_v51 }
 0x71a   : > { %3581 = vmatpush1.bf16.msra.mxu0 %v4972_v3  ;;  %3622 = vmatpush1.bf16.msra.mxu1 %v4973_v37 }
 0x71b   : > { %3582 = vmatprep.subr.bf16.mxu0 %v4974_v35  ;;  %3623 = vmatprep.subr.bf16.mxu1 %v4975_v1 }
 0x71e   : > { %3583 = vmatpush1.bf16.msra.mxu0 %v4976_v16  ;;  %3624 = vmatpush1.bf16.msra.mxu1 %v4977_v7 }
 0x71f   : > { %3584 = vmatprep.subr.bf16.mxu0 %v4978_v54  ;;  %3625 = vmatprep.subr.bf16.mxu1 %v4979_v8  ;;  %v7739_v8 = vld [vmem:[#allocation75_spill] sm:$0xff] }
 0x722   : > { %3585 = vmatpush1.bf16.msra.mxu0 %v4980_v9  ;;  %3626 = vmatpush1.bf16.msra.mxu1 %v4981_v22  ;;  %v7740_v22 = vld [vmem:[#allocation69_spill] sm:$0xff] }
 0x723   : > { %3586 = vmatprep.subr.bf16.mxu0 %v4982_v5  ;;  %3627 = vmatprep.subr.bf16.mxu1 %v4983_v42 }
 0x726   : > { %3587 = vmatpush1.bf16.msra.mxu0 %v4984_v27  ;;  %3628 = vmatpush1.bf16.msra.mxu1 %v7716_v2  ;;  %v4988_v2 = vld [vmem:[%s7387_s2 + $0xe0] ss:$16 sps:$4 sm:$0xff]  }
 0x727   : > { %3588 = vmatprep.subr.bf16.mxu0 %v4985_v0  ;;  %3629 = vmatprep.subr.bf16.mxu1 %v7718_v49  ;;  %v4989_v49 = vld [vmem:[%s7388_s3 + $0x4] ss:$16 sps:$4 sm:$0xff]   ;;  %v7741_v0 = vld [vmem:[#allocation77_spill] sm:$0xff] }
 0x72a   : > { %3589 = vmatpush1.bf16.msra.mxu0 %v4986_v4  ;;  %3630 = vmatpush1.bf16.msra.mxu1 %v7720_v39 }
 0x72b   : > { %3590 = vmatprep.subr.bf16.mxu0 %v4987_v12  ;;  %3631 = vmatprep.subr.bf16.mxu1 %v7722_v53  ;;  %v7742_v12 = vld [vmem:[#allocation70_spill] sm:$0xff] }
 0x72e   : > { %3591 = vmatpush1.bf16.msra.mxu0 %v4988_v2  ;;  %3632 = vmatpush1.bf16.msra.mxu1 %v7724_v62 }
 0x72f   : > { %3667 = vmatprep.subr.bf16.mxu0 %v4989_v49  ;;  %3708 = vmatprep.subr.bf16.mxu1 %v7726_v48 }
 0x7c4   : > { %v3378_v39 = vpop.f32.mrb[76].mxu0  ;;  %v3419_v19 = vpop.f32.mrb[84].mxu1 }
 0x7c5   : > { %v3426_v15 = vadd.f32 %v3378_v39, %v7735_v20  ;;  %v3428_v53 = vadd.f32 %v3419_v19, %v7736_v24  ;;  %v3380_v25 = vpop.f32.mrb[77].mxu0  ;;  %v3421_v60 = vpop.f32.mrb[85].mxu1 }
 0x7c6   : > { %v3427_v29 = vadd.f32 %v3380_v25, %v7737_v28  ;;  %v3429_v57 = vadd.f32 %v3421_v60, %v7738_v63  ;;  %v3382_v62 = vpop.f32.mrb[78].mxu0  ;;  %v3423_v14 = vpop.f32.mrb[86].mxu1 }
 0x7c7   : > { %v4406_v61 = vmul.f32 -1.442695, %v3426_v15  ;;  %v3383_v45 = vpop.f32.mrb[79].mxu0  ;;  %v3424_v36 = vpop.f32.mrb[87].mxu1  ;;  %v4990_v14 = vld [vmem:[%s7388_s3 + $0x8] ss:$16 sps:$4 sm:$0xff]  }
 0x7c8   : > { %v4407_v26 = vmul.f32 -1.442695, %v3427_v29  ;;  %v4408_v48 = vmul.f32 -1.442695, %v3429_v57 }
 0x7c9   : > { %4821 = vpow2.f32 %v4406_v61  ;;  %v4991_v61 = vld [vmem:[%s7388_s3 + $0x2c] ss:$16 sps:$4 sm:$0xff]  }
 0x7ca   : > { %4823 = vpow2.f32 %v4407_v26 }
 0x7cb   : > { %4825 = vpow2.f32 %v4408_v48 }
 0x7cc   : > { %4827 = vtanh.f32 %v3428_v53 }
 0x7d3   : > { %v4822_v46 = vpop.eup %4821 }
 0x7d4   : > { %v4824_v40 = vpop.eup %4823  ;;  %v3524_v6 = vadd.f32 1.0, %v4822_v46 }
 0x7d5   : > { %v3530_v52 = vadd.f32 1.0, %v4824_v40  ;;  %v4826_v41 = vpop.eup %4825 }
 0x7d6   : > { %4829 = vrcp.f32 %v3524_v6  ;;  %v4828_v13 = vpop.eup %4827  ;;  %v3537_v35 = vadd.f32 1.0, %v4826_v41 }
 0x7d7   : > { %4831 = vrcp.f32 %v3530_v52  ;;  %v5003_v52 = vld [vmem:[%s7388_s3 + $0xe4] ss:$16 sps:$4 sm:$0xff]  }
 0x7d8   : > { %4833 = vrcp.f32 %v3537_v35  ;;  %v4614_v35 = vld [vmem:[%s7390_s5] sm:$0xff]  }
 0x7e0   : > { %v4830_v51 = vpop.eup %4829 }
 0x7e1   : > { %v4832_v3 = vpop.eup %4831  ;;  %v3541_v37 = vmul.f32 %v4830_v51, %v4828_v13  ;;  %v5006_v51 = vld [vmem:[%s7388_s3 + $0xe8] ss:$16 sps:$4 sm:$0xff]  }
 0x7e2   : > { %v3540_v1 = vmul.f32 %v4832_v3, %v6976_v38  ;;  %v4834_v24 = vpop.eup %4833 }
 0x7e4   : > { %v7189_v16 = vadd.f32 %v3541_v37, %v3540_v1  ;;  %v3469_v7 = vpop.f32.mrb[80].mxu0  ;;  %v3510_v54 = vpop.f32.mrb[88].mxu1  ;;  %v4613_v37 = vld [vmem:[%s7390_s5 + $0x40] sm:$0xff]   ;;  %v4615_v1 = vld [vmem:[%s7390_s5 + $0x48] sm:$0xff]  }
 0x7e5   : > { %v3517_v9 = vadd.f32 %v3469_v7, %v7739_v8  ;;  %v3519_v5 = vadd.f32 %v3510_v54, %v7740_v22  ;;  %v3471_v42 = vpop.f32.mrb[81].mxu0  ;;  %v3512_v27 = vpop.f32.mrb[89].mxu1  ;;  %v4616_v7 = vld [vmem:[%s7390_s5 + $0x8] sm:$0xff]   ;;  %v4617_v54 = vld [vmem:[%s7390_s5 + $0x50] sm:$0xff]   ;;  %v4620_v22 = vld [vmem:[%s7390_s5 + $0x18] sm:$0xff]  }
 0x7e6   : > { %4835 = vtanh.f32 %v7189_v16  ;;  %v3518_v4 = vadd.f32 %v3471_v42, %v7741_v0  ;;  %v3520_v2 = vadd.f32 %v3512_v27, %v7742_v12  ;;  %v3473_v49 = vpop.f32.mrb[82].mxu0  ;;  %v3514_v39 = vpop.f32.mrb[90].mxu1  ;;  %v4618_v8 = vld [vmem:[%s7390_s5 + $0x10] sm:$0xff]   ;;  %v4622_v42 = vld [vmem:[%s7390_s5 + $0x20] sm:$0xff]   ;;  %v4623_v27 = vld [vmem:[%s7390_s5 + $0x68] sm:$0xff]  }
 0x7e7   : > { %v4409_v38 = vmul.f32 -1.442695, %v3517_v9  ;;  %v3474_v19 = vpop.f32.mrb[83].mxu0  ;;  %v3515_v20 = vpop.f32.mrb[91].mxu1  ;;  %v4619_v9 = vld [vmem:[%s7390_s5 + $0x58] sm:$0xff]   ;;  %v4624_v0 = vld [vmem:[%s7390_s5 + $0x28] sm:$0xff]  }
 0x7e8   : > { %v4410_v15 = vmul.f32 -1.442695, %v3518_v4  ;;  %v4411_v25 = vmul.f32 -1.442695, %v3520_v2  ;;  %v4625_v4 = vld [vmem:[%s7390_s5 + $0x70] sm:$0xff]   ;;  %v4627_v2 = vld [vmem:[%s7390_s5 + $0x78] sm:$0xff]  }
 0x7e9   : > { %4837 = vpow2.f32 %v4409_v38  ;;  %v4626_v12 = vld [vmem:[%s7390_s5 + $0x30] sm:$0xff]   ;;  %v4628_v49 = vld [vmem:[%s7390_s5 + $0x38] sm:$0xff]  }
 0x7ea   : > { %4839 = vpow2.f32 %v4410_v15  ;;  %v7743_v19 = vld [vmem:[#allocation65_spill] sm:$0xff]  ;;  %v7744_v15 = vld [vmem:[#allocation60_spill] sm:$0xff] }
 0x7eb   : > { %4841 = vpow2.f32 %v4411_v25 }
 0x7ec   : > { %4843 = vtanh.f32 %v3519_v5  ;;  %v4621_v5 = vld [vmem:[%s7390_s5 + $0x60] sm:$0xff]  }
 0x7f0   : > { %v4836_v53 = vpop.eup %4835 }
 0x7f1   : > { %v7196_v60 = vmul.f32 %v4836_v53, %v4834_v24 }
 0x7f3   : > { %v4838_v28 = vpop.eup %4837  ;;  %v3575_v29 = vpack.c.bf16 %v7196_v60, %v7196_v60 }
 0x7f4   : > { %v4840_v63 = vpop.eup %4839  ;;  %v3548_v57 = vadd.f32 1.0, %v4838_v28  ;;  %v7745_v28 = vld [vmem:[#allocation66_spill] sm:$0xff] }
 0x7f5   : > { %v3554_v62 = vadd.f32 1.0, %v4840_v63  ;;  %3609 = vmatmul.mubr.bf16.vlgmr.msra.gmra.mrb[84].mxu0 %v3575_v29  ;;  %3650 = vmatmul.mubr.bf16.vlgmr.msra.gmra.mrb[92].mxu1 %v3575_v29  ;;  %v4842_v45 = vpop.eup %4841  ;;  %v7746_v63 = vld [vmem:[#allocation62_spill] sm:$0xff] }
 0x7f6   : > { %4845 = vrcp.f32 %v3548_v57  ;;  %3668 = vmatpush1.bf16.msra.mxu0 %v6990_v21  ;;  %3709 = vmatpush1.bf16.msra.mxu1 %v4990_v14  ;;  %v4992_v21 = vld [vmem:[%s7388_s3 + $0x28] ss:$16 sps:$4 sm:$0xff]   ;;  %v3561_v46 = vadd.f32 1.0, %v4842_v45 }
 0x7f7   : > { %4847 = vrcp.f32 %v3554_v62  ;;  %3669 = vmatprep.subr.bf16.mxu0 %v6997_v23  ;;  %3710 = vmatprep.subr.bf16.mxu1 %v4991_v61  ;;  %v4993_v23 = vld [vmem:[%s7388_s3 + $0x4c] ss:$16 sps:$4 sm:$0xff]  }
 0x7f8   : > { %3699 = vmatprep.mubr.bf16.mxu0 %v7524_v33  ;;  %3740 = vmatprep.mubr.bf16.mxu1 %v7524_v33  ;;  %v4994_v33 = vld [vmem:[%s7388_s3 + $0x48] ss:$16 sps:$4 sm:$0xff]   ;;  %4849 = vrcp.f32 %v3561_v46 }
 0x7fa   : > { %3670 = vmatpush1.bf16.msra.mxu0 %v7006_v58  ;;  %3711 = vmatpush1.bf16.msra.mxu1 %v4992_v21  ;;  %v4844_v58 = vpop.eup %4843 }
 0x7fb   : > { %3671 = vmatprep.subr.bf16.mxu0 %v7013_v56  ;;  %3712 = vmatprep.subr.bf16.mxu1 %v4993_v23  ;;  %v4995_v56 = vld [vmem:[%s7388_s3 + $0x6c] ss:$16 sps:$4 sm:$0xff]  }
 0x7fe   : > { %3672 = vmatpush1.bf16.msra.mxu0 %v7020_v59  ;;  %3713 = vmatpush1.bf16.msra.mxu1 %v4994_v33  ;;  %v4996_v59 = vld [vmem:[%s7388_s3 + $0x68] ss:$16 sps:$4 sm:$0xff]  }
 0x7ff   : > { %3673 = vmatprep.subr.bf16.mxu0 %v7027_v55  ;;  %3714 = vmatprep.subr.bf16.mxu1 %v4995_v56  ;;  %v4997_v55 = vld [vmem:[%s7388_s3 + $0x8c] ss:$16 sps:$4 sm:$0xff]  }
 0x800   : > { %v4846_v36 = vpop.eup %4845 }
 0x801   : > { %v4848_v26 = vpop.eup %4847  ;;  %v3565_v48 = vmul.f32 %v4846_v36, %v4844_v58 }
 0x802   : > { %v3564_v40 = vmul.f32 %v4848_v26, %v7046_v43  ;;  %3674 = vmatpush1.bf16.msra.mxu0 %v7035_v47  ;;  %3715 = vmatpush1.bf16.msra.mxu1 %v4996_v59  ;;  %v4998_v47 = vld [vmem:[%s7388_s3 + $0x88] ss:$16 sps:$4 sm:$0xff]  }
 0x803   : > { %3675 = vmatprep.subr.bf16.mxu0 %v7042_v32  ;;  %3716 = vmatprep.subr.bf16.mxu1 %v4997_v55  ;;  %v4999_v32 = vld [vmem:[%s7388_s3 + $0xac] ss:$16 sps:$4 sm:$0xff]   ;;  %v5000_v43 = vld [vmem:[%s7388_s3 + $0xa8] ss:$16 sps:$4 sm:$0xff]  }
 0x804   : > { %v7235_v6 = vadd.f32 %v3565_v48, %v3564_v40 }
 0x806   : > { %4851 = vtanh.f32 %v7235_v6  ;;  %3676 = vmatpush1.bf16.msra.mxu0 %v7052_v11  ;;  %3717 = vmatpush1.bf16.msra.mxu1 %v4998_v47  ;;  %v5001_v11 = vld [vmem:[%s7388_s3 + $0xcc] ss:$16 sps:$4 sm:$0xff]  }
 0x807   : > { %3677 = vmatprep.subr.bf16.mxu0 %v7059_v34  ;;  %3718 = vmatprep.subr.bf16.mxu1 %v4999_v32  ;;  %v5002_v34 = vld [vmem:[%s7388_s3 + $0xc8] ss:$16 sps:$4 sm:$0xff]  }
 0x80a   : > { %3678 = vmatpush1.bf16.msra.mxu0 %v7066_v30  ;;  %3719 = vmatpush1.bf16.msra.mxu1 %v5000_v43  ;;  %v4850_v30 = vpop.eup %4849 }
 0x80b   : > { %3679 = vmatprep.subr.bf16.mxu0 %v7073_v18  ;;  %3720 = vmatprep.subr.bf16.mxu1 %v5001_v11  ;;  %v5004_v18 = vld [vmem:[%s7388_s3 + $0xec] ss:$16 sps:$4 sm:$0xff]  }
 0x80e   : > { %3680 = vmatpush1.bf16.msra.mxu0 %v7080_v31  ;;  %3721 = vmatpush1.bf16.msra.mxu1 %v5002_v34  ;;  %v5005_v31 = vld [vmem:[%s7388_s3 + $0xe0] ss:$16 sps:$4 sm:$0xff]  }
 0x80f   : > { %3681 = vmatprep.subr.bf16.mxu0 %v5003_v52  ;;  %3722 = vmatprep.subr.bf16.mxu1 %v5004_v18  ;;  %v7748_v18 = vld [vmem:[#allocation67_spill] sm:$0xff] }
 0x810   : > { %v4852_v41 = vpop.eup %4851 }
 0x811   : > { %v7264_v13 = vmul.f32 %v4852_v41, %v4850_v30  ;;  %v7747_v30 = vld [vmem:[#allocation71_spill] sm:$0xff] }
 0x812   : > { %3682 = vmatpush1.bf16.msra.mxu0 %v5005_v31  ;;  %3723 = vmatpush1.bf16.msra.mxu1 %v5006_v51 }
 0x813   : > { %v3666_v3 = vpack.c.bf16 %v7264_v13, %v7264_v13  ;;  %4440 = vmatprep.subr.bf16.mxu0 %v4613_v37 }
 0x815   : > { %3700 = vmatmul.mubr.bf16.vlgmr.msra.gmra.mrb[88].mxu0 %v3666_v3  ;;  %3741 = vmatmul.mubr.bf16.vlgmr.msra.gmra.mrb[96].mxu1 %v3666_v3  ;;  %v7749_v3 = vld [vmem:[#allocation73_spill] sm:$0xff] }
 0x816   : > { %4441 = vmatpush3.bf16.msra.mxu0 %v4614_v35  ;;  %v7750_v35 = vld [vmem:[#allocation68_spill] sm:$0xff] }
 0x817   : > { %4442 = vmatprep.subr.bf16.mxu0 %v4615_v1 }
 0x81a   : > { %4443 = vmatpush3.bf16.msra.mxu0 %v4616_v7 }
 0x81b   : > { %4444 = vmatprep.subr.bf16.mxu0 %v4617_v54 }
 0x81e   : > { %4445 = vmatpush3.bf16.msra.mxu0 %v4618_v8 }
 0x81f   : > { %4446 = vmatprep.subr.bf16.mxu0 %v4619_v9 }
 0x822   : > { %4447 = vmatpush3.bf16.msra.mxu0 %v4620_v22 }
 0x823   : > { %4448 = vmatprep.subr.bf16.mxu0 %v4621_v5 }
 0x826   : > { %4449 = vmatpush3.bf16.msra.mxu0 %v4622_v42 }
 0x827   : > { %4450 = vmatprep.subr.bf16.mxu0 %v4623_v27 }
 0x82a   : > { %4451 = vmatpush3.bf16.msra.mxu0 %v4624_v0 }
 0x82b   : > { %4452 = vmatprep.subr.bf16.mxu0 %v4625_v4 }
 0x82e   : > { %4453 = vmatpush3.bf16.msra.mxu0 %v4626_v12 }
 0x82f   : > { %4454 = vmatprep.subr.bf16.mxu0 %v4627_v2 }
 0x832   : > { %4455 = vmatpush3.bf16.msra.mxu0 %v4628_v49 }
 0x8c8   : > { %v3610_v39 = vpop.f32.mrb[84].mxu0  ;;  %v3651_v38 = vpop.f32.mrb[92].mxu1 }
 0x8c9   : > { %v3658_v20 = vadd.f32 %v3610_v39, %v7743_v19  ;;  %v3660_v24 = vadd.f32 %v3651_v38, %v7744_v15  ;;  %v3612_v53 = vpop.f32.mrb[85].mxu0  ;;  %v3653_v25 = vpop.f32.mrb[93].mxu1 }
 0x8ca   : > { %v3659_v29 = vadd.f32 %v3612_v53, %v7745_v28  ;;  %v3661_v57 = vadd.f32 %v3653_v25, %v7746_v63  ;;  %v3614_v62 = vpop.f32.mrb[86].mxu0  ;;  %v3655_v14 = vpop.f32.mrb[94].mxu1 }
 0x8cb   : > { %v4412_v61 = vmul.f32 -1.442695, %v3658_v20  ;;  %v3615_v21 = vpop.f32.mrb[87].mxu0  ;;  %v3656_v23 = vpop.f32.mrb[95].mxu1  ;;  %v7751_v62 = vld [vmem:[#allocation95_spill] sm:$0xff]  ;;  %v7752_v14 = vld [vmem:[#allocation22_spill] sm:$0xff] }
 0x8cc   : > { %v4413_v45 = vmul.f32 -1.442695, %v3659_v29  ;;  %v4414_v33 = vmul.f32 -1.442695, %v3661_v57  ;;  %v3822_v21 = vpack.c.bf16 %v6929_v17, %v7086_v50  ;;  %v7753_v23 = vld [vmem:[#allocation32_spill] sm:$0xff] }
 0x8cd   : > { %4853 = vpow2.f32 %v4412_v61  ;;  %v3819_v61 = vpack.c.bf16 %v7752_v14, %v7751_v62 }
 0x8ce   : > { %4855 = vpow2.f32 %v4413_v45  ;;  %v7754_v45 = vld [vmem:[#allocation36_spill] sm:$0xff] }
 0x8cf   : > { %4857 = vpow2.f32 %v4414_v33  ;;  %v7755_v33 = vld [vmem:[#allocation21_spill] sm:$0xff] }
 0x8d0   : > { %4859 = vtanh.f32 %v3660_v24 }
 0x8d7   : > { %v4854_v58 = vpop.eup %4853 }
 0x8d8   : > { %v4856_v56 = vpop.eup %4855  ;;  %v3756_v36 = vadd.f32 1.0, %v4854_v58  ;;  %v7756_v58 = vld [vmem:[#allocation17_spill] sm:$0xff] }
 0x8d9   : > { %v3762_v26 = vadd.f32 1.0, %v4856_v56  ;;  %v4858_v48 = vpop.eup %4857  ;;  %v3824_v56 = vpack.c.bf16 %v7756_v58, %v7755_v33 }
 0x8da   : > { %4861 = vrcp.f32 %v3756_v36  ;;  %v4860_v46 = vpop.eup %4859  ;;  %v3769_v47 = vadd.f32 1.0, %v4858_v48  ;;  %v7757_v36 = vld [vmem:[#allocation6_spill] sm:$0xff] }
 0x8db   : > { %4863 = vrcp.f32 %v3762_v26  ;;  %v7758_v26 = vld [vmem:[#allocation96_spill] sm:$0xff] }
 0x8dc   : > { %4865 = vrcp.f32 %v3769_v47  ;;  %v3826_v48 = vpack.c.bf16 %v7758_v26, %v7757_v36 }
 0x8e4   : > { %v4862_v40 = vpop.eup %4861 }
 0x8e5   : > { %v4864_v59 = vpop.eup %4863  ;;  %v3773_v55 = vmul.f32 %v4862_v40, %v4860_v46  ;;  %v4418_v46 = vld [vmem:[%s7391_s6] ss:$0 sm:$0xff] }
 0x8e6   : > { %v3772_v32 = vmul.f32 %v4864_v59, %v7189_v16  ;;  %v4866_v5 = vpop.eup %4865 }
 0x8e8   : > { %v3701_v43 = vpop.f32.mrb[88].mxu0  ;;  %v3742_v11 = vpop.f32.mrb[96].mxu1  ;;  %v3774_v34 = vadd.f32 %v3773_v55, %v3772_v32 }
 0x8e9   : > { %v3749_v52 = vadd.f32 %v3701_v43, %v7747_v30  ;;  %v3751_v41 = vadd.f32 %v3742_v11, %v7748_v18  ;;  %v3703_v31 = vpop.f32.mrb[89].mxu0  ;;  %v3744_v51 = vpop.f32.mrb[97].mxu1 }
 0x8ea   : > { %v3750_v37 = vadd.f32 %v3703_v31, %v7749_v3  ;;  %v3752_v1 = vadd.f32 %v3744_v51, %v7750_v35  ;;  %v3705_v7 = vpop.f32.mrb[90].mxu0  ;;  %v3746_v54 = vpop.f32.mrb[98].mxu1  ;;  %4867 = vtanh.f32 %v3774_v34 }
 0x8eb   : > { %v4415_v8 = vmul.f32 -1.442695, %v3749_v52  ;;  %v3706_v9 = vpop.f32.mrb[91].mxu0  ;;  %v3747_v16 = vpop.f32.mrb[99].mxu1 }
 0x8ec   : > { %v4416_v22 = vmul.f32 -1.442695, %v3750_v37  ;;  %v4417_v27 = vmul.f32 -1.442695, %v3752_v1 }
 0x8ed   : > { %4869 = vpow2.f32 %v4415_v8 }
 0x8ee   : > { %4871 = vpow2.f32 %v4416_v22 }
 0x8ef   : > { %4873 = vpow2.f32 %v4417_v27 }
 0x8f0   : > { %4875 = vtanh.f32 %v3751_v41 }
 0x8f4   : > { %v4868_v42 = vpop.eup %4867 }
 0x8f5   : > { %v3776_v0 = vmul.f32 %v4868_v42, %v4866_v5 }
 0x8f7   : > { %v4870_v4 = vpop.eup %4869  ;;  %v3825_v17 = vpack.c.bf16 %v3776_v0, %v7196_v60 }
 0x8f8   : > { %v4872_v12 = vpop.eup %4871  ;;  %v3780_v2 = vadd.f32 1.0, %v4870_v4 }
 0x8f9   : > { %v3786_v49 = vadd.f32 1.0, %v4872_v12  ;;  %v4874_v39 = vpop.eup %4873 }
 0x8fa   : > { %4877 = vrcp.f32 %v3780_v2  ;;  %v4876_v38 = vpop.eup %4875  ;;  %v3793_v24 = vadd.f32 1.0, %v4874_v39 }
 0x8fb   : > { %4879 = vrcp.f32 %v3786_v49 }
 0x8fc   : > { %4881 = vrcp.f32 %v3793_v24 }
 0x904   : > { %v4878_v19 = vpop.eup %4877 }
 0x905   : > { %v4880_v20 = vpop.eup %4879  ;;  %v3797_v15 = vmul.f32 %v4878_v19, %v4876_v38 }
 0x906   : > { %v3796_v53 = vmul.f32 %v4880_v20, %v7235_v6  ;;  %v4882_v28 = vpop.eup %4881  ;;  %v3821_v6 = vpack.c.bf16 %v7754_v45, %v7753_v23 }
 0x908   : > { %v3798_v25 = vadd.f32 %v3797_v15, %v3796_v53 }
 0x90a   : > { %4883 = vtanh.f32 %v3798_v25 }
 0x914   : > { %v4884_v29 = vpop.eup %4883 }
 0x915   : > { %v3800_v63 = vmul.f32 %v4884_v29, %v4882_v28 }
 0x917   : > { %v3820_v57 = vpack.c.bf16 %v7264_v13, %v3800_v63  ;;  %v3823_v13 = vpack.c.bf16 %v6983_v10, %v6891_v44 }
 0x919   : > { %3994 = vmatprep.mubr.bf16.mxu0 %v3820_v57 }
 0x91a   : > { %3995 = vmatmul.mubr.bf16.vlgmr.msra.gmra.mrb[92].mxu0 %v3819_v61 }
 0x91b   : > { %4002 = vmatprep.mubr.bf16.mxu0 %v3822_v21 }
 0x922   : > { %4003 = vmatmul.mubr.bf16.gmra.mrb[96].mxu0 %v3821_v6 }
 0x923   : > { %4010 = vmatprep.mubr.bf16.mxu0 %v3824_v56 }
 0x92a   : > { %4011 = vmatmul.mubr.bf16.gmra.mrb[100].mxu0 %v3823_v13 }
 0x92b   : > { %4018 = vmatprep.mubr.bf16.mxu0 %v3826_v48 }
 0x932   : > { %4019 = vmatmul.mubr.bf16.gmra.mrb[104].mxu0 %v3825_v17 }
 0x9ed   : > { %v4456_v50 = vpop.f32.mrb[92].mxu0 }
 0x9ee   : > { %v4457_v40 = vpop.f32.mrb[93].mxu0 }
 0x9ef   : > { %v4458_v59 = vadd.f32 %v4457_v40, %v4456_v50  ;;  %v4459_v55 = vpop.f32.mrb[94].mxu0 }
 0x9f0   : > { %v4460_v47 = vpop.f32.mrb[95].mxu0 }
 0x9f1   : > { %v3997_v32 = vadd.f32 %v4458_v59, %v4418_v46  ;;  %v4461_v43 = vadd.f32 %v4460_v47, %v4459_v55 }
 0x9f3   : > { %4027 = vst [vmem:[%s7350_s20] sm:$0xff] %v3997_v32  ;;  %v4000_v44 = vadd.f32 %v4461_v43, %v4418_v46 }
 0x9f5   : > { %4028 = vst [vmem:[%s7350_s20 + $0x8] sm:$0xff] %v4000_v44  ;;  %v4462_v10 = vpop.f32.mrb[96].mxu0 }
 0x9f6   : > { %v4463_v60 = vpop.f32.mrb[97].mxu0 }
 0x9f7   : > { %v4464_v11 = vadd.f32 %v4463_v60, %v4462_v10  ;;  %v4465_v34 = vpop.f32.mrb[98].mxu0 }
 0x9f8   : > { %v4466_v30 = vpop.f32.mrb[99].mxu0 }
 0x9f9   : > { %v4005_v52 = vadd.f32 %v4464_v11, %v4418_v46  ;;  %v4467_v18 = vadd.f32 %v4466_v30, %v4465_v34 }
 0x9fa   : > { %v4085_v4 = vld [vmem:[%s7350_s20] sm:$0xff] (%p5102_p5) }
 0x9fb   : > { %4029 = vst [vmem:[%s7350_s20 + $0x10] sm:$0xff] %v4005_v52  ;;  %v4008_v41 = vadd.f32 %v4467_v18, %v4418_v46  ;;  %4086 = vst [vmem:[%s4043_s23] sm:$0xff] (%p5102_p5), %v4085_v4 }
 0x9fc   : > { %v4087_v12 = vld [vmem:[%s7350_s20 + $0x8] sm:$0xff] (%p5102_p5) }
 0x9fd   : > { %4030 = vst [vmem:[%s7350_s20 + $0x18] sm:$0xff] %v4008_v41  ;;  %v4468_v31 = vpop.f32.mrb[100].mxu0  ;;  %4088 = vst [vmem:[%s4043_s23 + $0x10] sm:$0xff] (%p5102_p5), %v4087_v12 }
 0x9fe   : > { %v4469_v51 = vpop.f32.mrb[101].mxu0 }
 0x9ff   : > { %v4470_v3 = vadd.f32 %v4469_v51, %v4468_v31  ;;  %v4471_v37 = vpop.f32.mrb[102].mxu0 }
 0xa00   : > { %v4472_v35 = vpop.f32.mrb[103].mxu0 }
 0xa01   : > { %v4013_v1 = vadd.f32 %v4470_v3, %v4418_v46  ;;  %v4473_v7 = vadd.f32 %v4472_v35, %v4471_v37 }
 0xa02   : > { %v4089_v2 = vld [vmem:[%s7350_s20 + $0x10] sm:$0xff] (%p5102_p5) }
 0xa03   : > { %4031 = vst [vmem:[%s7350_s20 + $0x20] sm:$0xff] %v4013_v1  ;;  %v4016_v54 = vadd.f32 %v4473_v7, %v4418_v46  ;;  %4090 = vst [vmem:[%s4043_s23 + $0x20] sm:$0xff] (%p5102_p5), %v4089_v2 }
 0xa04   : > { %v4091_v49 = vld [vmem:[%s7350_s20 + $0x18] sm:$0xff] (%p5102_p5) }
 0xa05   : > { %4032 = vst [vmem:[%s7350_s20 + $0x28] sm:$0xff] %v4016_v54  ;;  %v4474_v8 = vpop.f32.mrb[104].mxu0  ;;  %4092 = vst [vmem:[%s4043_s23 + $0x30] sm:$0xff] (%p5102_p5), %v4091_v49 }
 0xa06   : > { %v4475_v9 = vpop.f32.mrb[105].mxu0 }
 0xa07   : > { %v4476_v16 = vadd.f32 %v4475_v9, %v4474_v8  ;;  %v4477_v22 = vpop.f32.mrb[106].mxu0  ;;  %4041 = sbr.rel (!%p5102_p5) target bundleno = 2582 (0xa16), region = 90 }
 0xa08   : > { %v4478_v5 = vpop.f32.mrb[107].mxu0 }
 0xa09   : > { %v4021_v42 = vadd.f32 %v4476_v16, %v4418_v46  ;;  %v4479_v27 = vadd.f32 %v4478_v5, %v4477_v22 }
 0xa0a   : > { %v4093_v39 = vld [vmem:[%s7350_s20 + $0x20] sm:$0xff] (%p5102_p5) }
 0xa0b   : > { %4033 = vst [vmem:[%s7350_s20 + $0x30] sm:$0xff] %v4021_v42  ;;  %v4024_v0 = vadd.f32 %v4479_v27, %v4418_v46  ;;  %4094 = vst [vmem:[%s4043_s23 + $0x40] sm:$0xff] (%p5102_p5), %v4093_v39 }
 0xa0c   : > { %v4095_v38 = vld [vmem:[%s7350_s20 + $0x28] sm:$0xff] (%p5102_p5) }
 0xa0d   : > { %4034 = vst [vmem:[%s7350_s20 + $0x38] sm:$0xff] %v4024_v0  ;;  %4096 = vst [vmem:[%s4043_s23 + $0x50] sm:$0xff] (%p5102_p5), %v4095_v38 }
 0xa12   : > { %v4097_v19 = vld [vmem:[%s7350_s20 + $0x30] sm:$0xff] }
 0xa13   : > { %4098 = vst [vmem:[%s4043_s23 + $0x60] sm:$0xff] %v4097_v19 }
 0xa14   : > { %v4099_v20 = vld [vmem:[%s7350_s20 + $0x38] sm:$0xff] }
 0xa15   : > { %4100 = vst [vmem:[%s4043_s23 + $0x70] sm:$0xff] %v4099_v20 }
 0xa16 PF: > { %p14_p10 = scmp.ge.s32.totalorder %s5089_s28, 4   ;;  %s7759_s24 = smov %s5025_s25 }
 0xa17   : > { %s7760_s25 = smov %s5100_s8  ;;  %s7761_s26 = smov %s5089_s28 }
 0xa18   :  { %16 = sbr.rel (!%p14_p10) target bundleno = 2 (0x2), region = 173 }

</bundles_post_ra>
